<compile_context>
chip_gen: v5e
topology: v5e:2x2
jax: 0.10.0
libtpu: 0.0.40
codegen_flags: <defaults>
</compile_context>

<pallas_src>
import functools

import jax
import jax.numpy as jnp
from jax import lax
from jax.experimental import pallas as pl
from jax.experimental.pallas import tpu as pltpu


def _round_up(x, m):
    return (x + m - 1) // m * m


# ------------------------------------------------------------------------
# Fused Conv1d + LeakyReLU(0.2) + AvgPool1d(4,4) — unified MXU kernel.
#
# Math: with x_pad the zero-padded input and phase decomposition
#   x4[q, c, j] = x_pad[c, 4j + q],
# the pooled output is
#   o[c, i] = sum_p 0.25 * LReLU( b[c] + sum_{k,ci} w[c,ci,k] x_pad[ci, 4i+p+k] )
# Writing s = p + k (s in [0, K+3)), slab[s*C_in+ci, i] = x_pad[ci, 4i+s], so
# each phase p is ONE dot:  acc_p = b + W_p @ slab, with
#   W_p[c, s*C_in+ci] = w[c, ci, s-p] for p <= s < p+K, 0 otherwise.
# ------------------------------------------------------------------------
def _conv_kernel(x4_ref, w_ref, b_ref, o_ref, *, L_out, S_pad, accum_in_regs):
    # x4_ref: (4, C_in, Jx)            phase-decomposed zero-padded input
    # w_ref : (4, C_out, C_in*S_pad)   zero-padded tap slab, one per output phase
    # b_ref : (C_out, 1)
    # o_ref : (C_out, L_out)           pooled output
    C_out = o_ref.shape[0]

    # One stacked slab per grid step: row block s = shift-by-s window.
    slab = jnp.concatenate(
        [x4_ref[s % 4, :, s // 4: s // 4 + L_out] for s in range(S_pad)],
        axis=0)                                        # (C_in*S_pad, L_out)

    bias = jnp.broadcast_to(b_ref[...], (C_out, L_out))  # hoisted: built once
    out = None
    for p in range(4):                                  # pooled output phase
        acc = bias + jnp.dot(w_ref[p], slab, preferred_element_type=jnp.float32)
        # LeakyReLU(0.2) with the AvgPool(4) 1/4 scale folded in.
        val = jnp.where(acc > 0, acc * 0.25, acc * 0.05)
        if accum_in_regs:
            out = val if p == 0 else out + val          # layers 2/3: tiny tiles
        else:
            # layer 1: (8, 2048) tile -> keep a single live accumulator (RMW).
            if p == 0:
                o_ref[...] = val
            else:
                o_ref[...] = o_ref[...] + val
    if accum_in_regs:
        o_ref[...] = out


def conv_lrelu_pool(x, w, b, pad):
    """Fused Conv1d(stride=1, zero pad) + LeakyReLU(0.2) + AvgPool1d(4,4)."""
    B, C_in, L_in = x.shape
    C_out, _, K = w.shape
    L_conv = L_in + 2 * pad - K + 1
    L_out = L_conv // 4                      # AvgPool1d(4,4) floor behaviour
    S = K + 3                                # distinct shifts s = p + k
    # pad S so the MXU contraction C_in*S_pad is a sublane multiple of 8
    S_pad = S if (C_in * S) % 8 == 0 else _round_up(S, 8)
    Jx = _round_up(L_out + (S_pad - 1) // 4, 128)

    # Phase decomposition (tiny XLA glue): X4[b, q, c, j] = x_pad[b, c, 4j + q].
    xp = jnp.pad(x, ((0, 0), (0, 0), (pad, 4 * Jx - L_in - pad)))
    x4 = xp.reshape(B, C_in, Jx, 4).transpose(0, 3, 1, 2)        # (B, 4, C_in, Jx)

    # Zero-padded per-phase weight slabs W_p (tiny, built once per call).
    wt = jnp.transpose(w, (0, 2, 1))                              # (C_out, K, C_in)
    w_full = jnp.zeros((4, C_out, S_pad, C_in), jnp.float32)
    for p in range(4):
        w_full = w_full.at[p, :, p:p + K, :].set(wt)
    w_stk = w_full.reshape(4, C_out, S_pad * C_in)
    b2 = b.reshape(C_out, 1)

    accum_in_regs = (C_out * L_out) <= 8192   # layers 2/3 yes, layer 1 no
    kernel = functools.partial(_conv_kernel, L_out=L_out, S_pad=S_pad,
                               accum_in_regs=accum_in_regs)
    return pl.pallas_call(
        kernel,
        out_shape=jax.ShapeDtypeStruct((B, C_out, L_out), jnp.float32),
        grid=(B,),
        in_specs=[
            pl.BlockSpec((None, 4, C_in, Jx), lambda bi: (bi, 0, 0, 0)),
            pl.BlockSpec((4, C_out, S_pad * C_in), lambda bi: (0, 0, 0)),
            pl.BlockSpec((C_out, 1), lambda bi: (0, 0)),
        ],
        out_specs=pl.BlockSpec((None, C_out, L_out), lambda bi: (bi, 0, 0)),
        compiler_params=pltpu.CompilerParams(dimension_semantics=("parallel",)),
    )(x4, w_stk, b2)


# ------------------------------------------------------------------------
# Linear(4096 -> 8192): int8 weight stream, per-output-column scales,
# full-K reduction per 1024-wide output tile.
# ------------------------------------------------------------------------
def _fc_kernel(x_ref, wq_ref, s_ref, b_ref, o_ref):
    # x_ref : (n_chunks, B, tk)  f32
    # wq_ref: (n_chunks, tk, tn) int8
    # s_ref : (1, tn) f32   per-output-column dequant scale
    # b_ref : (1, tn) f32
    # o_ref : (B, tn) f32
    n_chunks = x_ref.shape[0]

    def body(c, acc):
        # Dequant one K-chunk on the VPU (scale is per column of the output,
        # so it commutes with the K-sum and is applied once at the end).
        # TODO(synk): a per-chip native int8-MXU (v5e/v6e) / fp8 (v7x) path
        # would also remove this dequant traffic; kept chip-agnostic here.
        w_c = wq_ref[c].astype(jnp.float32)                 # (tk, tn)
        return acc + jnp.dot(x_ref[c], w_c, preferred_element_type=jnp.float32)

    acc = lax.fori_loop(0, n_chunks, body, jnp.zeros(o_ref.shape, jnp.float32))
    o_ref[...] = acc * s_ref[...] + b_ref[...]


def linear_int8(x, wq3, scale, b, *, tn=1024):
    # y = x @ dequant(wq) + b ;  wq3: (K//tk, tk, N) int8, scale: (1, N) f32.
    n_chunks, tk, N = wq3.shape
    B, Kdim = x.shape
    assert Kdim == n_chunks * tk and N % tn == 0
    # Pre-chunk the (tiny) activations so the kernel only ever indexes a
    # leading axis dynamically (no in-kernel sublane/lane dynamic slices).
    x3 = x.reshape(B, n_chunks, tk).transpose(1, 0, 2)        # (n_chunks, B, tk)
    return pl.pallas_call(
        _fc_kernel,
        out_shape=jax.ShapeDtypeStruct((B, N), jnp.float32),
        grid=(N // tn,),
        in_specs=[
            pl.BlockSpec((n_chunks, B, tk), lambda j: (0, 0, 0)),  # fetched once
            pl.BlockSpec((n_chunks, tk, tn), lambda j: (0, 0, j)),  # 4 MiB int8/tile
            pl.BlockSpec((1, tn), lambda j: (0, j)),
            pl.BlockSpec((1, tn), lambda j: (0, j)),
        ],
        out_specs=pl.BlockSpec((B, tn), lambda j: (0, j)),
        compiler_params=pltpu.CompilerParams(dimension_semantics=("parallel",)),
    )(x3, wq3, scale, b.reshape(1, N))


# ------------------------------------------------------------------------
# Full forward pass.
# ------------------------------------------------------------------------
@jax.jit
def generator_8192_forward(x, params):
    out = x.reshape(-1, 1, 8192).astype(jnp.float32)
    # TODO(synk): conv stages stay as separate pallas_calls; fusing layers 2+3
    # (32 KiB/sample intermediate) and cross-call prefetch of the first FC
    # weight tile (P10) are possible v7x latency wins, skipped for robustness.
    out = conv_lrelu_pool(out, params["w1"], params["b1"], pad=5)
    out = conv_lrelu_pool(out, params["w2"], params["b2"], pad=12)
    out = conv_lrelu_pool(out, params["w3"], params["b3"], pad=12)
    out = out.reshape(out.shape[0], -1)          # torch.flatten(out, 1): (B, 4096)
    out = linear_int8(out, params["wq_fc"], params["scale_fc"], params["b_fc"])
    return out


FC_K, FC_N, FC_TK = 4096, 8192, 512


def _quantize_int8_per_col(w):
    # w: (K, N) f32 -> int8 values with per-output-column f32 scales.
    amax = jnp.max(jnp.abs(w), axis=0, keepdims=True)
    scale = jnp.maximum(amax, 1e-30) / 127.0
    q = jnp.clip(jnp.round(w / scale), -127, 127).astype(jnp.int8)
    return q, scale.astype(jnp.float32)


def init_params(key):
    ks = jax.random.split(key, 8)
    # FC weight stored pre-transposed (in_features, out_features).
    w_fc = jax.random.normal(ks[6], (FC_K, FC_N), jnp.float32) * 0.02
    wq, scale = _quantize_int8_per_col(w_fc)
    return {
        "w1": jax.random.normal(ks[0], (8, 1, 10), jnp.float32) * 0.05,
        "b1": jax.random.normal(ks[1], (8,), jnp.float32) * 0.05,
        "w2": jax.random.normal(ks[2], (16, 8, 25), jnp.float32) * 0.05,
        "b2": jax.random.normal(ks[3], (16,), jnp.float32) * 0.05,
        "w3": jax.random.normal(ks[4], (32, 16, 25), jnp.float32) * 0.05,
        "b3": jax.random.normal(ks[5], (32,), jnp.float32) * 0.05,
        # int8 weight pre-reshaped to (K//tk, tk, N) so no reshape/copy of the
        # 32 MiB tensor happens inside the jitted forward.
        "wq_fc": wq.reshape(FC_K // FC_TK, FC_TK, FC_N),
        "scale_fc": scale,                                  # (1, 8192) f32
        "b_fc": jax.random.normal(ks[7], (FC_N,), jnp.float32) * 0.02,
        # Full-precision master copy (validation only, unused by the kernels).
        "w_fc_ref": w_fc,
    }


# ------------------------------------------------------------------------
# Pure-JAX reference (numerical sanity check only).
# ------------------------------------------------------------------------
def ref_forward(x, params, fc_weight):
    out = x.reshape(-1, 1, 8192).astype(jnp.float32)
    for w, b, pad in [(params["w1"], params["b1"], 5),
                      (params["w2"], params["b2"], 12),
                      (params["w3"], params["b3"], 12)]:
        out = lax.conv_general_dilated(
            out, w, window_strides=(1,), padding=[(pad, pad)],
            dimension_numbers=("NCH", "OIH", "NCH"))
        out = out + b[None, :, None]
        out = jnp.where(out > 0, out, 0.2 * out)
        B, C, L = out.shape
        Lp = (L // 4) * 4
        out = out[:, :, :Lp].reshape(B, C, Lp // 4, 4).mean(-1)
    out = out.reshape(out.shape[0], -1)
    return out @ fc_weight + params["b_fc"][None, :]


if __name__ == "__main__":
    key = jax.random.PRNGKey(0)
    kx, kp = jax.random.split(key)
    # batch=2; sequence length 8192 is fixed by the module (fc expects 4096 feats)
    x = jax.random.normal(kx, (2, 8192), jnp.float32)
    params = init_params(kp)

    y = jax.block_until_ready(generator_8192_forward(x, params))
    assert y.shape == (2, 8192), y.shape

    # (1) Kernel numerics: reference built from the SAME (dequantized) FC
    #     weights -> isolates Pallas-kernel error from the quantization choice.
    w_deq = (params["wq_fc"].reshape(FC_K, FC_N).astype(jnp.float32)
             * params["scale_fc"])
    err_kernel = float(jnp.max(jnp.abs(y - ref_forward(x, params, w_deq))))
    assert err_kernel < 5e-3, f"kernel max abs err {err_kernel}"

    # (2) End-to-end vs the full-precision module weights: includes the
    #     deliberate int8 FC-weight quantization tradeoff (review item 1).
    err_total = float(jnp.max(jnp.abs(
        y - ref_forward(x, params, params["w_fc_ref"]))))
    assert err_total < 2.5e-2, f"end-to-end max abs err {err_total}"

    print("KERNEL_OK")
</pallas_src>

<mosaic_0001>
module attributes {stable_mosaic.version = 11 : i64} {
  func.func @_conv_kernel(%arg0: i32, %arg1: memref<1x4x1x2176xf32, #tpu.memory_space<vmem>>, %arg2: memref<4x8x16xf32, #tpu.memory_space<vmem>>, %arg3: memref<8x1xf32, #tpu.memory_space<vmem>>, %arg4: memref<1x8x2048xf32, #tpu.memory_space<vmem>>) attributes {dimension_semantics = [#tpu.dimension_semantics<parallel>], iteration_bounds = array<i64: 2>, scalar_prefetch = 0 : i64, scratch_operands = 0 : i64, tpu.core_type = #tpu.core_type<tc>, window_params = [{transform_indices = @transform_0, window_bounds = array<i64: 1, 4, 1, 2176>}, {pipeline_mode = #tpu.pipeline_mode<synchronous>, transform_indices = @transform_1, window_bounds = array<i64: 4, 8, 16>}, {pipeline_mode = #tpu.pipeline_mode<synchronous>, transform_indices = @transform_2, window_bounds = array<i64: 8, 1>}, {transform_indices = @transform_3, window_bounds = array<i64: 1, 8, 2048>}]} {
    %c0 = arith.constant 0 : index
    %c0_0 = arith.constant 0 : index
    %c0_1 = arith.constant 0 : index
    %c0_2 = arith.constant 0 : index
    %0 = vector.load %arg1[%c0, %c0_0, %c0_1, %c0_2] : memref<1x4x1x2176xf32, #tpu.memory_space<vmem>>, vector<1x1x1x2048xf32>
    %1 = vector.shape_cast %0 : vector<1x1x1x2048xf32> to vector<1x2048xf32>
    %c0_3 = arith.constant 0 : index
    %c1 = arith.constant 1 : index
    %c0_4 = arith.constant 0 : index
    %c0_5 = arith.constant 0 : index
    %2 = vector.load %arg1[%c0_3, %c1, %c0_4, %c0_5] : memref<1x4x1x2176xf32, #tpu.memory_space<vmem>>, vector<1x1x1x2048xf32>
    %3 = vector.shape_cast %2 : vector<1x1x1x2048xf32> to vector<1x2048xf32>
    %c0_6 = arith.constant 0 : index
    %c2 = arith.constant 2 : index
    %c0_7 = arith.constant 0 : index
    %c0_8 = arith.constant 0 : index
    %4 = vector.load %arg1[%c0_6, %c2, %c0_7, %c0_8] : memref<1x4x1x2176xf32, #tpu.memory_space<vmem>>, vector<1x1x1x2048xf32>
    %5 = vector.shape_cast %4 : vector<1x1x1x2048xf32> to vector<1x2048xf32>
    %c0_9 = arith.constant 0 : index
    %c3 = arith.constant 3 : index
    %c0_10 = arith.constant 0 : index
    %c0_11 = arith.constant 0 : index
    %6 = vector.load %arg1[%c0_9, %c3, %c0_10, %c0_11] : memref<1x4x1x2176xf32, #tpu.memory_space<vmem>>, vector<1x1x1x2048xf32>
    %7 = vector.shape_cast %6 : vector<1x1x1x2048xf32> to vector<1x2048xf32>
    %c0_12 = arith.constant 0 : index
    %c0_13 = arith.constant 0 : index
    %c0_14 = arith.constant 0 : index
    %c1_15 = arith.constant 1 : index
    %8 = vector.load %arg1[%c0_12, %c0_13, %c0_14, %c1_15] : memref<1x4x1x2176xf32, #tpu.memory_space<vmem>>, vector<1x1x1x2048xf32>
    %9 = vector.shape_cast %8 : vector<1x1x1x2048xf32> to vector<1x2048xf32>
    %c0_16 = arith.constant 0 : index
    %c1_17 = arith.constant 1 : index
    %c0_18 = arith.constant 0 : index
    %c1_19 = arith.constant 1 : index
    %10 = vector.load %arg1[%c0_16, %c1_17, %c0_18, %c1_19] : memref<1x4x1x2176xf32, #tpu.memory_space<vmem>>, vector<1x1x1x2048xf32>
    %11 = vector.shape_cast %10 : vector<1x1x1x2048xf32> to vector<1x2048xf32>
    %c0_20 = arith.constant 0 : index
    %c2_21 = arith.constant 2 : index
    %c0_22 = arith.constant 0 : index
    %c1_23 = arith.constant 1 : index
    %12 = vector.load %arg1[%c0_20, %c2_21, %c0_22, %c1_23] : memref<1x4x1x2176xf32, #tpu.memory_space<vmem>>, vector<1x1x1x2048xf32>
    %13 = vector.shape_cast %12 : vector<1x1x1x2048xf32> to vector<1x2048xf32>
    %c0_24 = arith.constant 0 : index
    %c3_25 = arith.constant 3 : index
    %c0_26 = arith.constant 0 : index
    %c1_27 = arith.constant 1 : index
    %14 = vector.load %arg1[%c0_24, %c3_25, %c0_26, %c1_27] : memref<1x4x1x2176xf32, #tpu.memory_space<vmem>>, vector<1x1x1x2048xf32>
    %15 = vector.shape_cast %14 : vector<1x1x1x2048xf32> to vector<1x2048xf32>
    %c0_28 = arith.constant 0 : index
    %c0_29 = arith.constant 0 : index
    %c0_30 = arith.constant 0 : index
    %c2_31 = arith.constant 2 : index
    %16 = vector.load %arg1[%c0_28, %c0_29, %c0_30, %c2_31] : memref<1x4x1x2176xf32, #tpu.memory_space<vmem>>, vector<1x1x1x2048xf32>
    %17 = vector.shape_cast %16 : vector<1x1x1x2048xf32> to vector<1x2048xf32>
    %c0_32 = arith.constant 0 : index
    %c1_33 = arith.constant 1 : index
    %c0_34 = arith.constant 0 : index
    %c2_35 = arith.constant 2 : index
    %18 = vector.load %arg1[%c0_32, %c1_33, %c0_34, %c2_35] : memref<1x4x1x2176xf32, #tpu.memory_space<vmem>>, vector<1x1x1x2048xf32>
    %19 = vector.shape_cast %18 : vector<1x1x1x2048xf32> to vector<1x2048xf32>
    %c0_36 = arith.constant 0 : index
    %c2_37 = arith.constant 2 : index
    %c0_38 = arith.constant 0 : index
    %c2_39 = arith.constant 2 : index
    %20 = vector.load %arg1[%c0_36, %c2_37, %c0_38, %c2_39] : memref<1x4x1x2176xf32, #tpu.memory_space<vmem>>, vector<1x1x1x2048xf32>
    %21 = vector.shape_cast %20 : vector<1x1x1x2048xf32> to vector<1x2048xf32>
    %c0_40 = arith.constant 0 : index
    %c3_41 = arith.constant 3 : index
    %c0_42 = arith.constant 0 : index
    %c2_43 = arith.constant 2 : index
    %22 = vector.load %arg1[%c0_40, %c3_41, %c0_42, %c2_43] : memref<1x4x1x2176xf32, #tpu.memory_space<vmem>>, vector<1x1x1x2048xf32>
    %23 = vector.shape_cast %22 : vector<1x1x1x2048xf32> to vector<1x2048xf32>
    %c0_44 = arith.constant 0 : index
    %c0_45 = arith.constant 0 : index
    %c0_46 = arith.constant 0 : index
    %c3_47 = arith.constant 3 : index
    %24 = vector.load %arg1[%c0_44, %c0_45, %c0_46, %c3_47] : memref<1x4x1x2176xf32, #tpu.memory_space<vmem>>, vector<1x1x1x2048xf32>
    %25 = vector.shape_cast %24 : vector<1x1x1x2048xf32> to vector<1x2048xf32>
    %c0_48 = arith.constant 0 : index
    %c1_49 = arith.constant 1 : index
    %c0_50 = arith.constant 0 : index
    %c3_51 = arith.constant 3 : index
    %26 = vector.load %arg1[%c0_48, %c1_49, %c0_50, %c3_51] : memref<1x4x1x2176xf32, #tpu.memory_space<vmem>>, vector<1x1x1x2048xf32>
    %27 = vector.shape_cast %26 : vector<1x1x1x2048xf32> to vector<1x2048xf32>
    %c0_52 = arith.constant 0 : index
    %c2_53 = arith.constant 2 : index
    %c0_54 = arith.constant 0 : index
    %c3_55 = arith.constant 3 : index
    %28 = vector.load %arg1[%c0_52, %c2_53, %c0_54, %c3_55] : memref<1x4x1x2176xf32, #tpu.memory_space<vmem>>, vector<1x1x1x2048xf32>
    %29 = vector.shape_cast %28 : vector<1x1x1x2048xf32> to vector<1x2048xf32>
    %c0_56 = arith.constant 0 : index
    %c3_57 = arith.constant 3 : index
    %c0_58 = arith.constant 0 : index
    %c3_59 = arith.constant 3 : index
    %30 = vector.load %arg1[%c0_56, %c3_57, %c0_58, %c3_59] : memref<1x4x1x2176xf32, #tpu.memory_space<vmem>>, vector<1x1x1x2048xf32>
    %31 = vector.shape_cast %30 : vector<1x1x1x2048xf32> to vector<1x2048xf32>
    %32 = tpu.concatenate %1, %3, %5, %7, %9, %11, %13, %15, %17, %19, %21, %23, %25, %27, %29, %31 in 0 : vector<1x2048xf32>, vector<1x2048xf32>, vector<1x2048xf32>, vector<1x2048xf32>, vector<1x2048xf32>, vector<1x2048xf32>, vector<1x2048xf32>, vector<1x2048xf32>, vector<1x2048xf32>, vector<1x2048xf32>, vector<1x2048xf32>, vector<1x2048xf32>, vector<1x2048xf32>, vector<1x2048xf32>, vector<1x2048xf32>, vector<1x2048xf32> -> vector<16x2048xf32>
    %c0_60 = arith.constant 0 : index
    %c0_61 = arith.constant 0 : index
    %33 = vector.load %arg3[%c0_60, %c0_61] : memref<8x1xf32, #tpu.memory_space<vmem>>, vector<8x1xf32>
    %34 = vector.shape_cast %33 : vector<8x1xf32> to vector<8x1xf32>
    %35 = vector.broadcast %34 : vector<8x1xf32> to vector<8x2048xf32>
    %c0_62 = arith.constant 0 : index
    %c0_63 = arith.constant 0 : index
    %c0_64 = arith.constant 0 : index
    %36 = vector.load %arg2[%c0_62, %c0_63, %c0_64] : memref<4x8x16xf32, #tpu.memory_space<vmem>>, vector<1x8x16xf32>
    %37 = vector.shape_cast %36 : vector<1x8x16xf32> to vector<8x16xf32>
    %cst = arith.constant dense<0.000000e+00> : vector<8x2048xf32>
    %38 = tpu.matmul %37, %32, %cst {dimension_numbers = #tpu.dot_dimension_numbers<[1], [0], [0], [1], [0, 0, 1, 1], [], []>} : vector<8x16xf32>, vector<16x2048xf32>, vector<8x2048xf32> -> vector<8x2048xf32>
    %39 = arith.addf %35, %38 : vector<8x2048xf32>
    %cst_65 = arith.constant 0.000000e+00 : f32
    %40 = vector.broadcast %cst_65 : f32 to vector<8x2048xf32>
    %41 = arith.cmpf ogt, %39, %40 : vector<8x2048xf32>
    %cst_66 = arith.constant 2.500000e-01 : f32
    %42 = vector.broadcast %cst_66 : f32 to vector<8x2048xf32>
    %43 = arith.mulf %39, %42 : vector<8x2048xf32>
    %cst_67 = arith.constant 5.000000e-02 : f32
    %44 = vector.broadcast %cst_67 : f32 to vector<8x2048xf32>
    %45 = arith.mulf %39, %44 : vector<8x2048xf32>
    %46 = arith.select %41, %43, %45 : vector<8x2048xi1>, vector<8x2048xf32>
    %c0_68 = arith.constant 0 : index
    %c0_69 = arith.constant 0 : index
    %c0_70 = arith.constant 0 : index
    %47 = vector.load %arg4[%c0_68, %c0_69, %c0_70] : memref<1x8x2048xf32, #tpu.memory_space<vmem>>, vector<1x8x2048xf32>
    %48 = vector.shape_cast %47 : vector<1x8x2048xf32> to vector<8x2048xf32>
    %49 = vector.shape_cast %46 : vector<8x2048xf32> to vector<1x8x2048xf32>
    tpu.vector_store %arg4[%c0_68, %c0_69, %c0_70], %49 {strides = array<i32>} : memref<1x8x2048xf32, #tpu.memory_space<vmem>>, vector<1x8x2048xf32>,
    %c1_71 = arith.constant 1 : index
    %c0_72 = arith.constant 0 : index
    %c0_73 = arith.constant 0 : index
    %50 = vector.load %arg2[%c1_71, %c0_72, %c0_73] : memref<4x8x16xf32, #tpu.memory_space<vmem>>, vector<1x8x16xf32>
    %51 = vector.shape_cast %50 : vector<1x8x16xf32> to vector<8x16xf32>
    %cst_74 = arith.constant dense<0.000000e+00> : vector<8x2048xf32>
    %52 = tpu.matmul %51, %32, %cst_74 {dimension_numbers = #tpu.dot_dimension_numbers<[1], [0], [0], [1], [0, 0, 1, 1], [], []>} : vector<8x16xf32>, vector<16x2048xf32>, vector<8x2048xf32> -> vector<8x2048xf32>
    %53 = arith.addf %35, %52 : vector<8x2048xf32>
    %cst_75 = arith.constant 0.000000e+00 : f32
    %54 = vector.broadcast %cst_75 : f32 to vector<8x2048xf32>
    %55 = arith.cmpf ogt, %53, %54 : vector<8x2048xf32>
    %cst_76 = arith.constant 2.500000e-01 : f32
    %56 = vector.broadcast %cst_76 : f32 to vector<8x2048xf32>
    %57 = arith.mulf %53, %56 : vector<8x2048xf32>
    %cst_77 = arith.constant 5.000000e-02 : f32
    %58 = vector.broadcast %cst_77 : f32 to vector<8x2048xf32>
    %59 = arith.mulf %53, %58 : vector<8x2048xf32>
    %60 = arith.select %55, %57, %59 : vector<8x2048xi1>, vector<8x2048xf32>
    %c0_78 = arith.constant 0 : index
    %c0_79 = arith.constant 0 : index
    %c0_80 = arith.constant 0 : index
    %61 = vector.load %arg4[%c0_78, %c0_79, %c0_80] : memref<1x8x2048xf32, #tpu.memory_space<vmem>>, vector<1x8x2048xf32>
    %62 = vector.shape_cast %61 : vector<1x8x2048xf32> to vector<8x2048xf32>
    %63 = arith.addf %62, %60 : vector<8x2048xf32>
    %c0_81 = arith.constant 0 : index
    %c0_82 = arith.constant 0 : index
    %c0_83 = arith.constant 0 : index
    %64 = vector.load %arg4[%c0_81, %c0_82, %c0_83] : memref<1x8x2048xf32, #tpu.memory_space<vmem>>, vector<1x8x2048xf32>
    %65 = vector.shape_cast %64 : vector<1x8x2048xf32> to vector<8x2048xf32>
    %66 = vector.shape_cast %63 : vector<8x2048xf32> to vector<1x8x2048xf32>
    tpu.vector_store %arg4[%c0_81, %c0_82, %c0_83], %66 {strides = array<i32>} : memref<1x8x2048xf32, #tpu.memory_space<vmem>>, vector<1x8x2048xf32>,
    %c2_84 = arith.constant 2 : index
    %c0_85 = arith.constant 0 : index
    %c0_86 = arith.constant 0 : index
    %67 = vector.load %arg2[%c2_84, %c0_85, %c0_86] : memref<4x8x16xf32, #tpu.memory_space<vmem>>, vector<1x8x16xf32>
    %68 = vector.shape_cast %67 : vector<1x8x16xf32> to vector<8x16xf32>
    %cst_87 = arith.constant dense<0.000000e+00> : vector<8x2048xf32>
    %69 = tpu.matmul %68, %32, %cst_87 {dimension_numbers = #tpu.dot_dimension_numbers<[1], [0], [0], [1], [0, 0, 1, 1], [], []>} : vector<8x16xf32>, vector<16x2048xf32>, vector<8x2048xf32> -> vector<8x2048xf32>
    %70 = arith.addf %35, %69 : vector<8x2048xf32>
    %cst_88 = arith.constant 0.000000e+00 : f32
    %71 = vector.broadcast %cst_88 : f32 to vector<8x2048xf32>
    %72 = arith.cmpf ogt, %70, %71 : vector<8x2048xf32>
    %cst_89 = arith.constant 2.500000e-01 : f32
    %73 = vector.broadcast %cst_89 : f32 to vector<8x2048xf32>
    %74 = arith.mulf %70, %73 : vector<8x2048xf32>
    %cst_90 = arith.constant 5.000000e-02 : f32
    %75 = vector.broadcast %cst_90 : f32 to vector<8x2048xf32>
    %76 = arith.mulf %70, %75 : vector<8x2048xf32>
    %77 = arith.select %72, %74, %76 : vector<8x2048xi1>, vector<8x2048xf32>
    %c0_91 = arith.constant 0 : index
    %c0_92 = arith.constant 0 : index
    %c0_93 = arith.constant 0 : index
    %78 = vector.load %arg4[%c0_91, %c0_92, %c0_93] : memref<1x8x2048xf32, #tpu.memory_space<vmem>>, vector<1x8x2048xf32>
    %79 = vector.shape_cast %78 : vector<1x8x2048xf32> to vector<8x2048xf32>
    %80 = arith.addf %79, %77 : vector<8x2048xf32>
    %c0_94 = arith.constant 0 : index
    %c0_95 = arith.constant 0 : index
    %c0_96 = arith.constant 0 : index
    %81 = vector.load %arg4[%c0_94, %c0_95, %c0_96] : memref<1x8x2048xf32, #tpu.memory_space<vmem>>, vector<1x8x2048xf32>
    %82 = vector.shape_cast %81 : vector<1x8x2048xf32> to vector<8x2048xf32>
    %83 = vector.shape_cast %80 : vector<8x2048xf32> to vector<1x8x2048xf32>
    tpu.vector_store %arg4[%c0_94, %c0_95, %c0_96], %83 {strides = array<i32>} : memref<1x8x2048xf32, #tpu.memory_space<vmem>>, vector<1x8x2048xf32>,
    %c3_97 = arith.constant 3 : index
    %c0_98 = arith.constant 0 : index
    %c0_99 = arith.constant 0 : index
    %84 = vector.load %arg2[%c3_97, %c0_98, %c0_99] : memref<4x8x16xf32, #tpu.memory_space<vmem>>, vector<1x8x16xf32>
    %85 = vector.shape_cast %84 : vector<1x8x16xf32> to vector<8x16xf32>
    %cst_100 = arith.constant dense<0.000000e+00> : vector<8x2048xf32>
    %86 = tpu.matmul %85, %32, %cst_100 {dimension_numbers = #tpu.dot_dimension_numbers<[1], [0], [0], [1], [0, 0, 1, 1], [], []>} : vector<8x16xf32>, vector<16x2048xf32>, vector<8x2048xf32> -> vector<8x2048xf32>
    %87 = arith.addf %35, %86 : vector<8x2048xf32>
    %cst_101 = arith.constant 0.000000e+00 : f32
    %88 = vector.broadcast %cst_101 : f32 to vector<8x2048xf32>
    %89 = arith.cmpf ogt, %87, %88 : vector<8x2048xf32>
    %cst_102 = arith.constant 2.500000e-01 : f32
    %90 = vector.broadcast %cst_102 : f32 to vector<8x2048xf32>
    %91 = arith.mulf %87, %90 : vector<8x2048xf32>
    %cst_103 = arith.constant 5.000000e-02 : f32
    %92 = vector.broadcast %cst_103 : f32 to vector<8x2048xf32>
    %93 = arith.mulf %87, %92 : vector<8x2048xf32>
    %94 = arith.select %89, %91, %93 : vector<8x2048xi1>, vector<8x2048xf32>
    %c0_104 = arith.constant 0 : index
    %c0_105 = arith.constant 0 : index
    %c0_106 = arith.constant 0 : index
    %95 = vector.load %arg4[%c0_104, %c0_105, %c0_106] : memref<1x8x2048xf32, #tpu.memory_space<vmem>>, vector<1x8x2048xf32>
    %96 = vector.shape_cast %95 : vector<1x8x2048xf32> to vector<8x2048xf32>
    %97 = arith.addf %96, %94 : vector<8x2048xf32>
    %c0_107 = arith.constant 0 : index
    %c0_108 = arith.constant 0 : index
    %c0_109 = arith.constant 0 : index
    %98 = vector.load %arg4[%c0_107, %c0_108, %c0_109] : memref<1x8x2048xf32, #tpu.memory_space<vmem>>, vector<1x8x2048xf32>
    %99 = vector.shape_cast %98 : vector<1x8x2048xf32> to vector<8x2048xf32>
    %100 = vector.shape_cast %97 : vector<8x2048xf32> to vector<1x8x2048xf32>
    tpu.vector_store %arg4[%c0_107, %c0_108, %c0_109], %100 {strides = array<i32>} : memref<1x8x2048xf32, #tpu.memory_space<vmem>>, vector<1x8x2048xf32>,
    return
  }
  func.func @transform_0(%arg0: i32) -> (i32, i32, i32, i32) {
    %c0_i32 = arith.constant 0 : i32
    %c0_i32_0 = arith.constant 0 : i32
    %c0_i32_1 = arith.constant 0 : i32
    %c0_i32_2 = arith.constant 0 : i32
    return %arg0, %c0_i32, %c0_i32_0, %c0_i32_1 : i32, i32, i32, i32
  }
  func.func @transform_1(%arg0: i32) -> (i32, i32, i32) {
    %c0_i32 = arith.constant 0 : i32
    %c0_i32_0 = arith.constant 0 : i32
    %c0_i32_1 = arith.constant 0 : i32
    %c0_i32_2 = arith.constant 0 : i32
    return %c0_i32, %c0_i32_0, %c0_i32_1 : i32, i32, i32
  }
  func.func @transform_2(%arg0: i32) -> (i32, i32) {
    %c0_i32 = arith.constant 0 : i32
    %c0_i32_0 = arith.constant 0 : i32
    %c0_i32_1 = arith.constant 0 : i32
    return %c0_i32, %c0_i32_0 : i32, i32
  }
  func.func @transform_3(%arg0: i32) -> (i32, i32, i32) {
    %c0_i32 = arith.constant 0 : i32
    %c0_i32_0 = arith.constant 0 : i32
    %c0_i32_1 = arith.constant 0 : i32
    return %arg0, %c0_i32, %c0_i32_0 : i32, i32, i32
  }
}

module attributes {stable_mosaic.version = 11 : i64} {
  func.func @_conv_kernel(%arg0: i32, %arg1: memref<1x4x8x640xf32, #tpu.memory_space<vmem>>, %arg2: memref<4x16x224xf32, #tpu.memory_space<vmem>>, %arg3: memref<16x1xf32, #tpu.memory_space<vmem>>, %arg4: memref<1x16x512xf32, #tpu.memory_space<vmem>>) attributes {dimension_semantics = [#tpu.dimension_semantics<parallel>], iteration_bounds = array<i64: 2>, scalar_prefetch = 0 : i64, scratch_operands = 0 : i64, tpu.core_type = #tpu.core_type<tc>, window_params = [{transform_indices = @transform_0, window_bounds = array<i64: 1, 4, 8, 640>}, {pipeline_mode = #tpu.pipeline_mode<synchronous>, transform_indices = @transform_1, window_bounds = array<i64: 4, 16, 224>}, {pipeline_mode = #tpu.pipeline_mode<synchronous>, transform_indices = @transform_2, window_bounds = array<i64: 16, 1>}, {transform_indices = @transform_3, window_bounds = array<i64: 1, 16, 512>}]} {
    %c0 = arith.constant 0 : index
    %c0_0 = arith.constant 0 : index
    %c0_1 = arith.constant 0 : index
    %c0_2 = arith.constant 0 : index
    %0 = vector.load %arg1[%c0, %c0_0, %c0_1, %c0_2] : memref<1x4x8x640xf32, #tpu.memory_space<vmem>>, vector<1x1x8x512xf32>
    %1 = vector.shape_cast %0 : vector<1x1x8x512xf32> to vector<8x512xf32>
    %c0_3 = arith.constant 0 : index
    %c1 = arith.constant 1 : index
    %c0_4 = arith.constant 0 : index
    %c0_5 = arith.constant 0 : index
    %2 = vector.load %arg1[%c0_3, %c1, %c0_4, %c0_5] : memref<1x4x8x640xf32, #tpu.memory_space<vmem>>, vector<1x1x8x512xf32>
    %3 = vector.shape_cast %2 : vector<1x1x8x512xf32> to vector<8x512xf32>
    %c0_6 = arith.constant 0 : index
    %c2 = arith.constant 2 : index
    %c0_7 = arith.constant 0 : index
    %c0_8 = arith.constant 0 : index
    %4 = vector.load %arg1[%c0_6, %c2, %c0_7, %c0_8] : memref<1x4x8x640xf32, #tpu.memory_space<vmem>>, vector<1x1x8x512xf32>
    %5 = vector.shape_cast %4 : vector<1x1x8x512xf32> to vector<8x512xf32>
    %c0_9 = arith.constant 0 : index
    %c3 = arith.constant 3 : index
    %c0_10 = arith.constant 0 : index
    %c0_11 = arith.constant 0 : index
    %6 = vector.load %arg1[%c0_9, %c3, %c0_10, %c0_11] : memref<1x4x8x640xf32, #tpu.memory_space<vmem>>, vector<1x1x8x512xf32>
    %7 = vector.shape_cast %6 : vector<1x1x8x512xf32> to vector<8x512xf32>
    %c0_12 = arith.constant 0 : index
    %c0_13 = arith.constant 0 : index
    %c0_14 = arith.constant 0 : index
    %c1_15 = arith.constant 1 : index
    %8 = vector.load %arg1[%c0_12, %c0_13, %c0_14, %c1_15] : memref<1x4x8x640xf32, #tpu.memory_space<vmem>>, vector<1x1x8x512xf32>
    %9 = vector.shape_cast %8 : vector<1x1x8x512xf32> to vector<8x512xf32>
    %c0_16 = arith.constant 0 : index
    %c1_17 = arith.constant 1 : index
    %c0_18 = arith.constant 0 : index
    %c1_19 = arith.constant 1 : index
    %10 = vector.load %arg1[%c0_16, %c1_17, %c0_18, %c1_19] : memref<1x4x8x640xf32, #tpu.memory_space<vmem>>, vector<1x1x8x512xf32>
    %11 = vector.shape_cast %10 : vector<1x1x8x512xf32> to vector<8x512xf32>
    %c0_20 = arith.constant 0 : index
    %c2_21 = arith.constant 2 : index
    %c0_22 = arith.constant 0 : index
    %c1_23 = arith.constant 1 : index
    %12 = vector.load %arg1[%c0_20, %c2_21, %c0_22, %c1_23] : memref<1x4x8x640xf32, #tpu.memory_space<vmem>>, vector<1x1x8x512xf32>
    %13 = vector.shape_cast %12 : vector<1x1x8x512xf32> to vector<8x512xf32>
    %c0_24 = arith.constant 0 : index
    %c3_25 = arith.constant 3 : index
    %c0_26 = arith.constant 0 : index
    %c1_27 = arith.constant 1 : index
    %14 = vector.load %arg1[%c0_24, %c3_25, %c0_26, %c1_27] : memref<1x4x8x640xf32, #tpu.memory_space<vmem>>, vector<1x1x8x512xf32>
    %15 = vector.shape_cast %14 : vector<1x1x8x512xf32> to vector<8x512xf32>
    %c0_28 = arith.constant 0 : index
    %c0_29 = arith.constant 0 : index
    %c0_30 = arith.constant 0 : index
    %c2_31 = arith.constant 2 : index
    %16 = vector.load %arg1[%c0_28, %c0_29, %c0_30, %c2_31] : memref<1x4x8x640xf32, #tpu.memory_space<vmem>>, vector<1x1x8x512xf32>
    %17 = vector.shape_cast %16 : vector<1x1x8x512xf32> to vector<8x512xf32>
    %c0_32 = arith.constant 0 : index
    %c1_33 = arith.constant 1 : index
    %c0_34 = arith.constant 0 : index
    %c2_35 = arith.constant 2 : index
    %18 = vector.load %arg1[%c0_32, %c1_33, %c0_34, %c2_35] : memref<1x4x8x640xf32, #tpu.memory_space<vmem>>, vector<1x1x8x512xf32>
    %19 = vector.shape_cast %18 : vector<1x1x8x512xf32> to vector<8x512xf32>
    %c0_36 = arith.constant 0 : index
    %c2_37 = arith.constant 2 : index
    %c0_38 = arith.constant 0 : index
    %c2_39 = arith.constant 2 : index
    %20 = vector.load %arg1[%c0_36, %c2_37, %c0_38, %c2_39] : memref<1x4x8x640xf32, #tpu.memory_space<vmem>>, vector<1x1x8x512xf32>
    %21 = vector.shape_cast %20 : vector<1x1x8x512xf32> to vector<8x512xf32>
    %c0_40 = arith.constant 0 : index
    %c3_41 = arith.constant 3 : index
    %c0_42 = arith.constant 0 : index
    %c2_43 = arith.constant 2 : index
    %22 = vector.load %arg1[%c0_40, %c3_41, %c0_42, %c2_43] : memref<1x4x8x640xf32, #tpu.memory_space<vmem>>, vector<1x1x8x512xf32>
    %23 = vector.shape_cast %22 : vector<1x1x8x512xf32> to vector<8x512xf32>
    %c0_44 = arith.constant 0 : index
    %c0_45 = arith.constant 0 : index
    %c0_46 = arith.constant 0 : index
    %c3_47 = arith.constant 3 : index
    %24 = vector.load %arg1[%c0_44, %c0_45, %c0_46, %c3_47] : memref<1x4x8x640xf32, #tpu.memory_space<vmem>>, vector<1x1x8x512xf32>
    %25 = vector.shape_cast %24 : vector<1x1x8x512xf32> to vector<8x512xf32>
    %c0_48 = arith.constant 0 : index
    %c1_49 = arith.constant 1 : index
    %c0_50 = arith.constant 0 : index
    %c3_51 = arith.constant 3 : index
    %26 = vector.load %arg1[%c0_48, %c1_49, %c0_50, %c3_51] : memref<1x4x8x640xf32, #tpu.memory_space<vmem>>, vector<1x1x8x512xf32>
    %27 = vector.shape_cast %26 : vector<1x1x8x512xf32> to vector<8x512xf32>
    %c0_52 = arith.constant 0 : index
    %c2_53 = arith.constant 2 : index
    %c0_54 = arith.constant 0 : index
    %c3_55 = arith.constant 3 : index
    %28 = vector.load %arg1[%c0_52, %c2_53, %c0_54, %c3_55] : memref<1x4x8x640xf32, #tpu.memory_space<vmem>>, vector<1x1x8x512xf32>
    %29 = vector.shape_cast %28 : vector<1x1x8x512xf32> to vector<8x512xf32>
    %c0_56 = arith.constant 0 : index
    %c3_57 = arith.constant 3 : index
    %c0_58 = arith.constant 0 : index
    %c3_59 = arith.constant 3 : index
    %30 = vector.load %arg1[%c0_56, %c3_57, %c0_58, %c3_59] : memref<1x4x8x640xf32, #tpu.memory_space<vmem>>, vector<1x1x8x512xf32>
    %31 = vector.shape_cast %30 : vector<1x1x8x512xf32> to vector<8x512xf32>
    %c0_60 = arith.constant 0 : index
    %c0_61 = arith.constant 0 : index
    %c0_62 = arith.constant 0 : index
    %c4 = arith.constant 4 : index
    %32 = vector.load %arg1[%c0_60, %c0_61, %c0_62, %c4] : memref<1x4x8x640xf32, #tpu.memory_space<vmem>>, vector<1x1x8x512xf32>
    %33 = vector.shape_cast %32 : vector<1x1x8x512xf32> to vector<8x512xf32>
    %c0_63 = arith.constant 0 : index
    %c1_64 = arith.constant 1 : index
    %c0_65 = arith.constant 0 : index
    %c4_66 = arith.constant 4 : index
    %34 = vector.load %arg1[%c0_63, %c1_64, %c0_65, %c4_66] : memref<1x4x8x640xf32, #tpu.memory_space<vmem>>, vector<1x1x8x512xf32>
    %35 = vector.shape_cast %34 : vector<1x1x8x512xf32> to vector<8x512xf32>
    %c0_67 = arith.constant 0 : index
    %c2_68 = arith.constant 2 : index
    %c0_69 = arith.constant 0 : index
    %c4_70 = arith.constant 4 : index
    %36 = vector.load %arg1[%c0_67, %c2_68, %c0_69, %c4_70] : memref<1x4x8x640xf32, #tpu.memory_space<vmem>>, vector<1x1x8x512xf32>
    %37 = vector.shape_cast %36 : vector<1x1x8x512xf32> to vector<8x512xf32>
    %c0_71 = arith.constant 0 : index
    %c3_72 = arith.constant 3 : index
    %c0_73 = arith.constant 0 : index
    %c4_74 = arith.constant 4 : index
    %38 = vector.load %arg1[%c0_71, %c3_72, %c0_73, %c4_74] : memref<1x4x8x640xf32, #tpu.memory_space<vmem>>, vector<1x1x8x512xf32>
    %39 = vector.shape_cast %38 : vector<1x1x8x512xf32> to vector<8x512xf32>
    %c0_75 = arith.constant 0 : index
    %c0_76 = arith.constant 0 : index
    %c0_77 = arith.constant 0 : index
    %c5 = arith.constant 5 : index
    %40 = vector.load %arg1[%c0_75, %c0_76, %c0_77, %c5] : memref<1x4x8x640xf32, #tpu.memory_space<vmem>>, vector<1x1x8x512xf32>
    %41 = vector.shape_cast %40 : vector<1x1x8x512xf32> to vector<8x512xf32>
    %c0_78 = arith.constant 0 : index
    %c1_79 = arith.constant 1 : index
    %c0_80 = arith.constant 0 : index
    %c5_81 = arith.constant 5 : index
    %42 = vector.load %arg1[%c0_78, %c1_79, %c0_80, %c5_81] : memref<1x4x8x640xf32, #tpu.memory_space<vmem>>, vector<1x1x8x512xf32>
    %43 = vector.shape_cast %42 : vector<1x1x8x512xf32> to vector<8x512xf32>
    %c0_82 = arith.constant 0 : index
    %c2_83 = arith.constant 2 : index
    %c0_84 = arith.constant 0 : index
    %c5_85 = arith.constant 5 : index
    %44 = vector.load %arg1[%c0_82, %c2_83, %c0_84, %c5_85] : memref<1x4x8x640xf32, #tpu.memory_space<vmem>>, vector<1x1x8x512xf32>
    %45 = vector.shape_cast %44 : vector<1x1x8x512xf32> to vector<8x512xf32>
    %c0_86 = arith.constant 0 : index
    %c3_87 = arith.constant 3 : index
    %c0_88 = arith.constant 0 : index
    %c5_89 = arith.constant 5 : index
    %46 = vector.load %arg1[%c0_86, %c3_87, %c0_88, %c5_89] : memref<1x4x8x640xf32, #tpu.memory_space<vmem>>, vector<1x1x8x512xf32>
    %47 = vector.shape_cast %46 : vector<1x1x8x512xf32> to vector<8x512xf32>
    %c0_90 = arith.constant 0 : index
    %c0_91 = arith.constant 0 : index
    %c0_92 = arith.constant 0 : index
    %c6 = arith.constant 6 : index
    %48 = vector.load %arg1[%c0_90, %c0_91, %c0_92, %c6] : memref<1x4x8x640xf32, #tpu.memory_space<vmem>>, vector<1x1x8x512xf32>
    %49 = vector.shape_cast %48 : vector<1x1x8x512xf32> to vector<8x512xf32>
    %c0_93 = arith.constant 0 : index
    %c1_94 = arith.constant 1 : index
    %c0_95 = arith.constant 0 : index
    %c6_96 = arith.constant 6 : index
    %50 = vector.load %arg1[%c0_93, %c1_94, %c0_95, %c6_96] : memref<1x4x8x640xf32, #tpu.memory_space<vmem>>, vector<1x1x8x512xf32>
    %51 = vector.shape_cast %50 : vector<1x1x8x512xf32> to vector<8x512xf32>
    %c0_97 = arith.constant 0 : index
    %c2_98 = arith.constant 2 : index
    %c0_99 = arith.constant 0 : index
    %c6_100 = arith.constant 6 : index
    %52 = vector.load %arg1[%c0_97, %c2_98, %c0_99, %c6_100] : memref<1x4x8x640xf32, #tpu.memory_space<vmem>>, vector<1x1x8x512xf32>
    %53 = vector.shape_cast %52 : vector<1x1x8x512xf32> to vector<8x512xf32>
    %c0_101 = arith.constant 0 : index
    %c3_102 = arith.constant 3 : index
    %c0_103 = arith.constant 0 : index
    %c6_104 = arith.constant 6 : index
    %54 = vector.load %arg1[%c0_101, %c3_102, %c0_103, %c6_104] : memref<1x4x8x640xf32, #tpu.memory_space<vmem>>, vector<1x1x8x512xf32>
    %55 = vector.shape_cast %54 : vector<1x1x8x512xf32> to vector<8x512xf32>
    %56 = tpu.concatenate %1, %3, %5, %7, %9, %11, %13, %15, %17, %19, %21, %23, %25, %27, %29, %31 in 0 : vector<8x512xf32>, vector<8x512xf32>, vector<8x512xf32>, vector<8x512xf32>, vector<8x512xf32>, vector<8x512xf32>, vector<8x512xf32>, vector<8x512xf32>, vector<8x512xf32>, vector<8x512xf32>, vector<8x512xf32>, vector<8x512xf32>, vector<8x512xf32>, vector<8x512xf32>, vector<8x512xf32>, vector<8x512xf32> -> vector<128x512xf32>
    %57 = tpu.concatenate %33, %35, %37, %39, %41, %43, %45, %47, %49, %51, %53, %55 in 0 : vector<8x512xf32>, vector<8x512xf32>, vector<8x512xf32>, vector<8x512xf32>, vector<8x512xf32>, vector<8x512xf32>, vector<8x512xf32>, vector<8x512xf32>, vector<8x512xf32>, vector<8x512xf32>, vector<8x512xf32>, vector<8x512xf32> -> vector<96x512xf32>
    %58 = tpu.concatenate %56, %57 in 0 : vector<128x512xf32>, vector<96x512xf32> -> vector<224x512xf32>
    %c0_105 = arith.constant 0 : index
    %c0_106 = arith.constant 0 : index
    %59 = vector.load %arg3[%c0_105, %c0_106] : memref<16x1xf32, #tpu.memory_space<vmem>>, vector<16x1xf32>
    %60 = vector.shape_cast %59 : vector<16x1xf32> to vector<16x1xf32>
    %61 = vector.broadcast %60 : vector<16x1xf32> to vector<16x512xf32>
    %c0_107 = arith.constant 0 : index
    %c0_108 = arith.constant 0 : index
    %c0_109 = arith.constant 0 : index
    %62 = vector.load %arg2[%c0_107, %c0_108, %c0_109] : memref<4x16x224xf32, #tpu.memory_space<vmem>>, vector<1x16x224xf32>
    %63 = vector.shape_cast %62 : vector<1x16x224xf32> to vector<16x224xf32>
    %cst = arith.constant dense<0.000000e+00> : vector<16x512xf32>
    %64 = tpu.matmul %63, %58, %cst {dimension_numbers = #tpu.dot_dimension_numbers<[1], [0], [0], [1], [0, 0, 1, 1], [], []>} : vector<16x224xf32>, vector<224x512xf32>, vector<16x512xf32> -> vector<16x512xf32>
    %65 = arith.addf %61, %64 : vector<16x512xf32>
    %cst_110 = arith.constant 0.000000e+00 : f32
    %66 = vector.broadcast %cst_110 : f32 to vector<16x512xf32>
    %67 = arith.cmpf ogt, %65, %66 : vector<16x512xf32>
    %cst_111 = arith.constant 2.500000e-01 : f32
    %68 = vector.broadcast %cst_111 : f32 to vector<16x512xf32>
    %69 = arith.mulf %65, %68 : vector<16x512xf32>
    %cst_112 = arith.constant 5.000000e-02 : f32
    %70 = vector.broadcast %cst_112 : f32 to vector<16x512xf32>
    %71 = arith.mulf %65, %70 : vector<16x512xf32>
    %72 = arith.select %67, %69, %71 : vector<16x512xi1>, vector<16x512xf32>
    %c1_113 = arith.constant 1 : index
    %c0_114 = arith.constant 0 : index
    %c0_115 = arith.constant 0 : index
    %73 = vector.load %arg2[%c1_113, %c0_114, %c0_115] : memref<4x16x224xf32, #tpu.memory_space<vmem>>, vector<1x16x224xf32>
    %74 = vector.shape_cast %73 : vector<1x16x224xf32> to vector<16x224xf32>
    %cst_116 = arith.constant dense<0.000000e+00> : vector<16x512xf32>
    %75 = tpu.matmul %74, %58, %cst_116 {dimension_numbers = #tpu.dot_dimension_numbers<[1], [0], [0], [1], [0, 0, 1, 1], [], []>} : vector<16x224xf32>, vector<224x512xf32>, vector<16x512xf32> -> vector<16x512xf32>
    %76 = arith.addf %61, %75 : vector<16x512xf32>
    %cst_117 = arith.constant 0.000000e+00 : f32
    %77 = vector.broadcast %cst_117 : f32 to vector<16x512xf32>
    %78 = arith.cmpf ogt, %76, %77 : vector<16x512xf32>
    %cst_118 = arith.constant 2.500000e-01 : f32
    %79 = vector.broadcast %cst_118 : f32 to vector<16x512xf32>
    %80 = arith.mulf %76, %79 : vector<16x512xf32>
    %cst_119 = arith.constant 5.000000e-02 : f32
    %81 = vector.broadcast %cst_119 : f32 to vector<16x512xf32>
    %82 = arith.mulf %76, %81 : vector<16x512xf32>
    %83 = arith.select %78, %80, %82 : vector<16x512xi1>, vector<16x512xf32>
    %84 = arith.addf %72, %83 : vector<16x512xf32>
    %c2_120 = arith.constant 2 : index
    %c0_121 = arith.constant 0 : index
    %c0_122 = arith.constant 0 : index
    %85 = vector.load %arg2[%c2_120, %c0_121, %c0_122] : memref<4x16x224xf32, #tpu.memory_space<vmem>>, vector<1x16x224xf32>
    %86 = vector.shape_cast %85 : vector<1x16x224xf32> to vector<16x224xf32>
    %cst_123 = arith.constant dense<0.000000e+00> : vector<16x512xf32>
    %87 = tpu.matmul %86, %58, %cst_123 {dimension_numbers = #tpu.dot_dimension_numbers<[1], [0], [0], [1], [0, 0, 1, 1], [], []>} : vector<16x224xf32>, vector<224x512xf32>, vector<16x512xf32> -> vector<16x512xf32>
    %88 = arith.addf %61, %87 : vector<16x512xf32>
    %cst_124 = arith.constant 0.000000e+00 : f32
    %89 = vector.broadcast %cst_124 : f32 to vector<16x512xf32>
    %90 = arith.cmpf ogt, %88, %89 : vector<16x512xf32>
    %cst_125 = arith.constant 2.500000e-01 : f32
    %91 = vector.broadcast %cst_125 : f32 to vector<16x512xf32>
    %92 = arith.mulf %88, %91 : vector<16x512xf32>
    %cst_126 = arith.constant 5.000000e-02 : f32
    %93 = vector.broadcast %cst_126 : f32 to vector<16x512xf32>
    %94 = arith.mulf %88, %93 : vector<16x512xf32>
    %95 = arith.select %90, %92, %94 : vector<16x512xi1>, vector<16x512xf32>
    %96 = arith.addf %84, %95 : vector<16x512xf32>
    %c3_127 = arith.constant 3 : index
    %c0_128 = arith.constant 0 : index
    %c0_129 = arith.constant 0 : index
    %97 = vector.load %arg2[%c3_127, %c0_128, %c0_129] : memref<4x16x224xf32, #tpu.memory_space<vmem>>, vector<1x16x224xf32>
    %98 = vector.shape_cast %97 : vector<1x16x224xf32> to vector<16x224xf32>
    %cst_130 = arith.constant dense<0.000000e+00> : vector<16x512xf32>
    %99 = tpu.matmul %98, %58, %cst_130 {dimension_numbers = #tpu.dot_dimension_numbers<[1], [0], [0], [1], [0, 0, 1, 1], [], []>} : vector<16x224xf32>, vector<224x512xf32>, vector<16x512xf32> -> vector<16x512xf32>
    %100 = arith.addf %61, %99 : vector<16x512xf32>
    %cst_131 = arith.constant 0.000000e+00 : f32
    %101 = vector.broadcast %cst_131 : f32 to vector<16x512xf32>
    %102 = arith.cmpf ogt, %100, %101 : vector<16x512xf32>
    %cst_132 = arith.constant 2.500000e-01 : f32
    %103 = vector.broadcast %cst_132 : f32 to vector<16x512xf32>
    %104 = arith.mulf %100, %103 : vector<16x512xf32>
    %cst_133 = arith.constant 5.000000e-02 : f32
    %105 = vector.broadcast %cst_133 : f32 to vector<16x512xf32>
    %106 = arith.mulf %100, %105 : vector<16x512xf32>
    %107 = arith.select %102, %104, %106 : vector<16x512xi1>, vector<16x512xf32>
    %108 = arith.addf %96, %107 : vector<16x512xf32>
    %c0_134 = arith.constant 0 : index
    %c0_135 = arith.constant 0 : index
    %c0_136 = arith.constant 0 : index
    %109 = vector.load %arg4[%c0_134, %c0_135, %c0_136] : memref<1x16x512xf32, #tpu.memory_space<vmem>>, vector<1x16x512xf32>
    %110 = vector.shape_cast %109 : vector<1x16x512xf32> to vector<16x512xf32>
    %111 = vector.shape_cast %108 : vector<16x512xf32> to vector<1x16x512xf32>
    tpu.vector_store %arg4[%c0_134, %c0_135, %c0_136], %111 {strides = array<i32>} : memref<1x16x512xf32, #tpu.memory_space<vmem>>, vector<1x16x512xf32>,
    return
  }
  func.func @transform_0(%arg0: i32) -> (i32, i32, i32, i32) {
    %c0_i32 = arith.constant 0 : i32
    %c0_i32_0 = arith.constant 0 : i32
    %c0_i32_1 = arith.constant 0 : i32
    %c0_i32_2 = arith.constant 0 : i32
    return %arg0, %c0_i32, %c0_i32_0, %c0_i32_1 : i32, i32, i32, i32
  }
  func.func @transform_1(%arg0: i32) -> (i32, i32, i32) {
    %c0_i32 = arith.constant 0 : i32
    %c0_i32_0 = arith.constant 0 : i32
    %c0_i32_1 = arith.constant 0 : i32
    %c0_i32_2 = arith.constant 0 : i32
    return %c0_i32, %c0_i32_0, %c0_i32_1 : i32, i32, i32
  }
  func.func @transform_2(%arg0: i32) -> (i32, i32) {
    %c0_i32 = arith.constant 0 : i32
    %c0_i32_0 = arith.constant 0 : i32
    %c0_i32_1 = arith.constant 0 : i32
    return %c0_i32, %c0_i32_0 : i32, i32
  }
  func.func @transform_3(%arg0: i32) -> (i32, i32, i32) {
    %c0_i32 = arith.constant 0 : i32
    %c0_i32_0 = arith.constant 0 : i32
    %c0_i32_1 = arith.constant 0 : i32
    return %arg0, %c0_i32, %c0_i32_0 : i32, i32, i32
  }
}

module attributes {stable_mosaic.version = 11 : i64} {
  func.func @_conv_kernel(%arg0: i32, %arg1: memref<1x4x16x256xf32, #tpu.memory_space<vmem>>, %arg2: memref<4x32x448xf32, #tpu.memory_space<vmem>>, %arg3: memref<32x1xf32, #tpu.memory_space<vmem>>, %arg4: memref<1x32x128xf32, #tpu.memory_space<vmem>>) attributes {dimension_semantics = [#tpu.dimension_semantics<parallel>], iteration_bounds = array<i64: 2>, scalar_prefetch = 0 : i64, scratch_operands = 0 : i64, tpu.core_type = #tpu.core_type<tc>, window_params = [{transform_indices = @transform_0, window_bounds = array<i64: 1, 4, 16, 256>}, {pipeline_mode = #tpu.pipeline_mode<synchronous>, transform_indices = @transform_1, window_bounds = array<i64: 4, 32, 448>}, {pipeline_mode = #tpu.pipeline_mode<synchronous>, transform_indices = @transform_2, window_bounds = array<i64: 32, 1>}, {transform_indices = @transform_3, window_bounds = array<i64: 1, 32, 128>}]} {
    %c0 = arith.constant 0 : index
    %c0_0 = arith.constant 0 : index
    %c0_1 = arith.constant 0 : index
    %c0_2 = arith.constant 0 : index
    %0 = vector.load %arg1[%c0, %c0_0, %c0_1, %c0_2] : memref<1x4x16x256xf32, #tpu.memory_space<vmem>>, vector<1x1x16x128xf32>
    %1 = vector.shape_cast %0 : vector<1x1x16x128xf32> to vector<16x128xf32>
    %c0_3 = arith.constant 0 : index
    %c1 = arith.constant 1 : index
    %c0_4 = arith.constant 0 : index
    %c0_5 = arith.constant 0 : index
    %2 = vector.load %arg1[%c0_3, %c1, %c0_4, %c0_5] : memref<1x4x16x256xf32, #tpu.memory_space<vmem>>, vector<1x1x16x128xf32>
    %3 = vector.shape_cast %2 : vector<1x1x16x128xf32> to vector<16x128xf32>
    %c0_6 = arith.constant 0 : index
    %c2 = arith.constant 2 : index
    %c0_7 = arith.constant 0 : index
    %c0_8 = arith.constant 0 : index
    %4 = vector.load %arg1[%c0_6, %c2, %c0_7, %c0_8] : memref<1x4x16x256xf32, #tpu.memory_space<vmem>>, vector<1x1x16x128xf32>
    %5 = vector.shape_cast %4 : vector<1x1x16x128xf32> to vector<16x128xf32>
    %c0_9 = arith.constant 0 : index
    %c3 = arith.constant 3 : index
    %c0_10 = arith.constant 0 : index
    %c0_11 = arith.constant 0 : index
    %6 = vector.load %arg1[%c0_9, %c3, %c0_10, %c0_11] : memref<1x4x16x256xf32, #tpu.memory_space<vmem>>, vector<1x1x16x128xf32>
    %7 = vector.shape_cast %6 : vector<1x1x16x128xf32> to vector<16x128xf32>
    %c0_12 = arith.constant 0 : index
    %c0_13 = arith.constant 0 : index
    %c0_14 = arith.constant 0 : index
    %c1_15 = arith.constant 1 : index
    %8 = vector.load %arg1[%c0_12, %c0_13, %c0_14, %c1_15] : memref<1x4x16x256xf32, #tpu.memory_space<vmem>>, vector<1x1x16x128xf32>
    %9 = vector.shape_cast %8 : vector<1x1x16x128xf32> to vector<16x128xf32>
    %c0_16 = arith.constant 0 : index
    %c1_17 = arith.constant 1 : index
    %c0_18 = arith.constant 0 : index
    %c1_19 = arith.constant 1 : index
    %10 = vector.load %arg1[%c0_16, %c1_17, %c0_18, %c1_19] : memref<1x4x16x256xf32, #tpu.memory_space<vmem>>, vector<1x1x16x128xf32>
    %11 = vector.shape_cast %10 : vector<1x1x16x128xf32> to vector<16x128xf32>
    %c0_20 = arith.constant 0 : index
    %c2_21 = arith.constant 2 : index
    %c0_22 = arith.constant 0 : index
    %c1_23 = arith.constant 1 : index
    %12 = vector.load %arg1[%c0_20, %c2_21, %c0_22, %c1_23] : memref<1x4x16x256xf32, #tpu.memory_space<vmem>>, vector<1x1x16x128xf32>
    %13 = vector.shape_cast %12 : vector<1x1x16x128xf32> to vector<16x128xf32>
    %c0_24 = arith.constant 0 : index
    %c3_25 = arith.constant 3 : index
    %c0_26 = arith.constant 0 : index
    %c1_27 = arith.constant 1 : index
    %14 = vector.load %arg1[%c0_24, %c3_25, %c0_26, %c1_27] : memref<1x4x16x256xf32, #tpu.memory_space<vmem>>, vector<1x1x16x128xf32>
    %15 = vector.shape_cast %14 : vector<1x1x16x128xf32> to vector<16x128xf32>
    %c0_28 = arith.constant 0 : index
    %c0_29 = arith.constant 0 : index
    %c0_30 = arith.constant 0 : index
    %c2_31 = arith.constant 2 : index
    %16 = vector.load %arg1[%c0_28, %c0_29, %c0_30, %c2_31] : memref<1x4x16x256xf32, #tpu.memory_space<vmem>>, vector<1x1x16x128xf32>
    %17 = vector.shape_cast %16 : vector<1x1x16x128xf32> to vector<16x128xf32>
    %c0_32 = arith.constant 0 : index
    %c1_33 = arith.constant 1 : index
    %c0_34 = arith.constant 0 : index
    %c2_35 = arith.constant 2 : index
    %18 = vector.load %arg1[%c0_32, %c1_33, %c0_34, %c2_35] : memref<1x4x16x256xf32, #tpu.memory_space<vmem>>, vector<1x1x16x128xf32>
    %19 = vector.shape_cast %18 : vector<1x1x16x128xf32> to vector<16x128xf32>
    %c0_36 = arith.constant 0 : index
    %c2_37 = arith.constant 2 : index
    %c0_38 = arith.constant 0 : index
    %c2_39 = arith.constant 2 : index
    %20 = vector.load %arg1[%c0_36, %c2_37, %c0_38, %c2_39] : memref<1x4x16x256xf32, #tpu.memory_space<vmem>>, vector<1x1x16x128xf32>
    %21 = vector.shape_cast %20 : vector<1x1x16x128xf32> to vector<16x128xf32>
    %c0_40 = arith.constant 0 : index
    %c3_41 = arith.constant 3 : index
    %c0_42 = arith.constant 0 : index
    %c2_43 = arith.constant 2 : index
    %22 = vector.load %arg1[%c0_40, %c3_41, %c0_42, %c2_43] : memref<1x4x16x256xf32, #tpu.memory_space<vmem>>, vector<1x1x16x128xf32>
    %23 = vector.shape_cast %22 : vector<1x1x16x128xf32> to vector<16x128xf32>
    %c0_44 = arith.constant 0 : index
    %c0_45 = arith.constant 0 : index
    %c0_46 = arith.constant 0 : index
    %c3_47 = arith.constant 3 : index
    %24 = vector.load %arg1[%c0_44, %c0_45, %c0_46, %c3_47] : memref<1x4x16x256xf32, #tpu.memory_space<vmem>>, vector<1x1x16x128xf32>
    %25 = vector.shape_cast %24 : vector<1x1x16x128xf32> to vector<16x128xf32>
    %c0_48 = arith.constant 0 : index
    %c1_49 = arith.constant 1 : index
    %c0_50 = arith.constant 0 : index
    %c3_51 = arith.constant 3 : index
    %26 = vector.load %arg1[%c0_48, %c1_49, %c0_50, %c3_51] : memref<1x4x16x256xf32, #tpu.memory_space<vmem>>, vector<1x1x16x128xf32>
    %27 = vector.shape_cast %26 : vector<1x1x16x128xf32> to vector<16x128xf32>
    %c0_52 = arith.constant 0 : index
    %c2_53 = arith.constant 2 : index
    %c0_54 = arith.constant 0 : index
    %c3_55 = arith.constant 3 : index
    %28 = vector.load %arg1[%c0_52, %c2_53, %c0_54, %c3_55] : memref<1x4x16x256xf32, #tpu.memory_space<vmem>>, vector<1x1x16x128xf32>
    %29 = vector.shape_cast %28 : vector<1x1x16x128xf32> to vector<16x128xf32>
    %c0_56 = arith.constant 0 : index
    %c3_57 = arith.constant 3 : index
    %c0_58 = arith.constant 0 : index
    %c3_59 = arith.constant 3 : index
    %30 = vector.load %arg1[%c0_56, %c3_57, %c0_58, %c3_59] : memref<1x4x16x256xf32, #tpu.memory_space<vmem>>, vector<1x1x16x128xf32>
    %31 = vector.shape_cast %30 : vector<1x1x16x128xf32> to vector<16x128xf32>
    %c0_60 = arith.constant 0 : index
    %c0_61 = arith.constant 0 : index
    %c0_62 = arith.constant 0 : index
    %c4 = arith.constant 4 : index
    %32 = vector.load %arg1[%c0_60, %c0_61, %c0_62, %c4] : memref<1x4x16x256xf32, #tpu.memory_space<vmem>>, vector<1x1x16x128xf32>
    %33 = vector.shape_cast %32 : vector<1x1x16x128xf32> to vector<16x128xf32>
    %c0_63 = arith.constant 0 : index
    %c1_64 = arith.constant 1 : index
    %c0_65 = arith.constant 0 : index
    %c4_66 = arith.constant 4 : index
    %34 = vector.load %arg1[%c0_63, %c1_64, %c0_65, %c4_66] : memref<1x4x16x256xf32, #tpu.memory_space<vmem>>, vector<1x1x16x128xf32>
    %35 = vector.shape_cast %34 : vector<1x1x16x128xf32> to vector<16x128xf32>
    %c0_67 = arith.constant 0 : index
    %c2_68 = arith.constant 2 : index
    %c0_69 = arith.constant 0 : index
    %c4_70 = arith.constant 4 : index
    %36 = vector.load %arg1[%c0_67, %c2_68, %c0_69, %c4_70] : memref<1x4x16x256xf32, #tpu.memory_space<vmem>>, vector<1x1x16x128xf32>
    %37 = vector.shape_cast %36 : vector<1x1x16x128xf32> to vector<16x128xf32>
    %c0_71 = arith.constant 0 : index
    %c3_72 = arith.constant 3 : index
    %c0_73 = arith.constant 0 : index
    %c4_74 = arith.constant 4 : index
    %38 = vector.load %arg1[%c0_71, %c3_72, %c0_73, %c4_74] : memref<1x4x16x256xf32, #tpu.memory_space<vmem>>, vector<1x1x16x128xf32>
    %39 = vector.shape_cast %38 : vector<1x1x16x128xf32> to vector<16x128xf32>
    %c0_75 = arith.constant 0 : index
    %c0_76 = arith.constant 0 : index
    %c0_77 = arith.constant 0 : index
    %c5 = arith.constant 5 : index
    %40 = vector.load %arg1[%c0_75, %c0_76, %c0_77, %c5] : memref<1x4x16x256xf32, #tpu.memory_space<vmem>>, vector<1x1x16x128xf32>
    %41 = vector.shape_cast %40 : vector<1x1x16x128xf32> to vector<16x128xf32>
    %c0_78 = arith.constant 0 : index
    %c1_79 = arith.constant 1 : index
    %c0_80 = arith.constant 0 : index
    %c5_81 = arith.constant 5 : index
    %42 = vector.load %arg1[%c0_78, %c1_79, %c0_80, %c5_81] : memref<1x4x16x256xf32, #tpu.memory_space<vmem>>, vector<1x1x16x128xf32>
    %43 = vector.shape_cast %42 : vector<1x1x16x128xf32> to vector<16x128xf32>
    %c0_82 = arith.constant 0 : index
    %c2_83 = arith.constant 2 : index
    %c0_84 = arith.constant 0 : index
    %c5_85 = arith.constant 5 : index
    %44 = vector.load %arg1[%c0_82, %c2_83, %c0_84, %c5_85] : memref<1x4x16x256xf32, #tpu.memory_space<vmem>>, vector<1x1x16x128xf32>
    %45 = vector.shape_cast %44 : vector<1x1x16x128xf32> to vector<16x128xf32>
    %c0_86 = arith.constant 0 : index
    %c3_87 = arith.constant 3 : index
    %c0_88 = arith.constant 0 : index
    %c5_89 = arith.constant 5 : index
    %46 = vector.load %arg1[%c0_86, %c3_87, %c0_88, %c5_89] : memref<1x4x16x256xf32, #tpu.memory_space<vmem>>, vector<1x1x16x128xf32>
    %47 = vector.shape_cast %46 : vector<1x1x16x128xf32> to vector<16x128xf32>
    %c0_90 = arith.constant 0 : index
    %c0_91 = arith.constant 0 : index
    %c0_92 = arith.constant 0 : index
    %c6 = arith.constant 6 : index
    %48 = vector.load %arg1[%c0_90, %c0_91, %c0_92, %c6] : memref<1x4x16x256xf32, #tpu.memory_space<vmem>>, vector<1x1x16x128xf32>
    %49 = vector.shape_cast %48 : vector<1x1x16x128xf32> to vector<16x128xf32>
    %c0_93 = arith.constant 0 : index
    %c1_94 = arith.constant 1 : index
    %c0_95 = arith.constant 0 : index
    %c6_96 = arith.constant 6 : index
    %50 = vector.load %arg1[%c0_93, %c1_94, %c0_95, %c6_96] : memref<1x4x16x256xf32, #tpu.memory_space<vmem>>, vector<1x1x16x128xf32>
    %51 = vector.shape_cast %50 : vector<1x1x16x128xf32> to vector<16x128xf32>
    %c0_97 = arith.constant 0 : index
    %c2_98 = arith.constant 2 : index
    %c0_99 = arith.constant 0 : index
    %c6_100 = arith.constant 6 : index
    %52 = vector.load %arg1[%c0_97, %c2_98, %c0_99, %c6_100] : memref<1x4x16x256xf32, #tpu.memory_space<vmem>>, vector<1x1x16x128xf32>
    %53 = vector.shape_cast %52 : vector<1x1x16x128xf32> to vector<16x128xf32>
    %c0_101 = arith.constant 0 : index
    %c3_102 = arith.constant 3 : index
    %c0_103 = arith.constant 0 : index
    %c6_104 = arith.constant 6 : index
    %54 = vector.load %arg1[%c0_101, %c3_102, %c0_103, %c6_104] : memref<1x4x16x256xf32, #tpu.memory_space<vmem>>, vector<1x1x16x128xf32>
    %55 = vector.shape_cast %54 : vector<1x1x16x128xf32> to vector<16x128xf32>
    %56 = tpu.concatenate %1, %3, %5, %7, %9, %11, %13, %15, %17, %19, %21, %23, %25, %27, %29, %31 in 0 : vector<16x128xf32>, vector<16x128xf32>, vector<16x128xf32>, vector<16x128xf32>, vector<16x128xf32>, vector<16x128xf32>, vector<16x128xf32>, vector<16x128xf32>, vector<16x128xf32>, vector<16x128xf32>, vector<16x128xf32>, vector<16x128xf32>, vector<16x128xf32>, vector<16x128xf32>, vector<16x128xf32>, vector<16x128xf32> -> vector<256x128xf32>
    %57 = tpu.concatenate %33, %35, %37, %39, %41, %43, %45, %47, %49, %51, %53, %55 in 0 : vector<16x128xf32>, vector<16x128xf32>, vector<16x128xf32>, vector<16x128xf32>, vector<16x128xf32>, vector<16x128xf32>, vector<16x128xf32>, vector<16x128xf32>, vector<16x128xf32>, vector<16x128xf32>, vector<16x128xf32>, vector<16x128xf32> -> vector<192x128xf32>
    %58 = tpu.concatenate %56, %57 in 0 : vector<256x128xf32>, vector<192x128xf32> -> vector<448x128xf32>
    %c0_105 = arith.constant 0 : index
    %c0_106 = arith.constant 0 : index
    %59 = vector.load %arg3[%c0_105, %c0_106] : memref<32x1xf32, #tpu.memory_space<vmem>>, vector<32x1xf32>
    %60 = vector.shape_cast %59 : vector<32x1xf32> to vector<32x1xf32>
    %61 = vector.broadcast %60 : vector<32x1xf32> to vector<32x128xf32>
    %c0_107 = arith.constant 0 : index
    %c0_108 = arith.constant 0 : index
    %c0_109 = arith.constant 0 : index
    %62 = vector.load %arg2[%c0_107, %c0_108, %c0_109] : memref<4x32x448xf32, #tpu.memory_space<vmem>>, vector<1x32x448xf32>
    %63 = vector.shape_cast %62 : vector<1x32x448xf32> to vector<32x448xf32>
    %cst = arith.constant dense<0.000000e+00> : vector<32x128xf32>
    %64 = tpu.matmul %63, %58, %cst {dimension_numbers = #tpu.dot_dimension_numbers<[1], [0], [0], [1], [0, 0, 1, 1], [], []>} : vector<32x448xf32>, vector<448x128xf32>, vector<32x128xf32> -> vector<32x128xf32>
    %65 = arith.addf %61, %64 : vector<32x128xf32>
    %cst_110 = arith.constant 0.000000e+00 : f32
    %66 = vector.broadcast %cst_110 : f32 to vector<32x128xf32>
    %67 = arith.cmpf ogt, %65, %66 : vector<32x128xf32>
    %cst_111 = arith.constant 2.500000e-01 : f32
    %68 = vector.broadcast %cst_111 : f32 to vector<32x128xf32>
    %69 = arith.mulf %65, %68 : vector<32x128xf32>
    %cst_112 = arith.constant 5.000000e-02 : f32
    %70 = vector.broadcast %cst_112 : f32 to vector<32x128xf32>
    %71 = arith.mulf %65, %70 : vector<32x128xf32>
    %72 = arith.select %67, %69, %71 : vector<32x128xi1>, vector<32x128xf32>
    %c1_113 = arith.constant 1 : index
    %c0_114 = arith.constant 0 : index
    %c0_115 = arith.constant 0 : index
    %73 = vector.load %arg2[%c1_113, %c0_114, %c0_115] : memref<4x32x448xf32, #tpu.memory_space<vmem>>, vector<1x32x448xf32>
    %74 = vector.shape_cast %73 : vector<1x32x448xf32> to vector<32x448xf32>
    %cst_116 = arith.constant dense<0.000000e+00> : vector<32x128xf32>
    %75 = tpu.matmul %74, %58, %cst_116 {dimension_numbers = #tpu.dot_dimension_numbers<[1], [0], [0], [1], [0, 0, 1, 1], [], []>} : vector<32x448xf32>, vector<448x128xf32>, vector<32x128xf32> -> vector<32x128xf32>
    %76 = arith.addf %61, %75 : vector<32x128xf32>
    %cst_117 = arith.constant 0.000000e+00 : f32
    %77 = vector.broadcast %cst_117 : f32 to vector<32x128xf32>
    %78 = arith.cmpf ogt, %76, %77 : vector<32x128xf32>
    %cst_118 = arith.constant 2.500000e-01 : f32
    %79 = vector.broadcast %cst_118 : f32 to vector<32x128xf32>
    %80 = arith.mulf %76, %79 : vector<32x128xf32>
    %cst_119 = arith.constant 5.000000e-02 : f32
    %81 = vector.broadcast %cst_119 : f32 to vector<32x128xf32>
    %82 = arith.mulf %76, %81 : vector<32x128xf32>
    %83 = arith.select %78, %80, %82 : vector<32x128xi1>, vector<32x128xf32>
    %84 = arith.addf %72, %83 : vector<32x128xf32>
    %c2_120 = arith.constant 2 : index
    %c0_121 = arith.constant 0 : index
    %c0_122 = arith.constant 0 : index
    %85 = vector.load %arg2[%c2_120, %c0_121, %c0_122] : memref<4x32x448xf32, #tpu.memory_space<vmem>>, vector<1x32x448xf32>
    %86 = vector.shape_cast %85 : vector<1x32x448xf32> to vector<32x448xf32>
    %cst_123 = arith.constant dense<0.000000e+00> : vector<32x128xf32>
    %87 = tpu.matmul %86, %58, %cst_123 {dimension_numbers = #tpu.dot_dimension_numbers<[1], [0], [0], [1], [0, 0, 1, 1], [], []>} : vector<32x448xf32>, vector<448x128xf32>, vector<32x128xf32> -> vector<32x128xf32>
    %88 = arith.addf %61, %87 : vector<32x128xf32>
    %cst_124 = arith.constant 0.000000e+00 : f32
    %89 = vector.broadcast %cst_124 : f32 to vector<32x128xf32>
    %90 = arith.cmpf ogt, %88, %89 : vector<32x128xf32>
    %cst_125 = arith.constant 2.500000e-01 : f32
    %91 = vector.broadcast %cst_125 : f32 to vector<32x128xf32>
    %92 = arith.mulf %88, %91 : vector<32x128xf32>
    %cst_126 = arith.constant 5.000000e-02 : f32
    %93 = vector.broadcast %cst_126 : f32 to vector<32x128xf32>
    %94 = arith.mulf %88, %93 : vector<32x128xf32>
    %95 = arith.select %90, %92, %94 : vector<32x128xi1>, vector<32x128xf32>
    %96 = arith.addf %84, %95 : vector<32x128xf32>
    %c3_127 = arith.constant 3 : index
    %c0_128 = arith.constant 0 : index
    %c0_129 = arith.constant 0 : index
    %97 = vector.load %arg2[%c3_127, %c0_128, %c0_129] : memref<4x32x448xf32, #tpu.memory_space<vmem>>, vector<1x32x448xf32>
    %98 = vector.shape_cast %97 : vector<1x32x448xf32> to vector<32x448xf32>
    %cst_130 = arith.constant dense<0.000000e+00> : vector<32x128xf32>
    %99 = tpu.matmul %98, %58, %cst_130 {dimension_numbers = #tpu.dot_dimension_numbers<[1], [0], [0], [1], [0, 0, 1, 1], [], []>} : vector<32x448xf32>, vector<448x128xf32>, vector<32x128xf32> -> vector<32x128xf32>
    %100 = arith.addf %61, %99 : vector<32x128xf32>
    %cst_131 = arith.constant 0.000000e+00 : f32
    %101 = vector.broadcast %cst_131 : f32 to vector<32x128xf32>
    %102 = arith.cmpf ogt, %100, %101 : vector<32x128xf32>
    %cst_132 = arith.constant 2.500000e-01 : f32
    %103 = vector.broadcast %cst_132 : f32 to vector<32x128xf32>
    %104 = arith.mulf %100, %103 : vector<32x128xf32>
    %cst_133 = arith.constant 5.000000e-02 : f32
    %105 = vector.broadcast %cst_133 : f32 to vector<32x128xf32>
    %106 = arith.mulf %100, %105 : vector<32x128xf32>
    %107 = arith.select %102, %104, %106 : vector<32x128xi1>, vector<32x128xf32>
    %108 = arith.addf %96, %107 : vector<32x128xf32>
    %c0_134 = arith.constant 0 : index
    %c0_135 = arith.constant 0 : index
    %c0_136 = arith.constant 0 : index
    %109 = vector.load %arg4[%c0_134, %c0_135, %c0_136] : memref<1x32x128xf32, #tpu.memory_space<vmem>>, vector<1x32x128xf32>
    %110 = vector.shape_cast %109 : vector<1x32x128xf32> to vector<32x128xf32>
    %111 = vector.shape_cast %108 : vector<32x128xf32> to vector<1x32x128xf32>
    tpu.vector_store %arg4[%c0_134, %c0_135, %c0_136], %111 {strides = array<i32>} : memref<1x32x128xf32, #tpu.memory_space<vmem>>, vector<1x32x128xf32>,
    return
  }
  func.func @transform_0(%arg0: i32) -> (i32, i32, i32, i32) {
    %c0_i32 = arith.constant 0 : i32
    %c0_i32_0 = arith.constant 0 : i32
    %c0_i32_1 = arith.constant 0 : i32
    %c0_i32_2 = arith.constant 0 : i32
    return %arg0, %c0_i32, %c0_i32_0, %c0_i32_1 : i32, i32, i32, i32
  }
  func.func @transform_1(%arg0: i32) -> (i32, i32, i32) {
    %c0_i32 = arith.constant 0 : i32
    %c0_i32_0 = arith.constant 0 : i32
    %c0_i32_1 = arith.constant 0 : i32
    %c0_i32_2 = arith.constant 0 : i32
    return %c0_i32, %c0_i32_0, %c0_i32_1 : i32, i32, i32
  }
  func.func @transform_2(%arg0: i32) -> (i32, i32) {
    %c0_i32 = arith.constant 0 : i32
    %c0_i32_0 = arith.constant 0 : i32
    %c0_i32_1 = arith.constant 0 : i32
    return %c0_i32, %c0_i32_0 : i32, i32
  }
  func.func @transform_3(%arg0: i32) -> (i32, i32, i32) {
    %c0_i32 = arith.constant 0 : i32
    %c0_i32_0 = arith.constant 0 : i32
    %c0_i32_1 = arith.constant 0 : i32
    return %arg0, %c0_i32, %c0_i32_0 : i32, i32, i32
  }
}

module attributes {stable_mosaic.version = 11 : i64} {
  func.func @_fc_kernel(%arg0: i32, %arg1: memref<8x2x512xf32, #tpu.memory_space<vmem>>, %arg2: memref<8x512x1024xi8, #tpu.memory_space<vmem>>, %arg3: memref<1x1024xf32, #tpu.memory_space<vmem>>, %arg4: memref<1x1024xf32, #tpu.memory_space<vmem>>, %arg5: memref<2x1024xf32, #tpu.memory_space<vmem>>) attributes {dimension_semantics = [#tpu.dimension_semantics<parallel>], iteration_bounds = array<i64: 8>, scalar_prefetch = 0 : i64, scratch_operands = 0 : i64, tpu.core_type = #tpu.core_type<tc>, window_params = [{pipeline_mode = #tpu.pipeline_mode<synchronous>, transform_indices = @transform_0, window_bounds = array<i64: 8, 2, 512>}, {transform_indices = @transform_1, window_bounds = array<i64: 8, 512, 1024>}, {transform_indices = @transform_2, window_bounds = array<i64: 1, 1024>}, {transform_indices = @transform_3, window_bounds = array<i64: 1, 1024>}, {transform_indices = @transform_4, window_bounds = array<i64: 2, 1024>}]} {
    %cst = arith.constant 0.000000e+00 : f32
    %0 = vector.broadcast %cst : f32 to vector<2x1024xf32>
    %c0_i32 = arith.constant 0 : i32
    %c8_i32 = arith.constant 8 : i32
    %1 = arith.addi %c0_i32, %c8_i32 : i32
    %c1_i32 = arith.constant 1 : i32
    %2 = scf.for %arg6 = %c0_i32 to %1 step %c1_i32 iter_args(%arg7 = %0) -> (vector<2x1024xf32>)  : i32 {
      %10 = arith.index_cast %arg6 : i32 to index
      %c0_6 = arith.constant 0 : index
      %c0_7 = arith.constant 0 : index
      %11 = vector.load %arg2[%10, %c0_6, %c0_7] : memref<8x512x1024xi8, #tpu.memory_space<vmem>>, vector<1x512x1024xi8>
      %12 = vector.shape_cast %11 : vector<1x512x1024xi8> to vector<512x1024xi8>
      %13 = arith.sitofp %12 : vector<512x1024xi8> to vector<512x1024xf32>
      %14 = arith.index_cast %arg6 : i32 to index
      %c0_8 = arith.constant 0 : index
      %c0_9 = arith.constant 0 : index
      %15 = vector.load %arg1[%14, %c0_8, %c0_9] : memref<8x2x512xf32, #tpu.memory_space<vmem>>, vector<1x2x512xf32>
      %16 = vector.shape_cast %15 : vector<1x2x512xf32> to vector<2x512xf32>
      %cst_10 = arith.constant dense<0.000000e+00> : vector<2x1024xf32>
      %17 = tpu.matmul %16, %13, %cst_10 {dimension_numbers = #tpu.dot_dimension_numbers<[1], [0], [0], [1], [0, 0, 1, 1], [], []>} : vector<2x512xf32>, vector<512x1024xf32>, vector<2x1024xf32> -> vector<2x1024xf32>
      %18 = arith.addf %arg7, %17 : vector<2x1024xf32>
      scf.yield %18 : vector<2x1024xf32>
    }
    %c8_i32_0 = arith.constant 8 : i32
    %c0 = arith.constant 0 : index
    %c0_1 = arith.constant 0 : index
    %3 = vector.load %arg3[%c0, %c0_1] : memref<1x1024xf32, #tpu.memory_space<vmem>>, vector<1x1024xf32>
    %4 = vector.broadcast %3 : vector<1x1024xf32> to vector<2x1024xf32>
    %5 = arith.mulf %2, %4 : vector<2x1024xf32>
    %c0_2 = arith.constant 0 : index
    %c0_3 = arith.constant 0 : index
    %6 = vector.load %arg4[%c0_2, %c0_3] : memref<1x1024xf32, #tpu.memory_space<vmem>>, vector<1x1024xf32>
    %7 = vector.broadcast %6 : vector<1x1024xf32> to vector<2x1024xf32>
    %8 = arith.addf %5, %7 : vector<2x1024xf32>
    %c0_4 = arith.constant 0 : index
    %c0_5 = arith.constant 0 : index
    %9 = vector.load %arg5[%c0_4, %c0_5] : memref<2x1024xf32, #tpu.memory_space<vmem>>, vector<2x1024xf32>
    tpu.vector_store %arg5[%c0_4, %c0_5], %8 {strides = array<i32>} : memref<2x1024xf32, #tpu.memory_space<vmem>>, vector<2x1024xf32>,
    return
  }
  func.func @transform_0(%arg0: i32) -> (i32, i32, i32) {
    %c0_i32 = arith.constant 0 : i32
    %c0_i32_0 = arith.constant 0 : i32
    %c0_i32_1 = arith.constant 0 : i32
    %c0_i32_2 = arith.constant 0 : i32
    return %c0_i32, %c0_i32_0, %c0_i32_1 : i32, i32, i32
  }
  func.func @transform_1(%arg0: i32) -> (i32, i32, i32) {
    %c0_i32 = arith.constant 0 : i32
    %c0_i32_0 = arith.constant 0 : i32
    %c0_i32_1 = arith.constant 0 : i32
    return %c0_i32, %c0_i32_0, %arg0 : i32, i32, i32
  }
  func.func @transform_2(%arg0: i32) -> (i32, i32) {
    %c0_i32 = arith.constant 0 : i32
    %c0_i32_0 = arith.constant 0 : i32
    return %c0_i32, %arg0 : i32, i32
  }
  func.func @transform_3(%arg0: i32) -> (i32, i32) {
    %c0_i32 = arith.constant 0 : i32
    %c0_i32_0 = arith.constant 0 : i32
    return %c0_i32, %arg0 : i32, i32
  }
  func.func @transform_4(%arg0: i32) -> (i32, i32) {
    %c0_i32 = arith.constant 0 : i32
    %c0_i32_0 = arith.constant 0 : i32
    return %c0_i32, %arg0 : i32, i32
  }
}

</mosaic_0001>

<bundles_post_ra>
// kernel: generator_8192_forward.4
= control target key start
LH: loop header
LB: loop body
LE: loop exit
PB: predicated region body
PF: predicated region fallthrough
CT: control target
= control target key end

     0   :  { %s3844_s12 = smov 0   ;;  %s6313_s0 = inlined_call_operand.vmem [shape: f32[2,4,1,2176], index: 0, kind: input, shape index: {}]   ;;  %s6314_s1 = inlined_call_operand.vmem [shape: f32[4,8,16], index: 1, kind: input, shape index: {}]   ;;  %s6315_s2 = inlined_call_operand.vmem [shape: f32[8,1], index: 2, kind: input, shape index: {}]   ;;  %s6316_s3 = inlined_call_operand.vmem [shape: f32[2,8,2048], index: 3, kind: output, shape index: {}]  }
   0x1 LB: > { %s3194_s13 = sadd.s32 4294967295, %s3818_s12   ;;  %p3198_p0 = scmp.ge.s32.totalorder %s3818_s12, 1  ;;  %s3818_s12 = sphi %s3844_s12, %s13_s12  }
   0x2   : > { %p136_p1 = scmp.lt.s32.totalorder %s3818_s12, 3 }
   0x4   : > { %p137_p2 = pnand %p3198_p0, %p136_p1 }
   0x6   : > { %140 = sbr.rel (%p137_p2) target bundleno = 648 (0x288), region = 32 }
   0xb   : > { %p159_p3 = scmp.lt.s32.totalorder %s3194_s13, 1  ;;  %s3820_s18 = smov 127   ;;  %vm355_vm0 = vcmask 1039360   ;;  %vm1122_vm1 = vcmask 1040384   ;;  %vm1139_vm2 = vcmask 1041408   ;;  %vm1156_vm3 = vcmask 1042432  }
   0xc   : > { %s3821_s19 = smov 126   ;;  %vm1173_vm4 = vcmask 1043456   ;;  %vm1190_vm5 = vcmask 1044480   ;;  %vm1207_vm6 = vcmask 1045504   ;;  %s3822_s20 = smov 125   ;;  %vm1224_vm7 = vcmask 1046528  }
   0xd   : > { %s6651_s13 = smov (!%p159_p3, %s3194_s13), 1  ;;  %vm626_vm8 = vcmask 1031168   ;;  %vm891_vm9 = vcmask 1022976   ;;  %vm1360_vm10 = vcmask 130048  }
   0xe   : > { %s3280_s14 = smul.u32 68, %s6651_s13  ;;  %s3279_s4 = sshll.u32 %s6651_s13, 7 }
   0xf   : > { %s6219_s7 = scalar_lea.vmem %s6316_s3, %s3279_s4 }
  0x10   : > { %s3858_s17 = scalar_lea.vmem %s6313_s0, %s3280_s14 }
  0x11   : > { %v3861_v0 = vld [vmem:[%s3858_s17 + $0x8] sm:$0xff]  ;;  %v3864_v1 = vld [vmem:[%s3858_s17] sm:$0xff]  ;;  %v3925_v20 = vld [vmem:[%s3858_s17 + $0x11] sm:$0xff] }
  0x12   : > { %v3867_v2 = vperm.slane %v3861_v0, 0  ;;  %v3870_v3 = vperm.slane %v3861_v0, 1  ;;  %v3873_v4 = vperm.slane %v3864_v1, 4  ;;  %v3876_v5 = vperm.slane %v3864_v1, 5  ;;  %v3804_v22 = vld [vmem:[%s3858_s17 + $0x10] ss:$0 sm:$0xff] }
  0x13   : > { %v6334_v6 = vperm.slane %v3864_v1, 0  ;;  %v6323_v7 = vperm.slane %v3864_v1, 1  ;;  %v6335_v11 = vperm.slane %v3861_v0, 2  ;;  %v6322_v12 = vperm.slane %v3861_v0, 3  ;;  %v3993_v39 = vld [vmem:[%s3858_s17 + $0x19] sm:$0xff]  ;;  %v4030_v49 = vld [vmem:[%s3858_s17 + $0x22] sm:$0xff] }
  0x14   : > { %6447 = vst [vmem:[#allocation2_spill] sm:$0xff] %v3870_v3  ;;  %v3882_v8 = vpack.i.bf16 %v3870_v3, %v3867_v2  ;;  %v3886_v9 = vpack.i.bf16 %v3876_v5, %v3873_v4  ;;  %v6330_v13 = vperm.slane %v3864_v1, 6  ;;  %v6328_v14 = vperm.slane %v3864_v1, 7  ;;  %v3805_v53 = vld [vmem:[%s3858_s17 + $0x21] ss:$0 sm:$0xff] }
  0x15   : > { %6448 = vst [vmem:[#allocation3_spill] sm:$0xff] %v3876_v5  ;;  %v3892_v10 = vpack.i.bf16 %v6323_v7, %v6334_v6  ;;  %v6321_v15 = vperm.slane %v3864_v1, 2  ;;  %v6319_v16 = vperm.slane %v3864_v1, 3  ;;  %v3910_v17 = vpack.i.bf16 %v6322_v12, %v6335_v11 }
  0x16   : > { %3314 = vrot.lane.b32.xlu2 %v3882_v8, %s3820_s18  ;;  %3304 = vrot.lane.b32.xlu1 %v3886_v9, %s3820_s18  ;;  %v3916_v18 = vpack.i.bf16 %v6328_v14, %v6330_v13  ;;  %v3932_v21 = vperm.slane %v3925_v20, 0  ;;  %v6318_v23 = vperm.slane %v3861_v0, 6  ;;  %v6317_v24 = vperm.slane %v3861_v0, 7  ;;  %v4128_v14 = vld [vmem:[%s3858_s17 + $0x33] sm:$0xff] }
  0x17   : > { %3294 = vrot.lane.b32.xlu0 %v3892_v10, %s3820_s18  ;;  %6449 = vst [vmem:[#allocation4_spill] sm:$0xff] %v3910_v17  ;;  %v3922_v19 = vpack.i.bf16 %v6319_v16, %v6321_v15  ;;  %v3940_v25 = vperm.slane %v3861_v0, 4  ;;  %v3943_v26 = vperm.slane %v3861_v0, 5  ;;  %v3963_v30 = vperm.slane %v3925_v20, 5  ;;  %v4096_v16 = vld [vmem:[%s3858_s17 + $0x2a] sm:$0xff] }
  0x18   : > { %6450 = vst [vmem:[#allocation5_spill] sm:$0xff] %v3916_v18  ;;  %v3946_v27 = vpack.i.bf16 %v3932_v21, %v3804_v22  ;;  %v3952_v28 = vpack.i.bf16 %v6317_v24, %v6318_v23  ;;  %v3966_v31 = vperm.slane %v3925_v20, 6  ;;  %v6320_v32 = vperm.slane %v3925_v20, 3 }
  0x19   : > { %6451 = vst [vmem:[#allocation6_spill] sm:$0xff] %v3932_v21  ;;  %v3956_v29 = vpack.i.bf16 %v3943_v26, %v3940_v25  ;;  %v6331_v33 = vperm.slane %v3925_v20, 4  ;;  %v3973_v34 = vperm.slane %v3925_v20, 1  ;;  %v3976_v35 = vperm.slane %v3925_v20, 2 }
  0x1a   : > { %6452 = vst [vmem:[#allocation7_spill] sm:$0xff] %v3943_v26  ;;  %v3980_v36 = vpack.i.bf16 %v3966_v31, %v3963_v30  ;;  %v4000_v40 = vperm.slane %v3993_v39, 3  ;;  %v4003_v41 = vperm.slane %v3993_v39, 4  ;;  %v4006_v42 = vperm.slane %v3993_v39, 1 }
  0x1b   : > { %6453 = vst [vmem:[#allocation8_spill] sm:$0xff] %v3952_v28  ;;  %v3986_v37 = vpack.i.bf16 %v6331_v33, %v6320_v32  ;;  %v3990_v38 = vpack.i.bf16 %v3976_v35, %v3973_v34  ;;  %v4009_v43 = vperm.slane %v3993_v39, 2  ;;  %v6329_v44 = vperm.slane %v3925_v20, 7 }
  0x1c   : > { %6454 = vst [vmem:[#allocation9_spill] sm:$0xff] %v3963_v30  ;;  %v6336_v45 = vperm.slane %v3993_v39, 0  ;;  %v4017_v46 = vpack.i.bf16 %v4003_v41, %v4000_v40  ;;  %v4037_v50 = vperm.slane %v4030_v49, 0  ;;  %v4040_v51 = vperm.slane %v4030_v49, 1 }
  0x1d   : > { %6455 = vst [vmem:[#allocation10_spill] sm:$0xff] %v3966_v31  ;;  %v4021_v47 = vpack.i.bf16 %v4009_v43, %v4006_v42  ;;  %v4043_v52 = vperm.slane %v3993_v39, 7  ;;  %v4049_v54 = vperm.slane %v3993_v39, 5  ;;  %v4052_v55 = vperm.slane %v3993_v39, 6 }
  0x1e   : > { %3319 = vrot.lane.b32.xlu2 %v3910_v17, %s3820_s18  ;;  %3309 = vrot.lane.b32.xlu1 %v3916_v18, %s3820_s18  ;;  %6456 = vst [vmem:[#allocation11_spill] sm:$0xff] %v3973_v34  ;;  %v4027_v48 = vpack.i.bf16 %v6336_v45, %v6329_v44  ;;  %v4056_v56 = vpack.i.bf16 %v4040_v51, %v4037_v50  ;;  %v6327_v59 = vperm.slane %v4030_v49, 6  ;;  %v6326_v60 = vperm.slane %v4030_v49, 7 }
  0x1f   : > { %3299 = vrot.lane.b32.xlu0 %v3922_v19, %s3820_s18  ;;  %6457 = vst [vmem:[#allocation12_spill] sm:$0xff] %v4000_v40  ;;  %v4059_v57 = vpack.i.bf16 %v3805_v53, %v4043_v52  ;;  %v4063_v58 = vpack.i.bf16 %v4052_v55, %v4049_v54  ;;  %v4072_v61 = vperm.slane %v4030_v49, 4  ;;  %v4075_v62 = vperm.slane %v4030_v49, 5 }
  0x20   : > { %6458 = vst [vmem:[#allocation13_spill] sm:$0xff] %v4006_v42  ;;  %v6325_v63 = vperm.slane %v4030_v49, 2  ;;  %v6324_v22 = vperm.slane %v4030_v49, 3  ;;  %v4085_v53 = vpack.i.bf16 %v6326_v60, %v6327_v59  ;;  %v4102_v32 = vperm.slane %v4096_v16, 4 }
  0x21   : > { %6459 = vst [vmem:[#allocation14_spill] sm:$0xff] %v4009_v43  ;;  %v3388_v24 = vpack.i.bf16 %v4075_v62, %v4072_v61  ;;  %v4105_v15 = vperm.slane %v4096_v16, 5  ;;  %v6333_v12 = vperm.slane %v4096_v16, 2  ;;  %v6332_v7 = vperm.slane %v4096_v16, 3 }
  0x22   : > { %6460 = vst [vmem:[#allocation15_spill] sm:$0xff] %v4027_v48  ;;  %v4093_v23 = vpack.i.bf16 %v6324_v22, %v6325_v63  ;;  %v4112_v22 = vperm.slane %v4096_v16, 0  ;;  %v4115_v63 = vperm.slane %v4096_v16, 1  ;;  %v4134_v44 = vperm.slane %v4128_v14, 1 }
  0x23   : > { %6461 = vst [vmem:[#allocation16_spill] sm:$0xff] %v4037_v50  ;;  %v4123_v60 = vpack.i.bf16 %v6332_v7, %v6333_v12  ;;  %v4137_v13 = vperm.slane %v4128_v14, 2  ;;  %v4140_v33 = vperm.slane %v4128_v14, 0  ;;  %v4143_v7 = vld [vmem:[%s3858_s17 + $0x32] ss:$0 sm:$0xff]  ;;  %v6345_v12 = vperm.slane %v4096_v16, 6 }
  0x24   : > { %6462 = vst [vmem:[#allocation17_spill] sm:$0xff] %v4040_v51  ;;  %v3398_v59 = vpack.i.bf16 %v4115_v63, %v4112_v22 }
  0x25   : > { %6463 = vst [vmem:[#allocation18_spill] sm:$0xff] %v4043_v52  ;;  %v3423_v6 = vpack.i.bf16 %v4137_v13, %v4134_v44  ;;  %v3418_v11 = vpack.i.bf16 %v4140_v33, %v4143_v7 }
  0x26   : > { %3334 = vrot.lane.b32.xlu2 %v3946_v27, %s3820_s18  ;;  %3329 = vrot.lane.b32.xlu1 %v3952_v28, %s3820_s18  ;;  %6464 = vst [vmem:[#allocation19_spill] sm:$0xff] %v4049_v54 }
  0x27   : > { %3324 = vrot.lane.b32.xlu0 %v3956_v29, %s3820_s18  ;;  %6465 = vst [vmem:[#allocation20_spill] sm:$0xff] %v4075_v62 }
  0x28   : > { %6466 = vst [vmem:[#allocation21_spill] sm:$0xff] %v4085_v53 }
  0x29   : > { %6467 = vst [vmem:[#allocation22_spill] sm:$0xff] %v4102_v32 }
  0x2a   : > { %6468 = vst [vmem:[#allocation23_spill] sm:$0xff] %v4105_v15 }
  0x2b   : > { %6469 = vst [vmem:[#allocation24_spill] sm:$0xff] %v4115_v63 }
  0x2c   : > { %6470 = vst [vmem:[#allocation25_spill] sm:$0xff] %v4123_v60 }
  0x2d   : > { %6471 = vst [vmem:[#allocation26_spill] sm:$0xff] %v4143_v7  ;;  %v4169_v7 = vperm.slane %v4128_v14, 6 }
  0x2e   : > { %3349 = vrot.lane.b32.xlu2 %v3980_v36, %s3820_s18  ;;  %3344 = vrot.lane.b32.xlu1 %v3986_v37, %s3820_s18 }
  0x2f   : > { %3339 = vrot.lane.b32.xlu0 %v3990_v38, %s3820_s18 }
  0x36   : > { %3364 = vrot.lane.b32.xlu2 %v4017_v46, %s3820_s18  ;;  %3359 = vrot.lane.b32.xlu1 %v4021_v47, %s3820_s18 }
  0x37   : > { %3354 = vrot.lane.b32.xlu0 %v4027_v48, %s3820_s18 }
  0x3e   : > { %3379 = vrot.lane.b32.xlu2 %v4056_v56, %s3820_s18  ;;  %3374 = vrot.lane.b32.xlu1 %v4059_v57, %s3820_s18 }
  0x3f   : > { %3369 = vrot.lane.b32.xlu0 %v4063_v58, %s3820_s18 }
  0x46   : > { %3394 = vrot.lane.b32.xlu2 %v4085_v53, %s3820_s18  ;;  %3389 = vrot.lane.b32.xlu1 %v3388_v24, %s3820_s18  ;;  %v3408_v24 = vpack.i.bf16 %v4105_v15, %v4102_v32  ;;  %v4166_v15 = vperm.slane %v4128_v14, 5 }
  0x47   : > { %3384 = vrot.lane.b32.xlu0 %v4093_v23, %s3820_s18 }
  0x48   : > { %6473 = vst [vmem:[#allocation28_spill] sm:$0xff] %v4166_v15 }
  0x4e   : > { %3409 = vrot.lane.b32.xlu2 %v3408_v24, %s3820_s18  ;;  %3404 = vrot.lane.b32.xlu1 %v4123_v60, %s3820_s18  ;;  %v6344_v24 = vperm.slane %v4096_v16, 7  ;;  %v4159_v60 = vld [vmem:[%s3858_s17 + $0x3b] sm:$0xff] }
  0x4f   : > { %3399 = vrot.lane.b32.xlu0 %v3398_v59, %s3820_s18  ;;  %v6350_v59 = vperm.slane %v4128_v14, 7  ;;  %v6351_v53 = vperm.slane %v4159_v60, 0  ;;  %v6366_v26 = vperm.slane %v4159_v60, 4 }
  0x50   : > { %v4156_v45 = vpack.i.bf16 %v6344_v24, %v6345_v12  ;;  %v6354_v24 = vperm.slane %v4128_v14, 3  ;;  %v6355_v12 = vperm.slane %v4128_v14, 4 }
  0x52   : > { %6472 = vst [vmem:[#allocation27_spill] sm:$0xff] %v4156_v45  ;;  %v4187_v32 = vpack.i.bf16 %v6355_v12, %v6354_v24  ;;  %v4203_v24 = vperm.slane %v4159_v60, 1  ;;  %v4206_v12 = vperm.slane %v4159_v60, 2 }
  0x54   : > { %6475 = vst [vmem:[#allocation30_spill] sm:$0xff] %v4187_v32  ;;  %v3443_v54 = vpack.i.bf16 %v4206_v12, %v4203_v24 }
  0x55   : > { %6478 = vst [vmem:[#allocation33_spill] sm:$0xff] %v4203_v24 }
  0x56   : > { %3424 = vrot.lane.b32.xlu2 %v3423_v6, %s3820_s18  ;;  %3419 = vrot.lane.b32.xlu1 %v3418_v11, %s3820_s18  ;;  %v4179_v6 = vpack.i.bf16 %v6351_v53, %v6350_v59  ;;  %v3433_v11 = vpack.i.bf16 %v4169_v7, %v4166_v15  ;;  %v4196_v59 = vperm.slane %v4159_v60, 6  ;;  %v6367_v53 = vperm.slane %v4159_v60, 3  ;;  %6479 = vst [vmem:[#allocation34_spill] sm:$0xff] %v4206_v12 }
  0x57   : > { %3414 = vrot.lane.b32.xlu0 %v4156_v45, %s3820_s18  ;;  %v4193_v45 = vperm.slane %v4159_v60, 5 }
  0x58   : > { %6474 = vst [vmem:[#allocation29_spill] sm:$0xff] %v4179_v6 }
  0x59   : > { %6476 = vst [vmem:[#allocation31_spill] sm:$0xff] %v4193_v45 }
  0x5a   : > { %6477 = vst [vmem:[#allocation32_spill] sm:$0xff] %v4196_v59 }
  0x5e   : > { %3439 = vrot.lane.b32.xlu2 %v4179_v6, %s3820_s18  ;;  %3434 = vrot.lane.b32.xlu1 %v3433_v11, %s3820_s18  ;;  %v3453_v11 = vpack.i.bf16 %v4196_v59, %v4193_v45  ;;  %v4214_v6 = vpack.i.bf16 %v6366_v26, %v6367_v53  ;;  %v3807_v45 = vld [vmem:[%s3858_s17 + $0x43] ss:$0 sm:$0xff] }
  0x5f   : > { %3429 = vrot.lane.b32.xlu0 %v4187_v32, %s3820_s18  ;;  %v4223_v32 = vperm.slane %v4159_v60, 7 }
  0x60   : > { %6480 = vst [vmem:[#allocation35_spill] sm:$0xff] %v4214_v6 }
  0x61   : > { %v4227_v59 = vpack.i.bf16 %v3807_v45, %v4223_v32 }
  0x63   : > { %6481 = vst [vmem:[#allocation36_spill] sm:$0xff] %v4227_v59 }
  0x66   : > { %3454 = vrot.lane.b32.xlu2 %v3453_v11, %s3820_s18  ;;  %3449 = vrot.lane.b32.xlu1 %v4214_v6, %s3820_s18 }
  0x67   : > { %3444 = vrot.lane.b32.xlu0 %v3443_v54, %s3820_s18 }
  0x6e   : > { %3469 = vrot.lane.b32.xlu2 %v3922_v19, %s3821_s19  ;;  %3464 = vrot.lane.b32.xlu1 %v3892_v10, %s3821_s19 }
  0x6f   : > { %3459 = vrot.lane.b32.xlu0 %v4227_v59, %s3820_s18 }
  0x70   : > { %v4235_v11 = vpop.permute.xlu2 %3314 }
  0x71   : > { %v3317_v45 = vunpack.i.h.bf16 %v4235_v11 }
  0x76   : > { %3484 = vrot.lane.b32.xlu2 %v3882_v8, %s3821_s19  ;;  %3479 = vrot.lane.b32.xlu1 %v3916_v18, %s3821_s19  ;;  %v3316_v18 = vunpack.i.l.bf16 %v4235_v11  ;;  %v6490_v11 = vperm.slane %v4159_v60, 0 }
  0x77   : > { %3474 = vrot.lane.b32.xlu0 %v3886_v9, %s3821_s19  ;;  %v6482_v9 = vperm.slane %v3993_v39, 0 }
  0x78   : > { %v4244_v54 = vpop.permute.xlu2 %3319 }
  0x79   : > { %v6369_v26 = vunpack.i.l.bf16 %v4244_v54  ;;  %v1131_v59 = vsel %vm1122_vm1, %v3867_v2, %v6482_v9 }
  0x7b   : > { %v4250_v53 = vsel %vm355_vm0, %v3317_v45, %v6369_v26  ;;  %v1132_v26 = vsel %vm1122_vm1, %v3870_v3, %v4006_v42  ;;  %v6484_v42 = vperm.slane %v3864_v1, 0 }
  0x7d   : > { %v1123_v3 = vsel %vm1122_vm1, %v6484_v42, %v3932_v21  ;;  %v6486_v42 = vperm.slane %v3925_v20, 4 }
  0x7e   : > { %3499 = vrot.lane.b32.xlu2 %v3952_v28, %s3821_s19  ;;  %3494 = vrot.lane.b32.xlu1 %v3956_v29, %s3821_s19  ;;  %v6483_v29 = vperm.slane %v3861_v0, 2 }
  0x7f   : > { %3489 = vrot.lane.b32.xlu0 %v3910_v17, %s3821_s19  ;;  %v1128_v17 = vsel %vm1122_vm1, %v3876_v5, %v3963_v30 }
  0x80   : > { %v4258_v8 = vpop.permute.xlu2 %3334  ;;  %v1133_v28 = vsel %vm1122_vm1, %v6483_v29, %v4009_v43  ;;  %v1149_v29 = vsel %vm1139_vm2, %v1132_v26, %v4115_v63  ;;  %v1140_v26 = vsel %vm1139_vm2, %v1123_v3, %v4037_v50  ;;  %v6487_v63 = vperm.slane %v3864_v1, 6 }
  0x81   : > { %v1145_v3 = vsel %vm1139_vm2, %v1128_v17, %v4075_v62  ;;  %v364_v17 = vsel %vm355_vm0, %v3316_v18, %v3317_v45 }
  0x82   : > { %v1129_v21 = vsel %vm1122_vm1, %v6487_v63, %v3966_v31 }
  0x86   : > { %3514 = vrot.lane.b32.xlu2 %v3986_v37, %s3821_s19  ;;  %3509 = vrot.lane.b32.xlu1 %v3990_v38, %s3821_s19  ;;  %v1148_v38 = vsel %vm1139_vm2, %v1131_v59, %v4112_v22  ;;  %v1127_v59 = vsel %vm1122_vm1, %v3873_v4, %v6486_v42  ;;  %v4318_v42 = vsel %vm1156_vm3, %v1149_v29, %v4203_v24  ;;  %v6492_v29 = vperm.slane %v4030_v49, 7 }
  0x87   : > { %3504 = vrot.lane.b32.xlu0 %v3946_v27, %s3821_s19  ;;  %v6485_v27 = vperm.slane %v4096_v16, 2  ;;  %v1165_v5 = vsel %vm1156_vm3, %v1148_v38, %v6490_v11  ;;  %v1144_v31 = vsel %vm1139_vm2, %v1127_v59, %v4072_v61 }
  0x88   : > { %v4277_v39 = vpop.permute.xlu2 %3349  ;;  %v4279_v9 = vpop.permute.xlu1 %3304 }
  0x89   : > { %v4289_v43 = vpop.permute.xlu0 %3294  ;;  %v1150_v6 = vsel %vm1139_vm2, %v1133_v28, %v6485_v27  ;;  %v6488_v28 = vperm.slane %v3925_v20, 7  ;;  %v6489_v27 = vperm.slane %v3864_v1, 7  ;;  %v6495_v45 = vunpack.i.h.bf16 %v4277_v39 }
  0x8a   : > { %v4324_v63 = vsel %vm1156_vm3, %v1150_v6, %v4206_v12  ;;  %v6491_v6 = vperm.slane %v4030_v49, 6  ;;  %v3297_v62 = vunpack.i.h.bf16 %v4289_v43  ;;  %v6496_v12 = vunpack.i.l.bf16 %v4277_v39 }
  0x8b   : > { %v1130_v30 = vsel %vm1122_vm1, %v6489_v27, %v6488_v28  ;;  %v4330_v28 = vsel %vm1156_vm3, %v1140_v26, %v4140_v33  ;;  %v6493_v26 = vperm.slane %v3864_v1, 1 }
  0x8c   : > { %v1146_v38 = vsel %vm1139_vm2, %v1129_v21, %v6491_v6  ;;  %v1147_v59 = vsel %vm1139_vm2, %v1130_v30, %v6492_v29  ;;  %v6396_v21 = vunpack.i.h.bf16 %v4279_v9 }
  0x8e   : > { %3529 = vrot.lane.b32.xlu2 %v4021_v47, %s3821_s19  ;;  %3524 = vrot.lane.b32.xlu1 %v4027_v48, %s3821_s19  ;;  %v1124_v47 = vsel %vm1122_vm1, %v6493_v26, %v3973_v34  ;;  %v6494_v26 = vperm.slane %v3861_v0, 3  ;;  %v429_v48 = vsel %vm355_vm0, %v6496_v12, %v6495_v45  ;;  %v6502_v45 = vperm.slane %v3864_v1, 3 }
  0x8f   : > { %3519 = vrot.lane.b32.xlu0 %v3980_v36, %s3821_s19  ;;  %v1162_v36 = vsel %vm1156_vm3, %v1145_v3, %v4166_v15 }
  0x90   : > { %v4351_v11 = vpop.permute.xlu2 %3364  ;;  %v4355_v24 = vpop.permute.xlu1 %3309  ;;  %v1134_v27 = vsel %vm1122_vm1, %v6494_v26, %v4000_v40  ;;  %v4411_v40 = vsel %vm1173_vm4, %v1165_v5, %v364_v17  ;;  %v4428_v5 = vsel %vm1156_vm3, %v1146_v38, %v4169_v7  ;;  %v1141_v17 = vsel %vm1139_vm2, %v1124_v47, %v4040_v51 }
  0x91   : > { %v6392_v30 = vunpack.i.h.bf16 %v4355_v24  ;;  %v6395_v6 = vunpack.i.l.bf16 %v4355_v24  ;;  %v4360_v29 = vpop.permute.xlu0 %3299  ;;  %v6507_v38 = vperm.slane %v4030_v49, 3 }
  0x92   : > { %v6498_v34 = vunpack.i.h.bf16 %v4360_v29 }
  0x93   : > { %v4369_v3 = vsel %vm355_vm0, %v6392_v30, %v3316_v18  ;;  %v361_v15 = vsel %vm355_vm0, %v6396_v21, %v6395_v6  ;;  %v6497_v30 = vunpack.i.l.bf16 %v4279_v9  ;;  %v6499_v6 = vperm.slane %v4128_v14, 4 }
  0x94   : > { %v1179_v18 = vsel %vm1173_vm4, %v1162_v36, %v361_v15  ;;  %v6500_v21 = vperm.slane %v3864_v1, 2  ;;  %v6501_v15 = vperm.slane %v3925_v20, 3  ;;  %v6505_v1 = vperm.slane %v4096_v16, 3 }
  0x95   : > { %v4391_v50 = vsel %vm355_vm0, %v6498_v34, %v6497_v30  ;;  %v4396_v26 = vsel %vm1156_vm3, %v1144_v31, %v6499_v6  ;;  %v6503_v34 = vunpack.i.l.bf16 %v4360_v29  ;;  %v6504_v31 = vperm.slane %v4128_v14, 7 }
  0x96   : > { %v1125_v12 = vsel %vm1122_vm1, %v6500_v21, %v3976_v35  ;;  %v1126_v36 = vsel %vm1122_vm1, %v6502_v45, %v6501_v15  ;;  %3544 = vrot.lane.b32.xlu2 %v4059_v57, %s3821_s19  ;;  %3539 = vrot.lane.b32.xlu1 %v4063_v58, %s3821_s19  ;;  %v1151_v20 = vsel %vm1139_vm2, %v1134_v27, %v6505_v1  ;;  %v3336_v21 = vunpack.i.l.bf16 %v4258_v8 }
  0x97   : > { %v357_v30 = vsel %vm355_vm0, %v3297_v62, %v6503_v34  ;;  %v4416_v6 = vsel %vm1156_vm3, %v1147_v59, %v6504_v31  ;;  %3534 = vrot.lane.b32.xlu0 %v4017_v46, %s3821_s19  ;;  %v4435_v57 = vsel %vm1190_vm5, %v1179_v18, %v429_v48  ;;  %v6400_v58 = vunpack.i.h.bf16 %v4351_v11 }
  0x98   : > { %v6506_v27 = vperm.slane %v4030_v49, 2  ;;  %v1143_v45 = vsel %vm1139_vm2, %v1126_v36, %v6507_v38  ;;  %v4445_v34 = vpop.permute.xlu2 %3379  ;;  %v4447_v47 = vpop.permute.xlu1 %3329  ;;  %v3322_v46 = vunpack.i.h.bf16 %v4244_v54  ;;  %v6508_v31 = vperm.slane %v4159_v60, 3 }
  0x99   : > { %v6398_v48 = vunpack.i.h.bf16 %v4447_v47  ;;  %v4455_v59 = vpop.permute.xlu0 %3324  ;;  %v4461_v36 = vpack.i.bf16 %v4137_v13, %v4072_v61  ;;  %v1158_v38 = vsel %vm1156_vm3, %v1141_v17, %v4134_v44 }
  0x9a   : > { %v1142_v15 = vsel %vm1139_vm2, %v1125_v12, %v6506_v27  ;;  %v1168_v1 = vsel %vm1156_vm3, %v1151_v20, %v6508_v31  ;;  %v6401_v49 = vunpack.i.h.bf16 %v4455_v59  ;;  %v3296_v27 = vunpack.i.l.bf16 %v4289_v43 }
  0x9b   : > { %v4469_v18 = vsel %vm355_vm0, %v6398_v48, %v3336_v21  ;;  %v6509_v20 = vunpack.i.l.bf16 %v4351_v11  ;;  %v1159_v61 = vsel %vm1156_vm3, %v1142_v15, %v4137_v13  ;;  %v6510_v12 = vunpack.i.l.bf16 %v4447_v47 }
  0x9c   : > { %v6511_v17 = vunpack.i.l.bf16 %v4455_v59  ;;  %v6512_v48 = vunpack.i.l.bf16 %v4244_v54  ;;  %v6514_v13 = vperm.slane %v3861_v0, 6  ;;  %v3337_v54 = vunpack.i.h.bf16 %v4258_v8 }
  0x9d   : > { %v435_v31 = vsel %vm355_vm0, %v6509_v20, %v6400_v58  ;;  %v4483_v43 = vsel %vm355_vm0, %v6401_v49, %v6510_v12  ;;  %v6513_v20 = vperm.slane %v4128_v14, 3  ;;  %v4502_v49 = vsel %vm1173_vm4, %v4318_v42, %v4250_v53 }
  0x9e   : > { %v367_v21 = vsel %vm355_vm0, %v3322_v46, %v6511_v17  ;;  %v366_v51 = vsel %vm355_vm0, %v6512_v48, %v3322_v46  ;;  %v1137_v15 = vsel %vm1122_vm1, %v6514_v13, %v4052_v55  ;;  %v6515_v46 = vperm.slane %v3861_v0, 7  ;;  %3559 = vrot.lane.b32.xlu2 %v4461_v36, %s3821_s19  ;;  %3554 = vrot.lane.b32.xlu1 %v4093_v23, %s3821_s19 }
  0x9f   : > { %v1160_v58 = vsel %vm1156_vm3, %v1143_v45, %v6513_v20  ;;  %v1185_v12 = vsel %vm1173_vm4, %v1168_v1, %v367_v21  ;;  %v1135_v45 = vsel %vm1122_vm1, %v3940_v25, %v4003_v41  ;;  %v356_v53 = vsel %vm355_vm0, %v3296_v27, %v3297_v62  ;;  %3549 = vrot.lane.b32.xlu0 %v4056_v56, %s3821_s19 }
  0xa0   : > { %v1138_v14 = vsel %vm1122_vm1, %v6515_v46, %v4043_v52  ;;  %v3381_v8 = vunpack.i.l.bf16 %v4445_v34  ;;  %v4522_v0 = vsel %vm1190_vm5, %v1185_v12, %v435_v31  ;;  %v4524_v48 = vpop.permute.xlu2 %3394  ;;  %v3345_v1 = vpop.permute.xlu1 %3344  ;;  %v3573_v17 = vpack.i.bf16 %v3976_v35, %v3873_v4 }
  0xa1   : > { %v6516_v21 = vunpack.i.h.bf16 %v4279_v9  ;;  %v6517_v62 = vunpack.i.l.bf16 %v4279_v9  ;;  %v6518_v20 = vunpack.i.h.bf16 %v4360_v29  ;;  %v6519_v56 = vunpack.i.l.bf16 %v4360_v29  ;;  %v3340_v46 = vpop.permute.xlu0 %3339 }
  0xa2   : > { %v3347_v13 = vunpack.i.h.bf16 %v3345_v1  ;;  %v3346_v12 = vunpack.i.l.bf16 %v3345_v1  ;;  %v1174_v42 = vsel %vm1173_vm4, %v4330_v28, %v356_v53  ;;  %v1177_v4 = vsel %vm1173_vm4, %v1160_v58, %v4391_v50 }
  0xa3   : > { %v360_v27 = vsel %vm355_vm0, %v6517_v62, %v6516_v21  ;;  %v358_v31 = vsel %vm355_vm0, %v6519_v56, %v6518_v20  ;;  %v3342_v35 = vunpack.i.h.bf16 %v3340_v46  ;;  %v3341_v52 = vunpack.i.l.bf16 %v3340_v46 }
  0xa4   : > { %v1175_v9 = vsel %vm1173_vm4, %v1158_v38, %v357_v30  ;;  %v6520_v21 = vunpack.i.h.bf16 %v4445_v34  ;;  %v6521_v29 = vunpack.i.l.bf16 %v4277_v39  ;;  %v427_v1 = vsel %vm355_vm0, %v3346_v12, %v3347_v13 }
  0xa5   : > { %v1176_v56 = vsel %vm1173_vm4, %v1159_v61, %v358_v31  ;;  %v426_v28 = vsel %vm355_vm0, %v3342_v35, %v3346_v12  ;;  %v424_v50 = vsel %vm355_vm0, %v3337_v54, %v3341_v52  ;;  %v425_v58 = vsel %vm355_vm0, %v3341_v52, %v3342_v35  ;;  %v6522_v31 = vld [vmem:[#allocation19_spill] sm:$0xff] }
  0xa6   : > { %v492_v62 = vsel %vm355_vm0, %v3381_v8, %v6520_v21  ;;  %v428_v20 = vsel %vm355_vm0, %v3347_v13, %v6521_v29  ;;  %v4555_v30 = vsel %vm1190_vm5, %v1176_v56, %v426_v28  ;;  %v4558_v38 = vsel %vm1190_vm5, %v1177_v4, %v427_v1  ;;  %v6523_v13 = vld [vmem:[#allocation7_spill] sm:$0xff]  ;;  %3574 = vrot.lane.b32.xlu2 %v3573_v17, %s3822_s20  ;;  %v6529_v21 = vld [vmem:[#allocation22_spill] sm:$0xff] }
  0xa7   : > { %v1191_v53 = vsel %vm1190_vm5, %v1174_v42, %v424_v50  ;;  %v4562_v8 = vsel %vm1190_vm5, %v1175_v9, %v425_v58  ;;  %v1178_v61 = vsel %vm1173_vm4, %v4396_v26, %v360_v27  ;;  %v1136_v54 = vsel %vm1122_vm1, %v6523_v13, %v6522_v31  ;;  %3569 = vrot.lane.b32.xlu1 %v3922_v19, %s3822_s20  ;;  %v6524_v27 = vld [vmem:[#allocation30_spill] sm:$0xff]  ;;  %v6530_v1 = vld [vmem:[#allocation23_spill] sm:$0xff] }
  0xa8   : > { %v4573_v52 = vsel %vm1207_vm6, %v1191_v53, %v492_v62  ;;  %v1184_v42 = vsel %vm1173_vm4, %v4324_v63, %v366_v51  ;;  %v3397_v12 = vunpack.i.h.bf16 %v4524_v48  ;;  %v3396_v26 = vunpack.i.l.bf16 %v4524_v48  ;;  %3564 = vrot.lane.b32.xlu0 %v6524_v27, %s3821_s19  ;;  %v4597_v29 = vpop.permute.xlu2 %3409 }
  0xa9   : > { %v4582_v46 = vsel %vm1190_vm5, %v1178_v61, %v428_v20  ;;  %v6525_v17 = vunpack.i.h.bf16 %v4355_v24  ;;  %v6526_v19 = vunpack.i.l.bf16 %v4355_v24  ;;  %v6527_v35 = vperm.slane %v4096_v16, 6  ;;  %v3360_v20 = vpop.permute.xlu1 %3359  ;;  %v3355_v50 = vpop.permute.xlu0 %3354 }
  0xaa   : > { %v6528_v63 = vperm.slane %v4096_v16, 7  ;;  %v1152_v62 = vsel %vm1139_vm2, %v1135_v45, %v6529_v21  ;;  %v1153_v56 = vsel %vm1139_vm2, %v1136_v54, %v6530_v1  ;;  %v3362_v24 = vunpack.i.h.bf16 %v3360_v20 }
  0xab   : > { %v362_v4 = vsel %vm355_vm0, %v6526_v19, %v6525_v17  ;;  %v1154_v51 = vsel %vm1139_vm2, %v1137_v15, %v6527_v35  ;;  %v3361_v28 = vunpack.i.l.bf16 %v3360_v20  ;;  %v3357_v58 = vunpack.i.h.bf16 %v3355_v50  ;;  %v6533_v20 = vld [vmem:[#allocation32_spill] sm:$0xff] }
  0xac   : > { %v1155_v9 = vsel %vm1139_vm2, %v1138_v14, %v6528_v63  ;;  %v3356_v53 = vunpack.i.l.bf16 %v3355_v50  ;;  %v1181_v16 = vsel %vm1173_vm4, %v4416_v6, %v4369_v3  ;;  %v1180_v15 = vsel %vm1173_vm4, %v4428_v5, %v362_v4 }
  0xad   : > { %v498_v14 = vsel %vm355_vm0, %v3396_v26, %v3397_v12  ;;  %v6531_v45 = vunpack.i.l.bf16 %v4351_v11  ;;  %v433_v54 = vsel %vm355_vm0, %v3361_v28, %v3362_v24  ;;  %v432_v17 = vsel %vm355_vm0, %v3357_v58, %v3361_v28 }
  0xae   : > { %v6532_v19 = vunpack.i.h.bf16 %v4277_v39  ;;  %v431_v6 = vsel %vm355_vm0, %v3356_v53, %v3357_v58  ;;  %v4629_v63 = vsel %vm1190_vm5, %v4411_v40, %v432_v17  ;;  %v1172_v39 = vsel %vm1156_vm3, %v1155_v9, %v4223_v32  ;;  %3589 = vrot.lane.b32.xlu2 %v4461_v36, %s3822_s20 }
  0xaf   : > { %v434_v61 = vsel %vm355_vm0, %v3362_v24, %v6531_v45  ;;  %v4622_v4 = vsel %vm1190_vm5, %v1181_v16, %v431_v6  ;;  %v1171_v24 = vsel %vm1156_vm3, %v1154_v51, %v6533_v20  ;;  %3584 = vrot.lane.b32.xlu1 %v4093_v23, %s3822_s20  ;;  %v6535_v40 = vunpack.i.l.bf16 %v4447_v47 }
  0xb0   : > { %v430_v3 = vsel %vm355_vm0, %v6532_v19, %v3356_v53  ;;  %v4625_v35 = vsel %vm1190_vm5, %v1184_v42, %v434_v61  ;;  %v6534_v42 = vunpack.i.h.bf16 %v4447_v47  ;;  %v3412_v51 = vunpack.i.h.bf16 %v4597_v29  ;;  %3579 = vrot.lane.b32.xlu0 %v3986_v37, %s3822_s20  ;;  %v6537_v53 = vld [vmem:[#allocation31_spill] sm:$0xff]  ;;  %v4665_v45 = vpop.permute.xlu2 %3424 }
  0xb1   : > { %v1197_v5 = vsel %vm1190_vm5, %v1180_v15, %v430_v3  ;;  %v3411_v58 = vunpack.i.l.bf16 %v4597_v29  ;;  %v4653_v36 = vsel %vm1190_vm5, %v4502_v49, %v433_v54  ;;  %v6536_v23 = vperm.slane %v4159_v60, 4  ;;  %v3375_v37 = vpop.permute.xlu1 %3374  ;;  %v3370_v49 = vpop.permute.xlu0 %3369  ;;  %v6550_v29 = vld [vmem:[#allocation15_spill] sm:$0xff] }
  0xb2   : > { %v4640_v28 = vsel %vm1207_vm6, %v1197_v5, %v498_v14  ;;  %v370_v50 = vsel %vm355_vm0, %v6535_v40, %v6534_v42  ;;  %v1170_v47 = vsel %vm1156_vm3, %v1153_v56, %v6537_v53  ;;  %v6538_v16 = vunpack.i.h.bf16 %v4455_v59 }
  0xb3   : > { %v1169_v9 = vsel %vm1156_vm3, %v1152_v62, %v6536_v23  ;;  %v6539_v15 = vunpack.i.l.bf16 %v4455_v59  ;;  %v3377_v61 = vunpack.i.h.bf16 %v3375_v37  ;;  %v3376_v17 = vunpack.i.l.bf16 %v3375_v37 }
  0xb4   : > { %v4669_v60 = vpack.i.bf16 %v4134_v44, %v4140_v33  ;;  %v1189_v62 = vsel %vm1173_vm4, %v1172_v39, %v4469_v18  ;;  %v1188_v56 = vsel %vm1173_vm4, %v1171_v24, %v370_v50  ;;  %v3372_v54 = vunpack.i.h.bf16 %v3370_v49  ;;  %v6541_v50 = vld [vmem:[#allocation21_spill] sm:$0xff] }
  0xb5   : > { %v368_v14 = vsel %vm355_vm0, %v6539_v15, %v6538_v16  ;;  %v3371_v19 = vunpack.i.l.bf16 %v3370_v49  ;;  %v1187_v59 = vsel %vm1173_vm4, %v1170_v47, %v4483_v43  ;;  %v504_v6 = vsel %vm355_vm0, %v3411_v58, %v3412_v51 }
  0xb6   : > { %v1186_v3 = vsel %vm1173_vm4, %v1169_v9, %v368_v14  ;;  %v439_v33 = vsel %vm355_vm0, %v3376_v17, %v3377_v61  ;;  %v438_v44 = vsel %vm355_vm0, %v3372_v54, %v3376_v17  ;;  %v6540_v18 = vunpack.i.h.bf16 %v4351_v11  ;;  %3604 = vrot.lane.b32.xlu2 %v6541_v50, %s3821_s19 }
  0xb7   : > { %v437_v24 = vsel %vm355_vm0, %v3371_v19, %v3372_v54  ;;  %v4689_v43 = vsel %vm1190_vm5, %v1189_v62, %v439_v33  ;;  %v4692_v39 = vsel %vm1190_vm5, %v1188_v56, %v438_v44  ;;  %3599 = vrot.lane.b32.xlu1 %v4669_v60, %s3821_s19  ;;  %v3427_v23 = vunpack.i.h.bf16 %v4665_v45  ;;  %v6543_v33 = vld [vmem:[#allocation29_spill] sm:$0xff] }
  0xb8   : > { %v436_v5 = vsel %vm355_vm0, %v6540_v18, %v3371_v19  ;;  %v4696_v40 = vsel %vm1190_vm5, %v1187_v59, %v437_v24  ;;  %v3426_v9 = vunpack.i.l.bf16 %v4665_v45  ;;  %3594 = vrot.lane.b32.xlu0 %v6524_v27, %s3822_s20  ;;  %v4709_v47 = vpop.permute.xlu2 %3439  ;;  %v4713_v49 = vpack.i.bf16 %v4169_v7, %v4112_v22 }
  0xb9   : > { %v1203_v42 = vsel %vm1190_vm5, %v1186_v3, %v436_v5  ;;  %v3390_v16 = vpop.permute.xlu1 %3389  ;;  %v3385_v37 = vpop.permute.xlu0 %3384  ;;  %v6542_v19 = vunpack.i.h.bf16 %v4445_v34 }
  0xba   : > { %v4703_v11 = vsel %vm1207_vm6, %v1203_v42, %v504_v6  ;;  %v3392_v15 = vunpack.i.h.bf16 %v3390_v16  ;;  %v3391_v14 = vunpack.i.l.bf16 %v3390_v16  ;;  %v3387_v61 = vunpack.i.h.bf16 %v3385_v37 }
  0xbb   : > { %v3386_v17 = vunpack.i.l.bf16 %v3385_v37  ;;  %v561_v27 = vsel %vm355_vm0, %v3426_v9, %v3427_v23  ;;  %v6545_v37 = vld [vmem:[#allocation6_spill] sm:$0xff] }
  0xbc   : > { %v497_v62 = vsel %vm355_vm0, %v3392_v15, %v3396_v26  ;;  %v496_v56 = vsel %vm355_vm0, %v3391_v14, %v3392_v15  ;;  %v495_v54 = vsel %vm355_vm0, %v3387_v61, %v3391_v14 }
  0xbd   : > { %v493_v7 = vsel %vm355_vm0, %v6542_v19, %v3386_v17  ;;  %v494_v22 = vsel %vm355_vm0, %v3386_v17, %v3387_v61  ;;  %v4731_v26 = vsel %vm1207_vm6, %v4582_v46, %v496_v56  ;;  %v4739_v3 = vsel %vm1207_vm6, %v4558_v38, %v495_v54  ;;  %v6546_v61 = vld [vmem:[#allocation11_spill] sm:$0xff] }
  0xbe   : > { %v4735_v59 = vsel %vm1207_vm6, %v4555_v30, %v494_v22  ;;  %v1209_v6 = vsel %vm1207_vm6, %v4562_v8, %v493_v7  ;;  %v4745_v34 = vsel %vm1207_vm6, %v4435_v57, %v497_v62  ;;  %3619 = vrot.lane.b32.xlu2 %v6543_v33, %s3821_s19  ;;  %v3442_v46 = vunpack.i.h.bf16 %v4709_v47 }
  0xbf   : > { %3614 = vrot.lane.b32.xlu1 %v3892_v10, %s3822_s20  ;;  %v4752_v30 = vsel %vm1224_vm7, %v1209_v6, %v561_v27  ;;  %v3441_v38 = vunpack.i.l.bf16 %v4709_v47  ;;  %v6544_v10 = vld [vmem:[#allocation16_spill] sm:$0xff]  ;;  %v3623_v17 = vpack.i.bf16 %v6546_v61, %v6545_v37  ;;  %v6559_v47 = vld [vmem:[#allocation25_spill] sm:$0xff] }
  0xc0   : > { %3609 = vrot.lane.b32.xlu0 %v4713_v49, %s3821_s19  ;;  %v4758_v8 = vpop.permute.xlu2 %3454  ;;  %v3633_v16 = vpack.i.bf16 %v6544_v10, %v3867_v2 }
  0xc1   : > { %v3405_v57 = vpop.permute.xlu1 %3404  ;;  %v3400_v5 = vpop.permute.xlu0 %3399  ;;  %v567_v62 = vsel %vm355_vm0, %v3441_v38, %v3442_v46 }
  0xc2   : > { %v3407_v44 = vunpack.i.h.bf16 %v3405_v57  ;;  %v3406_v18 = vunpack.i.l.bf16 %v3405_v57  ;;  %v3402_v24 = vunpack.i.h.bf16 %v3400_v5  ;;  %v3401_v42 = vunpack.i.l.bf16 %v3400_v5  ;;  %v6548_v5 = vld [vmem:[#allocation17_spill] sm:$0xff] }
  0xc4   : > { %v503_v15 = vsel %vm355_vm0, %v3407_v44, %v3411_v58  ;;  %v502_v14 = vsel %vm355_vm0, %v3406_v18, %v3407_v44  ;;  %v501_v56 = vsel %vm355_vm0, %v3402_v24, %v3406_v18  ;;  %v499_v27 = vsel %vm355_vm0, %v3397_v12, %v3401_v42  ;;  %v6547_v12 = vld [vmem:[#allocation5_spill] sm:$0xff] }
  0xc5   : > { %v500_v2 = vsel %vm355_vm0, %v3401_v42, %v3402_v24  ;;  %v4778_v58 = vsel %vm1207_vm6, %v4625_v35, %v502_v14  ;;  %v1215_v54 = vsel %vm1207_vm6, %v4622_v4, %v499_v27  ;;  %v4784_v19 = vsel %vm1207_vm6, %v4522_v0, %v503_v15  ;;  %v6549_v24 = vld [vmem:[#allocation10_spill] sm:$0xff] }
  0xc6   : > { %v4788_v7 = vsel %vm1207_vm6, %v4629_v63, %v500_v2  ;;  %v4792_v48 = vsel %vm1207_vm6, %v4653_v36, %v501_v56  ;;  %3634 = vrot.lane.b32.xlu2 %v3633_v16, %s3822_s20  ;;  %v4798_v35 = vsel %vm1224_vm7, %v1215_v54, %v567_v62  ;;  %v3457_v4 = vunpack.i.h.bf16 %v4758_v8 }
  0xc7   : > { %3629 = vrot.lane.b32.xlu1 %v6547_v12, %s3822_s20  ;;  %v3456_v0 = vunpack.i.l.bf16 %v4758_v8  ;;  %v3638_v42 = vpack.i.bf16 %v6549_v24, %v6548_v5 }
  0xc8   : > { %3624 = vrot.lane.b32.xlu0 %v3623_v17, %s3822_s20  ;;  %v4803_v22 = vpop.permute.xlu2 %3469 }
  0xc9   : > { %v3420_v63 = vpop.permute.xlu1 %3419  ;;  %v3415_v57 = vpop.permute.xlu0 %3414  ;;  %v573_v16 = vsel %vm355_vm0, %v3456_v0, %v3457_v4 }
  0xca   : > { %v3422_v6 = vunpack.i.h.bf16 %v3420_v63  ;;  %v3421_v36 = vunpack.i.l.bf16 %v3420_v63  ;;  %v3417_v44 = vunpack.i.h.bf16 %v3415_v57  ;;  %v3416_v18 = vunpack.i.l.bf16 %v3415_v57 }
  0xcc   : > { %v560_v10 = vsel %vm355_vm0, %v3422_v6, %v3426_v9  ;;  %v507_v15 = vsel %vm355_vm0, %v3417_v44, %v3421_v36  ;;  %v505_v14 = vsel %vm355_vm0, %v3412_v51, %v3416_v18  ;;  %v506_v37 = vsel %vm355_vm0, %v3416_v18, %v3417_v44 }
  0xcd   : > { %v4820_v61 = vsel %vm1224_vm7, %v4573_v52, %v560_v10  ;;  %v1222_v17 = vsel %vm1207_vm6, %v4692_v39, %v506_v37  ;;  %v1223_v9 = vsel %vm1207_vm6, %v4689_v43, %v507_v15  ;;  %v1221_v62 = vsel %vm1207_vm6, %v4696_v40, %v505_v14 }
  0xce   : > { %3649 = vrot.lane.b32.xlu2 %v4669_v60, %s3822_s20  ;;  %v4833_v51 = vsel %vm1224_vm7, %v1221_v62, %v573_v16 }
  0xcf   : > { %3644 = vrot.lane.b32.xlu1 %v6550_v29, %s3822_s20  ;;  %6551 = vst [vmem:[#allocation19_spill] sm:$0xff] %v4833_v51 }
  0xd0   : > { %3639 = vrot.lane.b32.xlu0 %v3638_v42, %s3822_s20  ;;  %v4836_v56 = vpop.permute.xlu2 %3484  ;;  %v6558_v42 = vld [vmem:[#allocation28_spill] sm:$0xff] }
  0xd1   : > { %v3435_v52 = vpop.permute.xlu1 %3434  ;;  %v3430_v43 = vpop.permute.xlu0 %3429 }
  0xd2   : > { %v3437_v39 = vunpack.i.h.bf16 %v3435_v52  ;;  %v3436_v27 = vunpack.i.l.bf16 %v3435_v52  ;;  %v3432_v2 = vunpack.i.h.bf16 %v3430_v43  ;;  %v3431_v54 = vunpack.i.l.bf16 %v3430_v43  ;;  %v6562_v43 = vld [vmem:[#allocation9_spill] sm:$0xff] }
  0xd4   : > { %v566_v40 = vsel %vm355_vm0, %v3437_v39, %v3441_v38  ;;  %v565_v60 = vsel %vm355_vm0, %v3436_v27, %v3437_v39  ;;  %v562_v12 = vsel %vm355_vm0, %v3427_v23, %v3431_v54  ;;  %v563_v63 = vsel %vm355_vm0, %v3431_v54, %v3432_v2 }
  0xd5   : > { %v4846_v6 = vsel %vm1224_vm7, %v4640_v28, %v566_v40  ;;  %v564_v36 = vsel %vm355_vm0, %v3432_v2, %v3436_v27  ;;  %v4851_v57 = vsel %vm1224_vm7, %v4735_v59, %v562_v12  ;;  %v4855_v38 = vsel %vm1224_vm7, %v4739_v3, %v563_v63  ;;  %v6561_v27 = vld [vmem:[#allocation3_spill] sm:$0xff]  ;;  %v6563_v63 = vld [vmem:[#allocation4_spill] sm:$0xff] }
  0xd6   : > { %6552 = vst [vmem:[#allocation7_spill] sm:$0xff] %v4851_v57  ;;  %v4859_v45 = vsel %vm1224_vm7, %v4731_v26, %v564_v36  ;;  %3664 = vrot.lane.b32.xlu2 %v6543_v33, %s3822_s20  ;;  %v4867_v28 = vsel %vm1224_vm7, %v4745_v34, %v565_v60  ;;  %v6556_v33 = vld [vmem:[#allocation34_spill] sm:$0xff]  ;;  %v3683_v2 = vpack.i.bf16 %v6562_v43, %v6561_v27  ;;  %v6564_v36 = vld [vmem:[#allocation35_spill] sm:$0xff] }
  0xd7   : > { %6553 = vst [vmem:[#allocation30_spill] sm:$0xff] %v4855_v38  ;;  %3659 = vrot.lane.b32.xlu1 %v4713_v49, %s3822_s20  ;;  %v4875_v24 = vpack.i.bf16 %v6556_v33, %v6529_v21  ;;  %v6557_v49 = vld [vmem:[#allocation20_spill] sm:$0xff] }
  0xd8   : > { %6554 = vst [vmem:[#allocation22_spill] sm:$0xff] %v4859_v45  ;;  %3654 = vrot.lane.b32.xlu0 %v6541_v50, %s3822_s20  ;;  %v4871_v59 = vpop.permute.xlu2 %3499  ;;  %v3668_v10 = vpack.i.bf16 %v6558_v42, %v6557_v49 }
  0xd9   : > { %6555 = vst [vmem:[#allocation23_spill] sm:$0xff] %v4867_v28  ;;  %v3450_v23 = vpop.permute.xlu1 %3449  ;;  %v3445_v26 = vpop.permute.xlu0 %3444 }
  0xda   : > { %v3452_v3 = vunpack.i.h.bf16 %v3450_v23  ;;  %v3451_v44 = vunpack.i.l.bf16 %v3450_v23  ;;  %v3447_v18 = vunpack.i.h.bf16 %v3445_v26  ;;  %v3446_v5 = vunpack.i.l.bf16 %v3445_v26 }
  0xdb   : > { %v3486_v23 = vunpack.i.l.bf16 %v4836_v56  ;;  %v3708_v26 = vpack.i.bf16 %v6558_v42, %v4003_v41 }
  0xdc   : > { %v571_v34 = vsel %vm355_vm0, %v3451_v44, %v3452_v3  ;;  %v572_v16 = vsel %vm355_vm0, %v3452_v3, %v3456_v0  ;;  %v570_v50 = vsel %vm355_vm0, %v3447_v18, %v3451_v44  ;;  %v568_v14 = vsel %vm355_vm0, %v3442_v46, %v3446_v5 }
  0xdd   : > { %v4884_v15 = vsel %vm1224_vm7, %v4784_v19, %v571_v34  ;;  %v569_v21 = vsel %vm355_vm0, %v3446_v5, %v3447_v18  ;;  %v4892_v37 = vsel %vm1224_vm7, %v4778_v58, %v570_v50  ;;  %v4896_v62 = vsel %vm1224_vm7, %v4788_v7, %v568_v14  ;;  %v6565_v18 = vld [vmem:[#allocation14_spill] sm:$0xff]  ;;  %v6566_v5 = vld [vmem:[#allocation12_spill] sm:$0xff] }
  0xde   : > { %v4900_v0 = vsel %vm1224_vm7, %v4792_v48, %v569_v21  ;;  %3679 = vrot.lane.b32.xlu2 %v4875_v24, %s3821_s19  ;;  %v4908_v46 = vsel %vm1224_vm7, %v4703_v11, %v572_v16  ;;  %v6403_v58 = vunpack.i.l.bf16 %v4803_v22  ;;  %v3703_v33 = vpack.i.bf16 %v6566_v5, %v6565_v18 }
  0xdf   : > { %3674 = vrot.lane.b32.xlu1 %v6559_v47, %s3821_s19  ;;  %6560 = vst [vmem:[#allocation32_spill] sm:$0xff] %v4908_v46  ;;  %v3698_v34 = vpack.i.bf16 %v6557_v49, %v3940_v25  ;;  %v6409_v50 = vunpack.i.l.bf16 %v4871_v59  ;;  %v3487_v14 = vunpack.i.h.bf16 %v4836_v56 }
  0xe0   : > { %3669 = vrot.lane.b32.xlu0 %v3668_v10, %s3821_s19  ;;  %v4912_v19 = vpop.permute.xlu2 %3514 }
  0xe1   : > { %v4914_v7 = vpop.permute.xlu1 %3464  ;;  %v3460_v29 = vpop.permute.xlu0 %3459 }
  0xe2   : > { %v3467_v48 = vunpack.i.h.bf16 %v4914_v7  ;;  %v3462_v52 = vunpack.i.h.bf16 %v3460_v29  ;;  %v3461_v39 = vunpack.i.l.bf16 %v3460_v29  ;;  %v3466_v18 = vunpack.i.l.bf16 %v4914_v7 }
  0xe4   : > { %v628_v11 = vsel %vm626_vm8, %v3467_v48, %v6403_v58  ;;  %v574_v54 = vsel %vm355_vm0, %v3457_v4, %v3461_v39  ;;  %v575_v40 = vsel %vm355_vm0, %v3461_v39, %v3462_v52 }
  0xe5   : > { %v4929_v60 = vsel %vm1224_vm7, %v1222_v17, %v574_v54  ;;  %v4932_v12 = vsel %vm1224_vm7, %v1223_v9, %v575_v40 }
  0xe6   : > { %3694 = vrot.lane.b32.xlu2 %v6563_v63, %s3822_s20 }
  0xe7   : > { %3689 = vrot.lane.b32.xlu1 %v6564_v36, %s3821_s19 }
  0xe8   : > { %3684 = vrot.lane.b32.xlu0 %v3683_v2, %s3822_s20  ;;  %v4940_v8 = vpop.permute.xlu2 %3529 }
  0xe9   : > { %v4942_v4 = vpop.permute.xlu1 %3479  ;;  %v4946_v9 = vpop.permute.xlu0 %3474  ;;  %v6404_v41 = vunpack.i.h.bf16 %v4940_v8  ;;  %v3531_v42 = vunpack.i.l.bf16 %v4940_v8 }
  0xea   : > { %v3482_v17 = vunpack.i.h.bf16 %v4942_v4  ;;  %v6411_v3 = vunpack.i.l.bf16 %v4942_v4  ;;  %v6410_v44 = vunpack.i.h.bf16 %v4946_v9  ;;  %v6573_v7 = vunpack.i.l.bf16 %v4942_v4 }
  0xeb   : > { %v702_v39 = vsel %vm626_vm8, %v3531_v42, %v6404_v41 }
  0xec   : > { %v4956_v10 = vsel %vm626_vm8, %v3482_v17, %v3486_v23  ;;  %v4965_v16 = vsel %vm626_vm8, %v6410_v44, %v6411_v3  ;;  %v627_v44 = vsel %vm626_vm8, %v3466_v18, %v3467_v48  ;;  %v635_v48 = vsel %vm626_vm8, %v3486_v23, %v3487_v14 }
  0xed   : > { %v6574_v23 = vunpack.i.h.bf16 %v4946_v9 }
  0xee   : > { %3709 = vrot.lane.b32.xlu2 %v3708_v26, %s3822_s20 }
  0xef   : > { %3704 = vrot.lane.b32.xlu1 %v3703_v33, %s3822_s20 }
  0xf0   : > { %3699 = vrot.lane.b32.xlu0 %v3698_v34, %s3822_s20  ;;  %v4973_v25 = vpop.permute.xlu2 %3544  ;;  %v3502_v34 = vunpack.i.h.bf16 %v4871_v59 }
  0xf1   : > { %v4975_v49 = vpop.permute.xlu1 %3494  ;;  %v4980_v52 = vpop.permute.xlu0 %3489  ;;  %v3547_v63 = vunpack.i.h.bf16 %v4973_v25  ;;  %v6412_v26 = vunpack.i.l.bf16 %v4973_v25 }
  0xf2   : > { %v6408_v21 = vunpack.i.h.bf16 %v4975_v49  ;;  %v6407_v29 = vunpack.i.l.bf16 %v4975_v49  ;;  %v6406_v27 = vunpack.i.h.bf16 %v4980_v52  ;;  %v6405_v43 = vunpack.i.l.bf16 %v4980_v52 }
  0xf4   : > { %v4992_v56 = vsel %vm626_vm8, %v6408_v21, %v6409_v50  ;;  %v4999_v2 = vsel %vm626_vm8, %v6406_v27, %v6407_v29  ;;  %v636_v54 = vsel %vm626_vm8, %v3487_v14, %v6405_v43  ;;  %v6568_v29 = vld [vmem:[#allocation24_spill] sm:$0xff]  ;;  %v6569_v21 = vld [vmem:[#allocation33_spill] sm:$0xff]  ;;  %v6575_v14 = vunpack.i.l.bf16 %v4946_v9 }
  0xf5   : > { %v5005_v40 = vsel %vm1122_vm1, %v636_v54, %v702_v39  ;;  %v3728_v50 = vpack.i.bf16 %v6569_v21, %v6568_v29 }
  0xf6   : > { %3724 = vrot.lane.b32.xlu2 %v6564_v36, %s3822_s20  ;;  %v6567_v36 = vld [vmem:[#allocation26_spill] sm:$0xff] }
  0xf7   : > { %3719 = vrot.lane.b32.xlu1 %v4875_v24, %s3822_s20  ;;  %v3738_v41 = vpack.i.bf16 %v6533_v20, %v6567_v36  ;;  %v708_v24 = vsel %vm626_vm8, %v6412_v26, %v3547_v63 }
  0xf8   : > { %3714 = vrot.lane.b32.xlu0 %v6559_v47, %s3822_s20  ;;  %v5016_v5 = vpop.permute.xlu2 %3559 }
  0xf9   : > { %v5018_v33 = vpop.permute.xlu1 %3509  ;;  %v3505_v58 = vpop.permute.xlu0 %3504 }
  0xfa   : > { %v6413_v39 = vunpack.i.h.bf16 %v5018_v33  ;;  %v3511_v54 = vunpack.i.l.bf16 %v5018_v33  ;;  %v3507_v47 = vunpack.i.h.bf16 %v3505_v58  ;;  %v3506_v43 = vunpack.i.l.bf16 %v3505_v58 }
  0xfc   : > { %v694_v27 = vsel %vm626_vm8, %v3511_v54, %v6413_v39  ;;  %v693_v36 = vsel %vm626_vm8, %v3507_v47, %v3511_v54  ;;  %v642_v63 = vsel %vm626_vm8, %v3502_v34, %v3506_v43  ;;  %v6570_v39 = vld [vmem:[#allocation27_spill] sm:$0xff] }
  0xfd   : > { %v5037_v3 = vsel %vm1122_vm1, %v628_v11, %v694_v27  ;;  %v5042_v58 = vsel %vm1122_vm1, %v627_v44, %v693_v36  ;;  %v5045_v26 = vsel %vm1122_vm1, %v642_v63, %v708_v24  ;;  %v6572_v36 = vld [vmem:[#allocation13_spill] sm:$0xff]  ;;  %v631_v44 = vsel %vm626_vm8, %v6575_v14, %v6574_v23 }
  0xfe   : > { %3739 = vrot.lane.b32.xlu2 %v3738_v41, %s3821_s19  ;;  %v6571_v41 = vld [vmem:[#allocation2_spill] sm:$0xff] }
  0xff   : > { %3734 = vrot.lane.b32.xlu1 %v6570_v39, %s3821_s19  ;;  %v3743_v63 = vpack.i.bf16 %v6572_v36, %v6571_v41 }
 0x100   : > { %3729 = vrot.lane.b32.xlu0 %v3728_v50, %s3821_s19  ;;  %v5053_v11 = vpop.permute.xlu2 %3574  ;;  %v633_v50 = vsel %vm626_vm8, %v6573_v7, %v3482_v17  ;;  %v6576_v17 = vunpack.i.h.bf16 %v4912_v19 }
 0x101   : > { %v3525_v27 = vpop.permute.xlu1 %3524  ;;  %v3520_v54 = vpop.permute.xlu0 %3519 }
 0x102   : > { %v3527_v43 = vunpack.i.h.bf16 %v3525_v27  ;;  %v3526_v18 = vunpack.i.l.bf16 %v3525_v27  ;;  %v3522_v24 = vunpack.i.h.bf16 %v3520_v54  ;;  %v3521_v47 = vunpack.i.l.bf16 %v3520_v54 }
 0x104   : > { %v701_v27 = vsel %vm626_vm8, %v3527_v43, %v3531_v42  ;;  %v700_v51 = vsel %vm626_vm8, %v3526_v18, %v3527_v43  ;;  %v699_v4 = vsel %vm626_vm8, %v3522_v24, %v3526_v18  ;;  %v697_v7 = vsel %vm626_vm8, %v6576_v17, %v3521_v47 }
 0x105   : > { %v5071_v54 = vsel %vm1122_vm1, %v635_v48, %v701_v27  ;;  %v5075_v41 = vsel %vm1122_vm1, %v4956_v10, %v700_v51  ;;  %v5082_v36 = vsel %vm1122_vm1, %v633_v50, %v699_v4  ;;  %v698_v42 = vsel %vm626_vm8, %v3521_v47, %v3522_v24  ;;  %v6577_v10 = vld [vmem:[#allocation8_spill] sm:$0xff] }
 0x106   : > { %v5086_v43 = vsel %vm1122_vm1, %v631_v44, %v697_v7  ;;  %v5090_v51 = vsel %vm1122_vm1, %v4965_v16, %v698_v42  ;;  %3754 = vrot.lane.b32.xlu2 %v6577_v10, %s3822_s20  ;;  %v6578_v48 = vld [vmem:[#allocation36_spill] sm:$0xff]  ;;  %v6579_v24 = vunpack.i.l.bf16 %v4871_v59  ;;  %v3808_v16 = vld [vmem:[%s3858_s17 + $0x21] ss:$0 sm:$0xff]  ;;  %v6582_v59 = vunpack.i.l.bf16 %v4975_v49 }
 0x107   : > { %3749 = vrot.lane.b32.xlu1 %v6578_v48, %s3821_s19  ;;  %v3768_v27 = vpack.i.bf16 %v6569_v21, %v3808_v16  ;;  %v6580_v7 = vld [vmem:[#allocation18_spill] sm:$0xff]  ;;  %v3809_v10 = vld [vmem:[%s3858_s17 + $0x10] ss:$0 sm:$0xff]  ;;  %v6581_v48 = vunpack.i.h.bf16 %v4975_v49 }
 0x108   : > { %3744 = vrot.lane.b32.xlu0 %v3743_v63, %s3822_s20  ;;  %v5097_v18 = vpop.permute.xlu2 %3589  ;;  %v641_v44 = vsel %vm626_vm8, %v6579_v24, %v3502_v34  ;;  %v3763_v42 = vpack.i.bf16 %v6580_v7, %v4052_v55  ;;  %v3758_v63 = vpack.i.bf16 %v6568_v29, %v3809_v10  ;;  %v6584_v24 = vunpack.i.l.bf16 %v4980_v52 }
 0x109   : > { %v3540_v50 = vpop.permute.xlu1 %3539  ;;  %v3535_v14 = vpop.permute.xlu0 %3534  ;;  %v639_v34 = vsel %vm626_vm8, %v6582_v59, %v6581_v48  ;;  %v3811_v59 = vld [vmem:[%s3858_s17 + $0x32] ss:$0 sm:$0xff] }
 0x10a   : > { %v3542_v47 = vunpack.i.h.bf16 %v3540_v50  ;;  %v3541_v23 = vunpack.i.l.bf16 %v3540_v50  ;;  %v3537_v4 = vunpack.i.h.bf16 %v3535_v14  ;;  %v3536_v17 = vunpack.i.l.bf16 %v3535_v14 }
 0x10b   : > { %v6583_v50 = vunpack.i.h.bf16 %v4980_v52  ;;  %v6585_v14 = vunpack.i.l.bf16 %v4973_v25  ;;  %v6587_v52 = vunpack.i.h.bf16 %v4940_v8 }
 0x10c   : > { %v706_v55 = vsel %vm626_vm8, %v3541_v23, %v3542_v47  ;;  %v705_v7 = vsel %vm626_vm8, %v3537_v4, %v3541_v23  ;;  %v704_v48 = vsel %vm626_vm8, %v3536_v17, %v3537_v4  ;;  %v3810_v4 = vld [vmem:[%s3858_s17 + $0x43] ss:$0 sm:$0xff] }
 0x10d   : > { %v637_v21 = vsel %vm626_vm8, %v6584_v24, %v6583_v50  ;;  %v707_v16 = vsel %vm626_vm8, %v3542_v47, %v6585_v14  ;;  %v5127_v49 = vsel %vm1122_vm1, %v4992_v56, %v706_v55  ;;  %v703_v10 = vsel %vm626_vm8, %v6587_v52, %v3536_v17 }
 0x10e   : > { %v5123_v29 = vsel %vm1122_vm1, %v641_v44, %v707_v16  ;;  %6586 = vst [vmem:[#allocation31_spill] sm:$0xff] %v5127_v49  ;;  %v5134_v25 = vsel %vm1122_vm1, %v639_v34, %v705_v7  ;;  %v5138_v47 = vsel %vm1122_vm1, %v637_v21, %v703_v10  ;;  %v5142_v44 = vsel %vm1122_vm1, %v4999_v2, %v704_v48 }
 0x10f   : > { %3769 = vrot.lane.b32.xlu2 %v3768_v27, %s3822_s20  ;;  %3764 = vrot.lane.b32.xlu1 %v3763_v42, %s3822_s20  ;;  %v3783_v17 = vpack.i.bf16 %v3810_v4, %v4223_v32  ;;  %v3778_v34 = vpack.i.bf16 %v6533_v20, %v3811_v59  ;;  %v3793_v32 = vpack.i.bf16 %v6522_v31, %v6523_v13  ;;  %v3516_v20 = vunpack.i.l.bf16 %v4912_v19 }
 0x110   : > { %3759 = vrot.lane.b32.xlu0 %v3758_v63, %s3822_s20  ;;  %v5147_v8 = vpop.permute.xlu2 %3604  ;;  %v3798_v63 = vpack.i.bf16 %v6537_v53, %v6530_v1  ;;  %v3472_v50 = vunpack.i.h.bf16 %v4803_v22  ;;  %v6415_v24 = vunpack.i.l.bf16 %v5016_v5  ;;  %v6588_v31 = vunpack.i.h.bf16 %v4912_v19 }
 0x111   : > { %v5149_v56 = vpop.permute.xlu1 %3554  ;;  %v5151_v23 = vpop.permute.xlu0 %3549  ;;  %v6589_v1 = vunpack.i.l.bf16 %v4946_v9  ;;  %v6425_v55 = vunpack.i.h.bf16 %v5016_v5  ;;  %v6590_v7 = vunpack.i.h.bf16 %v5018_v33  ;;  %v6417_v10 = vunpack.i.l.bf16 %v5053_v11 }
 0x112   : > { %v3556_v21 = vunpack.i.l.bf16 %v5149_v56  ;;  %v696_v13 = vsel %vm626_vm8, %v3516_v20, %v6588_v31  ;;  %v6591_v9 = vunpack.i.l.bf16 %v4803_v22 }
 0x113   : > { %v630_v53 = vsel %vm626_vm8, %v3472_v50, %v6589_v1  ;;  %v695_v52 = vsel %vm626_vm8, %v6590_v7, %v3516_v20  ;;  %v6423_v1 = vunpack.i.h.bf16 %v5053_v11  ;;  %v6418_v7 = vunpack.i.l.bf16 %v5097_v18 }
 0x114   : > { %v1244_v31 = vsel %vm1122_vm1, %v630_v53, %v696_v13 }
 0x117   : > { %3784 = vrot.lane.b32.xlu2 %v3783_v17, %s3822_s20  ;;  %3779 = vrot.lane.b32.xlu1 %v3778_v34, %s3822_s20  ;;  %v629_v17 = vsel %vm626_vm8, %v6591_v9, %v3472_v50 }
 0x118   : > { %3774 = vrot.lane.b32.xlu0 %v6570_v39, %s3822_s20  ;;  %v5161_v2 = vpop.permute.xlu2 %3619  ;;  %v3557_v39 = vunpack.i.h.bf16 %v5149_v56 }
 0x119   : > { %v5163_v27 = vpop.permute.xlu1 %3569 }
 0x11a   : > { %v5165_v42 = vpop.permute.xlu0 %3564  ;;  %v3572_v48 = vunpack.i.h.bf16 %v5163_v27  ;;  %v6424_v19 = vunpack.i.l.bf16 %v5163_v27  ;;  %v762_v59 = vsel %vm626_vm8, %v3557_v39, %v6415_v24  ;;  %v761_v33 = vsel %vm626_vm8, %v3556_v21, %v3557_v39 }
 0x11b   : > { %v6416_v14 = vunpack.i.h.bf16 %v5165_v42  ;;  %v3566_v16 = vunpack.i.l.bf16 %v5165_v42  ;;  %v1243_v39 = vsel %vm1122_vm1, %v629_v17, %v695_v52  ;;  %v1260_v24 = vsel %vm1139_vm2, %v1244_v31, %v762_v59 }
 0x11c   : > { %v1259_v9 = vsel %vm1139_vm2, %v1243_v39, %v761_v33 }
 0x11d   : > { %v828_v22 = vsel %vm626_vm8, %v3566_v16, %v6416_v14  ;;  %v894_v14 = vsel %vm891_vm9, %v6424_v19, %v3572_v48 }
 0x11e   : > { %v1276_v53 = vsel %vm1156_vm3, %v1260_v24, %v828_v22 }
 0x11f   : > { %3799 = vrot.lane.b32.xlu2 %v3798_v63, %s3822_s20  ;;  %3794 = vrot.lane.b32.xlu1 %v3793_v32, %s3822_s20  ;;  %v827_v32 = vsel %vm626_vm8, %v6425_v55, %v3566_v16  ;;  %v895_v16 = vsel %vm891_vm9, %v3572_v48, %v6417_v10 }
 0x120   : > { %3789 = vrot.lane.b32.xlu0 %v3798_v63, %s3821_s19  ;;  %v5205_v34 = vpop.permute.xlu2 %3634  ;;  %v1275_v13 = vsel %vm1156_vm3, %v1259_v9, %v827_v32  ;;  %v1292_v48 = vsel %vm1173_vm4, %v1276_v53, %v895_v16 }
 0x121   : > { %v5194_v4 = vpop.permute.xlu1 %3584  ;;  %v1291_v39 = vsel %vm1173_vm4, %v1275_v13, %v894_v14 }
 0x122   : > { %v5207_v63 = vpop.permute.xlu0 %3579  ;;  %v3587_v52 = vunpack.i.h.bf16 %v5194_v4  ;;  %v6422_v17 = vunpack.i.l.bf16 %v5194_v4 }
 0x123   : > { %v6420_v20 = vunpack.i.h.bf16 %v5207_v63  ;;  %v3581_v50 = vunpack.i.l.bf16 %v5207_v63 }
 0x124   : > { %v1027_v24 = vsel %vm891_vm9, %v3587_v52, %v6418_v7  ;;  %v1026_v32 = vsel %vm891_vm9, %v6422_v17, %v3587_v52 }
 0x125   : > { %v960_v59 = vsel %vm891_vm9, %v6423_v1, %v3581_v50  ;;  %v961_v33 = vsel %vm891_vm9, %v3581_v50, %v6420_v20  ;;  %v6421_v50 = vunpack.i.h.bf16 %v5097_v18 }
 0x126   : > { %v1307_v9 = vsel %vm1190_vm5, %v1291_v39, %v960_v59  ;;  %v1308_v10 = vsel %vm1190_vm5, %v1292_v48, %v961_v33 }
 0x127   : > { %v1323_v52 = vsel %vm1207_vm6, %v1307_v9, %v1026_v32  ;;  %v1324_v33 = vsel %vm1207_vm6, %v1308_v10, %v1027_v24  ;;  %v3552_v10 = vunpack.i.h.bf16 %v5151_v23  ;;  %v3551_v24 = vunpack.i.l.bf16 %v5151_v23 }
 0x128   : > { %v5254_v13 = vpop.permute.xlu2 %3649 }
 0x129   : > { %v3600_v31 = vpop.permute.xlu1 %3599  ;;  %v760_v7 = vsel %vm626_vm8, %v3552_v10, %v3556_v21  ;;  %v3651_v21 = vunpack.i.l.bf16 %v5254_v13 }
 0x12a   : > { %v5247_v22 = vpop.permute.xlu0 %3594  ;;  %v3602_v20 = vunpack.i.h.bf16 %v3600_v31  ;;  %v1258_v46 = vsel %vm1139_vm2, %v5037_v3, %v760_v7 }
 0x12b   : > { %v6419_v14 = vunpack.i.h.bf16 %v5247_v22  ;;  %v3596_v16 = vunpack.i.l.bf16 %v5247_v22 }
 0x12d   : > { %v1092_v53 = vsel %vm891_vm9, %v6421_v50, %v3596_v16  ;;  %v1093_v59 = vsel %vm891_vm9, %v3596_v16, %v6419_v14  ;;  %v759_v14 = vsel %vm626_vm8, %v3551_v24, %v3552_v10  ;;  %v3601_v50 = vunpack.i.l.bf16 %v3600_v31 }
 0x12e   : > { %v5265_v39 = vsel %vm1224_vm7, %v1323_v52, %v1092_v53  ;;  %v5268_v48 = vsel %vm1224_vm7, %v1324_v33, %v1093_v59  ;;  %v3607_v52 = vunpack.i.h.bf16 %v5147_v8  ;;  %v6427_v59 = vunpack.i.l.bf16 %v5147_v8 }
 0x12f   : > { %1418 = vmatpush.msra.mxu2 %v5265_v39  ;;  %1438 = vmatpush.msra.mxu3 %v5268_v48  ;;  %v1257_v56 = vsel %vm1139_vm2, %v5042_v58, %v759_v14  ;;  %v6592_v31 = vunpack.i.h.bf16 %v5016_v5  ;;  %v825_v24 = vsel %vm626_vm8, %v3601_v50, %v3602_v20  ;;  %v6593_v58 = vunpack.i.l.bf16 %v5163_v27 }
 0x130   : > { %v5276_v16 = vpop.permute.xlu2 %3664  ;;  %v765_v23 = vsel %vm626_vm8, %v6427_v59, %v3607_v52  ;;  %v3621_v59 = vunpack.i.l.bf16 %v5161_v2  ;;  %v3637_v10 = vunpack.i.h.bf16 %v5205_v34 }
 0x131   : > { %1419 = vmatpush.msra.mxu2 %v4851_v57  ;;  %1439 = vmatpush.msra.mxu3 %v4855_v38  ;;  %v3615_v32 = vpop.permute.xlu1 %3614  ;;  %v3652_v38 = vunpack.i.h.bf16 %v5254_v13 }
 0x132   : > { %v5274_v9 = vpop.permute.xlu0 %3609  ;;  %v3617_v17 = vunpack.i.h.bf16 %v3615_v32  ;;  %v3616_v1 = vunpack.i.l.bf16 %v3615_v32  ;;  %v826_v32 = vsel %vm626_vm8, %v3602_v20, %v6592_v31  ;;  %v6594_v20 = vunpack.i.h.bf16 %v5053_v11 }
 0x133   : > { %v1274_v27 = vsel %vm1156_vm3, %v1258_v46, %v826_v32  ;;  %v6597_v46 = vunpack.i.h.bf16 %v5097_v18 }
 0x134   : > { %v892_v3 = vsel %vm891_vm9, %v3616_v1, %v3617_v17  ;;  %v893_v7 = vsel %vm891_vm9, %v3617_v17, %v6593_v58  ;;  %v1273_v1 = vsel %vm1156_vm3, %v1257_v56, %v825_v24  ;;  %v3612_v17 = vunpack.i.h.bf16 %v5274_v9 }
 0x135   : > { %v1090_v58 = vsel %vm891_vm9, %v3651_v21, %v3652_v38  ;;  %v1289_v31 = vsel %vm1173_vm4, %v1273_v1, %v892_v3  ;;  %v1290_v49 = vsel %vm1173_vm4, %v1274_v27, %v893_v7  ;;  %v6596_v1 = vunpack.i.l.bf16 %v5194_v4 }
 0x138   : > { %v5308_v14 = vpop.permute.xlu2 %3679 }
 0x139   : > { %v5280_v53 = vpop.permute.xlu1 %3629 }
 0x13a   : > { %v3625_v33 = vpop.permute.xlu0 %3624  ;;  %v3632_v56 = vunpack.i.h.bf16 %v5280_v53 }
 0x13b   : > { %v3627_v19 = vunpack.i.h.bf16 %v3625_v33  ;;  %v3626_v55 = vunpack.i.l.bf16 %v3625_v33 }
 0x13d   : > { %v959_v50 = vsel %vm891_vm9, %v3627_v19, %v6594_v20  ;;  %v958_v33 = vsel %vm891_vm9, %v3626_v55, %v3627_v19  ;;  %v6595_v20 = vunpack.i.l.bf16 %v5274_v9 }
 0x13e   : > { %v1305_v32 = vsel %vm1190_vm5, %v1289_v31, %v958_v33  ;;  %v1306_v24 = vsel %vm1190_vm5, %v1290_v49, %v959_v50  ;;  %v1091_v33 = vsel %vm891_vm9, %v3652_v38, %v6597_v46  ;;  %v6598_v31 = vunpack.i.h.bf16 %v5161_v2 }
 0x13f   : > { %v766_v55 = vsel %vm626_vm8, %v3607_v52, %v6595_v20  ;;  %v831_v38 = vsel %vm626_vm8, %v3612_v17, %v3621_v59  ;;  %v6599_v46 = vunpack.i.l.bf16 %v5205_v34 }
 0x140   : > { %v832_v50 = vsel %vm626_vm8, %v3621_v59, %v6598_v31 }
 0x141   : > { %v5316_v57 = vpop.permute.xlu1 %3644 }
 0x142   : > { %v5321_v13 = vpop.permute.xlu0 %3639  ;;  %v6432_v21 = vunpack.i.h.bf16 %v5316_v57  ;;  %v3646_v3 = vunpack.i.l.bf16 %v5316_v57 }
 0x143   : > { %v3641_v19 = vunpack.i.l.bf16 %v5321_v13  ;;  %v6437_v27 = vunpack.i.h.bf16 %v5321_v13 }
 0x145   : > { %v1024_v7 = vsel %vm891_vm9, %v3637_v10, %v3641_v19  ;;  %v1025_v52 = vsel %vm891_vm9, %v3641_v19, %v6596_v1  ;;  %v1264_v10 = vsel %vm1139_vm2, %v5075_v41, %v766_v55  ;;  %v1263_v41 = vsel %vm1139_vm2, %v5082_v36, %v765_v23 }
 0x146   : > { %v1321_v20 = vsel %vm1207_vm6, %v1305_v32, %v1024_v7  ;;  %v1322_v49 = vsel %vm1207_vm6, %v1306_v24, %v1025_v52  ;;  %v6434_v32 = vunpack.i.h.bf16 %v5276_v16  ;;  %v3666_v7 = vunpack.i.l.bf16 %v5276_v16 }
 0x147   : > { %v5352_v4 = vsel %vm1224_vm7, %v1321_v20, %v1090_v58  ;;  %v5355_v19 = vsel %vm1224_vm7, %v1322_v49, %v1091_v33  ;;  %v899_v24 = vsel %vm891_vm9, %v3632_v56, %v6599_v46  ;;  %v6600_v58 = vunpack.i.l.bf16 %v5280_v53  ;;  %v5378_v20 = vpop.permute.xlu2 %3694 }
 0x148   : > { %1378 = vmatpush.msra.mxu0 %v5352_v4  ;;  %1398 = vmatpush.msra.mxu1 %v5355_v19  ;;  %v965_v1 = vsel %vm891_vm9, %v3646_v3, %v6432_v21  ;;  %v1280_v52 = vsel %vm1156_vm3, %v1264_v10, %v832_v50  ;;  %v964_v33 = vsel %vm891_vm9, %v6437_v27, %v3646_v3 }
 0x149   : > { %v898_v55 = vsel %vm891_vm9, %v6600_v58, %v3632_v56  ;;  %v5375_v59 = vpop.permute.xlu1 %3659  ;;  %v1279_v56 = vsel %vm1156_vm3, %v1263_v41, %v831_v38  ;;  %v1296_v31 = vsel %vm1173_vm4, %v1280_v52, %v899_v24  ;;  %v1097_v58 = vsel %vm891_vm9, %v3666_v7, %v6434_v32 }
 0x14a   : > { %v6436_v36 = vunpack.i.h.bf16 %v5375_v59  ;;  %v6433_v23 = vunpack.i.l.bf16 %v5375_v59  ;;  %v5385_v49 = vpop.permute.xlu0 %3654  ;;  %1379 = vmatpush.msra.mxu0 %v4820_v61  ;;  %1399 = vmatpush.msra.mxu1 %v4752_v30  ;;  %v1295_v3 = vsel %vm1173_vm4, %v1279_v56, %v898_v55  ;;  %v1312_v21 = vsel %vm1190_vm5, %v1296_v31, %v965_v1  ;;  %v5411_v55 = vld [vmem:[%s6314_s1] sm:$0xff] }
 0x14b   : > { %v3657_v50 = vunpack.i.h.bf16 %v5385_v49  ;;  %v6435_v10 = vunpack.i.l.bf16 %v5385_v49  ;;  %v1311_v41 = vsel %vm1190_vm5, %v1295_v3, %v964_v33  ;;  %3212 = vmatmul.msk.f32.vlgmr.msra.gmra.mxu2 %vm1360_vm10, %v5411_v55  ;;  %3213 = vmatmul.msk.f32.vlgmr.msra.gmra.mxu3 %vm1360_vm10, %v5411_v55 }
 0x14c   : > { %v1096_v46 = vsel %vm891_vm9, %v6436_v36, %v3666_v7  ;;  %3210 = vmatmul.msk.f32.vlgmr.msra.gmra.mxu0 %vm1360_vm10, %v5411_v55  ;;  %3211 = vmatmul.msk.f32.vlgmr.msra.gmra.mxu1 %vm1360_vm10, %v5411_v55 }
 0x14d   : > { %v1031_v38 = vsel %vm891_vm9, %v3657_v50, %v6433_v23  ;;  %v1030_v24 = vsel %vm891_vm9, %v6435_v10, %v3657_v50  ;;  %v6603_v23 = vunpack.i.h.bf16 %v5165_v42 }
 0x14e   : > { %v1327_v7 = vsel %vm1207_vm6, %v1311_v41, %v1030_v24  ;;  %v1328_v1 = vsel %vm1207_vm6, %v1312_v21, %v1031_v38  ;;  %v6602_v41 = vunpack.i.l.bf16 %v5147_v8 }
 0x14f   : > { %v5420_v52 = vsel %vm1224_vm7, %v1327_v7, %v1096_v46  ;;  %v5423_v33 = vsel %vm1224_vm7, %v1328_v1, %v1097_v58  ;;  %v5435_v31 = vpop.permute.xlu2 %3709  ;;  %v6601_v58 = vunpack.i.l.bf16 %v5016_v5 }
 0x150   : > { %1498 = vmatpush.msrb.mxu2 %v5420_v52  ;;  %1518 = vmatpush.msrb.mxu3 %v5423_v33 }
 0x151   : > { %v5431_v21 = vpop.permute.xlu1 %3674 }
 0x152   : > { %v3670_v56 = vpop.permute.xlu0 %3669  ;;  %1499 = vmatpush.msrb.mxu2 %v4846_v6  ;;  %1519 = vmatpush.msrb.mxu3 %v4798_v35 }
 0x153   : > { %v3671_v50 = vunpack.i.l.bf16 %v3670_v56  ;;  %3216 = vmatmul.msk.f32.vlgmr.msrb.gmra.mxu2 %vm1360_vm10, %v5411_v55  ;;  %3217 = vmatmul.msk.f32.vlgmr.msrb.gmra.mxu3 %vm1360_vm10, %v5411_v55  ;;  %v3672_v3 = vunpack.i.h.bf16 %v3670_v56 }
 0x155   : > { %v763_v38 = vsel %vm626_vm8, %v6601_v58, %v3671_v50  ;;  %v764_v7 = vsel %vm626_vm8, %v3671_v50, %v6602_v41  ;;  %v829_v32 = vsel %vm626_vm8, %v6603_v23, %v3672_v3  ;;  %v830_v5 = vsel %vm626_vm8, %v3672_v3, %v3612_v17 }
 0x156   : > { %v1261_v10 = vsel %vm1139_vm2, %v5086_v43, %v763_v38  ;;  %v1262_v8 = vsel %vm1139_vm2, %v5090_v51, %v764_v7  ;;  %v6604_v50 = vunpack.i.l.bf16 %v5053_v11  ;;  %v3697_v43 = vunpack.i.h.bf16 %v5378_v20 }
 0x157   : > { %v5455_v27 = vpop.permute.xlu2 %3724  ;;  %v3712_v58 = vunpack.i.h.bf16 %v5435_v31  ;;  %v6605_v38 = vunpack.i.l.bf16 %v5280_v53  ;;  %v3677_v41 = vunpack.i.h.bf16 %v5431_v21  ;;  %v1277_v51 = vsel %vm1156_vm3, %v1261_v10, %v829_v32 }
 0x158   : > { %v1278_v7 = vsel %vm1156_vm3, %v1262_v8, %v830_v5  ;;  %v6607_v32 = vunpack.i.h.bf16 %v5321_v13  ;;  %v6608_v8 = vunpack.i.h.bf16 %v5247_v22  ;;  %v6610_v13 = vunpack.i.l.bf16 %v5308_v14 }
 0x159   : > { %v5441_v46 = vpop.permute.xlu1 %3689  ;;  %v6613_v5 = vunpack.i.l.bf16 %v5097_v18 }
 0x15a   : > { %v3685_v24 = vpop.permute.xlu0 %3684  ;;  %v3691_v11 = vunpack.i.l.bf16 %v5441_v46 }
 0x15b   : > { %v3686_v1 = vunpack.i.l.bf16 %v3685_v24  ;;  %v3687_v56 = vunpack.i.h.bf16 %v3685_v24 }
 0x15d   : > { %v896_v42 = vsel %vm891_vm9, %v6604_v50, %v3686_v1  ;;  %v897_v24 = vsel %vm891_vm9, %v3686_v1, %v6605_v38  ;;  %v6606_v50 = vunpack.i.h.bf16 %v5207_v63  ;;  %v963_v10 = vsel %vm891_vm9, %v3687_v56, %v6607_v32 }
 0x15e   : > { %v1293_v53 = vsel %vm1173_vm4, %v1277_v51, %v896_v42  ;;  %v1294_v3 = vsel %vm1173_vm4, %v1278_v7, %v897_v24  ;;  %v1094_v42 = vsel %vm891_vm9, %v6608_v8, %v3712_v58  ;;  %v6609_v51 = vunpack.i.h.bf16 %v5375_v59 }
 0x15f   : > { %v962_v36 = vsel %vm891_vm9, %v6606_v50, %v3687_v56  ;;  %v770_v56 = vsel %vm626_vm8, %v3677_v41, %v6610_v13  ;;  %v6611_v24 = vunpack.i.l.bf16 %v5431_v21  ;;  %v6612_v32 = vunpack.i.h.bf16 %v5308_v14 }
 0x160   : > { %v1095_v50 = vsel %vm891_vm9, %v3712_v58, %v6609_v51  ;;  %v1309_v22 = vsel %vm1190_vm5, %v1293_v53, %v962_v36  ;;  %v6614_v51 = vunpack.i.l.bf16 %v5385_v49  ;;  %v1310_v38 = vsel %vm1190_vm5, %v1294_v3, %v963_v10 }
 0x161   : > { %v5481_v23 = vpop.permute.xlu1 %3704  ;;  %v769_v7 = vsel %vm626_vm8, %v6611_v24, %v3677_v41  ;;  %v835_v1 = vsel %vm626_vm8, %v6612_v32, %v3691_v11  ;;  %v6615_v41 = vunpack.i.h.bf16 %v5441_v46  ;;  %v6438_v3 = vunpack.i.h.bf16 %v5455_v27 }
 0x162   : > { %v5489_v17 = vpop.permute.xlu0 %3699  ;;  %v3707_v8 = vunpack.i.h.bf16 %v5481_v23  ;;  %v6442_v32 = vunpack.i.l.bf16 %v5481_v23  ;;  %v1267_v10 = vsel %vm1139_vm2, %v5138_v47, %v769_v7 }
 0x163   : > { %v3702_v63 = vunpack.i.h.bf16 %v5489_v17  ;;  %v836_v24 = vsel %vm626_vm8, %v3691_v11, %v6615_v41  ;;  %v6616_v18 = vunpack.i.l.bf16 %v5489_v17  ;;  %v3726_v11 = vunpack.i.l.bf16 %v5455_v27 }
 0x165   : > { %v1028_v58 = vsel %vm891_vm9, %v6613_v5, %v3702_v63  ;;  %v1029_v13 = vsel %vm891_vm9, %v3702_v63, %v6614_v51  ;;  %v903_v5 = vsel %vm891_vm9, %v3697_v43, %v6616_v18  ;;  %v1101_v18 = vsel %vm891_vm9, %v3726_v11, %v6438_v3 }
 0x166   : > { %v1325_v36 = vsel %vm1207_vm6, %v1309_v22, %v1028_v58  ;;  %v1326_v53 = vsel %vm1207_vm6, %v1310_v38, %v1029_v13  ;;  %v1268_v38 = vsel %vm1139_vm2, %v5142_v44, %v770_v56  ;;  %v5538_v22 = vpop.permute.xlu2 %3739  ;;  %v1283_v58 = vsel %vm1156_vm3, %v1267_v10, %v835_v1 }
 0x167   : > { %v5527_v49 = vsel %vm1224_vm7, %v1325_v36, %v1094_v42  ;;  %v5530_v63 = vsel %vm1224_vm7, %v1326_v53, %v1095_v50  ;;  %v6617_v42 = vunpack.i.l.bf16 %v5378_v20  ;;  %v1284_v51 = vsel %vm1156_vm3, %v1268_v38, %v836_v24 }
 0x168   : > { %1458 = vmatpush.msrb.mxu0 %v5527_v49  ;;  %1478 = vmatpush.msrb.mxu1 %v5530_v63  ;;  %v6618_v13 = vunpack.i.l.bf16 %v5435_v31  ;;  %v968_v44 = vsel %vm891_vm9, %v6442_v32, %v3707_v8  ;;  %v1300_v56 = vsel %vm1173_vm4, %v1284_v51, %v903_v5 }
 0x169   : > { %v902_v50 = vsel %vm891_vm9, %v6617_v42, %v3697_v43  ;;  %v5550_v7 = vpop.permute.xlu1 %3719 }
 0x16a   : > { %v969_v47 = vsel %vm891_vm9, %v3707_v8, %v6618_v13  ;;  %v6441_v41 = vunpack.i.h.bf16 %v5550_v7  ;;  %v6439_v43 = vunpack.i.l.bf16 %v5550_v7  ;;  %v5558_v36 = vpop.permute.xlu0 %3714  ;;  %1459 = vmatpush.msrb.mxu0 %v4859_v45  ;;  %1479 = vmatpush.msrb.mxu1 %v4867_v28  ;;  %v1299_v53 = vsel %vm1173_vm4, %v1283_v58, %v902_v50 }
 0x16b   : > { %v3717_v1 = vunpack.i.h.bf16 %v5558_v36  ;;  %v6440_v24 = vunpack.i.l.bf16 %v5558_v36  ;;  %3214 = vmatmul.msk.f32.vlgmr.msrb.gmra.mxu0 %vm1360_vm10, %v5411_v55  ;;  %3215 = vmatmul.msk.f32.vlgmr.msrb.gmra.mxu1 %vm1360_vm10, %v5411_v55  ;;  %v1315_v38 = vsel %vm1190_vm5, %v1299_v53, %v968_v44  ;;  %v1316_v42 = vsel %vm1190_vm5, %v1300_v56, %v969_v47  ;;  %v1353_v47 = vld [vmem:[%s6315_s2] sm:$0xff] }
 0x16c   : > { %v1100_v8 = vsel %vm891_vm9, %v6441_v41, %v3726_v11  ;;  %v3823_v56 = vmov 0   ;;  %v6626_v28 = vunpack.i.l.bf16 %v5481_v23 }
 0x16d   : > { %v1035_v5 = vsel %vm891_vm9, %v3717_v1, %v6439_v43  ;;  %v1034_v10 = vsel %vm891_vm9, %v6440_v24, %v3717_v1  ;;  %3803 = vset.pattern.permute.xlu0 %v3823_v56  ;;  %v6621_v43 = vunpack.i.h.bf16 %v5161_v2  ;;  %v3741_v2 = vunpack.i.l.bf16 %v5538_v22 }
 0x16e   : > { %v1331_v51 = vsel %vm1207_vm6, %v1315_v38, %v1034_v10  ;;  %v1332_v50 = vsel %vm1207_vm6, %v1316_v42, %v1035_v5  ;;  %v5595_v1 = vpop.permute.xlu2 %3754  ;;  %1356 = vperm.xlu0 %3803, %v1353_v47   ;;  %v6619_v5 = vunpack.i.l.bf16 %v5274_v9  ;;  %v6620_v42 = vunpack.i.l.bf16 %v5431_v21 }
 0x16f   : > { %v5586_v58 = vsel %vm1224_vm7, %v1331_v51, %v1100_v8  ;;  %v5589_v11 = vsel %vm1224_vm7, %v1332_v50, %v1101_v18  ;;  %v6622_v9 = vunpack.i.h.bf16 %v5308_v14 }
 0x170   : > { %1578 = vmatpush.msra.mxu2 %v5586_v58  ;;  %1598 = vmatpush.msra.mxu3 %v5589_v11 }
 0x171   : > { %v5593_v13 = vpop.permute.xlu1 %3734 }
 0x172   : > { %v3730_v44 = vpop.permute.xlu0 %3729  ;;  %1579 = vmatpush.msra.mxu2 %v4892_v37  ;;  %1599 = vmatpush.msra.mxu3 %v4884_v15 }
 0x173   : > { %3220 = vmatmul.msk.f32.vlgmr.msra.gmra.mxu2 %vm1360_vm10, %v5411_v55  ;;  %3221 = vmatmul.msk.f32.vlgmr.msra.gmra.mxu3 %vm1360_vm10, %v5411_v55  ;;  %v3731_v8 = vunpack.i.l.bf16 %v3730_v44  ;;  %v3732_v53 = vunpack.i.h.bf16 %v3730_v44 }
 0x175   : > { %v767_v10 = vsel %vm626_vm8, %v6619_v5, %v3731_v8  ;;  %v768_v51 = vsel %vm626_vm8, %v3731_v8, %v6620_v42  ;;  %v833_v24 = vsel %vm626_vm8, %v6621_v43, %v3732_v53  ;;  %v834_v5 = vsel %vm626_vm8, %v3732_v53, %v6622_v9 }
 0x176   : > { %v3770_v3 = vpop.permute.xlu2 %3769  ;;  %v1265_v47 = vsel %vm1139_vm2, %v5071_v54, %v767_v10  ;;  %v1266_v21 = vsel %vm1139_vm2, %v5005_v40, %v768_v51  ;;  %v6623_v8 = vunpack.i.l.bf16 %v5205_v34  ;;  %v3757_v43 = vunpack.i.h.bf16 %v5595_v1 }
 0x177   : > { %v3772_v41 = vunpack.i.h.bf16 %v3770_v3  ;;  %v6624_v54 = vunpack.i.l.bf16 %v5378_v20  ;;  %v1281_v9 = vsel %vm1156_vm3, %v1265_v47, %v833_v24  ;;  %v1282_v51 = vsel %vm1156_vm3, %v1266_v21, %v834_v5 }
 0x178   : > { %v6627_v5 = vunpack.i.h.bf16 %v5276_v16  ;;  %v6628_v21 = vunpack.i.h.bf16 %v5550_v7 }
 0x179   : > { %v3750_v18 = vpop.permute.xlu1 %3749 }
 0x17a   : > { %v3745_v38 = vpop.permute.xlu0 %3744  ;;  %v3751_v40 = vunpack.i.l.bf16 %v3750_v18 }
 0x17b   : > { %v3746_v50 = vunpack.i.l.bf16 %v3745_v38  ;;  %v3747_v44 = vunpack.i.h.bf16 %v3745_v38  ;;  %v3737_v38 = vunpack.i.h.bf16 %v5593_v13 }
 0x17d   : > { %v900_v42 = vsel %vm891_vm9, %v6623_v8, %v3746_v50  ;;  %v901_v10 = vsel %vm891_vm9, %v3746_v50, %v6624_v54  ;;  %v6625_v8 = vunpack.i.h.bf16 %v5316_v57  ;;  %v3771_v50 = vunpack.i.l.bf16 %v3770_v3 }
 0x17e   : > { %v1297_v32 = vsel %vm1173_vm4, %v1281_v9, %v900_v42  ;;  %v3752_v54 = vunpack.i.h.bf16 %v3750_v18  ;;  %v967_v53 = vsel %vm891_vm9, %v3747_v44, %v6626_v28  ;;  %v1298_v24 = vsel %vm1173_vm4, %v1282_v51, %v901_v10 }
 0x17f   : > { %v966_v56 = vsel %vm891_vm9, %v6625_v8, %v3747_v44  ;;  %v1098_v57 = vsel %vm891_vm9, %v6627_v5, %v3772_v41  ;;  %v1099_v42 = vsel %vm891_vm9, %v3772_v41, %v6628_v21  ;;  %v774_v3 = vsel %vm626_vm8, %v3737_v38, %v3741_v2 }
 0x180   : > { %v6629_v18 = vunpack.i.l.bf16 %v5593_v13  ;;  %v6630_v28 = vunpack.i.h.bf16 %v5538_v22  ;;  %v1313_v10 = vsel %vm1190_vm5, %v1297_v32, %v966_v56  ;;  %v6631_v9 = vunpack.i.l.bf16 %v5375_v59  ;;  %v3785_v56 = vpop.permute.xlu2 %3784 }
 0x181   : > { %v5640_v20 = vpop.permute.xlu1 %3764  ;;  %v6632_v41 = vunpack.i.l.bf16 %v5558_v36  ;;  %v1314_v8 = vsel %vm1190_vm5, %v1298_v24, %v967_v53 }
 0x182   : > { %v3760_v47 = vpop.permute.xlu0 %3759  ;;  %v773_v23 = vsel %vm626_vm8, %v6629_v18, %v3737_v38  ;;  %v839_v44 = vsel %vm626_vm8, %v6630_v28, %v3751_v40  ;;  %v3767_v16 = vunpack.i.h.bf16 %v5640_v20  ;;  %v840_v38 = vsel %vm626_vm8, %v3751_v40, %v3752_v54 }
 0x183   : > { %v3762_v34 = vunpack.i.h.bf16 %v3760_v47  ;;  %v3761_v45 = vunpack.i.l.bf16 %v3760_v47  ;;  %v3766_v47 = vunpack.i.l.bf16 %v5640_v20  ;;  %v3786_v18 = vunpack.i.l.bf16 %v3785_v56 }
 0x184   : > { %v1271_v53 = vsel %vm1139_vm2, %v5123_v29, %v773_v23  ;;  %v1272_v40 = vsel %vm1139_vm2, %v5045_v26, %v774_v3 }
 0x185   : > { %v1032_v51 = vsel %vm891_vm9, %v6631_v9, %v3762_v34  ;;  %v1033_v2 = vsel %vm891_vm9, %v3762_v34, %v6632_v41  ;;  %v907_v21 = vsel %vm891_vm9, %v3757_v43, %v3761_v45  ;;  %v3787_v34 = vunpack.i.h.bf16 %v3785_v56 }
 0x186   : > { %v1329_v5 = vsel %vm1207_vm6, %v1313_v10, %v1032_v51  ;;  %v1330_v32 = vsel %vm1207_vm6, %v1314_v8, %v1033_v2  ;;  %v6633_v45 = vunpack.i.l.bf16 %v5595_v1  ;;  %v1287_v24 = vsel %vm1156_vm3, %v1271_v53, %v839_v44 }
 0x187   : > { %v5674_v59 = vsel %vm1224_vm7, %v1329_v5, %v1098_v57  ;;  %v5677_v36 = vsel %vm1224_vm7, %v1330_v32, %v1099_v42  ;;  %v1288_v57 = vsel %vm1156_vm3, %v1272_v40, %v840_v38  ;;  %v973_v42 = vsel %vm891_vm9, %v3767_v16, %v3771_v50 }
 0x188   : > { %1538 = vmatpush.msra.mxu0 %v5674_v59  ;;  %1558 = vmatpush.msra.mxu1 %v5677_v36  ;;  %v906_v54 = vsel %vm891_vm9, %v6633_v45, %v3757_v43  ;;  %v972_v26 = vsel %vm891_vm9, %v3766_v47, %v3767_v16  ;;  %v1304_v29 = vsel %vm1173_vm4, %v1288_v57, %v907_v21  ;;  %v3800_v21 = vpop.permute.xlu2 %3799  ;;  %v6634_v57 = vunpack.i.h.bf16 %v5441_v46 }
 0x189   : > { %v5691_v28 = vpop.permute.xlu1 %3779  ;;  %v1303_v16 = vsel %vm1173_vm4, %v1287_v24, %v906_v54  ;;  %v1105_v9 = vsel %vm891_vm9, %v3786_v18, %v3787_v34  ;;  %v1320_v8 = vsel %vm1190_vm5, %v1304_v29, %v973_v42  ;;  %v3801_v54 = vunpack.i.l.bf16 %v3800_v21 }
 0x18a   : > { %v3782_v3 = vunpack.i.h.bf16 %v5691_v28  ;;  %v3781_v23 = vunpack.i.l.bf16 %v5691_v28  ;;  %v3775_v10 = vpop.permute.xlu0 %3774  ;;  %1539 = vmatpush.msra.mxu0 %v4896_v62  ;;  %1559 = vmatpush.msra.mxu1 %v4900_v0  ;;  %v1319_v2 = vsel %vm1190_vm5, %v1303_v16, %v972_v26  ;;  %v6635_v26 = vunpack.i.h.bf16 %v5538_v22  ;;  %v6646_v28 = vld [vmem:[#allocation32_spill] sm:$0xff] }
 0x18b   : > { %v3777_v43 = vunpack.i.h.bf16 %v3775_v10  ;;  %v3776_v44 = vunpack.i.l.bf16 %v3775_v10  ;;  %3218 = vmatmul.msk.f32.vlgmr.msra.gmra.mxu0 %vm1360_vm10, %v5411_v55  ;;  %3219 = vmatmul.msk.f32.vlgmr.msra.gmra.mxu1 %vm1360_vm10, %v5411_v55  ;;  %v3802_v16 = vunpack.i.h.bf16 %v3800_v21 }
 0x18c   : > { %v1104_v50 = vsel %vm891_vm9, %v3782_v3, %v3786_v18 }
 0x18d   : > { %v1039_v51 = vsel %vm891_vm9, %v3777_v43, %v3781_v23  ;;  %v1038_v41 = vsel %vm891_vm9, %v3776_v44, %v3777_v43  ;;  %v6636_v23 = vunpack.i.l.bf16 %v5308_v14  ;;  %v6637_v43 = vunpack.i.l.bf16 %v5593_v13  ;;  %v6640_v14 = vld [vmem:[#allocation7_spill] sm:$0xff] }
 0x18e   : > { %v1335_v38 = vsel %vm1207_vm6, %v1319_v2, %v1038_v41  ;;  %v1336_v5 = vsel %vm1207_vm6, %v1320_v8, %v1039_v51  ;;  %v6639_v51 = vld [vmem:[#allocation31_spill] sm:$0xff]  ;;  %v6641_v2 = vunpack.i.l.bf16 %v5595_v1 }
 0x18f   : > { %v5717_v32 = vsel %vm1224_vm7, %v1335_v38, %v1104_v50  ;;  %v5720_v56 = vsel %vm1224_vm7, %v1336_v5, %v1105_v9  ;;  %v6638_v9 = vunpack.i.l.bf16 %v5489_v17  ;;  %v6642_v5 = vld [vmem:[#allocation30_spill] sm:$0xff]  ;;  %v6643_v17 = vunpack.i.l.bf16 %v5435_v31  ;;  %v5769_v1 = vld [vmem:[%s6314_s1 + $0x8] sm:$0xff] }
 0x190   : > { %1658 = vmatpush.msrb.mxu2 %v5717_v32  ;;  %1678 = vmatpush.msrb.mxu3 %v5720_v56 }
 0x191   : > { %v3795_v34 = vpop.permute.xlu1 %3794 }
 0x192   : > { %v3796_v18 = vunpack.i.l.bf16 %v3795_v34  ;;  %v3790_v53 = vpop.permute.xlu0 %3789  ;;  %1659 = vmatpush.msrb.mxu2 %v4929_v60  ;;  %1679 = vmatpush.msrb.mxu3 %v4932_v12  ;;  %v3797_v24 = vunpack.i.h.bf16 %v3795_v34 }
 0x193   : > { %v3792_v40 = vunpack.i.h.bf16 %v3790_v53  ;;  %v3791_v45 = vunpack.i.l.bf16 %v3790_v53  ;;  %3224 = vmatmul.msk.f32.vlgmr.msrb.gmra.mxu2 %vm1360_vm10, %v5411_v55  ;;  %3225 = vmatmul.msk.f32.vlgmr.msrb.gmra.mxu3 %vm1360_vm10, %v5411_v55  ;;  %v6644_v53 = vunpack.i.l.bf16 %v5550_v7  ;;  %v1103_v7 = vsel %vm891_vm9, %v3802_v16, %v3782_v3  ;;  %v6647_v3 = vld [vmem:[#allocation19_spill] sm:$0xff] }
 0x194   : > { %1839 = vmatpush.msra.mxu2 %v5265_v39  ;;  %1859 = vmatpush.msra.mxu3 %v5268_v48  ;;  %v904_v46 = vsel %vm891_vm9, %v6638_v9, %v3796_v18  ;;  %v905_v13 = vsel %vm891_vm9, %v3796_v18, %v6641_v2  ;;  %v971_v21 = vsel %vm891_vm9, %v3797_v24, %v3766_v47 }
 0x195   : > { %v837_v42 = vsel %vm626_vm8, %v6634_v57, %v3792_v40  ;;  %v838_v29 = vsel %vm626_vm8, %v3792_v40, %v6635_v26  ;;  %v771_v10 = vsel %vm626_vm8, %v6636_v23, %v3791_v45  ;;  %v772_v50 = vsel %vm626_vm8, %v3791_v45, %v6637_v43  ;;  %v3243_v26 = vld [vmem:[%s6314_s1 + $0x10] sm:$0xff] }
 0x196   : > { %v1269_v22 = vsel %vm1139_vm2, %v5134_v25, %v771_v10  ;;  %v1270_v41 = vsel %vm1139_vm2, %v6639_v51, %v772_v50  ;;  %1840 = vmatpush.msra.mxu2 %v6640_v14  ;;  %1860 = vmatpush.msra.mxu3 %v6642_v5  ;;  %v970_v25 = vsel %vm891_vm9, %v6643_v17, %v3797_v24  ;;  %v6645_v45 = vunpack.i.h.bf16 %v5455_v27 }
 0x197   : > { %v1285_v8 = vsel %vm1156_vm3, %v1269_v22, %v837_v42  ;;  %v1286_v38 = vsel %vm1156_vm3, %v1270_v41, %v838_v29  ;;  %v1036_v31 = vsel %vm891_vm9, %v6644_v53, %v3801_v54  ;;  %v1037_v40 = vsel %vm891_vm9, %v3801_v54, %v3776_v44  ;;  %v6649_v42 = vld [vmem:[#allocation23_spill] sm:$0xff] }
 0x198   : > { %1919 = vmatpush.msrb.mxu2 %v5420_v52  ;;  %1939 = vmatpush.msrb.mxu3 %v5423_v33  ;;  %v1301_v34 = vsel %vm1173_vm4, %v1285_v8, %v904_v46  ;;  %v1302_v18 = vsel %vm1173_vm4, %v1286_v38, %v905_v13  ;;  %v1102_v24 = vsel %vm891_vm9, %v6645_v45, %v3802_v16 }
 0x199   : > { %v1317_v20 = vsel %vm1190_vm5, %v1301_v34, %v970_v25  ;;  %v1318_v47 = vsel %vm1190_vm5, %v1302_v18, %v971_v21 }
 0x19a   : > { %1920 = vmatpush.msrb.mxu2 %v4846_v6  ;;  %1940 = vmatpush.msrb.mxu3 %v4798_v35  ;;  %v1333_v57 = vsel %vm1207_vm6, %v1317_v20, %v1036_v31  ;;  %v1334_v44 = vsel %vm1207_vm6, %v1318_v47, %v1037_v40 }
 0x19b   : > { %3229 = vmatmul.msk.f32.vlgmr.msra.gmra.mxu2 %vm1360_vm10, %v5769_v1  ;;  %3230 = vmatmul.msk.f32.vlgmr.msra.gmra.mxu3 %vm1360_vm10, %v5769_v1  ;;  %v5794_v27 = vsel %vm1224_vm7, %v1333_v57, %v1102_v24  ;;  %v5797_v54 = vsel %vm1224_vm7, %v1334_v44, %v1103_v7 }
 0x19c   : > { %1999 = vmatpush.msra.mxu2 %v5586_v58  ;;  %2019 = vmatpush.msra.mxu3 %v5589_v11 }
 0x19d   : > { %1618 = vmatpush.msrb.mxu0 %v5794_v27  ;;  %1638 = vmatpush.msrb.mxu1 %v5797_v54 }
 0x19e   : > { %2000 = vmatpush.msra.mxu2 %v4892_v37  ;;  %2020 = vmatpush.msra.mxu3 %v4884_v15 }
 0x19f   : > { %1619 = vmatpush.msrb.mxu0 %v6646_v28  ;;  %1639 = vmatpush.msrb.mxu1 %v6647_v3 }
 0x1a0   : > { %3222 = vmatmul.msk.f32.vlgmr.msrb.gmra.mxu0 %vm1360_vm10, %v5411_v55  ;;  %3223 = vmatmul.msk.f32.vlgmr.msrb.gmra.mxu1 %vm1360_vm10, %v5411_v55  ;;  %v6648_v55 = vld [vmem:[#allocation22_spill] sm:$0xff] }
 0x1a1   : > { %1799 = vmatpush.msra.mxu0 %v5352_v4  ;;  %1819 = vmatpush.msra.mxu1 %v5355_v19 }
 0x1a3   : > { %1800 = vmatpush.msra.mxu0 %v4820_v61  ;;  %1820 = vmatpush.msra.mxu1 %v4752_v30 }
 0x1a4   : > { %3233 = vmatmul.msk.f32.vlgmr.msrb.gmra.mxu2 %vm1360_vm10, %v5769_v1  ;;  %3234 = vmatmul.msk.f32.vlgmr.msrb.gmra.mxu3 %vm1360_vm10, %v5769_v1 }
 0x1a5   : > { %1879 = vmatpush.msrb.mxu0 %v5527_v49  ;;  %1899 = vmatpush.msrb.mxu1 %v5530_v63 }
 0x1a6   : > { %2079 = vmatpush.msrb.mxu2 %v5717_v32  ;;  %2099 = vmatpush.msrb.mxu3 %v5720_v56 }
 0x1a7   : > { %1880 = vmatpush.msrb.mxu0 %v6648_v55  ;;  %1900 = vmatpush.msrb.mxu1 %v6649_v42 }
 0x1a8   : > { %2080 = vmatpush.msrb.mxu2 %v4929_v60  ;;  %2100 = vmatpush.msrb.mxu3 %v4932_v12 }
 0x1a9   : > { %3227 = vmatmul.msk.f32.vlgmr.msra.gmra.mxu0 %vm1360_vm10, %v5769_v1  ;;  %3228 = vmatmul.msk.f32.vlgmr.msra.gmra.mxu1 %vm1360_vm10, %v5769_v1 }
 0x1aa   : > { %1959 = vmatpush.msra.mxu0 %v5674_v59  ;;  %1979 = vmatpush.msra.mxu1 %v5677_v36 }
 0x1ac   : > { %1960 = vmatpush.msra.mxu0 %v4896_v62  ;;  %1980 = vmatpush.msra.mxu1 %v4900_v0 }
 0x1ad   : > { %3237 = vmatmul.msk.f32.vlgmr.msra.gmra.mxu2 %vm1360_vm10, %v5769_v1  ;;  %3238 = vmatmul.msk.f32.vlgmr.msra.gmra.mxu3 %vm1360_vm10, %v5769_v1 }
 0x1ae   : > { %2292 = vmatpush.msra.mxu2 %v5265_v39  ;;  %2312 = vmatpush.msra.mxu3 %v5268_v48 }
 0x1b0   : > { %2293 = vmatpush.msra.mxu2 %v6640_v14  ;;  %2313 = vmatpush.msra.mxu3 %v6642_v5 }
 0x1b1   : > { %3231 = vmatmul.msk.f32.vlgmr.msrb.gmra.mxu0 %vm1360_vm10, %v5769_v1  ;;  %3232 = vmatmul.msk.f32.vlgmr.msrb.gmra.mxu1 %vm1360_vm10, %v5769_v1 }
 0x1b2   : > { %2039 = vmatpush.msrb.mxu0 %v5794_v27  ;;  %2059 = vmatpush.msrb.mxu1 %v5797_v54 }
 0x1b4   : > { %2040 = vmatpush.msrb.mxu0 %v6646_v28  ;;  %2060 = vmatpush.msrb.mxu1 %v6647_v3 }
 0x1b5   : > { %3241 = vmatmul.msk.f32.vlgmr.msrb.gmra.mxu2 %vm1360_vm10, %v5769_v1  ;;  %3242 = vmatmul.msk.f32.vlgmr.msrb.gmra.mxu3 %vm1360_vm10, %v5769_v1 }
 0x1b6   : > { %2372 = vmatpush.msrb.mxu2 %v5420_v52  ;;  %2392 = vmatpush.msrb.mxu3 %v5423_v33 }
 0x1b8   : > { %2373 = vmatpush.msrb.mxu2 %v4846_v6  ;;  %2393 = vmatpush.msrb.mxu3 %v4798_v35 }
 0x1b9   : > { %3235 = vmatmul.msk.f32.vlgmr.msra.gmra.mxu0 %vm1360_vm10, %v5769_v1  ;;  %3236 = vmatmul.msk.f32.vlgmr.msra.gmra.mxu1 %vm1360_vm10, %v5769_v1 }
 0x1ba   : > { %2252 = vmatpush.msra.mxu0 %v5352_v4  ;;  %2272 = vmatpush.msra.mxu1 %v5355_v19 }
 0x1bc   : > { %2253 = vmatpush.msra.mxu0 %v4820_v61  ;;  %2273 = vmatpush.msra.mxu1 %v4752_v30 }
 0x1bd   : > { %3246 = vmatmul.msk.f32.vlgmr.msra.gmra.mxu2 %vm1360_vm10, %v3243_v26  ;;  %3247 = vmatmul.msk.f32.vlgmr.msra.gmra.mxu3 %vm1360_vm10, %v3243_v26 }
 0x1be   : > { %2452 = vmatpush.msra.mxu2 %v5586_v58  ;;  %2472 = vmatpush.msra.mxu3 %v5589_v11 }
 0x1c0   : > { %2453 = vmatpush.msra.mxu2 %v4892_v37  ;;  %2473 = vmatpush.msra.mxu3 %v4884_v15 }
 0x1c1   : > { %3239 = vmatmul.msk.f32.vlgmr.msrb.gmra.mxu0 %vm1360_vm10, %v5769_v1  ;;  %3240 = vmatmul.msk.f32.vlgmr.msrb.gmra.mxu1 %vm1360_vm10, %v5769_v1 }
 0x1c2   : > { %2332 = vmatpush.msrb.mxu0 %v5527_v49  ;;  %2352 = vmatpush.msrb.mxu1 %v5530_v63 }
 0x1c4   : > { %2333 = vmatpush.msrb.mxu0 %v6648_v55  ;;  %2353 = vmatpush.msrb.mxu1 %v6649_v42 }
 0x1c5   : > { %3250 = vmatmul.msk.f32.vlgmr.msrb.gmra.mxu2 %vm1360_vm10, %v3243_v26  ;;  %3251 = vmatmul.msk.f32.vlgmr.msrb.gmra.mxu3 %vm1360_vm10, %v3243_v26 }
 0x1c6   : > { %2532 = vmatpush.msrb.mxu2 %v5717_v32  ;;  %2552 = vmatpush.msrb.mxu3 %v5720_v56 }
 0x1c8   : > { %2533 = vmatpush.msrb.mxu2 %v4929_v60  ;;  %2553 = vmatpush.msrb.mxu3 %v4932_v12 }
 0x1c9   : > { %3244 = vmatmul.msk.f32.vlgmr.msra.gmra.mxu0 %vm1360_vm10, %v3243_v26  ;;  %3245 = vmatmul.msk.f32.vlgmr.msra.gmra.mxu1 %vm1360_vm10, %v3243_v26 }
 0x1ca   : > { %2412 = vmatpush.msra.mxu0 %v5674_v59  ;;  %2432 = vmatpush.msra.mxu1 %v5677_v36 }
 0x1cc   : > { %2413 = vmatpush.msra.mxu0 %v4896_v62  ;;  %2433 = vmatpush.msra.mxu1 %v4900_v0 }
 0x1cd   : > { %3254 = vmatmul.msk.f32.vlgmr.msra.gmra.mxu2 %vm1360_vm10, %v3243_v26  ;;  %3255 = vmatmul.msk.f32.vlgmr.msra.gmra.mxu3 %vm1360_vm10, %v3243_v26 }
 0x1ce   : > { %2745 = vmatpush.msra.mxu2 %v5265_v39  ;;  %2765 = vmatpush.msra.mxu3 %v5268_v48  ;;  %v3260_v39 = vld [vmem:[%s6314_s1 + $0x18] sm:$0xff] }
 0x1d0   : > { %2746 = vmatpush.msra.mxu2 %v6640_v14  ;;  %2766 = vmatpush.msra.mxu3 %v6642_v5 }
 0x1d1   : > { %3248 = vmatmul.msk.f32.vlgmr.msrb.gmra.mxu0 %vm1360_vm10, %v3243_v26  ;;  %3249 = vmatmul.msk.f32.vlgmr.msrb.gmra.mxu1 %vm1360_vm10, %v3243_v26 }
 0x1d2   : > { %2492 = vmatpush.msrb.mxu0 %v5794_v27  ;;  %2512 = vmatpush.msrb.mxu1 %v5797_v54 }
 0x1d4   : > { %2493 = vmatpush.msrb.mxu0 %v6646_v28  ;;  %2513 = vmatpush.msrb.mxu1 %v6647_v3 }
 0x1d5   : > { %3258 = vmatmul.msk.f32.vlgmr.msrb.gmra.mxu2 %vm1360_vm10, %v3243_v26  ;;  %3259 = vmatmul.msk.f32.vlgmr.msrb.gmra.mxu3 %vm1360_vm10, %v3243_v26 }
 0x1d6   : > { %2825 = vmatpush.msrb.mxu2 %v5420_v52  ;;  %2845 = vmatpush.msrb.mxu3 %v5423_v33 }
 0x1d8   : > { %2826 = vmatpush.msrb.mxu2 %v4846_v6  ;;  %2846 = vmatpush.msrb.mxu3 %v4798_v35  ;;  %v1441_v35 = vpop.f32.mrf.mxu3  ;;  %v1401_v6 = vpop.f32.mrf.mxu1 }
 0x1d9   : > { %3252 = vmatmul.msk.f32.vlgmr.msra.gmra.mxu0 %vm1360_vm10, %v3243_v26  ;;  %3253 = vmatmul.msk.f32.vlgmr.msra.gmra.mxu1 %vm1360_vm10, %v3243_v26 }
 0x1da   : > { %2705 = vmatpush.msra.mxu0 %v5352_v4  ;;  %2725 = vmatpush.msra.mxu1 %v5355_v19 }
 0x1dc   : > { %2706 = vmatpush.msra.mxu0 %v4820_v61  ;;  %2726 = vmatpush.msra.mxu1 %v4752_v30  ;;  %v1421_v30 = vpop.f32.mrf.mxu2  ;;  %v1381_v61 = vpop.f32.mrf.mxu0 }
 0x1dd   : > { %3263 = vmatmul.msk.f32.vlgmr.msra.gmra.mxu2 %vm1360_vm10, %v3260_v39  ;;  %3264 = vmatmul.msk.f32.vlgmr.msra.gmra.mxu3 %vm1360_vm10, %v3260_v39 }
 0x1de   : > { %2905 = vmatpush.msra.mxu2 %v5586_v58  ;;  %2925 = vmatpush.msra.mxu3 %v5589_v11 }
 0x1e0   : > { %2906 = vmatpush.msra.mxu2 %v4892_v37  ;;  %2926 = vmatpush.msra.mxu3 %v4884_v15  ;;  %v1521_v37 = vpop.f32.mrf.mxu3  ;;  %v5973_v11 = vpop.permute.xlu0 %1356 }
 0x1e1   : > { %3256 = vmatmul.msk.f32.vlgmr.msrb.gmra.mxu0 %vm1360_vm10, %v3243_v26  ;;  %3257 = vmatmul.msk.f32.vlgmr.msrb.gmra.mxu1 %vm1360_vm10, %v3243_v26  ;;  %v1684_v10 = vadd.f32 %v1381_v61, %v5973_v11  ;;  %v1685_v14 = vadd.f32 %v1401_v6, %v5973_v11  ;;  %v1691_v17 = vadd.f32 %v1521_v37, %v5973_v11 }
 0x1e2   : > { %2785 = vmatpush.msrb.mxu0 %v5527_v49  ;;  %2805 = vmatpush.msrb.mxu1 %v5530_v63 }
 0x1e3   : > { %vm1700_vm15 = vcmp.gt.f32.partialorder %v1684_v10, 0.0  ;;  %v1716_v1 = vmul.f32 0.25, %v1684_v10  ;;  %v1732_v40 = vmul.f32 0.05, %v1684_v10  ;;  %vm1701_vm0 = vcmp.gt.f32.partialorder %v1685_v14, 0.0 }
 0x1e4   : > { %2786 = vmatpush.msrb.mxu0 %v6648_v55  ;;  %2806 = vmatpush.msrb.mxu1 %v6649_v42  ;;  %v1501_v15 = vpop.f32.mrf.mxu2  ;;  %v1717_v47 = vmul.f32 0.25, %v1685_v14  ;;  %v1733_v45 = vmul.f32 0.05, %v1685_v14  ;;  %vm1707_vm2 = vcmp.gt.f32.partialorder %v1691_v17, 0.0 }
 0x1e5   : > { %3267 = vmatmul.msk.f32.vlgmr.msrb.gmra.mxu2 %vm1360_vm10, %v3260_v39  ;;  %3268 = vmatmul.msk.f32.vlgmr.msrb.gmra.mxu3 %vm1360_vm10, %v3260_v39  ;;  %v1690_v13 = vadd.f32 %v1501_v15, %v5973_v11 }
 0x1e6   : > { %2985 = vmatpush.msrb.mxu2 %v5717_v32  ;;  %3005 = vmatpush.msrb.mxu3 %v5720_v56 }
 0x1e7   : > { %vm1706_vm1 = vcmp.gt.f32.partialorder %v1690_v13, 0.0  ;;  %v1722_v7 = vmul.f32 0.25, %v1690_v13  ;;  %v1738_v44 = vmul.f32 0.05, %v1690_v13 }
 0x1e8   : > { %2986 = vmatpush.msrb.mxu2 %v4929_v60  ;;  %3006 = vmatpush.msrb.mxu3 %v4932_v12 }
 0x1e9   : > { %3261 = vmatmul.msk.f32.vlgmr.msra.gmra.mxu0 %vm1360_vm10, %v3260_v39  ;;  %3262 = vmatmul.msk.f32.vlgmr.msra.gmra.mxu1 %vm1360_vm10, %v3260_v39 }
 0x1ea   : > { %2865 = vmatpush.msra.mxu0 %v5674_v59  ;;  %2885 = vmatpush.msra.mxu1 %v5677_v36  ;;  %v1686_v59 = vadd.f32 %v1421_v30, %v5973_v11  ;;  %v1687_v36 = vadd.f32 %v1441_v35, %v5973_v11 }
 0x1ec   : > { %2866 = vmatpush.msra.mxu0 %v4896_v62  ;;  %2886 = vmatpush.msra.mxu1 %v4900_v0  ;;  %v1461_v62 = vpop.f32.mrf.mxu0  ;;  %v1481_v0 = vpop.f32.mrf.mxu1  ;;  %v1718_v16 = vmul.f32 0.25, %v1686_v59  ;;  %v1734_v9 = vmul.f32 0.05, %v1686_v59  ;;  %v1719_v46 = vmul.f32 0.25, %v1687_v36  ;;  %v1735_v22 = vmul.f32 0.05, %v1687_v36 }
 0x1ed   : > { %3271 = vmatmul.msk.f32.vlgmr.msra.gmra.mxu2 %vm1360_vm10, %v3260_v39  ;;  %3272 = vmatmul.msk.f32.vlgmr.msra.gmra.mxu3 %vm1360_vm10, %v3260_v39  ;;  %v1688_v32 = vadd.f32 %v1461_v62, %v5973_v11  ;;  %v1689_v23 = vadd.f32 %v1481_v0, %v5973_v11  ;;  %vm1702_vm11 = vcmp.gt.f32.partialorder %v1686_v59, 0.0  ;;  %vm1703_vm12 = vcmp.gt.f32.partialorder %v1687_v36, 0.0 }
 0x1ee   : > { %v5990_v38 = vsel %vm1702_vm11, %v1718_v16, %v1734_v9  ;;  %v5992_v5 = vsel %vm1703_vm12, %v1719_v46, %v1735_v22  ;;  %v6019_v62 = vsel %vm1700_vm15, %v1716_v1, %v1732_v40  ;;  %v6022_v0 = vsel %vm1701_vm0, %v1717_v47, %v1733_v45 }
 0x1ef   : > { %v1720_v51 = vmul.f32 0.25, %v1688_v32  ;;  %v1736_v41 = vmul.f32 0.05, %v1688_v32  ;;  %vm1704_vm13 = vcmp.gt.f32.partialorder %v1688_v32, 0.0  ;;  %vm1705_vm14 = vcmp.gt.f32.partialorder %v1689_v23, 0.0 }
 0x1f0   : > { %v1721_v2 = vmul.f32 0.25, %v1689_v23  ;;  %v1737_v8 = vmul.f32 0.05, %v1689_v23 }
 0x1f1   : > { %3265 = vmatmul.msk.f32.vlgmr.msrb.gmra.mxu0 %vm1360_vm10, %v3260_v39  ;;  %3266 = vmatmul.msk.f32.vlgmr.msrb.gmra.mxu1 %vm1360_vm10, %v3260_v39  ;;  %v5995_v25 = vsel %vm1704_vm13, %v1720_v51, %v1736_v41 }
 0x1f2   : > { %2945 = vmatpush.msrb.mxu0 %v5794_v27  ;;  %2965 = vmatpush.msrb.mxu1 %v5797_v54  ;;  %v1723_v27 = vmul.f32 0.25, %v1691_v17  ;;  %v6012_v6 = vsel %vm1705_vm14, %v1721_v2, %v1737_v8 }
 0x1f4   : > { %2946 = vmatpush.msrb.mxu0 %v6646_v28  ;;  %2966 = vmatpush.msrb.mxu1 %v6647_v3  ;;  %v1739_v3 = vmul.f32 0.05, %v1691_v17 }
 0x1f5   : > { %3275 = vmatmul.msk.f32.vlgmr.msrb.gmra.mxu2 %vm1360_vm10, %v3260_v39  ;;  %3276 = vmatmul.msk.f32.vlgmr.msrb.gmra.mxu3 %vm1360_vm10, %v3260_v39 }
 0x1f6   : > { %v1581_v60 = vpop.f32.mrf.mxu2  ;;  %v1601_v12 = vpop.f32.mrf.mxu3 }
 0x1f7   : > { %v1694_v21 = vadd.f32 %v1581_v60, %v5973_v11  ;;  %v1695_v53 = vadd.f32 %v1601_v12, %v5973_v11  ;;  %v6025_v60 = vsel %vm1706_vm1, %v1722_v7, %v1738_v44 }
 0x1f9   : > { %3269 = vmatmul.msk.f32.vlgmr.msra.gmra.mxu0 %vm1360_vm10, %v3260_v39  ;;  %3270 = vmatmul.msk.f32.vlgmr.msra.gmra.mxu1 %vm1360_vm10, %v3260_v39  ;;  %vm1710_vm3 = vcmp.gt.f32.partialorder %v1694_v21, 0.0  ;;  %v1726_v54 = vmul.f32 0.25, %v1694_v21  ;;  %v1742_v28 = vmul.f32 0.05, %v1694_v21  ;;  %vm1711_vm4 = vcmp.gt.f32.partialorder %v1695_v53, 0.0 }
 0x1fa   : > { %v1727_v55 = vmul.f32 0.25, %v1695_v53  ;;  %v1743_v42 = vmul.f32 0.05, %v1695_v53 }
 0x201   : > { %3273 = vmatmul.msk.f32.vlgmr.msrb.gmra.mxu0 %vm1360_vm10, %v3260_v39  ;;  %3274 = vmatmul.msk.f32.vlgmr.msrb.gmra.mxu1 %vm1360_vm10, %v3260_v39 }
 0x208   : > { %v1541_v48 = vpop.f32.mrf.mxu0  ;;  %v1561_v4 = vpop.f32.mrf.mxu1 }
 0x209   : > { %v1692_v31 = vadd.f32 %v1541_v48, %v5973_v11  ;;  %v1693_v20 = vadd.f32 %v1561_v4, %v5973_v11  ;;  %v6032_v4 = vsel %vm1710_vm3, %v1726_v54, %v1742_v28 }
 0x20b   : > { %v1724_v26 = vmul.f32 0.25, %v1692_v31  ;;  %v1740_v39 = vmul.f32 0.05, %v1692_v31  ;;  %v1725_v30 = vmul.f32 0.25, %v1693_v20  ;;  %v1741_v35 = vmul.f32 0.05, %v1693_v20 }
 0x20c   : > { %vm1708_vm5 = vcmp.gt.f32.partialorder %v1692_v31, 0.0  ;;  %vm1709_vm6 = vcmp.gt.f32.partialorder %v1693_v20, 0.0 }
 0x20d   : > { %v6042_v59 = vsel %vm1708_vm5, %v1724_v26, %v1740_v39  ;;  %v6044_v36 = vsel %vm1709_vm6, %v1725_v30, %v1741_v35 }
 0x216   : > { %v5961_v19 = vpop.f32.mrf.mxu2  ;;  %v5963_v52 = vpop.f32.mrf.mxu3 }
 0x217   : > { %v1698_v61 = vadd.f32 %v5961_v19, %v5973_v11  ;;  %v1699_v15 = vadd.f32 %v5963_v52, %v5973_v11  ;;  %v6035_v19 = vsel %vm1711_vm4, %v1727_v55, %v1743_v42 }
 0x219   : > { %v1730_v32 = vmul.f32 0.25, %v1698_v61  ;;  %v1746_v23 = vmul.f32 0.05, %v1698_v61  ;;  %vm1714_vm7 = vcmp.gt.f32.partialorder %v1698_v61, 0.0  ;;  %vm1715_vm8 = vcmp.gt.f32.partialorder %v1699_v15, 0.0 }
 0x21a   : > { %v1731_v9 = vmul.f32 0.25, %v1699_v15 }
 0x21b   : > { %v6056_v8 = vsel %vm1714_vm7, %v1730_v32, %v1746_v23 }
 0x21d   : > { %v5965_v33 = vpop.f32.mrf.mxu0  ;;  %v5967_v49 = vpop.f32.mrf.mxu1 }
 0x21e   : > { %v5969_v63 = vpop.f32.mrf.mxu2  ;;  %v5971_v58 = vpop.f32.mrf.mxu3  ;;  %v1696_v46 = vadd.f32 %v5965_v33, %v5973_v11  ;;  %v1697_v22 = vadd.f32 %v5967_v49, %v5973_v11 }
 0x21f   : > { %v2107_v37 = vadd.f32 %v5969_v63, %v5973_v11  ;;  %v2108_v52 = vadd.f32 %v5971_v58, %v5973_v11  ;;  %v6040_v63 = vsel %vm1707_vm2, %v1723_v27, %v1739_v3  ;;  %v1747_v58 = vmul.f32 0.05, %v1699_v15 }
 0x220   : > { %vm1712_vm11 = vcmp.gt.f32.partialorder %v1696_v46, 0.0  ;;  %v1728_v21 = vmul.f32 0.25, %v1696_v46  ;;  %v1744_v49 = vmul.f32 0.05, %v1696_v46  ;;  %vm1713_vm12 = vcmp.gt.f32.partialorder %v1697_v22, 0.0 }
 0x221   : > { %v2139_v51 = vmul.f32 0.25, %v2107_v37  ;;  %v2155_v41 = vmul.f32 0.05, %v2107_v37  ;;  %vm2123_vm9 = vcmp.gt.f32.partialorder %v2107_v37, 0.0  ;;  %v2140_v14 = vmul.f32 0.25, %v2108_v52 }
 0x222   : > { %v2156_v2 = vmul.f32 0.05, %v2108_v52  ;;  %vm2124_vm10 = vcmp.gt.f32.partialorder %v2108_v52, 0.0  ;;  %v1729_v53 = vmul.f32 0.25, %v1697_v22  ;;  %v1745_v31 = vmul.f32 0.05, %v1697_v22 }
 0x223   : > { %v2171_v40 = vsel %vm2123_vm9, %v2139_v51, %v2155_v41  ;;  %v6075_v42 = vsel %vm1715_vm8, %v1731_v9, %v1747_v58  ;;  %v6080_v39 = vsel %vm1712_vm11, %v1728_v21, %v1744_v49 }
 0x224   : > { %v2172_v47 = vsel %vm2124_vm10, %v2140_v14, %v2156_v2  ;;  %v6083_v30 = vsel %vm1713_vm12, %v1729_v53, %v1745_v31  ;;  %v6086_v35 = vadd.f32 %v2171_v40, %v5990_v38 }
 0x225   : > { %v6089_v61 = vadd.f32 %v2172_v47, %v5992_v5 }
 0x226   : > { %v5978_v56 = vpop.f32.mrf.mxu0  ;;  %v5980_v29 = vpop.f32.mrf.mxu1 }
 0x227   : > { %v5984_v43 = vpop.f32.mrf.mxu2  ;;  %v5986_v50 = vpop.f32.mrf.mxu3  ;;  %v2105_v13 = vadd.f32 %v5978_v56, %v5973_v11  ;;  %v2106_v17 = vadd.f32 %v5980_v29, %v5973_v11 }
 0x228   : > { %v2111_v33 = vadd.f32 %v5984_v43, %v5973_v11  ;;  %v2112_v1 = vadd.f32 %v5986_v50, %v5973_v11 }
 0x229   : > { %vm2121_vm13 = vcmp.gt.f32.partialorder %v2105_v13, 0.0  ;;  %v2137_v29 = vmul.f32 0.25, %v2105_v13  ;;  %v2153_v45 = vmul.f32 0.05, %v2105_v13  ;;  %vm2122_vm14 = vcmp.gt.f32.partialorder %v2106_v17, 0.0 }
 0x22a   : > { %v2138_v43 = vmul.f32 0.25, %v2106_v17  ;;  %v2154_v7 = vmul.f32 0.05, %v2106_v17  ;;  %v2143_v44 = vmul.f32 0.25, %v2111_v33  ;;  %v2159_v50 = vmul.f32 0.05, %v2111_v33 }
 0x22b   : > { %v2144_v28 = vmul.f32 0.25, %v2112_v1  ;;  %v2160_v3 = vmul.f32 0.05, %v2112_v1  ;;  %vm2127_vm15 = vcmp.gt.f32.partialorder %v2111_v33, 0.0  ;;  %vm2128_vm0 = vcmp.gt.f32.partialorder %v2112_v1, 0.0 }
 0x22c   : > { %v2170_v15 = vsel %vm2122_vm14, %v2138_v43, %v2154_v7  ;;  %v2175_v52 = vsel %vm2127_vm15, %v2143_v44, %v2159_v50 }
 0x22d   : > { %v2176_v32 = vsel %vm2128_vm0, %v2144_v28, %v2160_v3  ;;  %v6109_v40 = vadd.f32 %v2170_v15, %v6022_v0  ;;  %v6112_v47 = vadd.f32 %v2175_v52, %v6025_v60 }
 0x22e   : > { %v5998_v34 = vpop.f32.mrf.mxu0  ;;  %v6000_v18 = vpop.f32.mrf.mxu1 }
 0x22f   : > { %v2109_v55 = vadd.f32 %v5998_v34, %v5973_v11  ;;  %v2110_v26 = vadd.f32 %v6000_v18, %v5973_v11  ;;  %v2169_v34 = vsel %vm2121_vm13, %v2137_v29, %v2153_v45  ;;  %v6115_v29 = vadd.f32 %v2176_v32, %v6040_v63 }
 0x230   : > { %v6005_v24 = vpop.f32.mrf.mxu2  ;;  %v6007_v57 = vpop.f32.mrf.mxu3 }
 0x231   : > { %v2115_v37 = vadd.f32 %v6005_v24, %v5973_v11  ;;  %v2116_v18 = vadd.f32 %v6007_v57, %v5973_v11  ;;  %vm2125_vm1 = vcmp.gt.f32.partialorder %v2109_v55, 0.0  ;;  %v2141_v23 = vmul.f32 0.25, %v2109_v55 }
 0x232   : > { %v2157_v9 = vmul.f32 0.05, %v2109_v55  ;;  %vm2126_vm2 = vcmp.gt.f32.partialorder %v2110_v26, 0.0  ;;  %v2142_v22 = vmul.f32 0.25, %v2110_v26  ;;  %v2158_v51 = vmul.f32 0.05, %v2110_v26 }
 0x233   : > { %vm2131_vm3 = vcmp.gt.f32.partialorder %v2115_v37, 0.0  ;;  %v2147_v41 = vmul.f32 0.25, %v2115_v37  ;;  %v2163_v14 = vmul.f32 0.05, %v2115_v37  ;;  %vm2132_vm4 = vcmp.gt.f32.partialorder %v2116_v18, 0.0 }
 0x234   : > { %v2148_v13 = vmul.f32 0.25, %v2116_v18  ;;  %v2164_v17 = vmul.f32 0.05, %v2116_v18  ;;  %v2173_v45 = vsel %vm2125_vm1, %v2141_v23, %v2157_v9  ;;  %v2174_v43 = vsel %vm2126_vm2, %v2142_v22, %v2158_v51 }
 0x235   : > { %v2179_v7 = vsel %vm2131_vm3, %v2147_v41, %v2163_v14  ;;  %v6130_v26 = vadd.f32 %v2173_v45, %v5995_v25 }
 0x236   : > { %v6027_v12 = vpop.f32.mrf.mxu0  ;;  %v6029_v48 = vpop.f32.mrf.mxu1  ;;  %v6139_v32 = vadd.f32 %v2179_v7, %v6032_v4 }
 0x237   : > { %v2113_v38 = vadd.f32 %v6027_v12, %v5973_v11  ;;  %v2114_v5 = vadd.f32 %v6029_v48, %v5973_v11 }
 0x238   : > { %v6046_v10 = vpop.f32.mrf.mxu2  ;;  %v6048_v16 = vpop.f32.mrf.mxu3 }
 0x239   : > { %v2119_v24 = vadd.f32 %v6046_v10, %v5973_v11  ;;  %v2120_v57 = vadd.f32 %v6048_v16, %v5973_v11  ;;  %vm2129_vm5 = vcmp.gt.f32.partialorder %v2113_v38, 0.0  ;;  %v2145_v48 = vmul.f32 0.25, %v2113_v38 }
 0x23a   : > { %v2161_v33 = vmul.f32 0.05, %v2113_v38  ;;  %vm2130_vm6 = vcmp.gt.f32.partialorder %v2114_v5, 0.0  ;;  %v2146_v21 = vmul.f32 0.25, %v2114_v5  ;;  %v2162_v49 = vmul.f32 0.05, %v2114_v5 }
 0x23b   : > { %v2151_v1 = vmul.f32 0.25, %v2119_v24  ;;  %v2167_v53 = vmul.f32 0.05, %v2119_v24  ;;  %v2152_v10 = vmul.f32 0.25, %v2120_v57  ;;  %v2168_v31 = vmul.f32 0.05, %v2120_v57 }
 0x23c   : > { %v6106_v16 = vadd.f32 %v2169_v34, %v6019_v62  ;;  %vm2135_vm7 = vcmp.gt.f32.partialorder %v2119_v24, 0.0  ;;  %vm2136_vm8 = vcmp.gt.f32.partialorder %v2120_v57, 0.0  ;;  %v2180_v62 = vsel %vm2132_vm4, %v2148_v13, %v2164_v17 }
 0x23d   : > { %v2177_v44 = vsel %vm2129_vm5, %v2145_v48, %v2161_v33  ;;  %v2178_v0 = vsel %vm2130_vm6, %v2146_v21, %v2162_v49  ;;  %v2183_v3 = vsel %vm2135_vm7, %v2151_v1, %v2167_v53  ;;  %v2184_v60 = vsel %vm2136_vm8, %v2152_v10, %v2168_v31 }
 0x23e   : > { %v6064_v56 = vpop.f32.mrf.mxu0  ;;  %v6066_v20 = vpop.f32.mrf.mxu1  ;;  %v6133_v34 = vadd.f32 %v2174_v43, %v6012_v6  ;;  %v6149_v6 = vadd.f32 %v2178_v0, %v6044_v36  ;;  %v6155_v38 = vadd.f32 %v2184_v60, %v6075_v42 }
 0x23f   : > { %v6125_v63 = vadd.f32 %v6064_v56, %v5973_v11  ;;  %v6142_v56 = vadd.f32 %v2180_v62, %v6035_v19  ;;  %v2118_v4 = vadd.f32 %v6066_v20, %v5973_v11 }
 0x240   : > { %v6068_v27 = vpop.f32.mrf.mxu2  ;;  %v6070_v54 = vpop.f32.mrf.mxu3 }
 0x241   : > { %v2560_v55 = vadd.f32 %v6068_v27, %v5973_v11  ;;  %v2561_v15 = vadd.f32 %v6070_v54, %v5973_v11  ;;  %v6145_v27 = vadd.f32 %v2177_v44, %v6042_v59  ;;  %v6152_v54 = vadd.f32 %v2183_v3, %v6056_v8 }
 0x242   : > { %vm2133_vm9 = vcmp.gt.f32.partialorder %v6125_v63, 0.0  ;;  %v2149_v19 = vmul.f32 0.25, %v6125_v63  ;;  %v2165_v22 = vmul.f32 0.05, %v6125_v63  ;;  %vm2134_vm14 = vcmp.gt.f32.partialorder %v2118_v4, 0.0 }
 0x243   : > { %vm2576_vm10 = vcmp.gt.f32.partialorder %v2560_v55, 0.0  ;;  %v2592_v59 = vmul.f32 0.25, %v2560_v55  ;;  %v2608_v23 = vmul.f32 0.05, %v2560_v55  ;;  %vm2577_vm11 = vcmp.gt.f32.partialorder %v2561_v15, 0.0 }
 0x244   : > { %v2593_v9 = vmul.f32 0.25, %v2561_v15  ;;  %v2609_v36 = vmul.f32 0.05, %v2561_v15  ;;  %v2150_v57 = vmul.f32 0.25, %v2118_v4  ;;  %v2166_v41 = vmul.f32 0.05, %v2118_v4 }
 0x245   : > { %v2624_v13 = vsel %vm2576_vm10, %v2592_v59, %v2608_v23  ;;  %v6177_v55 = vsel %vm2133_vm9, %v2149_v19, %v2165_v22 }
 0x246   : > { %v2255_v46 = vpop.f32.mrf.mxu0  ;;  %v2275_v58 = vpop.f32.mrf.mxu1  ;;  %v2625_v17 = vsel %vm2577_vm11, %v2593_v9, %v2609_v36  ;;  %v6180_v15 = vsel %vm2134_vm14, %v2150_v57, %v2166_v41 }
 0x247   : > { %v2558_v37 = vadd.f32 %v2255_v46, %v5973_v11  ;;  %v2559_v25 = vadd.f32 %v2275_v58, %v5973_v11 }
 0x248   : > { %v2375_v12 = vpop.f32.mrf.mxu2  ;;  %v2395_v2 = vpop.f32.mrf.mxu3 }
 0x249   : > { %v2590_v5 = vmul.f32 0.25, %v2558_v37  ;;  %v2606_v46 = vmul.f32 0.05, %v2558_v37  ;;  %v2591_v8 = vmul.f32 0.25, %v2559_v25  ;;  %v2607_v58 = vmul.f32 0.05, %v2559_v25 }
 0x24a   : > { %v2564_v42 = vadd.f32 %v2375_v12, %v5973_v11  ;;  %vm2574_vm12 = vcmp.gt.f32.partialorder %v2558_v37, 0.0  ;;  %vm2575_vm13 = vcmp.gt.f32.partialorder %v2559_v25, 0.0  ;;  %v2565_v20 = vadd.f32 %v2395_v2, %v5973_v11 }
 0x24b   : > { %v2622_v2 = vsel %vm2574_vm12, %v2590_v5, %v2606_v46  ;;  %v2623_v49 = vsel %vm2575_vm13, %v2591_v8, %v2607_v58  ;;  %v2657_v25 = vadd.f32 %v2625_v17, %v6089_v61 }
 0x24c   : > { %vm2580_vm15 = vcmp.gt.f32.partialorder %v2564_v42, 0.0  ;;  %v2596_v53 = vmul.f32 0.25, %v2564_v42  ;;  %v2612_v10 = vmul.f32 0.05, %v2564_v42  ;;  %vm2581_vm0 = vcmp.gt.f32.partialorder %v2565_v20, 0.0 }
 0x24d   : > { %v2597_v31 = vmul.f32 0.25, %v2565_v20  ;;  %v2613_v45 = vmul.f32 0.05, %v2565_v20  ;;  %v2654_v59 = vadd.f32 %v2622_v2, %v6106_v16  ;;  %v2655_v63 = vadd.f32 %v2623_v49, %v6109_v40 }
 0x24e   : > { %v2335_v50 = vpop.f32.mrf.mxu0  ;;  %v2355_v28 = vpop.f32.mrf.mxu1  ;;  %v2628_v23 = vsel %vm2580_vm15, %v2596_v53, %v2612_v10 }
 0x24f   : > { %v2562_v14 = vadd.f32 %v2335_v50, %v5973_v11  ;;  %v2563_v48 = vadd.f32 %v2355_v28, %v5973_v11  ;;  %v2629_v4 = vsel %vm2581_vm0, %v2597_v31, %v2613_v45  ;;  %v6195_v61 = vadd.f32 %v2628_v23, %v6112_v47 }
 0x250   : > { %v2455_v18 = vpop.f32.mrf.mxu2  ;;  %v2475_v52 = vpop.f32.mrf.mxu3  ;;  %v6200_v42 = vadd.f32 %v2629_v4, %v6115_v29 }
 0x251   : > { %v2568_v12 = vadd.f32 %v2455_v18, %v5973_v11  ;;  %v2569_v1 = vadd.f32 %v2475_v52, %v5973_v11  ;;  %vm2578_vm1 = vcmp.gt.f32.partialorder %v2562_v14, 0.0  ;;  %v2594_v43 = vmul.f32 0.25, %v2562_v14 }
 0x252   : > { %v2610_v7 = vmul.f32 0.05, %v2562_v14  ;;  %vm2579_vm2 = vcmp.gt.f32.partialorder %v2563_v48, 0.0  ;;  %v2595_v62 = vmul.f32 0.25, %v2563_v48  ;;  %v2611_v44 = vmul.f32 0.05, %v2563_v48 }
 0x253   : > { %v2600_v0 = vmul.f32 0.25, %v2568_v12  ;;  %v2616_v50 = vmul.f32 0.05, %v2568_v12  ;;  %v2601_v28 = vmul.f32 0.25, %v2569_v1  ;;  %v2617_v3 = vmul.f32 0.05, %v2569_v1 }
 0x254   : > { %vm2584_vm3 = vcmp.gt.f32.partialorder %v2568_v12, 0.0  ;;  %vm2585_vm4 = vcmp.gt.f32.partialorder %v2569_v1, 0.0  ;;  %v2656_v52 = vadd.f32 %v2624_v13, %v6086_v35  ;;  %v2626_v19 = vsel %vm2578_vm1, %v2594_v43, %v2610_v7 }
 0x255   : > { %v2627_v9 = vsel %vm2579_vm2, %v2595_v62, %v2611_v44  ;;  %v2632_v46 = vsel %vm2584_vm3, %v2600_v0, %v2616_v50  ;;  %v2633_v8 = vsel %vm2585_vm4, %v2601_v28, %v2617_v3  ;;  %v6203_v22 = vadd.f32 %v2626_v19, %v6130_v26 }
 0x256   : > { %v2415_v51 = vpop.f32.mrf.mxu0  ;;  %v2435_v24 = vpop.f32.mrf.mxu1  ;;  %v6206_v20 = vadd.f32 %v2627_v9, %v6133_v34  ;;  %v6211_v47 = vadd.f32 %v2632_v46, %v6139_v32  ;;  %v6214_v57 = vadd.f32 %v2633_v8, %v6142_v56 }
 0x257   : > { %v2566_v60 = vadd.f32 %v2415_v51, %v5973_v11  ;;  %v2567_v16 = vadd.f32 %v2435_v24, %v5973_v11 }
 0x258   : > { %v6169_v33 = vpop.f32.mrf.mxu2  ;;  %v6171_v21 = vpop.f32.mrf.mxu3 }
 0x259   : > { %v2598_v35 = vmul.f32 0.25, %v2566_v60  ;;  %v2614_v58 = vmul.f32 0.05, %v2566_v60  ;;  %vm2582_vm5 = vcmp.gt.f32.partialorder %v2566_v60, 0.0  ;;  %vm2583_vm8 = vcmp.gt.f32.partialorder %v2567_v16, 0.0 }
 0x25a   : > { %v2599_v26 = vmul.f32 0.25, %v2567_v16  ;;  %v2615_v13 = vmul.f32 0.05, %v2567_v16  ;;  %v6223_v32 = vadd.f32 %v6169_v33, %v5973_v11  ;;  %v6232_v1 = vadd.f32 %v6171_v21, %v5973_v11 }
 0x25b   : > { %v2630_v41 = vsel %vm2582_vm5, %v2598_v35, %v2614_v58 }
 0x25c   : > { %v6228_v49 = vadd.f32 %v2630_v41, %v6145_v27  ;;  %v2631_v0 = vsel %vm2583_vm8, %v2599_v26, %v2615_v13  ;;  %vm2588_vm11 = vcmp.gt.f32.partialorder %v6223_v32, 0.0  ;;  %v2604_v19 = vmul.f32 0.25, %v6223_v32 }
 0x25d   : > { %v6242_v4 = vadd.f32 %v2631_v0, %v6149_v6  ;;  %v2620_v9 = vmul.f32 0.05, %v6223_v32  ;;  %v2621_v6 = vmul.f32 0.05, %v6232_v1  ;;  %vm2589_vm0 = vcmp.gt.f32.partialorder %v6232_v1, 0.0 }
 0x25e   : > { %v6182_v37 = vpop.f32.mrf.mxu0  ;;  %v6184_v18 = vpop.f32.mrf.mxu1 }
 0x25f   : > { %v6254_v58 = vadd.f32 %v6182_v37, %v5973_v11  ;;  %v6264_v37 = vadd.f32 %v6184_v18, %v5973_v11 }
 0x260   : > { %v2748_v36 = vpop.f32.mrf.mxu2  ;;  %v2768_v5 = vpop.f32.mrf.mxu3 }
 0x261   : > { %v3013_v40 = vadd.f32 %v2748_v36, %v5973_v11  ;;  %v3014_v51 = vadd.f32 %v2768_v5, %v5973_v11  ;;  %vm2586_vm3 = vcmp.gt.f32.partialorder %v6254_v58, 0.0  ;;  %vm2587_vm4 = vcmp.gt.f32.partialorder %v6264_v37, 0.0 }
 0x263   : > { %vm3029_vm6 = vcmp.gt.f32.partialorder %v3013_v40, 0.0  ;;  %v3045_v24 = vmul.f32 0.25, %v3013_v40  ;;  %v3061_v29 = vmul.f32 0.05, %v3013_v40  ;;  %vm3030_vm7 = vcmp.gt.f32.partialorder %v3014_v51, 0.0 }
 0x264   : > { %v3046_v14 = vmul.f32 0.25, %v3014_v51  ;;  %v3062_v34 = vmul.f32 0.05, %v3014_v51 }
 0x265   : > { %v3077_v56 = vsel %vm3029_vm6, %v3045_v24, %v3061_v29 }
 0x266   : > { %v2708_v17 = vpop.f32.mrf.mxu0  ;;  %v2728_v48 = vpop.f32.mrf.mxu1  ;;  %v3109_v53 = vadd.f32 %v3077_v56, %v2656_v52  ;;  %v3078_v10 = vsel %vm3030_vm7, %v3046_v14, %v3062_v34 }
 0x267   : > { %v3011_v12 = vadd.f32 %v2708_v17, %v5973_v11  ;;  %v3012_v2 = vadd.f32 %v2728_v48, %v5973_v11  ;;  %v3110_v33 = vadd.f32 %v3078_v10, %v2657_v25 }
 0x268   : > { %v2828_v31 = vpop.f32.mrf.mxu2  ;;  %v2848_v45 = vpop.f32.mrf.mxu3  ;;  %3125 = vst [vmem:[%s6219_s7 + $0x10] sm:$0xff] %v3109_v53  ;;  %v2636_v53 = vsel %vm2588_vm11, %v2604_v19, %v2620_v9 }
 0x269   : > { %vm3027_vm9 = vcmp.gt.f32.partialorder %v3011_v12, 0.0  ;;  %v3043_v43 = vmul.f32 0.25, %v3011_v12  ;;  %v3059_v7 = vmul.f32 0.05, %v3011_v12  ;;  %vm3028_vm10 = vcmp.gt.f32.partialorder %v3012_v2, 0.0  ;;  %3126 = vst [vmem:[%s6219_s7 + $0x18] sm:$0xff] %v3110_v33 }
 0x26a   : > { %v3044_v62 = vmul.f32 0.25, %v3012_v2  ;;  %v3060_v44 = vmul.f32 0.05, %v3012_v2  ;;  %v3017_v27 = vadd.f32 %v2828_v31, %v5973_v11  ;;  %v3018_v50 = vadd.f32 %v2848_v45, %v5973_v11 }
 0x26b   : > { %v3075_v21 = vsel %vm3027_vm9, %v3043_v43, %v3059_v7  ;;  %v2618_v7 = vmul.f32 0.05, %v6254_v58 }
 0x26c   : > { %v3107_v28 = vadd.f32 %v3075_v21, %v2654_v59  ;;  %v3076_v3 = vsel %vm3028_vm10, %v3044_v62, %v3060_v44  ;;  %vm3033_vm12 = vcmp.gt.f32.partialorder %v3017_v27, 0.0  ;;  %v3049_v60 = vmul.f32 0.25, %v3017_v27 }
 0x26d   : > { %v3108_v52 = vadd.f32 %v3076_v3, %v2655_v63  ;;  %v3065_v25 = vmul.f32 0.05, %v3017_v27  ;;  %vm3034_vm13 = vcmp.gt.f32.partialorder %v3018_v50, 0.0  ;;  %v3050_v23 = vmul.f32 0.25, %v3018_v50 }
 0x26e   : > { %3123 = vst [vmem:[%s6219_s7] sm:$0xff] %v3107_v28  ;;  %v3066_v36 = vmul.f32 0.05, %v3018_v50  ;;  %v2788_v5 = vpop.f32.mrf.mxu0  ;;  %v2808_v46 = vpop.f32.mrf.mxu1  ;;  %v2605_v59 = vmul.f32 0.25, %v6232_v1 }
 0x26f   : > { %3124 = vst [vmem:[%s6219_s7 + $0x8] sm:$0xff] %v3108_v52  ;;  %v3081_v8 = vsel %vm3033_vm12, %v3049_v60, %v3065_v25  ;;  %v3015_v63 = vadd.f32 %v2788_v5, %v5973_v11  ;;  %v3016_v35 = vadd.f32 %v2808_v46, %v5973_v11  ;;  %v2603_v52 = vmul.f32 0.25, %v6264_v37 }
 0x270   : > { %v3113_v16 = vadd.f32 %v3081_v8, %v6195_v61  ;;  %v3082_v40 = vsel %vm3034_vm13, %v3050_v23, %v3066_v36  ;;  %v2908_v51 = vpop.f32.mrf.mxu2  ;;  %v2928_v24 = vpop.f32.mrf.mxu3  ;;  %v2637_v18 = vsel %vm2589_vm0, %v2605_v59, %v2621_v6  ;;  %v2213_v59 = vadd.f32 %v6177_v55, %v6080_v39 }
 0x271   : > { %v3114_v41 = vadd.f32 %v3082_v40, %v6200_v42  ;;  %vm3031_vm14 = vcmp.gt.f32.partialorder %v3015_v63, 0.0  ;;  %v3047_v29 = vmul.f32 0.25, %v3015_v63  ;;  %v3063_v14 = vmul.f32 0.05, %v3015_v63 }
 0x272   : > { %3129 = vst [vmem:[%s6219_s7 + $0x30] sm:$0xff] %v3113_v16  ;;  %vm3032_vm15 = vcmp.gt.f32.partialorder %v3016_v35, 0.0  ;;  %v3048_v26 = vmul.f32 0.25, %v3016_v35  ;;  %v3064_v13 = vmul.f32 0.05, %v3016_v35  ;;  %v3021_v34 = vadd.f32 %v2908_v51, %v5973_v11 }
 0x273   : > { %3130 = vst [vmem:[%s6219_s7 + $0x38] sm:$0xff] %v3114_v41  ;;  %v3079_v61 = vsel %vm3031_vm14, %v3047_v29, %v3063_v14  ;;  %v3022_v42 = vadd.f32 %v2928_v24, %v5973_v11  ;;  %v2668_v8 = vadd.f32 %v2636_v53, %v6152_v54  ;;  %v2669_v63 = vadd.f32 %v2637_v18, %v6155_v38 }
 0x274   : > { %v3111_v17 = vadd.f32 %v3079_v61, %v6203_v22  ;;  %v3080_v48 = vsel %vm3032_vm15, %v3048_v26, %v3064_v13  ;;  %vm3037_vm1 = vcmp.gt.f32.partialorder %v3021_v34, 0.0  ;;  %v3053_v56 = vmul.f32 0.25, %v3021_v34 }
 0x275   : > { %v3112_v12 = vadd.f32 %v3080_v48, %v6206_v20  ;;  %v3069_v2 = vmul.f32 0.05, %v3021_v34  ;;  %vm3038_vm2 = vcmp.gt.f32.partialorder %v3022_v42, 0.0  ;;  %v3054_v1 = vmul.f32 0.25, %v3022_v42 }
 0x276   : > { %3127 = vst [vmem:[%s6219_s7 + $0x20] sm:$0xff] %v3111_v17  ;;  %v3070_v10 = vmul.f32 0.05, %v3022_v42  ;;  %v2868_v31 = vpop.f32.mrf.mxu0  ;;  %v2888_v45 = vpop.f32.mrf.mxu1  ;;  %v2602_v22 = vmul.f32 0.25, %v6254_v58  ;;  %v2214_v39 = vadd.f32 %v6180_v15, %v6083_v30 }
 0x277   : > { %3128 = vst [vmem:[%s6219_s7 + $0x28] sm:$0xff] %v3112_v12  ;;  %v3085_v33 = vsel %vm3037_vm1, %v3053_v56, %v3069_v2  ;;  %v3019_v20 = vadd.f32 %v2868_v31, %v5973_v11  ;;  %v3020_v43 = vadd.f32 %v2888_v45, %v5973_v11 }
 0x278   : > { %v3117_v32 = vadd.f32 %v3085_v33, %v6211_v47  ;;  %v3086_v62 = vsel %vm3038_vm2, %v3054_v1, %v3070_v10  ;;  %v2988_v44 = vpop.f32.mrf.mxu2  ;;  %v3008_v27 = vpop.f32.mrf.mxu3  ;;  %v2619_v47 = vmul.f32 0.05, %v6264_v37  ;;  %v2634_v16 = vsel %vm2586_vm3, %v2602_v22, %v2618_v7 }
 0x279   : > { %v3118_v0 = vadd.f32 %v3086_v62, %v6214_v57  ;;  %vm3035_vm5 = vcmp.gt.f32.partialorder %v3019_v20, 0.0  ;;  %v3051_v21 = vmul.f32 0.25, %v3019_v20  ;;  %v3067_v50 = vmul.f32 0.05, %v3019_v20 }
 0x27a   : > { %3133 = vst [vmem:[%s6219_s7 + $0x50] sm:$0xff] %v3117_v32  ;;  %vm3036_vm6 = vcmp.gt.f32.partialorder %v3020_v43, 0.0  ;;  %v3052_v28 = vmul.f32 0.25, %v3020_v43  ;;  %v3068_v3 = vmul.f32 0.05, %v3020_v43  ;;  %v3025_v60 = vadd.f32 %v2988_v44, %v5973_v11 }
 0x27b   : > { %3134 = vst [vmem:[%s6219_s7 + $0x58] sm:$0xff] %v3118_v0  ;;  %v3083_v25 = vsel %vm3035_vm5, %v3051_v21, %v3067_v50  ;;  %v3026_v23 = vadd.f32 %v3008_v27, %v5973_v11  ;;  %v2635_v54 = vsel %vm2587_vm4, %v2603_v52, %v2619_v47  ;;  %v2666_v29 = vadd.f32 %v2634_v16, %v2213_v59 }
 0x27c   : > { %v3115_v57 = vadd.f32 %v3083_v25, %v6228_v49  ;;  %v3084_v19 = vsel %vm3036_vm6, %v3052_v28, %v3068_v3  ;;  %vm3041_vm7 = vcmp.gt.f32.partialorder %v3025_v60, 0.0  ;;  %v3057_v9 = vmul.f32 0.25, %v3025_v60 }
 0x27d   : > { %v3116_v36 = vadd.f32 %v3084_v19, %v6242_v4  ;;  %v3073_v5 = vmul.f32 0.05, %v3025_v60  ;;  %vm3042_vm8 = vcmp.gt.f32.partialorder %v3026_v23, 0.0  ;;  %v3058_v46 = vmul.f32 0.25, %v3026_v23 }
 0x27e   : > { %3131 = vst [vmem:[%s6219_s7 + $0x40] sm:$0xff] %v3115_v57  ;;  %v3074_v35 = vmul.f32 0.05, %v3026_v23  ;;  %v2948_v6 = vpop.f32.mrf.mxu0  ;;  %v2968_v49 = vpop.f32.mrf.mxu1  ;;  %v2667_v26 = vadd.f32 %v2635_v54, %v2214_v39 }
 0x27f   : > { %3132 = vst [vmem:[%s6219_s7 + $0x48] sm:$0xff] %v3116_v36  ;;  %v3089_v4 = vsel %vm3041_vm7, %v3057_v9, %v3073_v5  ;;  %v3023_v40 = vadd.f32 %v2948_v6, %v5973_v11  ;;  %v3024_v51 = vadd.f32 %v2968_v49, %v5973_v11 }
 0x280   : > { %v3121_v38 = vadd.f32 %v3089_v4, %v2668_v8  ;;  %v3090_v55 = vsel %vm3042_vm8, %v3058_v46, %v3074_v35 }
 0x281   : > { %v3122_v24 = vadd.f32 %v3090_v55, %v2669_v63  ;;  %vm3039_vm9 = vcmp.gt.f32.partialorder %v3023_v40, 0.0  ;;  %v3055_v58 = vmul.f32 0.25, %v3023_v40  ;;  %v3071_v41 = vmul.f32 0.05, %v3023_v40 }
 0x282   : > { %3137 = vst [vmem:[%s6219_s7 + $0x70] sm:$0xff] %v3121_v38  ;;  %vm3040_vm10 = vcmp.gt.f32.partialorder %v3024_v51, 0.0  ;;  %v3056_v14 = vmul.f32 0.25, %v3024_v51  ;;  %v3072_v11 = vmul.f32 0.05, %v3024_v51 }
 0x283   : > { %3138 = vst [vmem:[%s6219_s7 + $0x78] sm:$0xff] %v3122_v24  ;;  %v3087_v30 = vsel %vm3039_vm9, %v3055_v58, %v3071_v41 }
 0x284   : > { %v3119_v15 = vadd.f32 %v3087_v30, %v2666_v29  ;;  %v3088_v13 = vsel %vm3040_vm10, %v3056_v14, %v3072_v11 }
 0x285   : > { %v3120_v34 = vadd.f32 %v3088_v13, %v2667_v26 }
 0x286   : > { %3135 = vst [vmem:[%s6219_s7 + $0x60] sm:$0xff] %v3119_v15 }
 0x287   : > { %3136 = vst [vmem:[%s6219_s7 + $0x68] sm:$0xff] %v3120_v34 }
 0x288 PF: > { %s13_s12 = sadd.s32 1, %s3818_s12  }
 0x289   : > { %p10_p4 = scmp.ge.s32.totalorder %s13_s12, 4  }
 0x28b   :  { %12 = sbr.rel (!%p10_p4) target bundleno = 1 (0x1), region = 68 }

// kernel: generator_8192_forward.5
= control target key start
LH: loop header
LB: loop body
LE: loop exit
PB: predicated region body
PF: predicated region fallthrough
CT: control target
= control target key end

     0   :  { %s2124_s12 = smov 0   ;;  %s3711_s0 = inlined_call_operand.vmem [shape: f32[2,4,8,640], index: 0, kind: input, shape index: {}]   ;;  %s3712_s1 = inlined_call_operand.vmem [shape: f32[4,16,224], index: 1, kind: input, shape index: {}]   ;;  %s3713_s2 = inlined_call_operand.vmem [shape: f32[16,1], index: 2, kind: input, shape index: {}]   ;;  %s3714_s3 = inlined_call_operand.vmem [shape: f32[2,16,512], index: 3, kind: output, shape index: {}]  }
   0x1 LB: > { %s1689_s13 = sadd.s32 4294967295, %s2097_s12   ;;  %p1693_p0 = scmp.ge.s32.totalorder %s2097_s12, 1  ;;  %s2097_s12 = sphi %s2124_s12, %s13_s12  }
   0x2   : > { %p137_p1 = scmp.lt.s32.totalorder %s2097_s12, 3 }
   0x4   : > { %p138_p2 = pnand %p1693_p0, %p137_p1 }
   0x6   : > { %141 = sbr.rel (%p138_p2) target bundleno = 707 (0x2c3), region = 32 }
   0xb   : > { %p161_p3 = scmp.lt.s32.totalorder %s1689_s13, 1  ;;  %s2099_s18 = smov 126   ;;  %vm297_vm0 = vcmask 1031168   ;;  %vm209_vm1 = vcmask 1039360   ;;  %vm370_vm2 = vcmask 1022976   ;;  %vm553_vm3 = vcmask 1014784  }
   0xc   : > { %s2100_s19 = smov 127   ;;  %s2101_s20 = smov 125   ;;  %vm666_vm4 = vcmask 785408  }
   0xd   : > { %s4180_s13 = smov (!%p161_p3, %s1689_s13), 1  ;;  %s2102_s21 = smov 124  }
   0xe   : > { %s1759_s14 = smul.u32 160, %s4180_s13  ;;  %s1758_s6 = sshll.u32 %s4180_s13, 6 }
   0xf   : > { %s3669_s9 = scalar_lea.vmem %s3714_s3, %s1758_s6 }
  0x10   : > { %s2138_s17 = scalar_lea.vmem %s3711_s0, %s1759_s14 }
  0x11   : > { %v2141_v0 = vld [vmem:[%s2138_s17 + $0x80] sm:$0xff]  ;;  %v2144_v1 = vld [vmem:[%s2138_s17 + $0x88] sm:$0xff]  ;;  %v2165_v9 = vld [vmem:[%s2138_s17 + $0x58] sm:$0xff] }
  0x12   : > { %v1703_v2 = vld [vmem:[%s2138_s17 + $0x60] sm:$0xff]  ;;  %v1783_v3 = vpack.i.bf16 %v2144_v1, %v2141_v0  ;;  %v2150_v4 = vld [vmem:[%s2138_s17 + $0x68] sm:$0xff]  ;;  %v2168_v10 = vld [vmem:[%s2138_s17 + $0x90] sm:$0xff] }
  0x13   : > { %v2153_v5 = vld [vmem:[%s2138_s17] sm:$0xff]  ;;  %v2156_v6 = vld [vmem:[%s2138_s17 + $0x8] sm:$0xff]  ;;  %v1793_v7 = vpack.i.bf16 %v2150_v4, %v1703_v2  ;;  %v2171_v11 = vld [vmem:[%s2138_s17 + $0x30] sm:$0xff]  ;;  %v1788_v14 = vpack.i.bf16 %v2165_v9, %v2168_v10  ;;  %v1823_v24 = vpack.i.bf16 %v1703_v2, %v2165_v9  ;;  %v1818_v26 = vpack.i.bf16 %v2168_v10, %v2144_v1 }
  0x14   : > { %v1773_v8 = vpack.i.bf16 %v2156_v6, %v2153_v5  ;;  %1784 = vrot.lane.b32.xlu1 %v1783_v3, %s2099_s18  ;;  %v2174_v12 = vld [vmem:[%s2138_s17 + $0x38] sm:$0xff]  ;;  %v173_v13 = vld [vmem:[%s2138_s17 + $0x10] sm:$0xff]  ;;  %v2195_v20 = vld [vmem:[%s2138_s17 + $0x40] sm:$0xff]  ;;  %v1828_v25 = vpack.i.bf16 %v2171_v11, %v2150_v4 }
  0x15   : > { %1794 = vrot.lane.b32.xlu2 %v1793_v7, %s2099_s18  ;;  %v1798_v15 = vpack.i.bf16 %v2174_v12, %v2171_v11  ;;  %v1778_v16 = vpack.i.bf16 %v2141_v0, %v173_v13  ;;  %v2186_v17 = vld [vmem:[%s2138_s17 + $0x18] sm:$0xff]  ;;  %v2189_v18 = vld [vmem:[%s2138_s17 + $0x50] sm:$0xff]  ;;  %3910 = vst [vmem:[#allocation3_spill] sm:$0xff] %v2195_v20  ;;  %v1803_v23 = vpack.i.bf16 %v2156_v6, %v2195_v20  ;;  %v2214_v27 = vld [vmem:[%s2138_s17 + $0x28] sm:$0xff] }
  0x16   : > { %1774 = vrot.lane.b32.xlu0 %v1773_v8, %s2100_s19  ;;  %3909 = vst [vmem:[#allocation2_spill] sm:$0xff] %v2186_v17  ;;  %v2192_v19 = vld [vmem:[%s2138_s17 + $0x78] sm:$0xff]  ;;  %v1808_v21 = vpack.i.bf16 %v2186_v17, %v173_v13  ;;  %v1838_v28 = vpack.i.bf16 %v2195_v20, %v2174_v12  ;;  %v1833_v30 = vpack.i.bf16 %v2153_v5, %v2214_v27  ;;  %v1710_v31 = vld [vmem:[%s2138_s17 + $0x70] sm:$0xff]  ;;  %v190_v33 = vld [vmem:[%s2138_s17 + $0x20] sm:$0xff] }
  0x17   : > { %v1813_v22 = vpack.i.bf16 %v2189_v18, %v2192_v19  ;;  %v1843_v29 = vpack.i.bf16 %v2192_v19, %v2186_v17  ;;  %v1711_v32 = vld [vmem:[%s2138_s17 + $0x98] sm:$0xff]  ;;  %v1709_v34 = vld [vmem:[%s2138_s17 + $0x48] sm:$0xff]  ;;  %v1848_v37 = vpack.i.bf16 %v2214_v27, %v2189_v18  ;;  %v2237_v38 = vpack.i.bf16 %v173_v13, %v2156_v6 }
  0x18   : > { %v1853_v35 = vpack.i.bf16 %v1710_v31, %v1711_v32  ;;  %v1858_v36 = vpack.i.bf16 %v190_v33, %v1709_v34  ;;  %v2242_v39 = vpack.i.bf16 %v1711_v32, %v2168_v10  ;;  %v2246_v40 = vpack.i.bf16 %v190_v33, %v2186_v17 }
  0x19   : > { %v2250_v41 = vpack.i.bf16 %v1710_v31, %v2150_v4  ;;  %v2254_v42 = vpack.i.bf16 %v1709_v34, %v2195_v20 }
  0x1c   : > { %1789 = vrot.lane.b32.xlu1 %v1788_v14, %s2099_s18 }
  0x1d   : > { %1799 = vrot.lane.b32.xlu2 %v1798_v15, %s2099_s18 }
  0x1e   : > { %1779 = vrot.lane.b32.xlu0 %v1778_v16, %s2100_s19 }
  0x24   : > { %1809 = vrot.lane.b32.xlu1 %v1808_v21, %s2099_s18 }
  0x25   : > { %1814 = vrot.lane.b32.xlu2 %v1813_v22, %s2099_s18 }
  0x26   : > { %1804 = vrot.lane.b32.xlu0 %v1803_v23, %s2099_s18 }
  0x2c   : > { %1824 = vrot.lane.b32.xlu1 %v1823_v24, %s2100_s19 }
  0x2d   : > { %1829 = vrot.lane.b32.xlu2 %v1828_v25, %s2100_s19 }
  0x2e   : > { %1819 = vrot.lane.b32.xlu0 %v1818_v26, %s2100_s19 }
  0x34   : > { %1839 = vrot.lane.b32.xlu1 %v1838_v28, %s2100_s19 }
  0x35   : > { %1844 = vrot.lane.b32.xlu2 %v1843_v29, %s2100_s19 }
  0x36   : > { %1834 = vrot.lane.b32.xlu0 %v1833_v30, %s2099_s18 }
  0x3c   : > { %1854 = vrot.lane.b32.xlu1 %v1853_v35, %s2099_s18 }
  0x3d   : > { %1859 = vrot.lane.b32.xlu2 %v1858_v36, %s2099_s18 }
  0x3e   : > { %1849 = vrot.lane.b32.xlu0 %v1848_v37, %s2100_s19 }
  0x44   : > { %1869 = vrot.lane.b32.xlu1 %v1858_v36, %s2100_s19 }
  0x45   : > { %1874 = vrot.lane.b32.xlu2 %v1783_v3, %s2101_s20 }
  0x46   : > { %1864 = vrot.lane.b32.xlu0 %v1853_v35, %s2100_s19 }
  0x4c   : > { %1884 = vrot.lane.b32.xlu1 %v1798_v15, %s2101_s20 }
  0x4d   : > { %1889 = vrot.lane.b32.xlu2 %v2237_v38, %s2101_s20 }
  0x4e   : > { %1879 = vrot.lane.b32.xlu0 %v1823_v24, %s2101_s20 }
  0x55   : > { %1899 = vrot.lane.b32.xlu2 %v1833_v30, %s2101_s20 }
  0x56   : > { %1894 = vrot.lane.b32.xlu0 %v1813_v22, %s2101_s20 }
  0x5d   : > { %1904 = vrot.lane.b32.xlu2 %v2242_v39, %s2101_s20 }
  0x5e   : > { %1919 = vrot.lane.b32.xlu0 %v1823_v24, %s2102_s21 }
  0x65   : > { %1909 = vrot.lane.b32.xlu2 %v2250_v41, %s2101_s20 }
  0x66   : > { %1924 = vrot.lane.b32.xlu0 %v2246_v40, %s2101_s20 }
  0x6d   : > { %1914 = vrot.lane.b32.xlu2 %v2254_v42, %s2101_s20 }
  0x6f   : > { %v2256_v43 = vpop.permute.xlu2 %1794 }
  0x70   : > { %v3723_v49 = vunpack.i.h.bf16 %v2256_v43  ;;  %v1796_v50 = vunpack.i.l.bf16 %v2256_v43 }
  0x72   : > { %v2278_v58 = vsel %vm297_vm0, %v1796_v50, %v3723_v49 }
  0x73   : > { %3911 = vst [vmem:[#allocation4_spill] sm:$0xff] %v2278_v58 }
  0x77   : > { %v2259_v44 = vpop.permute.xlu2 %1799 }
  0x78   : > { %v1802_v2 = vunpack.i.h.bf16 %v2259_v44  ;;  %v1801_v3 = vunpack.i.l.bf16 %v2259_v44 }
  0x7a   : > { %v2306_v14 = vsel %vm297_vm0, %v1801_v3, %v1802_v2 }
  0x7b   : > { %3914 = vst [vmem:[#allocation7_spill] sm:$0xff] %v2306_v14 }
  0x7f   : > { %v1815_v45 = vpop.permute.xlu2 %1814 }
  0x80   : > { %v1816_v22 = vunpack.i.l.bf16 %v1815_v45  ;;  %v1817_v23 = vunpack.i.h.bf16 %v1815_v45 }
  0x86   : > { %v1785_v46 = vpop.permute.xlu1 %1784 }
  0x87   : > { %v2261_v47 = vpop.permute.xlu2 %1829  ;;  %v1787_v51 = vunpack.i.h.bf16 %v1785_v46  ;;  %v1786_v52 = vunpack.i.l.bf16 %v1785_v46 }
  0x88   : > { %v2263_v48 = vpop.permute.xlu0 %1774  ;;  %v3721_v46 = vunpack.i.h.bf16 %v2261_v47 }
  0x89   : > { %v2281_v59 = vsel %vm297_vm0, %v1786_v52, %v1787_v51  ;;  %v2329_v33 = vsel %vm297_vm0, %v1816_v22, %v1786_v52  ;;  %v3944_v20 = vunpack.i.h.bf16 %v2263_v48 }
  0x8a   : > { %3916 = vst [vmem:[#allocation9_spill] sm:$0xff] %v2329_v33 }
  0x8e   : > { %v2267_v53 = vpop.permute.xlu1 %1789 }
  0x8f   : > { %v1792_v54 = vunpack.i.h.bf16 %v2267_v53  ;;  %v3724_v55 = vunpack.i.l.bf16 %v2267_v53  ;;  %v2271_v56 = vpop.permute.xlu2 %1844 }
  0x90   : > { %v2273_v57 = vpop.permute.xlu0 %1779 }
  0x91   : > { %v2284_v60 = vsel %vm297_vm0, %v1792_v54, %v1796_v50  ;;  %v2289_v61 = vsel %vm297_vm0, %v1787_v51, %v3724_v55  ;;  %v1782_v25 = vunpack.i.h.bf16 %v2273_v57  ;;  %v2332_v34 = vsel %vm297_vm0, %v1817_v23, %v1792_v54 }
  0x92   : > { %3912 = vst [vmem:[#allocation5_spill] sm:$0xff] %v2284_v60  ;;  %v1933_v62 = vpack.i.bf16 %v2289_v61, %v2281_v59  ;;  %v1938_v63 = vpack.i.bf16 %v2278_v58, %v2284_v60 }
  0x93   : > { %3913 = vst [vmem:[#allocation6_spill] sm:$0xff] %v2289_v61 }
  0x94   : > { %1934 = vrot.lane.b32.xlu1 %v1933_v62, %s2102_s21  ;;  %1939 = vrot.lane.b32.xlu0 %v1938_v63, %s2102_s21  ;;  %3917 = vst [vmem:[#allocation10_spill] sm:$0xff] %v2332_v34 }
  0x96   : > { %v2299_v7 = vpop.permute.xlu1 %1809 }
  0x97   : > { %v2301_v8 = vpop.permute.xlu2 %1859 }
  0x98   : > { %v2303_v13 = vpop.permute.xlu0 %1804 }
  0x99   : > { %v3719_v15 = vunpack.i.l.bf16 %v2303_v13  ;;  %v1807_v62 = vunpack.i.h.bf16 %v2303_v13 }
  0x9b   : > { %v2312_v16 = vsel %vm297_vm0, %v1802_v2, %v3719_v15  ;;  %v1811_v15 = vunpack.i.l.bf16 %v2299_v7 }
  0x9c   : > { %3915 = vst [vmem:[#allocation8_spill] sm:$0xff] %v2312_v16  ;;  %v1943_v21 = vpack.i.bf16 %v2312_v16, %v2306_v14  ;;  %v1776_v16 = vunpack.i.l.bf16 %v2263_v48 }
  0x9e   : > { %1944 = vrot.lane.b32.xlu1 %v1943_v21, %s2102_s21  ;;  %v2317_v24 = vpop.permute.xlu1 %1824 }
  0x9f   : > { %v2322_v28 = vpop.permute.xlu2 %1874 }
  0xa0   : > { %v2320_v26 = vpop.permute.xlu0 %1819  ;;  %v3715_v31 = vunpack.i.h.bf16 %v2322_v28  ;;  %v3716_v32 = vunpack.i.l.bf16 %v2322_v28 }
  0xa1   : > { %v3718_v29 = vunpack.i.h.bf16 %v2320_v26  ;;  %v1821_v30 = vunpack.i.l.bf16 %v2320_v26 }
  0xa2   : > { %v2347_v37 = vsel %vm370_vm2, %v3716_v32, %v3715_v31  ;;  %v3722_v31 = vunpack.i.l.bf16 %v2271_v56  ;;  %v1781_v32 = vunpack.i.l.bf16 %v2273_v57 }
  0xa3   : > { %v2335_v35 = vsel %vm209_vm1, %v1782_v25, %v1821_v30  ;;  %v2340_v36 = vsel %vm209_vm1, %v1821_v30, %v3718_v29  ;;  %3920 = vst [vmem:[#allocation13_spill] sm:$0xff] %v2347_v37  ;;  %719 = vmatpush.msra.mxu2 %v2347_v37 }
  0xa4   : > { %3918 = vst [vmem:[#allocation11_spill] sm:$0xff] %v2335_v35  ;;  %v1958_v44 = vpack.i.bf16 %v2332_v34, %v2340_v36  ;;  %v1953_v45 = vpack.i.bf16 %v2335_v35, %v2329_v33  ;;  %v2399_v57 = vsel %vm209_vm1, %v1781_v32, %v3722_v31  ;;  %v2417_v31 = vsel %vm297_vm0, %v1807_v62, %v1811_v15 }
  0xa5   : > { %3919 = vst [vmem:[#allocation12_spill] sm:$0xff] %v2340_v36 }
  0xa6   : > { %1959 = vrot.lane.b32.xlu1 %v1958_v44, %s2102_s21  ;;  %1954 = vrot.lane.b32.xlu0 %v1953_v45, %s2102_s21  ;;  %v2357_v50 = vpop.permute.xlu1 %1839  ;;  %3927 = vst [vmem:[#allocation20_spill] sm:$0xff] %v2399_v57 }
  0xa7   : > { %v3717_v51 = vunpack.i.h.bf16 %v2357_v50  ;;  %v1841_v52 = vunpack.i.l.bf16 %v2357_v50  ;;  %3929 = vst [vmem:[#allocation22_spill] sm:$0xff] %v2417_v31 }
  0xa8   : > { %v1835_v54 = vpop.permute.xlu0 %1834 }
  0xa9   : > { %v1837_v63 = vunpack.i.h.bf16 %v1835_v54  ;;  %v1836_v2 = vunpack.i.l.bf16 %v1835_v54  ;;  %v2365_v21 = vsel %vm209_vm1, %v3721_v46, %v1841_v52  ;;  %v2370_v22 = vsel %vm209_vm1, %v1841_v52, %v3717_v51 }
  0xaa   : > { %3921 = vst [vmem:[#allocation14_spill] sm:$0xff] %v2365_v21  ;;  %v1847_v54 = vunpack.i.h.bf16 %v2271_v56  ;;  %v3720_v52 = vunpack.i.h.bf16 %v2263_v48 }
  0xab   : > { %3922 = vst [vmem:[#allocation15_spill] sm:$0xff] %v2370_v22  ;;  %v2373_v23 = vsel %vm297_vm0, %v1837_v63, %v1807_v62  ;;  %v2376_v30 = vsel %vm297_vm0, %v1836_v2, %v1801_v3  ;;  %v1827_v62 = vunpack.i.h.bf16 %v2317_v24 }
  0xac   : > { %3923 = vst [vmem:[#allocation16_spill] sm:$0xff] %v2373_v23  ;;  %v1973_v44 = vpack.i.bf16 %v2373_v23, %v2370_v22  ;;  %v1968_v45 = vpack.i.bf16 %v2365_v21, %v2376_v30  ;;  %v2389_v51 = vsel %vm209_vm1, %v1847_v54, %v1782_v25  ;;  %v2394_v29 = vsel %vm209_vm1, %v3720_v52, %v1781_v32 }
  0xad   : > { %3924 = vst [vmem:[#allocation17_spill] sm:$0xff] %v2376_v30  ;;  %v1983_v25 = vpack.i.bf16 %v2141_v0, %v2389_v51  ;;  %v1978_v54 = vpack.i.bf16 %v2399_v57, %v2394_v29  ;;  %v2434_v57 = vpop.permute.xlu2 %1889 }
  0xae   : > { %1974 = vrot.lane.b32.xlu1 %v1973_v44, %s2102_s21  ;;  %1969 = vrot.lane.b32.xlu0 %v1968_v45, %s2102_s21  ;;  %v1855_v3 = vpop.permute.xlu1 %1854  ;;  %3925 = vst [vmem:[#allocation18_spill] sm:$0xff] %v2389_v51  ;;  %v3725_v45 = vunpack.i.h.bf16 %v2299_v7 }
  0xaf   : > { %v1857_v63 = vunpack.i.h.bf16 %v1855_v3  ;;  %3926 = vst [vmem:[#allocation19_spill] sm:$0xff] %v2394_v29  ;;  %v1856_v52 = vunpack.i.l.bf16 %v1855_v3  ;;  %v3930_v3 = vunpack.i.l.bf16 %v2267_v53 }
  0xb0   : > { %v1850_v2 = vpop.permute.xlu0 %1849  ;;  %v2414_v32 = vsel %vm297_vm0, %v1811_v15, %v3725_v45  ;;  %v3732_v15 = vunpack.i.l.bf16 %v2261_v47 }
  0xb1   : > { %v1928_v44 = vpack.i.bf16 %v2171_v11, %v1857_v63  ;;  %v1851_v46 = vunpack.i.l.bf16 %v1850_v2  ;;  %3928 = vst [vmem:[#allocation21_spill] sm:$0xff] %v2414_v32  ;;  %v1948_v45 = vpack.i.bf16 %v2414_v32, %v2417_v31 }
  0xb3   : > { %1929 = vrot.lane.b32.xlu2 %v1928_v44, %s2102_s21  ;;  %v1826_v44 = vunpack.i.l.bf16 %v2317_v24 }
  0xb5   : > { %v2450_v37 = vsel %vm209_vm1, %v1826_v44, %v1827_v62 }
  0xb6   : > { %1984 = vrot.lane.b32.xlu1 %v1983_v25, %s2102_s21  ;;  %1979 = vrot.lane.b32.xlu0 %v1978_v54, %s2102_s21  ;;  %v2420_v49 = vpop.permute.xlu1 %1869  ;;  %v2427_v25 = vsel %vm297_vm0, %v3930_v3, %v1856_v52  ;;  %v2430_v54 = vsel %vm209_vm1, %v1851_v46, %v1826_v44  ;;  %v1852_v3 = vunpack.i.h.bf16 %v1850_v2  ;;  %v2447_v46 = vsel %vm209_vm1, %v1827_v62, %v3732_v15 }
  0xb7   : > { %3931 = vst [vmem:[#allocation23_spill] sm:$0xff] %v2430_v54  ;;  %v1998_v22 = vpack.i.bf16 %v1856_v52, %v2427_v25  ;;  %v1988_v53 = vpack.i.bf16 %v2430_v54, %v2144_v1  ;;  %v1891_v2 = vunpack.i.l.bf16 %v2434_v57  ;;  %v3935_v44 = vunpack.i.h.bf16 %v2261_v47 }
  0xb8   : > { %v2422_v55 = vpop.permute.xlu0 %1864  ;;  %3932 = vst [vmem:[#allocation24_spill] sm:$0xff] %v2447_v46  ;;  %v1963_v32 = vpack.i.bf16 %v2447_v46, %v2450_v37  ;;  %v3940_v46 = vunpack.i.h.bf16 %v2434_v57 }
  0xb9   : > { %3933 = vst [vmem:[#allocation25_spill] sm:$0xff] %v2450_v37  ;;  %v2468_v62 = vsel %vm209_vm1, %v1852_v3, %v3935_v44  ;;  %v1861_v3 = vunpack.i.l.bf16 %v2301_v8  ;;  %v1900_v44 = vpop.permute.xlu2 %1899 }
  0xba   : > { %3936 = vst [vmem:[#allocation26_spill] sm:$0xff] %v2468_v62  ;;  %v1901_v17 = vunpack.i.l.bf16 %v1900_v44 }
  0xbb   : > { %1949 = vrot.lane.b32.xlu2 %v1948_v45, %s2102_s21 }
  0xbe   : > { %1999 = vrot.lane.b32.xlu1 %v1998_v22, %s2102_s21  ;;  %1989 = vrot.lane.b32.xlu0 %v1988_v53, %s2102_s21  ;;  %v2452_v24 = vpop.permute.xlu1 %1884  ;;  %v3934_v53 = vunpack.i.h.bf16 %v2256_v43 }
  0xbf   : > { %v1886_v1 = vunpack.i.l.bf16 %v2452_v24  ;;  %v3938_v43 = vunpack.i.h.bf16 %v2452_v24 }
  0xc0   : > { %v2454_v52 = vpop.permute.xlu0 %1879  ;;  %v2463_v15 = vsel %vm297_vm0, %v3934_v53, %v1857_v63 }
  0xc1   : > { %v3739_v36 = vunpack.i.h.bf16 %v2454_v52  ;;  %v1881_v45 = vunpack.i.l.bf16 %v2454_v52  ;;  %v2482_v63 = vsel %vm370_vm2, %v1886_v1, %v3938_v43  ;;  %v2003_v53 = vpack.i.bf16 %v2463_v15, %v2468_v62 }
  0xc2   : > { %3939 = vst [vmem:[#allocation28_spill] sm:$0xff] %v2482_v63  ;;  %v1866_v43 = vunpack.i.l.bf16 %v2422_v55 }
  0xc3   : > { %v2477_v22 = vsel %vm370_vm2, %v1881_v45, %v3739_v36  ;;  %1964 = vrot.lane.b32.xlu2 %v1963_v32, %s2102_s21  ;;  %v2492_v36 = vsel %vm370_vm2, %v1891_v2, %v3940_v46  ;;  %v3942_v32 = vunpack.i.l.bf16 %v2303_v13  ;;  %v1902_v13 = vunpack.i.h.bf16 %v1900_v44 }
  0xc4   : > { %3937 = vst [vmem:[#allocation27_spill] sm:$0xff] %v2477_v22  ;;  %720 = vmatpush.msra.mxu2 %v2477_v22 }
  0xc5   : > { %3941 = vst [vmem:[#allocation29_spill] sm:$0xff] %v2492_v36  ;;  %v2503_v22 = vsel %vm297_vm0, %v3942_v32, %v1861_v3  ;;  %v3947_v32 = vunpack.i.l.bf16 %v2322_v28  ;;  %v2544_v44 = vsel %vm370_vm2, %v1902_v13, %v1891_v2 }
  0xc6   : > { %721 = vmatpush.msra.mxu2 %v2482_v63  ;;  %2004 = vrot.lane.b32.xlu1 %v2003_v53, %s2102_s21  ;;  %3943 = vst [vmem:[#allocation30_spill] sm:$0xff] %v2503_v22  ;;  %v2509_v63 = vsel %vm209_vm1, %v1776_v16, %v3944_v20  ;;  %v3946_v53 = vunpack.i.h.bf16 %v2320_v26  ;;  %v2528_v20 = vpop.permute.xlu2 %1904 }
  0xc7   : > { %1994 = vrot.lane.b32.xlu0 %v2237_v38, %s2102_s21  ;;  %3945 = vst [vmem:[#allocation31_spill] sm:$0xff] %v2509_v63  ;;  %v2008_v26 = vpack.i.bf16 %v2509_v63, %v2174_v12 }
  0xc8   : > { %v1895_v58 = vpop.permute.xlu0 %1894  ;;  %722 = vmatpush.msra.mxu2 %v2492_v36  ;;  %v2514_v38 = vsel %vm209_vm1, %v3946_v53, %v1866_v43 }
  0xc9   : > { %v1897_v46 = vunpack.i.h.bf16 %v1895_v58  ;;  %v1896_v61 = vunpack.i.l.bf16 %v1895_v58  ;;  %v2013_v58 = vpack.i.bf16 %v1861_v3, %v2503_v22  ;;  %v2028_v16 = vpack.i.bf16 %v1866_v43, %v2514_v38 }
  0xca   : > { %723 = vmatpush.msra.mxu2 %v2281_v59  ;;  %v1862_v3 = vunpack.i.h.bf16 %v2301_v8 }
  0xcb   : > { %v2520_v36 = vsel %vm370_vm2, %v1896_v61, %v3947_v32  ;;  %v2524_v48 = vsel %vm370_vm2, %v1897_v46, %v1881_v45  ;;  %2014 = vrot.lane.b32.xlu2 %v2013_v58, %s2102_s21  ;;  %v2535_v61 = vsel %vm370_vm2, %v1901_v17, %v1886_v1  ;;  %v1871_v45 = vunpack.i.l.bf16 %v2420_v49 }
  0xcc   : > { %673 = vmatpush.msra.mxu0 %v2520_v36  ;;  %724 = vmatpush.msra.mxu2 %v2284_v60  ;;  %v2023_v12 = vpack.i.bf16 %v2189_v18, %v1862_v3  ;;  %v3948_v17 = vunpack.i.h.bf16 %v2299_v7  ;;  %v3950_v1 = vunpack.i.h.bf16 %v2357_v50  ;;  %v1867_v50 = vunpack.i.h.bf16 %v2422_v55 }
  0xcd   : > { %v3952_v32 = vunpack.i.l.bf16 %v2261_v47  ;;  %v1906_v58 = vunpack.i.l.bf16 %v2528_v20  ;;  %v1872_v47 = vunpack.i.h.bf16 %v2420_v49  ;;  %v3955_v49 = vunpack.i.l.bf16 %v2271_v56 }
  0xce   : > { %674 = vmatpush.msra.mxu0 %v2524_v48  ;;  %725 = vmatpush.msra.mxu2 %v2306_v14  ;;  %v2552_v8 = vsel %vm297_vm0, %v3948_v17, %v1862_v3  ;;  %v2557_v43 = vsel %vm209_vm1, %v3950_v1, %v1871_v45  ;;  %v1910_v46 = vpop.permute.xlu2 %1909  ;;  %v2038_v13 = vpack.i.bf16 %v2153_v5, %v1867_v50 }
  0xcf   : > { %2029 = vrot.lane.b32.xlu0 %v2028_v16, %s2102_s21  ;;  %2009 = vrot.lane.b32.xlu1 %v2008_v26, %s2102_s21  ;;  %3949 = vst [vmem:[#allocation32_spill] sm:$0xff] %v2552_v8  ;;  %v2043_v2 = vpack.i.bf16 %v1871_v45, %v2557_v43  ;;  %v2018_v7 = vpack.i.bf16 %v2552_v8, %v2192_v19  ;;  %v1907_v45 = vunpack.i.h.bf16 %v2528_v20  ;;  %v1912_v17 = vunpack.i.h.bf16 %v1910_v46 }
  0xd0   : > { %675 = vmatpush.msra.mxu0 %v2535_v61  ;;  %726 = vmatpush.msra.mxu2 %v2417_v31  ;;  %3951 = vst [vmem:[#allocation33_spill] sm:$0xff] %v2557_v43  ;;  %v2574_v53 = vpop.permute.xlu0 %1919  ;;  %v2580_v55 = vsel %vm209_vm1, %v3952_v32, %v1867_v50  ;;  %v2606_v3 = vsel %vm209_vm1, %v3955_v49, %v1872_v47  ;;  %v1911_v1 = vunpack.i.l.bf16 %v1910_v46  ;;  %v3958_v20 = vunpack.i.h.bf16 %v2434_v57 }
  0xd1   : > { %v2033_v16 = vpack.i.bf16 %v2580_v55, %v2214_v27 }
  0xd2   : > { %676 = vmatpush.msra.mxu0 %v2544_v44  ;;  %727 = vmatpush.msra.mxu2 %v2335_v35 }
  0xd3   : > { %2024 = vrot.lane.b32.xlu2 %v2023_v12, %s2102_s21 }
  0xd4   : > { %677 = vmatpush.msra.mxu0 %v2329_v33  ;;  %728 = vmatpush.msra.mxu2 %v2450_v37 }
  0xd6   : > { %678 = vmatpush.msra.mxu0 %v2332_v34  ;;  %729 = vmatpush.msra.mxu2 %v2365_v21  ;;  %v1915_v26 = vpop.permute.xlu2 %1914 }
  0xd7   : > { %2044 = vrot.lane.b32.xlu0 %v2043_v2, %s2102_s21  ;;  %2019 = vrot.lane.b32.xlu1 %v2018_v7, %s2102_s21  ;;  %v2628_v2 = vsel %vm370_vm2, %v1906_v58, %v1907_v45  ;;  %v2637_v7 = vsel %vm370_vm2, %v1911_v1, %v1912_v17 }
  0xd8   : > { %679 = vmatpush.msra.mxu0 %v2376_v30  ;;  %730 = vmatpush.msra.mxu2 %v2394_v29  ;;  %3960 = vst [vmem:[#allocation37_spill] sm:$0xff] %v2628_v2 }
  0xd9   : > { %3962 = vst [vmem:[#allocation39_spill] sm:$0xff] %v2637_v7 }
  0xda   : > { %680 = vmatpush.msra.mxu0 %v2373_v23  ;;  %731 = vmatpush.msra.mxu2 %v2141_v0  ;;  %v3953_v0 = vunpack.i.h.bf16 %v2322_v28  ;;  %v2048_v28 = vpack.i.bf16 %v1872_v47, %v2606_v3 }
  0xdb   : > { %2039 = vrot.lane.b32.xlu2 %v2038_v13, %s2102_s21 }
  0xdc   : > { %681 = vmatpush.msra.mxu0 %v2389_v51  ;;  %732 = vmatpush.msra.mxu2 %v2165_v9  ;;  %v2599_v9 = vsel %vm370_vm2, %v3953_v0, %v1906_v58 }
  0xdd   : > { %3954 = vst [vmem:[#allocation34_spill] sm:$0xff] %v2599_v9 }
  0xde   : > { %682 = vmatpush.msra.mxu0 %v2430_v54  ;;  %733 = vmatpush.msra.mxu2 %v2171_v11  ;;  %v1925_v11 = vpop.permute.xlu0 %1924 }
  0xdf   : > { %2059 = vrot.lane.b32.xlu0 %v2250_v41, %s2102_s21  ;;  %2034 = vrot.lane.b32.xlu1 %v2033_v16, %s2102_s21  ;;  %v1916_v41 = vunpack.i.l.bf16 %v1915_v26  ;;  %v1926_v12 = vunpack.i.l.bf16 %v1925_v11  ;;  %v3966_v16 = vld [vmem:[#allocation2_spill] sm:$0xff] }
  0xe0   : > { %683 = vmatpush.msra.mxu0 %v2468_v62  ;;  %734 = vmatpush.msra.mxu2 %v2156_v6  ;;  %v3956_v6 = vunpack.i.h.bf16 %v2452_v24  ;;  %v2633_v24 = vld [vmem:[%s3712_s1] sm:$0xff] }
  0xe1   : > { %3961 = vst [vmem:[#allocation38_spill] sm:$0xff] %v2633_v24  ;;  %735 = vmatmul.f32.vlgmr.msra.gmra.mxu2 %v2633_v24 }
  0xe2   : > { %684 = vmatpush.msra.mxu0 %v2509_v63  ;;  %v2617_v56 = vsel %vm370_vm2, %v3956_v6, %v1916_v41 }
  0xe3   : > { %2054 = vrot.lane.b32.xlu2 %v2242_v39, %s2102_s21  ;;  %3957 = vst [vmem:[#allocation35_spill] sm:$0xff] %v2617_v56  ;;  %v1917_v39 = vunpack.i.h.bf16 %v1915_v26 }
  0xe4   : > { %685 = vmatpush.msra.mxu0 %v2192_v19  ;;  %v2624_v19 = vsel %vm370_vm2, %v3958_v20, %v1926_v12 }
  0xe5   : > { %3959 = vst [vmem:[#allocation36_spill] sm:$0xff] %v2624_v19  ;;  %v2647_v50 = vsel %vm370_vm2, %v1916_v41, %v1917_v39 }
  0xe6   : > { %686 = vmatpush.msra.mxu0 %v2189_v18  ;;  %v1927_v18 = vunpack.i.h.bf16 %v1925_v11 }
  0xe7   : > { %2049 = vrot.lane.b32.xlu1 %v2048_v28, %s2102_s21 }
  0xe8   : > { %687 = vmatpush.msra.mxu0 %v2214_v27  ;;  %v3963_v27 = vunpack.i.h.bf16 %v2454_v52 }
  0xea   : > { %688 = vmatpush.msra.mxu0 %v2153_v5  ;;  %v2644_v57 = vsel %vm370_vm2, %v3963_v27, %v1911_v1  ;;  %v2654_v5 = vsel %vm370_vm2, %v1926_v12, %v1927_v18 }
  0xeb   : > { %689 = vmatmul.f32.vlgmr.msra.gmra.mxu0 %v2633_v24  ;;  %2069 = vrot.lane.b32.xlu2 %v2246_v40, %s2102_s21  ;;  %3964 = vst [vmem:[#allocation40_spill] sm:$0xff] %v2654_v5 }
  0xec   : > { %811 = vmatpush.msrb.mxu0 %v2628_v2 }
  0xee   : > { %812 = vmatpush.msrb.mxu0 %v2637_v7 }
  0xef   : > { %2064 = vrot.lane.b32.xlu1 %v2254_v42, %s2102_s21  ;;  %v3965_v42 = vld [vmem:[#allocation3_spill] sm:$0xff] }
  0xf0   : > { %813 = vmatpush.msrb.mxu0 %v2647_v50 }
  0xf2   : > { %814 = vmatpush.msrb.mxu0 %v2654_v5 }
  0xf4   : > { %815 = vmatpush.msrb.mxu0 %v2427_v25 }
  0xf6   : > { %816 = vmatpush.msrb.mxu0 %v2463_v15 }
  0xf8   : > { %817 = vmatpush.msrb.mxu0 %v2503_v22 }
  0xfa   : > { %818 = vmatpush.msrb.mxu0 %v2552_v8 }
  0xfc   : > { %819 = vmatpush.msrb.mxu0 %v2514_v38 }
  0xfe   : > { %820 = vmatpush.msrb.mxu0 %v2580_v55 }
 0x100   : > { %821 = vmatpush.msrb.mxu0 %v2557_v43 }
 0x102   : > { %822 = vmatpush.msrb.mxu0 %v2606_v3 }
 0x104   : > { %823 = vmatpush.msrb.mxu0 %v2168_v10 }
 0x106   : > { %824 = vmatpush.msrb.mxu0 %v2150_v4  ;;  %v2670_v40 = vpop.permute.xlu1 %1934  ;;  %v2675_v13 = vpop.permute.xlu0 %1939 }
 0x107   : > { %v3758_v52 = vunpack.i.h.bf16 %v2670_v40  ;;  %v1936_v46 = vunpack.i.l.bf16 %v2670_v40  ;;  %v3757_v32 = vunpack.i.h.bf16 %v2675_v13  ;;  %v1941_v58 = vunpack.i.l.bf16 %v2675_v13 }
 0x108   : > { %825 = vmatpush.msrb.mxu0 %v3965_v42 }
 0x109   : > { %v2683_v4 = vsel %vm553_vm3, %v1936_v46, %v3758_v52  ;;  %v2690_v10 = vsel %vm553_vm3, %v1941_v58, %v3757_v32 }
 0x10a   : > { %826 = vmatpush.msrb.mxu0 %v3966_v16  ;;  %746 = vmatpush.msra.mxu3 %v2683_v4 }
 0x10c   : > { %981 = vmatpush.msra.mxu0 %v2683_v4  ;;  %747 = vmatpush.msra.mxu3 %v2690_v10 }
 0x10d   : > { %v2694_v47 = vpop.permute.xlu2 %1929 }
 0x10e   : > { %982 = vmatpush.msra.mxu0 %v2690_v10 }
 0x110   : > { %v2696_v0 = vpop.permute.xlu1 %1944 }
 0x111   : > { %v3756_v26 = vunpack.i.h.bf16 %v2696_v0  ;;  %v1946_v49 = vunpack.i.l.bf16 %v2696_v0 }
 0x113   : > { %v2703_v11 = vsel %vm553_vm3, %v1946_v49, %v3756_v26 }
 0x114   : > { %748 = vmatpush.msra.mxu3 %v2703_v11  ;;  %983 = vmatpush.msra.mxu0 %v2703_v11 }
 0x115   : > { %v2707_v41 = vpop.permute.xlu2 %1949 }
 0x116   : > { %v3755_v45 = vunpack.i.h.bf16 %v2707_v41  ;;  %v1951_v28 = vunpack.i.l.bf16 %v2707_v41 }
 0x118   : > { %v2711_v12 = vpop.permute.xlu1 %1959  ;;  %v1955_v6 = vpop.permute.xlu0 %1954  ;;  %v2718_v18 = vsel %vm553_vm3, %v1951_v28, %v3755_v45 }
 0x119   : > { %v1962_v17 = vunpack.i.h.bf16 %v2711_v12  ;;  %v3754_v1 = vunpack.i.l.bf16 %v2711_v12  ;;  %v1957_v20 = vunpack.i.h.bf16 %v1955_v6  ;;  %v1956_v39 = vunpack.i.l.bf16 %v1955_v6  ;;  %3967 = vst [vmem:[#allocation3_spill] sm:$0xff] %v2718_v18  ;;  %749 = vmatpush.msra.mxu3 %v2718_v18  ;;  %984 = vmatpush.msra.mxu0 %v2718_v18 }
 0x11b   : > { %v2723_v27 = vsel %vm553_vm3, %v1956_v39, %v1936_v46  ;;  %v2728_v42 = vsel %vm553_vm3, %v1957_v20, %v3754_v1  ;;  %v2734_v16 = vsel %vm553_vm3, %v1962_v17, %v1941_v58  ;;  %v2744_v1 = vld [vmem:[%s3712_s1 + $0x10] sm:$0xff] }
 0x11c   : > { %3968 = vst [vmem:[#allocation2_spill] sm:$0xff] %v2723_v27  ;;  %700 = vmatpush.msra.mxu1 %v2723_v27  ;;  %750 = vmatpush.msra.mxu3 %v2728_v42 }
 0x11d   : > { %3969 = vst [vmem:[#allocation41_spill] sm:$0xff] %v2728_v42  ;;  %985 = vmatpush.msra.mxu0 %v2728_v42  ;;  %v2737_v6 = vpop.permute.xlu2 %1964  ;;  %738 = vmatmul.f32.gmra.mxu2 %v2744_v1 }
 0x11e   : > { %3970 = vst [vmem:[#allocation42_spill] sm:$0xff] %v2734_v16  ;;  %701 = vmatpush.msra.mxu1 %v2734_v16  ;;  %v3765_v46 = vunpack.i.h.bf16 %v2737_v6  ;;  %v1966_v39 = vunpack.i.l.bf16 %v2737_v6  ;;  %692 = vmatmul.f32.gmra.mxu0 %v2744_v1 }
 0x11f   : > { %3971 = vst [vmem:[#allocation43_spill] sm:$0xff] %v2744_v1 }
 0x120   : > { %v2746_v45 = vpop.permute.xlu1 %1974  ;;  %v1970_v26 = vpop.permute.xlu0 %1969  ;;  %v2755_v29 = vsel %vm553_vm3, %v1966_v39, %v3765_v46 }
 0x121   : > { %v1977_v58 = vunpack.i.h.bf16 %v2746_v45  ;;  %v3766_v17 = vunpack.i.l.bf16 %v2746_v45  ;;  %v1972_v32 = vunpack.i.h.bf16 %v1970_v26  ;;  %v1971_v52 = vunpack.i.l.bf16 %v1970_v26  ;;  %3972 = vst [vmem:[#allocation44_spill] sm:$0xff] %v2755_v29  ;;  %751 = vmatpush.msra.mxu3 %v2755_v29  ;;  %986 = vmatpush.msra.mxu0 %v2755_v29 }
 0x123   : > { %v2760_v63 = vsel %vm553_vm3, %v1971_v52, %v1946_v49  ;;  %v2765_v21 = vsel %vm553_vm3, %v1972_v32, %v3766_v17  ;;  %v2771_v26 = vsel %vm553_vm3, %v1977_v58, %v1951_v28 }
 0x124   : > { %3973 = vst [vmem:[#allocation45_spill] sm:$0xff] %v2760_v63  ;;  %702 = vmatpush.msra.mxu1 %v2760_v63  ;;  %752 = vmatpush.msra.mxu3 %v2765_v21 }
 0x125   : > { %3974 = vst [vmem:[#allocation46_spill] sm:$0xff] %v2765_v21  ;;  %987 = vmatpush.msra.mxu0 %v2765_v21 }
 0x126   : > { %3975 = vst [vmem:[#allocation47_spill] sm:$0xff] %v2771_v26  ;;  %703 = vmatpush.msra.mxu1 %v2771_v26  ;;  %827 = vmatmul.f32.vlgmr.msrb.gmra.mxu0 %v2633_v24 }
 0x128   : > { %v2774_v46 = vpop.permute.xlu1 %1984  ;;  %v2776_v52 = vpop.permute.xlu0 %1979 }
 0x129   : > { %v1986_v49 = vunpack.i.l.bf16 %v2774_v46  ;;  %v3776_v17 = vunpack.i.h.bf16 %v2776_v52  ;;  %v1981_v62 = vunpack.i.l.bf16 %v2776_v52  ;;  %v3784_v26 = vunpack.i.h.bf16 %v2774_v46 }
 0x12b   : > { %v2783_v63 = vsel %vm553_vm3, %v1986_v49, %v1957_v20  ;;  %v2788_v28 = vsel %vm553_vm3, %v1981_v62, %v3776_v17 }
 0x12c   : > { %3976 = vst [vmem:[#allocation48_spill] sm:$0xff] %v2783_v63  ;;  %704 = vmatpush.msra.mxu1 %v2783_v63  ;;  %753 = vmatpush.msra.mxu3 %v2788_v28 }
 0x12d   : > { %3977 = vst [vmem:[#allocation49_spill] sm:$0xff] %v2788_v28  ;;  %988 = vmatpush.msra.mxu0 %v2788_v28 }
 0x12e   : > { %830 = vmatmul.f32.gmra.mxu0 %v2744_v1 }
 0x130   : > { %v2000_v37 = vpop.permute.xlu1 %1999  ;;  %v2796_v20 = vpop.permute.xlu0 %1989 }
 0x131   : > { %v2002_v49 = vunpack.i.h.bf16 %v2000_v37  ;;  %v2001_v17 = vunpack.i.l.bf16 %v2000_v37  ;;  %v1992_v54 = vunpack.i.h.bf16 %v2796_v20  ;;  %v3783_v63 = vunpack.i.l.bf16 %v2796_v20 }
 0x132   : > { %v3981_v37 = vunpack.i.h.bf16 %v2574_v53 }
 0x133   : > { %v2802_v16 = vsel %vm553_vm3, %v1992_v54, %v1966_v39  ;;  %v2809_v24 = vsel %vm553_vm3, %v3784_v26, %v3783_v63  ;;  %v2812_v58 = vsel %vm553_vm3, %v2001_v17, %v2002_v49  ;;  %v3982_v54 = vunpack.i.l.bf16 %v2574_v53  ;;  %v2015_v63 = vpop.permute.xlu2 %2014 }
 0x134   : > { %3978 = vst [vmem:[#allocation50_spill] sm:$0xff] %v2802_v16  ;;  %705 = vmatpush.msra.mxu1 %v2802_v16  ;;  %754 = vmatpush.msra.mxu3 %v2809_v24  ;;  %v1931_v49 = vunpack.i.l.bf16 %v2694_v47  ;;  %v2017_v1 = vunpack.i.h.bf16 %v2015_v63  ;;  %v2016_v16 = vunpack.i.l.bf16 %v2015_v63 }
 0x135   : > { %3979 = vst [vmem:[#allocation51_spill] sm:$0xff] %v2809_v24  ;;  %838 = vmatpush.msrb.mxu2 %v2812_v58  ;;  %989 = vmatpush.msra.mxu0 %v2809_v24  ;;  %v2823_v39 = vsel %vm553_vm3, %v3982_v54, %v3981_v37 }
 0x136   : > { %3980 = vst [vmem:[#allocation52_spill] sm:$0xff] %v2812_v58  ;;  %755 = vmatpush.msra.mxu3 %v2823_v39  ;;  %v2839_v54 = vsel %vm553_vm3, %v2016_v16, %v2017_v1 }
 0x137   : > { %3983 = vst [vmem:[#allocation53_spill] sm:$0xff] %v2823_v39  ;;  %990 = vmatpush.msra.mxu0 %v2823_v39 }
 0x138   : > { %v2005_v26 = vpop.permute.xlu1 %2004  ;;  %3986 = vst [vmem:[#allocation56_spill] sm:$0xff] %v2839_v54 }
 0x139   : > { %v2007_v58 = vunpack.i.h.bf16 %v2005_v26  ;;  %v2006_v35 = vunpack.i.l.bf16 %v2005_v26  ;;  %v2834_v37 = vpop.permute.xlu0 %1994 }
 0x13a   : > { %v3804_v63 = vunpack.i.h.bf16 %v2834_v37 }
 0x13b   : > { %v2829_v51 = vsel %vm553_vm3, %v2006_v35, %v1972_v32  ;;  %v2832_v24 = vsel %vm553_vm3, %v2007_v58, %v1931_v49  ;;  %v1932_v35 = vunpack.i.h.bf16 %v2694_v47  ;;  %v3806_v32 = vunpack.i.l.bf16 %v2834_v37 }
 0x13c   : > { %3984 = vst [vmem:[#allocation54_spill] sm:$0xff] %v2829_v51  ;;  %706 = vmatpush.msra.mxu1 %v2829_v51  ;;  %839 = vmatpush.msrb.mxu2 %v2832_v24  ;;  %v2025_v51 = vpop.permute.xlu2 %2024 }
 0x13d   : > { %3985 = vst [vmem:[#allocation55_spill] sm:$0xff] %v2832_v24  ;;  %v2862_v47 = vsel %vm553_vm3, %v3806_v32, %v3804_v63  ;;  %v2876_v63 = vld [vmem:[%s3712_s1 + $0x28] sm:$0xff]  ;;  %v3993_v32 = vunpack.i.h.bf16 %v2675_v13  ;;  %v3995_v13 = vunpack.i.h.bf16 %v2696_v0 }
 0x13e   : > { %840 = vmatpush.msrb.mxu2 %v2839_v54  ;;  %3989 = vst [vmem:[#allocation59_spill] sm:$0xff] %v2862_v47 }
 0x13f   : > { %3992 = vst [vmem:[#allocation61_spill] sm:$0xff] %v2876_v63 }
 0x141   : > { %v2843_v26 = vpop.permute.xlu1 %2009  ;;  %v2030_v54 = vpop.permute.xlu0 %2029 }
 0x142   : > { %v2012_v49 = vunpack.i.h.bf16 %v2843_v26  ;;  %v3805_v39 = vunpack.i.l.bf16 %v2843_v26 }
 0x144   : > { %v2850_v24 = vsel %vm553_vm3, %v2012_v49, %v1981_v62  ;;  %v2855_v1 = vsel %vm553_vm3, %v1932_v35, %v3805_v39  ;;  %v3990_v62 = vunpack.i.h.bf16 %v2670_v40  ;;  %v2884_v40 = vsel %vm553_vm3, %v3993_v32, %v2007_v58 }
 0x145   : > { %3987 = vst [vmem:[#allocation57_spill] sm:$0xff] %v2850_v24  ;;  %707 = vmatpush.msra.mxu1 %v2850_v24  ;;  %756 = vmatpush.msra.mxu3 %v2855_v1  ;;  %v2026_v24 = vunpack.i.l.bf16 %v2025_v51  ;;  %v2898_v58 = vsel %vm553_vm3, %v3995_v13, %v2016_v16  ;;  %v2040_v16 = vpop.permute.xlu2 %2039 }
 0x146   : > { %3988 = vst [vmem:[#allocation58_spill] sm:$0xff] %v2855_v1  ;;  %991 = vmatpush.msra.mxu0 %v2855_v1  ;;  %v2871_v49 = vsel %vm553_vm3, %v3990_v62, %v2001_v17  ;;  %v2889_v17 = vld [vmem:[%s3712_s1 + $0x8] sm:$0xff]  ;;  %v2027_v62 = vunpack.i.h.bf16 %v2025_v51  ;;  %v3996_v51 = vunpack.i.h.bf16 %v2774_v46 }
 0x147   : > { %757 = vmatpush.msra.mxu3 %v2862_v47  ;;  %3991 = vst [vmem:[#allocation60_spill] sm:$0xff] %v2871_v49 }
 0x148   : > { %992 = vmatpush.msra.mxu0 %v2862_v47  ;;  %3994 = vst [vmem:[#allocation62_spill] sm:$0xff] %v2884_v40  ;;  %1714 = vmatmul.msk.f32.vlgmr.msra.gmra.mxu3 %vm666_vm4, %v2889_v17 }
 0x149   : > { %792 = vmatpush.msrb.mxu3 %v2871_v49  ;;  %v2020_v39 = vpop.permute.xlu1 %2019  ;;  %1726 = vmatmul.msk.f32.vlgmr.msra.gmra.mxu0 %vm666_vm4, %v2876_v63  ;;  %v2032_v49 = vunpack.i.h.bf16 %v2030_v54  ;;  %v2045_v13 = vpop.permute.xlu0 %2044 }
 0x14a   : > { %1046 = vmatpush.msrb.mxu0 %v2628_v2  ;;  %v2022_v1 = vunpack.i.h.bf16 %v2020_v39  ;;  %v2021_v27 = vunpack.i.l.bf16 %v2020_v39  ;;  %v2031_v2 = vunpack.i.l.bf16 %v2030_v54  ;;  %v3999_v54 = vunpack.i.h.bf16 %v2707_v41 }
 0x14b   : > { %793 = vmatpush.msrb.mxu3 %v2884_v40  ;;  %v4003_v41 = vunpack.i.l.bf16 %v2711_v12  ;;  %v2047_v63 = vunpack.i.h.bf16 %v2045_v13 }
 0x14c   : > { %1047 = vmatpush.msrb.mxu0 %v2637_v7  ;;  %v2906_v39 = vsel %vm553_vm3, %v2021_v27, %v3996_v51  ;;  %v2909_v32 = vsel %vm553_vm3, %v2022_v1, %v2026_v24  ;;  %v2914_v0 = vsel %vm553_vm3, %v3999_v54, %v2022_v1  ;;  %v4001_v27 = vunpack.i.l.bf16 %v2574_v53  ;;  %v2941_v51 = vld [vmem:[%s3712_s1 + $0x18] sm:$0xff] }
 0x14d   : > { %794 = vmatpush.msrb.mxu3 %v2898_v58  ;;  %3997 = vst [vmem:[#allocation63_spill] sm:$0xff] %v2906_v39  ;;  %708 = vmatpush.msra.mxu1 %v2906_v39  ;;  %v2928_v24 = vsel %vm553_vm3, %v2031_v2, %v2032_v49  ;;  %v2933_v1 = vsel %vm553_vm3, %v4003_v41, %v2031_v2  ;;  %v2042_v49 = vunpack.i.h.bf16 %v2040_v16  ;;  %v2041_v54 = vunpack.i.l.bf16 %v2040_v16 }
 0x14e   : > { %3998 = vst [vmem:[#allocation64_spill] sm:$0xff] %v2909_v32  ;;  %1048 = vmatpush.msrb.mxu0 %v2647_v50  ;;  %841 = vmatpush.msrb.mxu2 %v2909_v32  ;;  %v2923_v46 = vsel %vm553_vm3, %v2027_v62, %v4001_v27  ;;  %v2046_v2 = vunpack.i.l.bf16 %v2045_v13  ;;  %v4008_v16 = vunpack.i.l.bf16 %v2834_v37 }
 0x14f   : > { %4000 = vst [vmem:[#allocation65_spill] sm:$0xff] %v2914_v0  ;;  %795 = vmatpush.msrb.mxu3 %v2914_v0  ;;  %709 = vmatpush.msra.mxu1 %v2923_v46 }
 0x150   : > { %1049 = vmatpush.msrb.mxu0 %v2654_v5  ;;  %4002 = vst [vmem:[#allocation66_spill] sm:$0xff] %v2928_v24  ;;  %842 = vmatpush.msrb.mxu2 %v2928_v24  ;;  %v4005_v24 = vunpack.i.h.bf16 %v2737_v6  ;;  %v4010_v6 = vunpack.i.l.bf16 %v2746_v45  ;;  %v2974_v13 = vsel %vm553_vm3, %v2046_v2, %v2047_v63 }
 0x151   : > { %4004 = vst [vmem:[#allocation67_spill] sm:$0xff] %v2933_v1  ;;  %796 = vmatpush.msrb.mxu3 %v2933_v1  ;;  %v2035_v62 = vpop.permute.xlu1 %2034 }
 0x152   : > { %1050 = vmatpush.msrb.mxu0 %v2427_v25  ;;  %v2037_v27 = vunpack.i.h.bf16 %v2035_v62  ;;  %v2036_v12 = vunpack.i.l.bf16 %v2035_v62  ;;  %1715 = vmatmul.msk.f32.gmra.mxu3 %vm666_vm4, %v2941_v51  ;;  %4012 = vst [vmem:[#allocation72_spill] sm:$0xff] %v2974_v13  ;;  %v2979_v62 = vld [vmem:[%s3712_s1 + $0x38] sm:$0xff] }
 0x153   : > { %4013 = vst [vmem:[#allocation73_spill] sm:$0xff] %v2979_v62  ;;  %1727 = vmatmul.msk.f32.gmra.mxu0 %vm666_vm4, %v2979_v62  ;;  %v3020_v62 = vld [vmem:[%s2138_s17 + $0x90] sm:$0xff] }
 0x154   : > { %1051 = vmatpush.msrb.mxu0 %v2463_v15  ;;  %v2947_v41 = vsel %vm553_vm3, %v2036_v12, %v1932_v35  ;;  %v2952_v1 = vsel %vm553_vm3, %v4005_v24, %v2037_v27  ;;  %v2955_v32 = vsel %vm553_vm3, %v2037_v27, %v2041_v54  ;;  %v2964_v35 = vsel %vm553_vm3, %v2042_v49, %v4008_v16  ;;  %v2055_v54 = vpop.permute.xlu2 %2054  ;;  %v2060_v27 = vpop.permute.xlu0 %2059 }
 0x155   : > { %4006 = vst [vmem:[#allocation68_spill] sm:$0xff] %v2952_v1  ;;  %710 = vmatpush.msra.mxu1 %v2947_v41  ;;  %797 = vmatpush.msrb.mxu3 %v2952_v1  ;;  %v2971_v24 = vsel %vm553_vm3, %v4010_v6, %v2046_v2  ;;  %v2057_v49 = vunpack.i.h.bf16 %v2055_v54  ;;  %v2056_v2 = vunpack.i.l.bf16 %v2055_v54  ;;  %v2062_v16 = vunpack.i.h.bf16 %v2060_v27 }
 0x156   : > { %4007 = vst [vmem:[#allocation69_spill] sm:$0xff] %v2955_v32  ;;  %1052 = vmatpush.msrb.mxu0 %v2503_v22  ;;  %843 = vmatpush.msrb.mxu2 %v2955_v32  ;;  %v4014_v6 = vunpack.i.h.bf16 %v2776_v52  ;;  %v4018_v52 = vunpack.i.l.bf16 %v2796_v20 }
 0x157   : > { %4009 = vst [vmem:[#allocation70_spill] sm:$0xff] %v2964_v35  ;;  %711 = vmatpush.msra.mxu1 %v2964_v35  ;;  %798 = vmatpush.msrb.mxu3 %v2971_v24  ;;  %v3002_v54 = vsel %vm553_vm3, %v2056_v2, %v2057_v49 }
 0x158   : > { %1053 = vmatpush.msrb.mxu0 %v2552_v8  ;;  %4011 = vst [vmem:[#allocation71_spill] sm:$0xff] %v2971_v24  ;;  %844 = vmatpush.msrb.mxu2 %v2974_v13 }
 0x159   : > { %765 = vmatpush.msrb.mxu1 %v2599_v9  ;;  %v2050_v45 = vpop.permute.xlu1 %2049  ;;  %4017 = vst [vmem:[#allocation76_spill] sm:$0xff] %v3002_v54 }
 0x15a   : > { %1054 = vmatpush.msrb.mxu0 %v2514_v38  ;;  %v2052_v12 = vunpack.i.h.bf16 %v2050_v45  ;;  %v2051_v63 = vunpack.i.l.bf16 %v2050_v45  ;;  %1712 = vmatmul.msk.f32.vlgmr.msra.gmra.mxu1 %vm666_vm4, %v2889_v17  ;;  %v2061_v45 = vunpack.i.l.bf16 %v2060_v27  ;;  %4021 = vst [vmem:[#allocation78_spill] sm:$0xff] %v3020_v62 }
 0x15b   : > { %766 = vmatpush.msrb.mxu1 %v2644_v57 }
 0x15c   : > { %1055 = vmatpush.msrb.mxu0 %v2580_v55  ;;  %v2994_v13 = vsel %vm553_vm3, %v4014_v6, %v2051_v63  ;;  %v2997_v24 = vsel %vm553_vm3, %v2051_v63, %v2052_v12  ;;  %v3011_v12 = vsel %vm553_vm3, %v4018_v52, %v2056_v2  ;;  %v3014_v27 = vsel %vm553_vm3, %v2061_v45, %v2062_v16  ;;  %v2070_v63 = vpop.permute.xlu2 %2069  ;;  %v4020_v6 = vld [vmem:[#allocation6_spill] sm:$0xff] }
 0x15d   : > { %4015 = vst [vmem:[#allocation74_spill] sm:$0xff] %v2994_v13  ;;  %767 = vmatpush.msrb.mxu1 %v2617_v56  ;;  %799 = vmatpush.msrb.mxu3 %v2994_v13  ;;  %v2072_v49 = vunpack.i.h.bf16 %v2070_v63  ;;  %v4022_v2 = vunpack.i.h.bf16 %v2574_v53 }
 0x15e   : > { %4016 = vst [vmem:[#allocation75_spill] sm:$0xff] %v2997_v24  ;;  %1056 = vmatpush.msrb.mxu0 %v2557_v43  ;;  %845 = vmatpush.msrb.mxu2 %v2997_v24 }
 0x15f   : > { %768 = vmatpush.msrb.mxu1 %v2624_v19  ;;  %4019 = vst [vmem:[#allocation77_spill] sm:$0xff] %v3011_v12  ;;  %800 = vmatpush.msrb.mxu3 %v3011_v12  ;;  %v3026_v16 = vsel %vm553_vm3, %v4022_v2, %v2061_v45  ;;  %v4023_v12 = vld [vmem:[#allocation4_spill] sm:$0xff] }
 0x160   : > { %1057 = vmatpush.msrb.mxu0 %v2606_v3  ;;  %846 = vmatpush.msrb.mxu2 %v3002_v54  ;;  %v2071_v54 = vunpack.i.l.bf16 %v2070_v63  ;;  %v3047_v63 = vld [vmem:[%s2138_s17 + $0x40] sm:$0xff] }
 0x161   : > { %769 = vmatpush.msrb.mxu1 %v4020_v6  ;;  %v2065_v20 = vpop.permute.xlu1 %2064  ;;  %801 = vmatpush.msrb.mxu3 %v3026_v16  ;;  %v3032_v6 = vld [vmem:[%s2138_s17 + $0x68] sm:$0xff] }
 0x162   : > { %1058 = vmatpush.msrb.mxu0 %v3020_v62  ;;  %v2067_v52 = vunpack.i.h.bf16 %v2065_v20  ;;  %v2066_v24 = vunpack.i.l.bf16 %v2065_v20  ;;  %847 = vmatpush.msrb.mxu2 %v3014_v27  ;;  %4024 = vst [vmem:[#allocation79_spill] sm:$0xff] %v3032_v6  ;;  %v4025_v62 = vunpack.i.l.bf16 %v2843_v26  ;;  %v4026_v20 = vld [vmem:[#allocation8_spill] sm:$0xff]  ;;  %v3051_v2 = vsel %vm553_vm3, %v2071_v54, %v2072_v49  ;;  %v4029_v26 = vld [vmem:[#allocation21_spill] sm:$0xff] }
 0x163   : > { %770 = vmatpush.msrb.mxu1 %v4023_v12  ;;  %4027 = vst [vmem:[#allocation8_spill] sm:$0xff] %v3047_v63  ;;  %v4032_v49 = vld [vmem:[#allocation12_spill] sm:$0xff] }
 0x164   : > { %1059 = vmatpush.msrb.mxu0 %v3032_v6  ;;  %v3038_v53 = vsel %vm553_vm3, %v4025_v62, %v2066_v24  ;;  %v3041_v45 = vsel %vm553_vm3, %v2066_v24, %v2067_v52  ;;  %1713 = vmatmul.msk.f32.gmra.mxu1 %vm666_vm4, %v2941_v51  ;;  %4028 = vst [vmem:[#allocation80_spill] sm:$0xff] %v3051_v2  ;;  %v3057_v24 = vld [vmem:[%s2138_s17 + $0x18] sm:$0xff]  ;;  %v4031_v62 = vunpack.i.h.bf16 %v2834_v37  ;;  %v4035_v37 = vld [vmem:[#allocation27_spill] sm:$0xff] }
 0x165   : > { %771 = vmatpush.msrb.mxu1 %v4026_v20  ;;  %802 = vmatpush.msrb.mxu3 %v3038_v53  ;;  %4030 = vst [vmem:[#allocation81_spill] sm:$0xff] %v3057_v24 }
 0x166   : > { %1060 = vmatpush.msrb.mxu0 %v3047_v63  ;;  %848 = vmatpush.msrb.mxu2 %v3041_v45  ;;  %v3063_v52 = vsel %vm553_vm3, %v4031_v62, %v2071_v54  ;;  %v4036_v54 = vld [vmem:[#allocation15_spill] sm:$0xff]  ;;  %v4037_v62 = vld [vmem:[#allocation28_spill] sm:$0xff] }
 0x167   : > { %772 = vmatpush.msrb.mxu1 %v4029_v26  ;;  %803 = vmatpush.msrb.mxu3 %v3063_v52  ;;  %v4033_v26 = vld [vmem:[#allocation13_spill] sm:$0xff] }
 0x168   : > { %1061 = vmatpush.msrb.mxu0 %v3057_v24  ;;  %849 = vmatpush.msrb.mxu2 %v3051_v2  ;;  %v4034_v24 = vld [vmem:[#allocation24_spill] sm:$0xff] }
 0x169   : > { %773 = vmatpush.msrb.mxu1 %v4032_v49  ;;  %908 = vmatpush.msra.mxu3 %v2520_v36 }
 0x16a   : > { %1224 = vmatpush.msra.mxu0 %v2683_v4  ;;  %954 = vmatpush.msra.mxu2 %v4033_v26  ;;  %v4038_v26 = vld [vmem:[#allocation20_spill] sm:$0xff] }
 0x16b   : > { %774 = vmatpush.msrb.mxu1 %v4034_v24  ;;  %909 = vmatpush.msra.mxu3 %v2524_v48  ;;  %v4039_v24 = vld [vmem:[#allocation29_spill] sm:$0xff] }
 0x16c   : > { %1225 = vmatpush.msra.mxu0 %v2690_v10  ;;  %955 = vmatpush.msra.mxu2 %v4035_v37  ;;  %v3085_v37 = vld [vmem:[%s2138_s17 + $0x88] sm:$0xff] }
 0x16d   : > { %775 = vmatpush.msrb.mxu1 %v4036_v54  ;;  %910 = vmatpush.msra.mxu3 %v2535_v61  ;;  %4040 = vst [vmem:[#allocation12_spill] sm:$0xff] %v3085_v37 }
 0x16e   : > { %1226 = vmatpush.msra.mxu0 %v2703_v11  ;;  %956 = vmatpush.msra.mxu2 %v4037_v62 }
 0x16f   : > { %776 = vmatpush.msrb.mxu1 %v4038_v26  ;;  %911 = vmatpush.msra.mxu3 %v2544_v44 }
 0x170   : > { %1227 = vmatpush.msra.mxu0 %v2718_v18  ;;  %957 = vmatpush.msra.mxu2 %v4039_v24  ;;  %v3092_v18 = vld [vmem:[%s2138_s17 + $0x60] sm:$0xff] }
 0x171   : > { %777 = vmatpush.msrb.mxu1 %v3085_v37  ;;  %912 = vmatpush.msra.mxu3 %v2329_v33  ;;  %4041 = vst [vmem:[#allocation15_spill] sm:$0xff] %v3092_v18 }
 0x172   : > { %1228 = vmatpush.msra.mxu0 %v2728_v42  ;;  %958 = vmatpush.msra.mxu2 %v2281_v59  ;;  %v3099_v42 = vld [vmem:[%s2138_s17 + $0x38] sm:$0xff] }
 0x173   : > { %778 = vmatpush.msrb.mxu1 %v3092_v18  ;;  %913 = vmatpush.msra.mxu3 %v2332_v34  ;;  %4042 = vst [vmem:[#allocation28_spill] sm:$0xff] %v3099_v42 }
 0x174   : > { %1229 = vmatpush.msra.mxu0 %v2755_v29  ;;  %959 = vmatpush.msra.mxu2 %v2284_v60  ;;  %v3106_v29 = vld [vmem:[%s2138_s17 + $0x10] sm:$0xff]  ;;  %v4052_v60 = vld [vmem:[#allocation45_spill] sm:$0xff] }
 0x175   : > { %779 = vmatpush.msrb.mxu1 %v3099_v42  ;;  %914 = vmatpush.msra.mxu3 %v2376_v30  ;;  %4043 = vst [vmem:[#allocation20_spill] sm:$0xff] %v3106_v29  ;;  %v4045_v42 = vld [vmem:[#allocation51_spill] sm:$0xff]  ;;  %v4048_v30 = vld [vmem:[#allocation42_spill] sm:$0xff] }
 0x176   : > { %1230 = vmatpush.msra.mxu0 %v2765_v21  ;;  %960 = vmatpush.msra.mxu2 %v2306_v14  ;;  %v4044_v21 = vld [vmem:[#allocation2_spill] sm:$0xff] }
 0x177   : > { %780 = vmatpush.msrb.mxu1 %v3106_v29  ;;  %915 = vmatpush.msra.mxu3 %v2373_v23  ;;  %v4046_v14 = vld [vmem:[#allocation18_spill] sm:$0xff]  ;;  %v4049_v29 = vld [vmem:[#allocation53_spill] sm:$0xff]  ;;  %v4050_v23 = vld [vmem:[#allocation23_spill] sm:$0xff] }
 0x178   : > { %1231 = vmatpush.msra.mxu0 %v2788_v28  ;;  %961 = vmatpush.msra.mxu2 %v2417_v31  ;;  %v4047_v28 = vld [vmem:[#allocation11_spill] sm:$0xff]  ;;  %v4051_v31 = vld [vmem:[#allocation25_spill] sm:$0xff] }
 0x179   : > { %1718 = vmatmul.msk.f32.vlgmr.msrb.gmra.mxu2 %vm666_vm4, %v2889_v17  ;;  %935 = vmatpush.msra.mxu1 %v4044_v21  ;;  %v4053_v21 = vld [vmem:[#allocation58_spill] sm:$0xff] }
 0x17a   : > { %1232 = vmatpush.msra.mxu0 %v4045_v42  ;;  %1716 = vmatmul.msk.f32.vlgmr.msrb.gmra.mxu3 %vm666_vm4, %v2889_v17  ;;  %v4054_v42 = vld [vmem:[#allocation26_spill] sm:$0xff] }
 0x17b   : > { %916 = vmatpush.msra.mxu3 %v4046_v14  ;;  %962 = vmatpush.msra.mxu2 %v4047_v28  ;;  %v4055_v17 = vld [vmem:[#allocation14_spill] sm:$0xff] }
 0x17c   : > { %936 = vmatpush.msra.mxu1 %v4048_v30  ;;  %1233 = vmatpush.msra.mxu0 %v4049_v29  ;;  %v3130_v30 = vld [vmem:[%s3712_s1 + $0x20] sm:$0xff]  ;;  %v4056_v29 = vld [vmem:[#allocation47_spill] sm:$0xff] }
 0x17d   : > { %917 = vmatpush.msra.mxu3 %v4050_v23  ;;  %963 = vmatpush.msra.mxu2 %v4051_v31  ;;  %v4057_v31 = vld [vmem:[#allocation38_spill] sm:$0xff]  ;;  %v4058_v23 = vld [vmem:[#allocation31_spill] sm:$0xff] }
 0x17e   : > { %937 = vmatpush.msra.mxu1 %v4052_v60  ;;  %1234 = vmatpush.msra.mxu0 %v4053_v21  ;;  %v4059_v60 = vld [vmem:[#allocation19_spill] sm:$0xff] }
 0x17f   : > { %918 = vmatpush.msra.mxu3 %v4054_v42  ;;  %964 = vmatpush.msra.mxu2 %v4055_v17  ;;  %v4060_v42 = vld [vmem:[#allocation37_spill] sm:$0xff]  ;;  %v4061_v17 = vld [vmem:[#allocation48_spill] sm:$0xff] }
 0x180   : > { %938 = vmatpush.msra.mxu1 %v4056_v29  ;;  %1235 = vmatpush.msra.mxu0 %v2862_v47  ;;  %v3145_v47 = vld [vmem:[%s2138_s17 + $0x78] sm:$0xff] }
 0x181   : > { %781 = vmatmul.f32.vlgmr.msrb.gmra.mxu1 %v4057_v31  ;;  %919 = vmatpush.msra.mxu3 %v4058_v23  ;;  %4062 = vst [vmem:[#allocation18_spill] sm:$0xff] %v3145_v47  ;;  %v3149_v31 = vld [vmem:[%s2138_s17 + $0x80] sm:$0xff]  ;;  %v4070_v23 = vld [vmem:[#allocation43_spill] sm:$0xff] }
 0x182   : > { %965 = vmatpush.msra.mxu2 %v4059_v60  ;;  %1062 = vmatmul.f32.vlgmr.msrb.gmra.mxu0 %v3130_v30  ;;  %4063 = vst [vmem:[#allocation58_spill] sm:$0xff] %v3149_v31  ;;  %v2103_v60 = vmov 0  }
 0x183   : > { %1289 = vmatpush.msrb.mxu0 %v4060_v42  ;;  %1719 = vmatmul.msk.f32.gmra.mxu2 %vm666_vm4, %v2941_v51  ;;  %v4064_v42 = vld [vmem:[#allocation50_spill] sm:$0xff] }
 0x184   : > { %939 = vmatpush.msra.mxu1 %v4061_v17  ;;  %1717 = vmatmul.msk.f32.gmra.mxu3 %vm666_vm4, %v2941_v51  ;;  %v650_v17 = vld [vmem:[%s3713_s2] sm:$0xff]  ;;  %v3158_v51 = vld [vmem:[%s2138_s17 + $0x50] sm:$0xff] }
 0x185   : > { %920 = vmatpush.msra.mxu3 %v3145_v47  ;;  %966 = vmatpush.msra.mxu2 %v3149_v31  ;;  %4065 = vst [vmem:[#allocation38_spill] sm:$0xff] %v3158_v51  ;;  %v3162_v47 = vld [vmem:[%s2138_s17 + $0x58] sm:$0xff]  ;;  %v3172_v31 = vld [vmem:[%s2138_s17 + $0x30] sm:$0xff] }
 0x186   : > { %1290 = vmatpush.msrb.mxu0 %v2637_v7  ;;  %940 = vmatpush.msra.mxu1 %v4064_v42  ;;  %4066 = vst [vmem:[#allocation82_spill] sm:$0xff] %v3162_v47  ;;  %v4067_v42 = vld [vmem:[#allocation54_spill] sm:$0xff]  ;;  %v3168_v7 = vld [vmem:[%s2138_s17 + $0x28] sm:$0xff] }
 0x187   : > { %2073 = vset.pattern.permute.xlu0 %v2103_v60  ;;  %921 = vmatpush.msra.mxu3 %v3158_v51  ;;  %4068 = vst [vmem:[#allocation54_spill] sm:$0xff] %v3172_v31  ;;  %v4069_v51 = vld [vmem:[#allocation57_spill] sm:$0xff] }
 0x188   : > { %967 = vmatpush.msra.mxu2 %v3162_v47  ;;  %1291 = vmatpush.msrb.mxu0 %v2647_v50  ;;  %v3179_v47 = vld [vmem:[%s2138_s17] sm:$0xff] }
 0x189   : > { %654 = vperm.xlu0 %2073, %v650_v17   ;;  %941 = vmatpush.msra.mxu1 %v4067_v42  ;;  %v3183_v17 = vld [vmem:[%s2138_s17 + $0x8] sm:$0xff] }
 0x18a   : > { %922 = vmatpush.msra.mxu3 %v3168_v7  ;;  %968 = vmatpush.msra.mxu2 %v3172_v31  ;;  %4071 = vst [vmem:[#allocation57_spill] sm:$0xff] %v3183_v17  ;;  %v4072_v31 = vld [vmem:[#allocation60_spill] sm:$0xff] }
 0x18b   : > { %1292 = vmatpush.msrb.mxu0 %v2654_v5  ;;  %942 = vmatpush.msra.mxu1 %v4069_v51  ;;  %v4073_v5 = vld [vmem:[#allocation52_spill] sm:$0xff] }
 0x18c   : > { %784 = vmatmul.f32.gmra.mxu1 %v4070_v23  ;;  %923 = vmatpush.msra.mxu3 %v3179_v47  ;;  %v4074_v23 = vld [vmem:[#allocation55_spill] sm:$0xff] }
 0x18d   : > { %969 = vmatpush.msra.mxu2 %v3183_v17  ;;  %1293 = vmatpush.msrb.mxu0 %v2427_v25 }
 0x18e   : > { %943 = vmatpush.msra.mxu1 %v2906_v39  ;;  %970 = vmatmul.f32.vlgmr.msra.gmra.mxu2 %v3130_v30  ;;  %v4075_v39 = vld [vmem:[#allocation56_spill] sm:$0xff] }
 0x18f   : > { %1027 = vmatpush.msrb.mxu3 %v4072_v31  ;;  %1073 = vmatpush.msrb.mxu2 %v4073_v5 }
 0x190   : > { %924 = vmatmul.f32.vlgmr.msra.gmra.mxu3 %v3130_v30  ;;  %1294 = vmatpush.msrb.mxu0 %v2463_v15 }
 0x191   : > { %944 = vmatpush.msra.mxu1 %v2923_v46  ;;  %1028 = vmatpush.msrb.mxu3 %v2884_v40  ;;  %v3206_v40 = vld [vmem:[%s3712_s1 + $0x30] sm:$0xff] }
 0x192   : > { %1074 = vmatpush.msrb.mxu2 %v4074_v23  ;;  %1295 = vmatpush.msrb.mxu0 %v2503_v22  ;;  %v4076_v23 = vld [vmem:[#allocation64_spill] sm:$0xff]  ;;  %v4077_v22 = vld [vmem:[#allocation61_spill] sm:$0xff] }
 0x193   : > { %945 = vmatpush.msra.mxu1 %v2947_v41  ;;  %1029 = vmatpush.msrb.mxu3 %v2898_v58 }
 0x194   : > { %1075 = vmatpush.msrb.mxu2 %v4075_v39  ;;  %1296 = vmatpush.msrb.mxu0 %v2552_v8  ;;  %v4078_v8 = vld [vmem:[#allocation67_spill] sm:$0xff] }
 0x195   : > { %946 = vmatpush.msra.mxu1 %v2964_v35  ;;  %1030 = vmatpush.msrb.mxu3 %v2914_v0  ;;  %v4079_v35 = vld [vmem:[#allocation66_spill] sm:$0xff]  ;;  %v651_v0 = vld [vmem:[%s3713_s2 + $0x8] sm:$0xff] }
 0x196   : > { %1076 = vmatpush.msrb.mxu2 %v4076_v23  ;;  %1724 = vmatmul.msk.f32.vlgmr.msra.gmra.mxu1 %vm666_vm4, %v4077_v22 }
 0x197   : > { %1000 = vmatpush.msrb.mxu1 %v2599_v9  ;;  %1297 = vmatpush.msrb.mxu0 %v2514_v38 }
 0x198   : > { %973 = vmatmul.f32.gmra.mxu2 %v3206_v40  ;;  %1031 = vmatpush.msrb.mxu3 %v4078_v8  ;;  %v4081_v8 = vld [vmem:[#allocation72_spill] sm:$0xff] }
 0x199   : > { %1077 = vmatpush.msrb.mxu2 %v4079_v35  ;;  %927 = vmatmul.f32.gmra.mxu3 %v3206_v40  ;;  %v4080_v35 = vld [vmem:[#allocation71_spill] sm:$0xff] }
 0x19a   : > { %1001 = vmatpush.msrb.mxu1 %v2644_v57  ;;  %1298 = vmatpush.msrb.mxu0 %v2580_v55 }
 0x19b   : > { %2074 = vset.pattern.permute.xlu1 %v2103_v60  ;;  %1032 = vmatpush.msrb.mxu3 %v2952_v1  ;;  %v4082_v60 = vld [vmem:[#allocation75_spill] sm:$0xff] }
 0x19c   : > { %1078 = vmatpush.msrb.mxu2 %v2955_v32  ;;  %659 = vperm.xlu1 %2074, %v651_v0   ;;  %v4083_v32 = vld [vmem:[#allocation73_spill] sm:$0xff]  ;;  %v4084_v0 = vld [vmem:[#allocation6_spill] sm:$0xff] }
 0x19d   : > { %1002 = vmatpush.msrb.mxu1 %v2617_v56  ;;  %1299 = vmatpush.msrb.mxu0 %v2557_v43  ;;  %v4085_v43 = vld [vmem:[#allocation78_spill] sm:$0xff] }
 0x19e   : > { %1033 = vmatpush.msrb.mxu3 %v4080_v35  ;;  %1079 = vmatpush.msrb.mxu2 %v4081_v8  ;;  %v4086_v35 = vld [vmem:[#allocation77_spill] sm:$0xff]  ;;  %v4087_v8 = vld [vmem:[#allocation76_spill] sm:$0xff] }
 0x19f   : > { %1003 = vmatpush.msrb.mxu1 %v2624_v19  ;;  %1300 = vmatpush.msrb.mxu0 %v2606_v3 }
 0x1a0   : > { %1034 = vmatpush.msrb.mxu3 %v2994_v13  ;;  %1065 = vmatmul.f32.gmra.mxu0 %v3206_v40 }
 0x1a1   : > { %1080 = vmatpush.msrb.mxu2 %v4082_v60  ;;  %1725 = vmatmul.msk.f32.gmra.mxu1 %vm666_vm4, %v4083_v32 }
 0x1a2   : > { %1004 = vmatpush.msrb.mxu1 %v4084_v0  ;;  %1301 = vmatpush.msrb.mxu0 %v4085_v43  ;;  %v3250_v43 = vld [vmem:[%s3712_s1 + $0x48] sm:$0xff] }
 0x1a3   : > { %1035 = vmatpush.msrb.mxu3 %v4086_v35  ;;  %1081 = vmatpush.msrb.mxu2 %v4087_v8 }
 0x1a4   : > { %1005 = vmatpush.msrb.mxu1 %v4023_v12  ;;  %1302 = vmatpush.msrb.mxu0 %v3032_v6  ;;  %v4088_v12 = vld [vmem:[#allocation21_spill] sm:$0xff] }
 0x1a5   : > { %1036 = vmatpush.msrb.mxu3 %v3026_v16  ;;  %1082 = vmatpush.msrb.mxu2 %v3014_v27  ;;  %v4089_v6 = vld [vmem:[#allocation81_spill] sm:$0xff] }
 0x1a6   : > { %1006 = vmatpush.msrb.mxu1 %v4026_v20  ;;  %1303 = vmatpush.msrb.mxu0 %v3047_v63  ;;  %v4090_v63 = vld [vmem:[#allocation13_spill] sm:$0xff] }
 0x1a7   : > { %1037 = vmatpush.msrb.mxu3 %v3038_v53  ;;  %1083 = vmatpush.msrb.mxu2 %v3041_v45 }
 0x1a8   : > { %1007 = vmatpush.msrb.mxu1 %v4088_v12  ;;  %1304 = vmatpush.msrb.mxu0 %v4089_v6  ;;  %v4091_v6 = vld [vmem:[#allocation24_spill] sm:$0xff] }
 0x1a9   : > { %1038 = vmatpush.msrb.mxu3 %v3063_v52  ;;  %1084 = vmatpush.msrb.mxu2 %v3051_v2  ;;  %v4092_v2 = vld [vmem:[#allocation27_spill] sm:$0xff] }
 0x1aa   : > { %1738 = vmatmul.msk.f32.vlgmr.msra.gmra.mxu0 %vm666_vm4, %v3250_v43  ;;  %1008 = vmatpush.msrb.mxu1 %v4032_v49 }
 0x1ab   : > { %1467 = vmatpush.msra.mxu0 %v2683_v4  ;;  %1730 = vmatmul.msk.f32.vlgmr.msrb.gmra.mxu2 %vm666_vm4, %v4077_v22  ;;  %v4093_v4 = vld [vmem:[#allocation3_spill] sm:$0xff] }
 0x1ac   : > { %1151 = vmatpush.msra.mxu3 %v2520_v36  ;;  %1197 = vmatpush.msra.mxu2 %v4090_v63 }
 0x1ad   : > { %1468 = vmatpush.msra.mxu0 %v2690_v10  ;;  %1009 = vmatpush.msrb.mxu1 %v4091_v6  ;;  %v4094_v10 = vld [vmem:[#allocation41_spill] sm:$0xff] }
 0x1ae   : > { %1152 = vmatpush.msra.mxu3 %v2524_v48  ;;  %1198 = vmatpush.msra.mxu2 %v4092_v2 }
 0x1af   : > { %1469 = vmatpush.msra.mxu0 %v2703_v11  ;;  %1010 = vmatpush.msrb.mxu1 %v4036_v54  ;;  %v4095_v11 = vld [vmem:[#allocation44_spill] sm:$0xff] }
 0x1b0   : > { %1153 = vmatpush.msra.mxu3 %v2535_v61  ;;  %1199 = vmatpush.msra.mxu2 %v4037_v62 }
 0x1b1   : > { %1470 = vmatpush.msra.mxu0 %v4093_v4  ;;  %1011 = vmatpush.msrb.mxu1 %v4038_v26  ;;  %v4096_v4 = vld [vmem:[#allocation5_spill] sm:$0xff] }
 0x1b2   : > { %1154 = vmatpush.msra.mxu3 %v2544_v44  ;;  %1200 = vmatpush.msra.mxu2 %v4039_v24  ;;  %v4099_v24 = vld [vmem:[#allocation17_spill] sm:$0xff] }
 0x1b3   : > { %1471 = vmatpush.msra.mxu0 %v4094_v10  ;;  %1012 = vmatpush.msrb.mxu1 %v3085_v37  ;;  %v4097_v10 = vld [vmem:[#allocation46_spill] sm:$0xff]  ;;  %v4098_v37 = vld [vmem:[#allocation28_spill] sm:$0xff] }
 0x1b4   : > { %1731 = vmatmul.msk.f32.gmra.mxu2 %vm666_vm4, %v4083_v32  ;;  %1155 = vmatpush.msra.mxu3 %v2329_v33  ;;  %v4100_v33 = vld [vmem:[#allocation7_spill] sm:$0xff] }
 0x1b5   : > { %1201 = vmatpush.msra.mxu2 %v2281_v59  ;;  %1728 = vmatmul.msk.f32.vlgmr.msrb.gmra.mxu3 %vm666_vm4, %v4077_v22  ;;  %v3295_v22 = vld [vmem:[%s3712_s1 + $0x58] sm:$0xff] }
 0x1b6   : > { %1472 = vmatpush.msra.mxu0 %v4095_v11  ;;  %1013 = vmatpush.msrb.mxu1 %v3092_v18  ;;  %v4101_v11 = vld [vmem:[#allocation49_spill] sm:$0xff]  ;;  %v4102_v18 = vld [vmem:[#allocation20_spill] sm:$0xff] }
 0x1b7   : > { %1156 = vmatpush.msra.mxu3 %v2332_v34  ;;  %1202 = vmatpush.msra.mxu2 %v4096_v4  ;;  %v4103_v34 = vld [vmem:[#allocation16_spill] sm:$0xff]  ;;  %v4104_v4 = vld [vmem:[#allocation22_spill] sm:$0xff] }
 0x1b8   : > { %1473 = vmatpush.msra.mxu0 %v4097_v10  ;;  %1014 = vmatpush.msrb.mxu1 %v4098_v37  ;;  %v4105_v10 = vld [vmem:[#allocation2_spill] sm:$0xff] }
 0x1b9   : > { %1157 = vmatpush.msra.mxu3 %v4099_v24  ;;  %1203 = vmatpush.msra.mxu2 %v4100_v33  ;;  %v4106_v33 = vld [vmem:[#allocation51_spill] sm:$0xff] }
 0x1ba   : > { %1474 = vmatpush.msra.mxu0 %v4101_v11  ;;  %1015 = vmatpush.msrb.mxu1 %v4102_v18  ;;  %v4107_v11 = vld [vmem:[#allocation42_spill] sm:$0xff]  ;;  %v4108_v18 = vld [vmem:[#allocation53_spill] sm:$0xff] }
 0x1bb   : > { %1158 = vmatpush.msra.mxu3 %v4103_v34  ;;  %1204 = vmatpush.msra.mxu2 %v4104_v4  ;;  %v4109_v4 = vld [vmem:[#allocation23_spill] sm:$0xff]  ;;  %v4110_v34 = vld [vmem:[#allocation25_spill] sm:$0xff] }
 0x1bc   : > { %1739 = vmatmul.msk.f32.gmra.mxu0 %vm666_vm4, %v3295_v22  ;;  %1016 = vmatmul.f32.vlgmr.msrb.gmra.mxu1 %v3130_v30  ;;  %v4111_v30 = vld [vmem:[#allocation45_spill] sm:$0xff] }
 0x1bd   : > { %1178 = vmatpush.msra.mxu1 %v4105_v10  ;;  %1475 = vmatpush.msra.mxu0 %v4106_v33  ;;  %v4112_v33 = vld [vmem:[#allocation26_spill] sm:$0xff] }
 0x1be   : > { %1159 = vmatpush.msra.mxu3 %v4046_v14  ;;  %1205 = vmatpush.msra.mxu2 %v4047_v28  ;;  %v3320_v28 = vld [vmem:[%s3712_s1 + $0x40] sm:$0xff] }
 0x1bf   : > { %1729 = vmatmul.msk.f32.gmra.mxu3 %vm666_vm4, %v4083_v32  ;;  %1179 = vmatpush.msra.mxu1 %v4107_v11  ;;  %v4113_v32 = vld [vmem:[#allocation14_spill] sm:$0xff] }
 0x1c0   : > { %1476 = vmatpush.msra.mxu0 %v4108_v18  ;;  %1160 = vmatpush.msra.mxu3 %v4109_v4  ;;  %v4114_v18 = vld [vmem:[#allocation59_spill] sm:$0xff]  ;;  %v4120_v11 = vld [vmem:[#allocation58_spill] sm:$0xff] }
 0x1c1   : > { %1206 = vmatpush.msra.mxu2 %v4110_v34  ;;  %1180 = vmatpush.msra.mxu1 %v4111_v30  ;;  %v4115_v4 = vld [vmem:[#allocation31_spill] sm:$0xff]  ;;  %v4119_v30 = vld [vmem:[#allocation18_spill] sm:$0xff] }
 0x1c2   : > { %1477 = vmatpush.msra.mxu0 %v4053_v21  ;;  %1161 = vmatpush.msra.mxu3 %v4112_v33  ;;  %v4116_v34 = vld [vmem:[#allocation19_spill] sm:$0xff]  ;;  %v4117_v21 = vld [vmem:[#allocation37_spill] sm:$0xff]  ;;  %v4118_v33 = vld [vmem:[#allocation48_spill] sm:$0xff] }
 0x1c3   : > { %1207 = vmatpush.msra.mxu2 %v4113_v32  ;;  %1181 = vmatpush.msra.mxu1 %v4056_v29  ;;  %v4121_v32 = vld [vmem:[#allocation39_spill] sm:$0xff]  ;;  %v4122_v29 = vld [vmem:[#allocation50_spill] sm:$0xff] }
 0x1c4   : > { %1478 = vmatpush.msra.mxu0 %v4114_v18  ;;  %1162 = vmatpush.msra.mxu3 %v4115_v4  ;;  %v4123_v18 = vld [vmem:[#allocation38_spill] sm:$0xff] }
 0x1c5   : > { %1208 = vmatpush.msra.mxu2 %v4116_v34  ;;  %1305 = vmatmul.f32.vlgmr.msrb.gmra.mxu0 %v3320_v28  ;;  %v4124_v4 = vld [vmem:[#allocation82_spill] sm:$0xff] }
 0x1c6   : > { %1532 = vmatpush.msrb.mxu0 %v4117_v21  ;;  %1019 = vmatmul.f32.gmra.mxu1 %v3206_v40  ;;  %v4125_v40 = vld [vmem:[#allocation54_spill] sm:$0xff]  ;;  %v4126_v21 = vld [vmem:[#allocation40_spill] sm:$0xff] }
 0x1c7   : > { %1182 = vmatpush.msra.mxu1 %v4118_v33  ;;  %1163 = vmatpush.msra.mxu3 %v4119_v30 }
 0x1c8   : > { %1209 = vmatpush.msra.mxu2 %v4120_v11  ;;  %1533 = vmatpush.msrb.mxu0 %v4121_v32  ;;  %v4127_v32 = vld [vmem:[#allocation63_spill] sm:$0xff] }
 0x1c9   : > { %1183 = vmatpush.msra.mxu1 %v4122_v29  ;;  %1164 = vmatpush.msra.mxu3 %v4123_v18 }
 0x1ca   : > { %1210 = vmatpush.msra.mxu2 %v4124_v4  ;;  %1534 = vmatpush.msrb.mxu0 %v2647_v50  ;;  %v4128_v50 = vld [vmem:[#allocation62_spill] sm:$0xff] }
 0x1cb   : > { %1184 = vmatpush.msra.mxu1 %v4067_v42  ;;  %1165 = vmatpush.msra.mxu3 %v3168_v7 }
 0x1cc   : > { %1211 = vmatpush.msra.mxu2 %v4125_v40  ;;  %1535 = vmatpush.msrb.mxu0 %v4126_v21  ;;  %v4129_v21 = vld [vmem:[#allocation55_spill] sm:$0xff] }
 0x1cd   : > { %1185 = vmatpush.msra.mxu1 %v4069_v51  ;;  %1166 = vmatpush.msra.mxu3 %v3179_v47 }
 0x1ce   : > { %1212 = vmatpush.msra.mxu2 %v3183_v17  ;;  %1536 = vmatpush.msrb.mxu0 %v2427_v25  ;;  %v4130_v17 = vld [vmem:[#allocation30_spill] sm:$0xff]  ;;  %v4131_v25 = vld [vmem:[#allocation32_spill] sm:$0xff] }
 0x1cf   : > { %1186 = vmatpush.msra.mxu1 %v4127_v32  ;;  %1213 = vmatmul.f32.vlgmr.msra.gmra.mxu2 %v3320_v28  ;;  %v4133_v32 = vld [vmem:[#allocation65_spill] sm:$0xff] }
 0x1d0   : > { %1270 = vmatpush.msrb.mxu3 %v4072_v31  ;;  %1316 = vmatpush.msrb.mxu2 %v4073_v5  ;;  %v4132_v5 = vld [vmem:[#allocation70_spill] sm:$0xff] }
 0x1d1   : > { %1167 = vmatmul.f32.vlgmr.msra.gmra.mxu3 %v3320_v28  ;;  %1537 = vmatpush.msrb.mxu0 %v2463_v15  ;;  %v3365_v15 = vld [vmem:[%s3712_s1 + $0x50] sm:$0xff] }
 0x1d2   : > { %1187 = vmatpush.msra.mxu1 %v2923_v46  ;;  %1271 = vmatpush.msrb.mxu3 %v4128_v50 }
 0x1d3   : > { %1317 = vmatpush.msrb.mxu2 %v4129_v21  ;;  %1538 = vmatpush.msrb.mxu0 %v4130_v17  ;;  %v4134_v17 = vld [vmem:[#allocation67_spill] sm:$0xff] }
 0x1d4   : > { %1188 = vmatpush.msra.mxu1 %v2947_v41  ;;  %1272 = vmatpush.msrb.mxu3 %v2898_v58 }
 0x1d5   : > { %1318 = vmatpush.msrb.mxu2 %v4075_v39  ;;  %1539 = vmatpush.msrb.mxu0 %v4131_v25  ;;  %v4135_v25 = vld [vmem:[#allocation66_spill] sm:$0xff] }
 0x1d6   : > { %1189 = vmatpush.msra.mxu1 %v4132_v5  ;;  %1273 = vmatpush.msrb.mxu3 %v4133_v32  ;;  %v4139_v32 = vld [vmem:[#allocation72_spill] sm:$0xff] }
 0x1d7   : > { %1319 = vmatpush.msrb.mxu2 %v4076_v23  ;;  %1736 = vmatmul.msk.f32.vlgmr.msra.gmra.mxu1 %vm666_vm4, %v3250_v43  ;;  %v4136_v23 = vld [vmem:[#allocation69_spill] sm:$0xff] }
 0x1d8   : > { %1243 = vmatpush.msrb.mxu1 %v2599_v9  ;;  %1540 = vmatpush.msrb.mxu0 %v2514_v38  ;;  %v4137_v9 = vld [vmem:[#allocation33_spill] sm:$0xff]  ;;  %v4138_v38 = vld [vmem:[#allocation71_spill] sm:$0xff] }
 0x1d9   : > { %1216 = vmatmul.f32.gmra.mxu2 %v3365_v15  ;;  %1274 = vmatpush.msrb.mxu3 %v4134_v17 }
 0x1da   : > { %1320 = vmatpush.msrb.mxu2 %v4135_v25  ;;  %1170 = vmatmul.f32.gmra.mxu3 %v3365_v15 }
 0x1db   : > { %1244 = vmatpush.msrb.mxu1 %v2644_v57  ;;  %1541 = vmatpush.msrb.mxu0 %v2580_v55  ;;  %v690_v55 = vpop.f32.mrf.mxu0 }
 0x1dc   : > { %1275 = vmatpush.msrb.mxu3 %v2952_v1  ;;  %1321 = vmatpush.msrb.mxu2 %v4136_v23  ;;  %v736_v1 = vpop.f32.mrf.mxu2 }
 0x1dd   : > { %1245 = vmatpush.msrb.mxu1 %v2617_v56  ;;  %1542 = vmatpush.msrb.mxu0 %v4137_v9  ;;  %v713_v9 = vpop.f32.mrf.mxu1  ;;  %v759_v56 = vpop.f32.mrf.mxu3 }
 0x1de   : > { %1276 = vmatpush.msrb.mxu3 %v4138_v38  ;;  %1322 = vmatpush.msrb.mxu2 %v4139_v32  ;;  %v4143_v32 = vld [vmem:[#allocation79_spill] sm:$0xff] }
 0x1df   : > { %1246 = vmatpush.msrb.mxu1 %v2624_v19  ;;  %1543 = vmatpush.msrb.mxu0 %v2606_v3  ;;  %v3393_v19 = vadd.f32 %v713_v9, %v690_v55  ;;  %v3395_v3 = vadd.f32 %v759_v56, %v736_v1  ;;  %v4144_v56 = vld [vmem:[#allocation8_spill] sm:$0xff] }
 0x1e0   : > { %1277 = vmatpush.msrb.mxu3 %v2994_v13  ;;  %1323 = vmatpush.msrb.mxu2 %v4082_v60  ;;  %v4141_v60 = vld [vmem:[#allocation78_spill] sm:$0xff]  ;;  %v4142_v13 = vld [vmem:[#allocation4_spill] sm:$0xff] }
 0x1e1   : > { %1737 = vmatmul.msk.f32.gmra.mxu1 %vm666_vm4, %v3295_v22  ;;  %1308 = vmatmul.f32.gmra.mxu0 %v3365_v15  ;;  %4140 = vst [vmem:[#allocation43_spill] sm:$0xff] %v3393_v19  ;;  %v4145_v55 = vld [vmem:[#allocation80_spill] sm:$0xff] }
 0x1e2   : > { %1247 = vmatpush.msrb.mxu1 %v4084_v0  ;;  %1278 = vmatpush.msrb.mxu3 %v4086_v35 }
 0x1e3   : > { %1324 = vmatpush.msrb.mxu2 %v4087_v8  ;;  %1544 = vmatpush.msrb.mxu0 %v4141_v60  ;;  %v693_v1 = vpop.f32.mrf.mxu0 }
 0x1e4   : > { %1248 = vmatpush.msrb.mxu1 %v4142_v13  ;;  %1279 = vmatpush.msrb.mxu3 %v3026_v16  ;;  %v739_v60 = vpop.f32.mrf.mxu2 }
 0x1e5   : > { %1325 = vmatpush.msrb.mxu2 %v3014_v27  ;;  %1545 = vmatpush.msrb.mxu0 %v4143_v32  ;;  %v716_v9 = vpop.f32.mrf.mxu1  ;;  %v762_v32 = vpop.f32.mrf.mxu3 }
 0x1e6   : > { %1249 = vmatpush.msrb.mxu1 %v4026_v20  ;;  %1280 = vmatpush.msrb.mxu3 %v3038_v53  ;;  %v3414_v19 = vadd.f32 %v716_v9, %v693_v1  ;;  %v4149_v1 = vld [vmem:[#allocation12_spill] sm:$0xff]  ;;  %v4156_v9 = vld [vmem:[#allocation22_spill] sm:$0xff] }
 0x1e7   : > { %1326 = vmatpush.msrb.mxu2 %v3041_v45  ;;  %1546 = vmatpush.msrb.mxu0 %v4144_v56  ;;  %v3416_v56 = vadd.f32 %v762_v32, %v739_v60  ;;  %v4155_v60 = vld [vmem:[#allocation20_spill] sm:$0xff]  ;;  %v4159_v32 = vld [vmem:[#allocation23_spill] sm:$0xff] }
 0x1e8   : > { %1250 = vmatpush.msrb.mxu1 %v4088_v12  ;;  %1281 = vmatpush.msrb.mxu3 %v3063_v52 }
 0x1e9   : > { %1327 = vmatpush.msrb.mxu2 %v4145_v55  ;;  %1740 = vmatmul.msk.f32.vlgmr.msrb.gmra.mxu3 %vm666_vm4, %v3250_v43 }
 0x1ea   : > { %1394 = vmatpush.msra.mxu3 %v2520_v36  ;;  %1251 = vmatpush.msrb.mxu1 %v4032_v49  ;;  %v4146_v36 = vld [vmem:[#allocation81_spill] sm:$0xff] }
 0x1eb   : > { %1742 = vmatmul.msk.f32.vlgmr.msrb.gmra.mxu2 %vm666_vm4, %v3250_v43  ;;  %1547 = vmatpush.msrb.mxu0 %v4146_v36  ;;  %v3440_v43 = vld [vmem:[%s3712_s1 + $0x68] sm:$0xff]  ;;  %v828_v36 = vpop.f32.mrf.mxu0 }
 0x1ec   : > { %1440 = vmatpush.msra.mxu2 %v4090_v63  ;;  %1395 = vmatpush.msra.mxu3 %v2524_v48  ;;  %v4147_v48 = vld [vmem:[#allocation29_spill] sm:$0xff] }
 0x1ed   : > { %1252 = vmatpush.msrb.mxu1 %v4091_v6  ;;  %v4148_v63 = vld [vmem:[#allocation9_spill] sm:$0xff]  ;;  %1750 = vmatmul.msk.f32.vlgmr.msra.gmra.mxu0 %vm666_vm4, %v3440_v43 }
 0x1ee   : > { %1441 = vmatpush.msra.mxu2 %v4092_v2  ;;  %1396 = vmatpush.msra.mxu3 %v2535_v61  ;;  %v4150_v61 = vld [vmem:[#allocation10_spill] sm:$0xff]  ;;  %v4152_v2 = vld [vmem:[#allocation5_spill] sm:$0xff] }
 0x1ef   : > { %1253 = vmatpush.msrb.mxu1 %v4036_v54 }
 0x1f0   : > { %1442 = vmatpush.msra.mxu2 %v4037_v62  ;;  %1397 = vmatpush.msra.mxu3 %v2544_v44  ;;  %v4151_v44 = vld [vmem:[#allocation15_spill] sm:$0xff]  ;;  %v4154_v62 = vld [vmem:[#allocation16_spill] sm:$0xff] }
 0x1f1   : > { %1254 = vmatpush.msrb.mxu1 %v4038_v26  ;;  %1741 = vmatmul.msk.f32.gmra.mxu3 %vm666_vm4, %v3295_v22 }
 0x1f2   : > { %1443 = vmatpush.msra.mxu2 %v4147_v48  ;;  %1398 = vmatpush.msra.mxu3 %v4148_v63  ;;  %v3463_v63 = vld [vmem:[%s3712_s1 + $0x78] sm:$0xff] }
 0x1f3   : > { %1255 = vmatpush.msrb.mxu1 %v4149_v1  ;;  %1743 = vmatmul.msk.f32.gmra.mxu2 %vm666_vm4, %v3295_v22  ;;  %v4158_v22 = vld [vmem:[#allocation42_spill] sm:$0xff] }
 0x1f4   : > { %1444 = vmatpush.msra.mxu2 %v2281_v59  ;;  %1399 = vmatpush.msra.mxu3 %v4150_v61  ;;  %v4153_v59 = vld [vmem:[#allocation7_spill] sm:$0xff]  ;;  %v4160_v61 = vld [vmem:[#allocation25_spill] sm:$0xff] }
 0x1f5   : > { %1256 = vmatpush.msrb.mxu1 %v4151_v44  ;;  %1751 = vmatmul.msk.f32.gmra.mxu0 %vm666_vm4, %v3463_v63 }
 0x1f6   : > { %1445 = vmatpush.msra.mxu2 %v4152_v2  ;;  %1400 = vmatpush.msra.mxu3 %v4099_v24  ;;  %v4157_v24 = vld [vmem:[#allocation11_spill] sm:$0xff] }
 0x1f7   : > { %1257 = vmatpush.msrb.mxu1 %v4098_v37 }
 0x1f8   : > { %1446 = vmatpush.msra.mxu2 %v4153_v59  ;;  %1401 = vmatpush.msra.mxu3 %v4154_v62  ;;  %v4163_v62 = vld [vmem:[#allocation14_spill] sm:$0xff] }
 0x1f9   : > { %1258 = vmatpush.msrb.mxu1 %v4155_v60 }
 0x1fa   : > { %1447 = vmatpush.msra.mxu2 %v4156_v9  ;;  %1259 = vmatmul.f32.vlgmr.msrb.gmra.mxu1 %v3320_v28 }
 0x1fb   : > { %1421 = vmatpush.msra.mxu1 %v4105_v10  ;;  %1402 = vmatpush.msra.mxu3 %v4046_v14  ;;  %v4161_v10 = vld [vmem:[#allocation45_spill] sm:$0xff]  ;;  %v4162_v14 = vld [vmem:[#allocation26_spill] sm:$0xff] }
 0x1fc   : > { %1448 = vmatpush.msra.mxu2 %v4157_v24  ;;  %v851_v48 = vpop.f32.mrf.mxu2  ;;  %v4164_v24 = vld [vmem:[#allocation47_spill] sm:$0xff] }
 0x1fd   : > { %1422 = vmatpush.msra.mxu1 %v4158_v22  ;;  %1403 = vmatpush.msra.mxu3 %v4159_v32  ;;  %v3466_v28 = vadd.f32 %v851_v48, %v828_v36  ;;  %v805_v59 = vpop.f32.mrf.mxu3  ;;  %v4165_v22 = vld [vmem:[#allocation31_spill] sm:$0xff] }
 0x1fe   : > { %1449 = vmatpush.msra.mxu2 %v4160_v61  ;;  %v782_v2 = vpop.f32.mrf.mxu1 }
 0x1ff   : > { %1423 = vmatpush.msra.mxu1 %v4161_v10  ;;  %1404 = vmatpush.msra.mxu3 %v4162_v14  ;;  %v3471_v9 = vadd.f32 %v805_v59, %v782_v2 }
 0x200   : > { %1450 = vmatpush.msra.mxu2 %v4163_v62 }
 0x201   : > { %1424 = vmatpush.msra.mxu1 %v4164_v24  ;;  %1405 = vmatpush.msra.mxu3 %v4165_v22 }
 0x202   : > { %1451 = vmatpush.msra.mxu2 %v4116_v34  ;;  %1262 = vmatmul.f32.gmra.mxu1 %v3365_v15  ;;  %v3490_v34 = vld [vmem:[%s3712_s1 + $0x60] sm:$0xff] }
 0x203   : > { %1425 = vmatpush.msra.mxu1 %v4118_v33  ;;  %1406 = vmatpush.msra.mxu3 %v4119_v30  ;;  %v831_v33 = vpop.f32.mrf.mxu0 }
 0x204   : > { %1452 = vmatpush.msra.mxu2 %v4120_v11  ;;  %1548 = vmatmul.f32.vlgmr.msrb.gmra.mxu0 %v3490_v34 }
 0x205   : > { %1426 = vmatpush.msra.mxu1 %v4122_v29  ;;  %1407 = vmatpush.msra.mxu3 %v4123_v18  ;;  %v4166_v29 = vld [vmem:[#allocation57_spill] sm:$0xff]  ;;  %v4168_v18 = vld [vmem:[#allocation52_spill] sm:$0xff] }
 0x206   : > { %1453 = vmatpush.msra.mxu2 %v4124_v4  ;;  %v854_v15 = vpop.f32.mrf.mxu2  ;;  %v4167_v4 = vld [vmem:[#allocation63_spill] sm:$0xff] }
 0x207   : > { %1427 = vmatpush.msra.mxu1 %v4067_v42  ;;  %1408 = vmatpush.msra.mxu3 %v3168_v7  ;;  %v3493_v11 = vadd.f32 %v854_v15, %v831_v33  ;;  %v808_v42 = vpop.f32.mrf.mxu3 }
 0x208   : > { %1454 = vmatpush.msra.mxu2 %v4125_v40  ;;  %v4176_v40 = vld [vmem:[#allocation74_spill] sm:$0xff] }
 0x209   : > { %1428 = vmatpush.msra.mxu1 %v4069_v51  ;;  %1409 = vmatpush.msra.mxu3 %v3179_v47  ;;  %v785_v7 = vpop.f32.mrf.mxu1  ;;  %v3514_v47 = vld [vmem:[%s3712_s1 + $0x70] sm:$0xff] }
 0x20a   : > { %1455 = vmatpush.msra.mxu2 %v4166_v29  ;;  %v3502_v30 = vadd.f32 %v808_v42, %v785_v7  ;;  %1410 = vmatmul.f32.vlgmr.msra.gmra.mxu3 %v3490_v34  ;;  %v4175_v51 = vld [vmem:[#allocation36_spill] sm:$0xff] }
 0x20b   : > { %1513 = vmatpush.msrb.mxu3 %v4072_v31  ;;  %1429 = vmatpush.msra.mxu1 %v4167_v4  ;;  %v4170_v31 = vld [vmem:[#allocation64_spill] sm:$0xff] }
 0x20c   : > { %1456 = vmatmul.f32.vlgmr.msra.gmra.mxu2 %v3490_v34  ;;  %1551 = vmatmul.f32.gmra.mxu0 %v3514_v47 }
 0x20d   : > { %1559 = vmatpush.msrb.mxu2 %v4168_v18  ;;  %1430 = vmatpush.msra.mxu1 %v2923_v46  ;;  %v4169_v46 = vld [vmem:[#allocation65_spill] sm:$0xff] }
 0x20e   : > { %1514 = vmatpush.msrb.mxu3 %v4128_v50  ;;  %v4177_v50 = vld [vmem:[#allocation75_spill] sm:$0xff] }
 0x20f   : > { %1560 = vmatpush.msrb.mxu2 %v4129_v21  ;;  %1431 = vmatpush.msra.mxu1 %v2947_v41  ;;  %v4171_v41 = vld [vmem:[#allocation34_spill] sm:$0xff]  ;;  %v3537_v21 = vpop.f32.mrf.mxu0 }
 0x210   : > { %1515 = vmatpush.msrb.mxu3 %v2898_v58  ;;  %v4173_v58 = vld [vmem:[#allocation35_spill] sm:$0xff] }
 0x211   : > { %1561 = vmatpush.msrb.mxu2 %v4075_v39  ;;  %1432 = vmatpush.msra.mxu1 %v4132_v5  ;;  %v4172_v5 = vld [vmem:[#allocation68_spill] sm:$0xff] }
 0x212   : > { %1516 = vmatpush.msrb.mxu3 %v4169_v46  ;;  %1748 = vmatmul.msk.f32.vlgmr.msra.gmra.mxu1 %vm666_vm4, %v3440_v43  ;;  %v4174_v39 = vld [vmem:[#allocation72_spill] sm:$0xff] }
 0x213   : > { %1562 = vmatpush.msrb.mxu2 %v4170_v31  ;;  %1486 = vmatpush.msrb.mxu1 %v4171_v41 }
 0x214   : > { %1459 = vmatmul.f32.gmra.mxu2 %v3514_v47  ;;  %1517 = vmatpush.msrb.mxu3 %v4134_v17  ;;  %v3589_v17 = vpop.permute.xlu1 %659 }
 0x215   : > { %1563 = vmatpush.msrb.mxu2 %v4135_v25  ;;  %1413 = vmatmul.f32.gmra.mxu3 %v3514_v47  ;;  %v863_v7 = vadd.f32 %v3502_v30, %v3589_v17 }
 0x216   : > { %1487 = vmatpush.msrb.mxu1 %v2644_v57  ;;  %1518 = vmatpush.msrb.mxu3 %v4172_v5  ;;  %v3544_v57 = vpop.f32.mrf.mxu2 }
 0x217   : > { %1564 = vmatpush.msrb.mxu2 %v4136_v23  ;;  %v887_v46 = vmul.f32 0.05, %v863_v7  ;;  %vm871_vm11 = vcmp.gt.f32.partialorder %v863_v7, 0.0 }
 0x218   : > { %1488 = vmatpush.msrb.mxu1 %v4173_v58  ;;  %1519 = vmatpush.msrb.mxu3 %v4138_v38 }
 0x219   : > { %1565 = vmatpush.msrb.mxu2 %v4174_v39 }
 0x21a   : > { %1489 = vmatpush.msrb.mxu1 %v4175_v51  ;;  %1520 = vmatpush.msrb.mxu3 %v4176_v40 }
 0x21b   : > { %1566 = vmatpush.msrb.mxu2 %v4177_v50  ;;  %1749 = vmatmul.msk.f32.gmra.mxu1 %vm666_vm4, %v3463_v63 }
 0x21c   : > { %1490 = vmatpush.msrb.mxu1 %v4084_v0  ;;  %1521 = vmatpush.msrb.mxu3 %v4086_v35  ;;  %v3563_v35 = vpop.f32.mrf.mxu3 }
 0x21d   : > { %1567 = vmatpush.msrb.mxu2 %v4087_v8  ;;  %v3560_v8 = vpop.f32.mrf.mxu0 }
 0x21e   : > { %1491 = vmatpush.msrb.mxu1 %v4142_v13  ;;  %1522 = vmatpush.msrb.mxu3 %v3026_v16  ;;  %v3565_v13 = vpop.f32.mrf.mxu2 }
 0x21f   : > { %1568 = vmatpush.msrb.mxu2 %v3014_v27 }
 0x220   : > { %1492 = vmatpush.msrb.mxu1 %v4026_v20  ;;  %1523 = vmatpush.msrb.mxu3 %v3038_v53 }
 0x221   : > { %1569 = vmatpush.msrb.mxu2 %v3041_v45 }
 0x222   : > { %1493 = vmatpush.msrb.mxu1 %v4088_v12  ;;  %1524 = vmatpush.msrb.mxu3 %v3063_v52  ;;  %v3567_v12 = vpop.f32.mrf.mxu1 }
 0x223   : > { %1570 = vmatpush.msrb.mxu2 %v4145_v55  ;;  %1752 = vmatmul.msk.f32.vlgmr.msrb.gmra.mxu3 %vm666_vm4, %v3440_v43  ;;  %v864_v55 = vadd.f32 %v3493_v11, %v3589_v17 }
 0x224   : > { %1494 = vmatpush.msrb.mxu1 %v4032_v49  ;;  %1754 = vmatmul.msk.f32.vlgmr.msrb.gmra.mxu2 %vm666_vm4, %v3440_v43  ;;  %v3582_v20 = vpop.f32.mrf.mxu3 }
 0x225   : > { %v1063_v27 = vpop.f32.mrf.mxu0  ;;  %v880_v36 = vmul.f32 0.25, %v864_v55  ;;  %v888_v48 = vmul.f32 0.05, %v864_v55  ;;  %vm872_vm7 = vcmp.gt.f32.partialorder %v864_v55, 0.0  ;;  %v4178_v55 = vld [vmem:[#allocation43_spill] sm:$0xff] }
 0x226   : > { %1495 = vmatpush.msrb.mxu1 %v4091_v6  ;;  %v3576_v6 = vpop.permute.xlu0 %654 }
 0x227   : > { %v860_v16 = vadd.f32 %v3466_v28, %v3576_v6  ;;  %v859_v43 = vadd.f32 %v3471_v9, %v3576_v6  ;;  %v896_v9 = vsel %vm872_vm7, %v880_v36, %v888_v48 }
 0x228   : > { %1496 = vmatpush.msrb.mxu1 %v4036_v54 }
 0x229   : > { %v884_v52 = vmul.f32 0.05, %v860_v16  ;;  %vm868_vm5 = vcmp.gt.f32.partialorder %v860_v16, 0.0  ;;  %v875_v10 = vmul.f32 0.25, %v859_v43  ;;  %v883_v14 = vmul.f32 0.05, %v859_v43 }
 0x22a   : > { %1497 = vmatpush.msrb.mxu1 %v4038_v26  ;;  %v876_v26 = vmul.f32 0.25, %v860_v16  ;;  %v3584_v49 = vpop.f32.mrf.mxu1  ;;  %vm867_vm9 = vcmp.gt.f32.partialorder %v859_v43, 0.0  ;;  %v857_v43 = vadd.f32 %v4178_v55, %v3576_v6 }
 0x22b   : > { %1753 = vmatmul.msk.f32.gmra.mxu3 %vm666_vm4, %v3463_v63  ;;  %v891_v15 = vsel %vm867_vm9, %v875_v10, %v883_v14  ;;  %v998_v10 = vadd.f32 %v3560_v8, %v3565_v13  ;;  %v3649_v8 = vadd.f32 %v3414_v19, %v3589_v17 }
 0x22c   : > { %1498 = vmatpush.msrb.mxu1 %v4149_v1  ;;  %1755 = vmatmul.msk.f32.gmra.mxu2 %vm666_vm4, %v3463_v63  ;;  %vm865_vm14 = vcmp.gt.f32.partialorder %v857_v43, 0.0 }
 0x22d   : > { %v1066_v38 = vpop.f32.mrf.mxu0 }
 0x22e   : > { %1499 = vmatpush.msrb.mxu1 %v4151_v44  ;;  %v1086_v53 = vpop.f32.mrf.mxu2 }
 0x22f   : > { %v1087_v45 = vadd.f32 %v1086_v53, %v1063_v27 }
 0x230   : > { %1500 = vmatpush.msrb.mxu1 %v4098_v37  ;;  %v892_v37 = vsel %vm868_vm5, %v876_v26, %v884_v52  ;;  %vm869_vm5 = vcmp.gt.f32.partialorder %v3649_v8, 0.0 }
 0x231   : > { %v1095_v54 = vadd.f32 %v1087_v45, %v3576_v6 }
 0x232   : > { %1501 = vmatpush.msrb.mxu1 %v4155_v60 }
 0x233   : > { %1502 = vmatmul.f32.vlgmr.msrb.gmra.mxu1 %v3490_v34  ;;  %vm1103_vm6 = vcmp.gt.f32.partialorder %v1095_v54, 0.0  ;;  %v1111_v23 = vmul.f32 0.25, %v1095_v54  ;;  %v1119_v0 = vmul.f32 0.05, %v1095_v54 }
 0x235   : > { %v1127_v25 = vsel %vm1103_vm6, %v1111_v23, %v1119_v0  ;;  %v1237_v40 = vpop.f32.mrf.mxu0 }
 0x236   : > { %v3593_v1 = vadd.f32 %v1127_v25, %v892_v37  ;;  %v995_v37 = vadd.f32 %v3537_v21, %v3544_v57  ;;  %v949_v25 = vadd.f32 %v3567_v12, %v3563_v35  ;;  %v873_v57 = vmul.f32 0.25, %v857_v43 }
 0x237   : > { %v1089_v44 = vpop.f32.mrf.mxu2  ;;  %v881_v35 = vmul.f32 0.05, %v857_v43 }
 0x238   : > { %v1090_v60 = vadd.f32 %v1089_v44, %v1066_v38  ;;  %v1040_v32 = vpop.f32.mrf.mxu3  ;;  %v858_v38 = vadd.f32 %v3395_v3, %v3576_v6  ;;  %v3631_v3 = vadd.f32 %v3416_v56, %v3589_v17 }
 0x239   : > { %v1017_v63 = vpop.f32.mrf.mxu1 }
 0x23a   : > { %v1099_v61 = vadd.f32 %v1090_v60, %v3589_v17  ;;  %v1041_v28 = vadd.f32 %v1040_v32, %v1017_v63  ;;  %v1093_v60 = vadd.f32 %v995_v37, %v3576_v6  ;;  %v1092_v32 = vadd.f32 %v949_v25, %v3576_v6 }
 0x23b   : > { %1505 = vmatmul.f32.gmra.mxu1 %v3514_v47  ;;  %v879_v47 = vmul.f32 0.25, %v863_v7  ;;  %vm866_vm13 = vcmp.gt.f32.partialorder %v858_v38, 0.0  ;;  %v874_v48 = vmul.f32 0.25, %v858_v38  ;;  %v882_v63 = vmul.f32 0.05, %v858_v38 }
 0x23c   : > { %vm1107_vm8 = vcmp.gt.f32.partialorder %v1099_v61, 0.0  ;;  %v1115_v2 = vmul.f32 0.25, %v1099_v61  ;;  %v1123_v59 = vmul.f32 0.05, %v1099_v61  ;;  %v1094_v62 = vadd.f32 %v1041_v28, %v3576_v6 }
 0x23d   : > { %v895_v58 = vsel %vm871_vm11, %v879_v47, %v887_v46  ;;  %v1240_v30 = vpop.f32.mrf.mxu0  ;;  %vm1101_vm15 = vcmp.gt.f32.partialorder %v1093_v60, 0.0  ;;  %v1109_v61 = vmul.f32 0.25, %v1093_v60  ;;  %v1117_v28 = vmul.f32 0.05, %v1093_v60 }
 0x23e   : > { %v1131_v24 = vsel %vm1107_vm8, %v1115_v2, %v1123_v59  ;;  %vm1102_vm10 = vcmp.gt.f32.partialorder %v1094_v62, 0.0  ;;  %v1110_v22 = vmul.f32 0.25, %v1094_v62  ;;  %v1118_v34 = vmul.f32 0.05, %v1094_v62 }
 0x23f   : > { %v3600_v33 = vadd.f32 %v1131_v24, %v896_v9  ;;  %v1108_v59 = vmul.f32 0.25, %v1092_v32  ;;  %v1116_v62 = vmul.f32 0.05, %v1092_v32  ;;  %v952_v9 = vadd.f32 %v3584_v49, %v3582_v20 }
 0x240   : > { %v1126_v11 = vsel %vm1102_vm10, %v1110_v22, %v1118_v34  ;;  %vm1100_vm0 = vcmp.gt.f32.partialorder %v1092_v32, 0.0  ;;  %v890_v22 = vsel %vm866_vm13, %v874_v48, %v882_v63  ;;  %v889_v34 = vsel %vm865_vm14, %v873_v57, %v881_v35 }
 0x241   : > { %v3602_v29 = vadd.f32 %v1126_v11, %v891_v15  ;;  %v1125_v15 = vsel %vm1101_vm15, %v1109_v61, %v1117_v28  ;;  %v878_v11 = vmul.f32 0.25, %v3631_v3  ;;  %v886_v20 = vmul.f32 0.05, %v3631_v3 }
 0x242   : > { %v1043_v42 = vpop.f32.mrf.mxu3  ;;  %v1097_v49 = vadd.f32 %v998_v10, %v3589_v17  ;;  %v1124_v7 = vsel %vm1100_vm0, %v1108_v59, %v1116_v62  ;;  %vm870_vm1 = vcmp.gt.f32.partialorder %v3631_v3, 0.0 }
 0x243   : > { %v1020_v4 = vpop.f32.mrf.mxu1 }
 0x244   : > { %v1044_v18 = vadd.f32 %v1043_v42, %v1020_v4  ;;  %v1096_v42 = vadd.f32 %v952_v9, %v3589_v17  ;;  %vm1105_vm4 = vcmp.gt.f32.partialorder %v1097_v49, 0.0  ;;  %v1113_v37 = vmul.f32 0.25, %v1097_v49 }
 0x245   : > { %v3609_v52 = vpop.f32.mrf.mxu0  ;;  %v1121_v25 = vmul.f32 0.05, %v1097_v49 }
 0x246   : > { %v1098_v31 = vadd.f32 %v1044_v18, %v3589_v17  ;;  %vm1104_vm6 = vcmp.gt.f32.partialorder %v1096_v42, 0.0  ;;  %v1120_v43 = vmul.f32 0.05, %v1096_v42 }
 0x248   : > { %vm1106_vm12 = vcmp.gt.f32.partialorder %v1098_v31, 0.0  ;;  %v1114_v41 = vmul.f32 0.25, %v1098_v31  ;;  %v1122_v5 = vmul.f32 0.05, %v1098_v31  ;;  %v877_v31 = vmul.f32 0.25, %v3649_v8 }
 0x24a   : > { %v1130_v39 = vsel %vm1106_vm12, %v1114_v41, %v1122_v5  ;;  %v885_v41 = vmul.f32 0.05, %v3649_v8 }
 0x24b   : > { %v3607_v51 = vadd.f32 %v1130_v39, %v895_v58  ;;  %v1133_v39 = vadd.f32 %v1125_v15, %v890_v22 }
 0x24c   : > { %v893_v49 = vsel %vm869_vm5, %v877_v31, %v885_v41 }
 0x252   : > { %v1214_v50 = vpop.f32.mrf.mxu2 }
 0x253   : > { %v1238_v36 = vadd.f32 %v1237_v40, %v1214_v50  ;;  %v1132_v40 = vadd.f32 %v1124_v7, %v889_v34  ;;  %v1129_v34 = vsel %vm1105_vm4, %v1113_v37, %v1121_v25  ;;  %v894_v7 = vsel %vm870_vm1, %v878_v11, %v886_v20 }
 0x254   : > { %v1168_v27 = vpop.f32.mrf.mxu3  ;;  %v1191_v16 = vpop.f32.mrf.mxu1 }
 0x255   : > { %v1192_v21 = vadd.f32 %v1191_v16, %v1168_v27  ;;  %v1336_v56 = vadd.f32 %v1238_v36, %v3576_v6 }
 0x257   : > { %v1335_v24 = vadd.f32 %v1192_v21, %v3576_v6  ;;  %v1352_v4 = vmul.f32 0.25, %v1336_v56  ;;  %v1360_v18 = vmul.f32 0.05, %v1336_v56  ;;  %vm1344_vm2 = vcmp.gt.f32.partialorder %v1336_v56, 0.0 }
 0x259   : > { %v1351_v47 = vmul.f32 0.25, %v1335_v24  ;;  %v1359_v19 = vmul.f32 0.05, %v1335_v24  ;;  %vm1343_vm3 = vcmp.gt.f32.partialorder %v1335_v24, 0.0 }
 0x25b   : > { %v1367_v38 = vsel %vm1343_vm3, %v1351_v47, %v1359_v19 }
 0x25c   : > { %v1217_v53 = vpop.f32.mrf.mxu2  ;;  %v1375_v21 = vadd.f32 %v1367_v38, %v1132_v40 }
 0x25d   : > { %v1171_v45 = vpop.f32.mrf.mxu3  ;;  %v1241_v46 = vadd.f32 %v1240_v30, %v1217_v53  ;;  %v1368_v30 = vsel %vm1344_vm2, %v1352_v4, %v1360_v18 }
 0x25e   : > { %v1194_v26 = vpop.f32.mrf.mxu1  ;;  %v3625_v44 = vpop.f32.mrf.mxu0  ;;  %v1376_v36 = vadd.f32 %v1368_v30, %v1133_v39 }
 0x25f   : > { %v1195_v5 = vadd.f32 %v1194_v26, %v1171_v45  ;;  %v1340_v55 = vadd.f32 %v1241_v46, %v3589_v17  ;;  %v1112_v26 = vmul.f32 0.25, %v1096_v42 }
 0x261   : > { %v1339_v60 = vadd.f32 %v1195_v5, %v3589_v17  ;;  %vm1348_vm9 = vcmp.gt.f32.partialorder %v1340_v55, 0.0  ;;  %v1356_v28 = vmul.f32 0.25, %v1340_v55  ;;  %v1364_v10 = vmul.f32 0.05, %v1340_v55 }
 0x262   : > { %v1128_v47 = vsel %vm1104_vm6, %v1112_v26, %v1120_v43 }
 0x263   : > { %v1355_v62 = vmul.f32 0.25, %v1339_v60  ;;  %v1363_v9 = vmul.f32 0.05, %v1339_v60  ;;  %vm1347_vm10 = vcmp.gt.f32.partialorder %v1339_v60, 0.0  ;;  %v1372_v19 = vsel %vm1348_vm9, %v1356_v28, %v1364_v10 }
 0x264   : > { %v1136_v42 = vadd.f32 %v1128_v47, %v893_v49 }
 0x265   : > { %v1371_v39 = vsel %vm1347_vm10, %v1355_v62, %v1363_v9 }
 0x266   : > { %v1379_v37 = vadd.f32 %v1371_v39, %v1136_v42 }
 0x26a   : > { %v1480_v13 = vpop.f32.mrf.mxu0 }
 0x26c   : > { %v3615_v0 = vpop.f32.mrf.mxu3 }
 0x26e   : > { %v3611_v54 = vpop.f32.mrf.mxu2 }
 0x26f   : > { %v1330_v25 = vadd.f32 %v3611_v54, %v3609_v52 }
 0x271   : > { %v1338_v30 = vadd.f32 %v1330_v25, %v3576_v6 }
 0x272   : > { %v1483_v61 = vpop.f32.mrf.mxu0 }
 0x273   : > { %v1354_v38 = vmul.f32 0.25, %v1338_v30  ;;  %v1362_v55 = vmul.f32 0.05, %v1338_v30  ;;  %vm1346_vm13 = vcmp.gt.f32.partialorder %v1338_v30, 0.0 }
 0x274   : > { %v3639_v2 = vpop.f32.mrf.mxu3 }
 0x275   : > { %v1370_v52 = vsel %vm1346_vm13, %v1354_v38, %v1362_v55 }
 0x276   : > { %v3633_v12 = vpop.f32.mrf.mxu2 }
 0x277   : > { %v3613_v23 = vpop.f32.mrf.mxu1 }
 0x278   : > { %v1284_v26 = vadd.f32 %v3615_v0, %v3613_v23 }
 0x27f   : > { %v3637_v14 = vpop.f32.mrf.mxu1 }
 0x280   : > { %v1287_v28 = vadd.f32 %v3639_v2, %v3637_v14 }
 0x28d   : > { %v1411_v27 = vpop.f32.mrf.mxu3 }
 0x28f   : > { %v1457_v58 = vpop.f32.mrf.mxu2  ;;  %v1434_v16 = vpop.f32.mrf.mxu1 }
 0x290   : > { %v1481_v50 = vadd.f32 %v1480_v13, %v1457_v58  ;;  %v1435_v53 = vadd.f32 %v1434_v16, %v1411_v27  ;;  %v1137_v58 = vadd.f32 %v1129_v34, %v894_v7  ;;  %v1341_v34 = vadd.f32 %v1287_v28, %v3589_v17 }
 0x292   : > { %v1579_v45 = vadd.f32 %v1481_v50, %v3576_v6  ;;  %v1578_v32 = vadd.f32 %v1435_v53, %v3576_v6  ;;  %v1380_v40 = vadd.f32 %v1372_v19, %v1137_v58  ;;  %v1549_v53 = vpop.f32.mrf.mxu0  ;;  %vm1349_vm3 = vcmp.gt.f32.partialorder %v1341_v34, 0.0 }
 0x294   : > { %vm1587_vm7 = vcmp.gt.f32.partialorder %v1579_v45, 0.0  ;;  %v1595_v48 = vmul.f32 0.25, %v1579_v45  ;;  %v1603_v63 = vmul.f32 0.05, %v1579_v45  ;;  %vm1586_vm8 = vcmp.gt.f32.partialorder %v1578_v32, 0.0 }
 0x295   : > { %v1594_v57 = vmul.f32 0.25, %v1578_v32  ;;  %v1602_v35 = vmul.f32 0.05, %v1578_v32  ;;  %v1333_v45 = vadd.f32 %v3633_v12, %v3625_v44  ;;  %v1378_v44 = vadd.f32 %v1370_v52, %v3593_v1 }
 0x296   : > { %v1611_v59 = vsel %vm1587_vm7, %v1595_v48, %v1603_v63 }
 0x297   : > { %v1619_v56 = vadd.f32 %v1611_v59, %v1376_v36  ;;  %v1610_v24 = vsel %vm1586_vm8, %v1594_v57, %v1602_v35  ;;  %v1460_v22 = vpop.f32.mrf.mxu2  ;;  %v1342_v54 = vadd.f32 %v1333_v45, %v3589_v17  ;;  %v1337_v36 = vadd.f32 %v1284_v26, %v3576_v6 }
 0x298   : > { %v1618_v13 = vadd.f32 %v1610_v24, %v1375_v21  ;;  %v1484_v15 = vadd.f32 %v1483_v61, %v1460_v22  ;;  %v1414_v4 = vpop.f32.mrf.mxu3  ;;  %v1437_v18 = vpop.f32.mrf.mxu1 }
 0x299   : > { %1627 = vst [vmem:[%s3669_s9 + $0x8] sm:$0xff] %v1619_v56  ;;  %v1438_v5 = vadd.f32 %v1437_v18, %v1414_v4  ;;  %vm1350_vm15 = vcmp.gt.f32.partialorder %v1342_v54, 0.0  ;;  %v1358_v57 = vmul.f32 0.25, %v1342_v54  ;;  %v1366_v23 = vmul.f32 0.05, %v1342_v54 }
 0x29a   : > { %1626 = vst [vmem:[%s3669_s9] sm:$0xff] %v1618_v13  ;;  %v1583_v46 = vadd.f32 %v1484_v15, %v3589_v17  ;;  %v1552_v12 = vpop.f32.mrf.mxu0  ;;  %v1353_v35 = vmul.f32 0.25, %v1337_v36  ;;  %v1361_v61 = vmul.f32 0.05, %v1337_v36  ;;  %vm1345_vm0 = vcmp.gt.f32.partialorder %v1337_v36, 0.0 }
 0x29b   : > { %v1582_v20 = vadd.f32 %v1438_v5, %v3589_v17  ;;  %v1374_v24 = vsel %vm1350_vm15, %v1358_v57, %v1366_v23  ;;  %v1365_v5 = vmul.f32 0.05, %v1341_v34 }
 0x29c   : > { %vm1591_vm11 = vcmp.gt.f32.partialorder %v1583_v46, 0.0  ;;  %v1599_v3 = vmul.f32 0.25, %v1583_v46  ;;  %v1607_v11 = vmul.f32 0.05, %v1583_v46  ;;  %v1369_v22 = vsel %vm1345_vm0, %v1353_v35, %v1361_v61 }
 0x29d   : > { %vm1590_vm12 = vcmp.gt.f32.partialorder %v1582_v20, 0.0  ;;  %v1598_v27 = vmul.f32 0.25, %v1582_v20  ;;  %v1606_v16 = vmul.f32 0.05, %v1582_v20  ;;  %v1382_v14 = vadd.f32 %v1374_v24, %v3600_v33 }
 0x29e   : > { %v1615_v50 = vsel %vm1591_vm11, %v1599_v3, %v1607_v11  ;;  %v1377_v18 = vadd.f32 %v1369_v22, %v3602_v29  ;;  %v1357_v46 = vmul.f32 0.25, %v1341_v34 }
 0x29f   : > { %v1623_v8 = vadd.f32 %v1615_v50, %v1380_v40  ;;  %v1614_v31 = vsel %vm1590_vm12, %v1598_v27, %v1606_v16 }
 0x2a0   : > { %v1622_v41 = vadd.f32 %v1614_v31, %v1379_v37  ;;  %v1373_v33 = vsel %vm1349_vm3, %v1357_v46, %v1365_v5 }
 0x2a1   : > { %1631 = vst [vmem:[%s3669_s9 + $0x28] sm:$0xff] %v1623_v8  ;;  %v1381_v29 = vadd.f32 %v1373_v33, %v3607_v51 }
 0x2a2   : > { %1630 = vst [vmem:[%s3669_s9 + $0x20] sm:$0xff] %v1622_v41 }
 0x2a6   : > { %v1526_v21 = vpop.f32.mrf.mxu3 }
 0x2a7   : > { %v1572_v43 = vpop.f32.mrf.mxu2 }
 0x2a8   : > { %v1573_v60 = vadd.f32 %v1572_v43, %v1549_v53 }
 0x2aa   : > { %v1581_v32 = vadd.f32 %v1573_v60, %v3576_v6 }
 0x2ac   : > { %vm1589_vm14 = vcmp.gt.f32.partialorder %v1581_v32, 0.0  ;;  %v1597_v48 = vmul.f32 0.25, %v1581_v32  ;;  %v1605_v63 = vmul.f32 0.05, %v1581_v32 }
 0x2ae   : > { %v1613_v0 = vsel %vm1589_vm14, %v1597_v48, %v1605_v63  ;;  %v1529_v19 = vpop.f32.mrf.mxu3 }
 0x2af   : > { %v1621_v10 = vadd.f32 %v1613_v0, %v1378_v44  ;;  %v1575_v59 = vpop.f32.mrf.mxu2 }
 0x2b0   : > { %v1576_v62 = vadd.f32 %v1575_v59, %v1552_v12  ;;  %v1503_v9 = vpop.f32.mrf.mxu1 }
 0x2b1   : > { %1629 = vst [vmem:[%s3669_s9 + $0x18] sm:$0xff] %v1621_v10  ;;  %v1527_v56 = vadd.f32 %v1526_v21, %v1503_v9 }
 0x2b2   : > { %v1585_v1 = vadd.f32 %v1576_v62, %v3589_v17 }
 0x2b3   : > { %v1580_v13 = vadd.f32 %v1527_v56, %v3576_v6 }
 0x2b4   : > { %vm1593_vm1 = vcmp.gt.f32.partialorder %v1585_v1, 0.0  ;;  %v1601_v15 = vmul.f32 0.25, %v1585_v1  ;;  %v1609_v7 = vmul.f32 0.05, %v1585_v1 }
 0x2b5   : > { %vm1588_vm2 = vcmp.gt.f32.partialorder %v1580_v13, 0.0  ;;  %v1596_v2 = vmul.f32 0.25, %v1580_v13  ;;  %v1604_v4 = vmul.f32 0.05, %v1580_v13 }
 0x2b6   : > { %v1617_v47 = vsel %vm1593_vm1, %v1601_v15, %v1609_v7 }
 0x2b7   : > { %v1625_v58 = vadd.f32 %v1617_v47, %v1382_v14  ;;  %v1612_v49 = vsel %vm1588_vm2, %v1596_v2, %v1604_v4 }
 0x2b8   : > { %v1620_v6 = vadd.f32 %v1612_v49, %v1377_v18  ;;  %v1506_v39 = vpop.f32.mrf.mxu1 }
 0x2b9   : > { %1633 = vst [vmem:[%s3669_s9 + $0x38] sm:$0xff] %v1625_v58  ;;  %v1530_v3 = vadd.f32 %v1529_v19, %v1506_v39 }
 0x2ba   : > { %1628 = vst [vmem:[%s3669_s9 + $0x10] sm:$0xff] %v1620_v6 }
 0x2bb   : > { %v1584_v11 = vadd.f32 %v1530_v3, %v3589_v17 }
 0x2bd   : > { %vm1592_vm4 = vcmp.gt.f32.partialorder %v1584_v11, 0.0  ;;  %v1600_v20 = vmul.f32 0.25, %v1584_v11  ;;  %v1608_v42 = vmul.f32 0.05, %v1584_v11 }
 0x2bf   : > { %v1616_v40 = vsel %vm1592_vm4, %v1600_v20, %v1608_v42 }
 0x2c0   : > { %v1624_v50 = vadd.f32 %v1616_v40, %v1381_v29 }
 0x2c2   : > { %1632 = vst [vmem:[%s3669_s9 + $0x30] sm:$0xff] %v1624_v50 }
 0x2c3 PF: > { %s13_s12 = sadd.s32 1, %s2097_s12  }
 0x2c4   : > { %p10_p4 = scmp.ge.s32.totalorder %s13_s12, 4  }
 0x2c6   :  { %12 = sbr.rel (!%p10_p4) target bundleno = 1 (0x1), region = 68 }

// kernel: generator_8192_forward.6
= control target key start
LH: loop header
LB: loop body
LE: loop exit
PB: predicated region body
PF: predicated region fallthrough
CT: control target
= control target key end

     0   :  { %s1639_s12 = smov 0   ;;  %s2460_s0 = inlined_call_operand.vmem [shape: f32[2,4,16,256], index: 0, kind: input, shape index: {}]   ;;  %s2461_s1 = inlined_call_operand.vmem [shape: f32[4,32,448], index: 1, kind: input, shape index: {}]   ;;  %s2462_s2 = inlined_call_operand.vmem [shape: f32[32,1], index: 2, kind: input, shape index: {}]   ;;  %s2463_s3 = inlined_call_operand.vmem [shape: f32[2,32,128], index: 3, kind: output, shape index: {}]  }
   0x1 LB: > { %s1253_s13 = sadd.s32 4294967295, %s1612_s12   ;;  %p1257_p0 = scmp.ge.s32.totalorder %s1612_s12, 1  ;;  %s1612_s12 = sphi %s1639_s12, %s13_s12  }
   0x2   : > { %p137_p1 = scmp.lt.s32.totalorder %s1612_s12, 3 }
   0x4   : > { %p138_p2 = pnand %p1257_p0, %p137_p1 }
   0x5   : > { %p161_p3 = scmp.lt.s32.totalorder (!%p138_p2), %s1253_s13, 1  ;;  %s1614_s18 = smov (!%p138_p2), 127  }
   0x6   : > { %141 = sbr.rel (%p138_p2) target bundleno = 588 (0x24c), region = 32  ;;  %s1615_s19 = smov (!%p138_p2), 126  }
   0x7   : > { %s1616_s20 = smov (!%p138_p2), 125   ;;  %s1617_s21 = smov (!%p138_p2), 124  }
   0xb   : > { %s2465_s13 = smov (!%p161_p3, %s1253_s13), 1  ;;  %vm202_vm0 = vcmask 1039360   ;;  %vm263_vm1 = vcmask 1031168   ;;  %vm312_vm2 = vcmask 1022976   ;;  %vm449_vm3 = vcmask 1014784  }
   0xc   : > { %s1340_s14 = sshll.u32 %s2465_s13, 7  ;;  %vm538_vm4 = vcmask 523264   ;;  %s1341_s8 = sshll.u32 %s2465_s13, 5 }
   0xd   : > { %s1653_s17 = scalar_lea.vmem %s2460_s0, %s1340_s14  ;;  %s2438_s11 = scalar_lea.vmem %s2463_s3, %s1341_s8 }
   0xe   : > { %v1656_v0 = vld [vmem:[%s1653_s17 + $0x70] sm:$0xff]  ;;  %v1273_v1 = vld [vmem:[%s1653_s17 + $0x78] sm:$0xff]  ;;  %v1670_v8 = vld [vmem:[%s1653_s17 + $0x60] sm:$0xff] }
   0xf   : > { %v1660_v2 = vld [vmem:[%s1653_s17 + $0x50] sm:$0xff]  ;;  %v1355_v3 = vpack.i.bf16 %v1273_v1, %v1656_v0  ;;  %v1271_v4 = vld [vmem:[%s1653_s17 + $0x58] sm:$0xff]  ;;  %v1272_v9 = vld [vmem:[%s1653_s17 + $0x68] sm:$0xff] }
  0x10   : > { %v1365_v5 = vpack.i.bf16 %v1271_v4, %v1660_v2  ;;  %v1666_v6 = vld [vmem:[%s1653_s17 + $0x30] sm:$0xff]  ;;  %v1269_v7 = vld [vmem:[%s1653_s17 + $0x38] sm:$0xff]  ;;  %v1675_v11 = vld [vmem:[%s1653_s17 + $0x40] sm:$0xff]  ;;  %v1360_v13 = vpack.i.bf16 %v1272_v9, %v1670_v8 }
  0x11   : > { %1356 = vrot.lane.b32.xlu0 %v1355_v3, %s1614_s18  ;;  %v1375_v10 = vpack.i.bf16 %v1269_v7, %v1666_v6  ;;  %v1270_v12 = vld [vmem:[%s1653_s17 + $0x48] sm:$0xff]  ;;  %v1680_v14 = vld [vmem:[%s1653_s17 + $0x20] sm:$0xff]  ;;  %v1688_v18 = vld [vmem:[%s1653_s17 + $0x10] sm:$0xff] }
  0x12   : > { %1366 = vrot.lane.b32.xlu1 %v1365_v5, %s1614_s18  ;;  %v1268_v15 = vld [vmem:[%s1653_s17 + $0x28] sm:$0xff]  ;;  %v1370_v16 = vpack.i.bf16 %v1270_v12, %v1675_v11  ;;  %v183_v19 = vld [vmem:[%s1653_s17 + $0x18] sm:$0xff]  ;;  %v1696_v21 = vld [vmem:[%s1653_s17] sm:$0xff] }
  0x13   : > { %1376 = vrot.lane.b32.xlu2 %v1375_v10, %s1614_s18  ;;  %v1685_v17 = vpack.i.bf16 %v1268_v15, %v1680_v14  ;;  %v1693_v20 = vpack.i.bf16 %v183_v19, %v1688_v18  ;;  %v182_v22 = vld [vmem:[%s1653_s17 + $0x8] sm:$0xff] }
  0x14   : > { %v1700_v23 = vpack.i.bf16 %v182_v22, %v1696_v21 }
  0x19   : > { %1361 = vrot.lane.b32.xlu0 %v1360_v13, %s1614_s18 }
  0x1a   : > { %1371 = vrot.lane.b32.xlu1 %v1370_v16, %s1614_s18 }
  0x1b   : > { %1381 = vrot.lane.b32.xlu2 %v1685_v17, %s1614_s18 }
  0x21   : > { %1386 = vrot.lane.b32.xlu0 %v1693_v20, %s1614_s18 }
  0x22   : > { %1391 = vrot.lane.b32.xlu1 %v1355_v3, %s1615_s19 }
  0x23   : > { %1396 = vrot.lane.b32.xlu2 %v1700_v23, %s1614_s18 }
  0x29   : > { %1401 = vrot.lane.b32.xlu0 %v1360_v13, %s1615_s19 }
  0x2a   : > { %1406 = vrot.lane.b32.xlu1 %v1365_v5, %s1615_s19 }
  0x2b   : > { %1411 = vrot.lane.b32.xlu2 %v1370_v16, %s1615_s19 }
  0x31   : > { %1416 = vrot.lane.b32.xlu0 %v1375_v10, %s1615_s19 }
  0x32   : > { %1421 = vrot.lane.b32.xlu1 %v1685_v17, %s1615_s19 }
  0x33   : > { %1426 = vrot.lane.b32.xlu2 %v1693_v20, %s1615_s19 }
  0x39   : > { %1431 = vrot.lane.b32.xlu0 %v1700_v23, %s1615_s19 }
  0x3a   : > { %1446 = vrot.lane.b32.xlu1 %v1365_v5, %s1616_s20 }
  0x3b   : > { %1441 = vrot.lane.b32.xlu2 %v1360_v13, %s1616_s20 }
  0x41   : > { %1436 = vrot.lane.b32.xlu0 %v1355_v3, %s1616_s20 }
  0x42   : > { %1491 = vrot.lane.b32.xlu1 %v1370_v16, %s1617_s21 }
  0x43   : > { %1456 = vrot.lane.b32.xlu2 %v1375_v10, %s1616_s20 }
  0x49   : > { %1451 = vrot.lane.b32.xlu0 %v1370_v16, %s1616_s20 }
  0x4b   : > { %1461 = vrot.lane.b32.xlu2 %v1685_v17, %s1616_s20 }
  0x51   : > { %1471 = vrot.lane.b32.xlu0 %v1355_v3, %s1617_s21 }
  0x53   : > { %1466 = vrot.lane.b32.xlu2 %v1693_v20, %s1616_s20 }
  0x59   : > { %1481 = vrot.lane.b32.xlu0 %v1360_v13, %s1617_s21 }
  0x5b   : > { %1476 = vrot.lane.b32.xlu2 %v1700_v23, %s1616_s20 }
  0x61   : > { %1496 = vrot.lane.b32.xlu0 %v1375_v10, %s1617_s21 }
  0x63   : > { %1486 = vrot.lane.b32.xlu2 %v1365_v5, %s1617_s21 }
  0x6d   : > { %v1377_v24 = vpop.permute.xlu2 %1376 }
  0x6e   : > { %v1379_v50 = vunpack.i.h.bf16 %v1377_v24  ;;  %v1378_v51 = vunpack.i.l.bf16 %v1377_v24 }
  0x70   : > { %v1749_v55 = vsel %vm202_vm0, %v1378_v51, %v1379_v50 }
  0x71   : > { %v1520_v5 = vpack.i.bf16 %v1379_v50, %v1749_v55 }
  0x75   : > { %v1382_v25 = vpop.permute.xlu2 %1381 }
  0x76   : > { %v1384_v44 = vunpack.i.h.bf16 %v1382_v25  ;;  %v1383_v45 = vunpack.i.l.bf16 %v1382_v25 }
  0x78   : > { %v1743_v53 = vsel %vm202_vm0, %v1383_v45, %v1384_v44 }
  0x79   : > { %v1530_v59 = vpack.i.bf16 %v1384_v44, %v1743_v53 }
  0x7d   : > { %v1715_v26 = vpop.permute.xlu2 %1396 }
  0x7e   : > { %v1399_v60 = vunpack.i.h.bf16 %v1715_v26  ;;  %v1398_v61 = vunpack.i.l.bf16 %v1715_v26 }
  0x80   : > { %v1766_v7 = vsel %vm202_vm0, %v1398_v61, %v1399_v60 }
  0x81   : > { %v1545_v15 = vpack.i.bf16 %v1399_v60, %v1766_v7 }
  0x83   : > { %v1357_v27 = vpop.permute.xlu0 %1356 }
  0x84   : > { %v1359_v28 = vunpack.i.h.bf16 %v1357_v27  ;;  %v1358_v29 = vunpack.i.l.bf16 %v1357_v27  ;;  %v1367_v30 = vpop.permute.xlu1 %1366 }
  0x85   : > { %v1369_v32 = vunpack.i.h.bf16 %v1367_v30  ;;  %v1368_v33 = vunpack.i.l.bf16 %v1367_v30  ;;  %v1720_v34 = vpop.permute.xlu2 %1411 }
  0x86   : > { %v1718_v31 = vsel %vm202_vm0, %v1358_v29, %v1359_v28 }
  0x87   : > { %v1500_v35 = vpack.i.bf16 %v1359_v28, %v1718_v31  ;;  %551 = vmatpush.msra.mxu0 %v1718_v31  ;;  %v1726_v36 = vsel %vm202_vm0, %v1368_v33, %v1369_v32 }
  0x88   : > { %v1510_v41 = vpack.i.bf16 %v1369_v32, %v1726_v36 }
  0x89   : > { %1501 = vrot.lane.b32.xlu1 %v1500_v35, %s1617_s21 }
  0x8b   : > { %v1362_v37 = vpop.permute.xlu0 %1361 }
  0x8c   : > { %v1364_v38 = vunpack.i.h.bf16 %v1362_v37  ;;  %v1363_v39 = vunpack.i.l.bf16 %v1362_v37  ;;  %v1372_v40 = vpop.permute.xlu1 %1371 }
  0x8d   : > { %v1374_v42 = vunpack.i.h.bf16 %v1372_v40  ;;  %v1373_v43 = vunpack.i.l.bf16 %v1372_v40  ;;  %v1732_v47 = vpop.permute.xlu2 %1426 }
  0x8e   : > { %v1730_v46 = vsel %vm202_vm0, %v1363_v39, %v1364_v38 }
  0x8f   : > { %v1505_v48 = vpack.i.bf16 %v1364_v38, %v1730_v46  ;;  %v1736_v49 = vsel %vm202_vm0, %v1373_v43, %v1374_v42  ;;  %552 = vmatpush.msra.mxu0 %v1730_v46  ;;  %v1413_v43 = vunpack.i.l.bf16 %v1720_v34 }
  0x90   : > { %v1515_v52 = vpack.i.bf16 %v1374_v42, %v1736_v49  ;;  %v1414_v42 = vunpack.i.h.bf16 %v1720_v34 }
  0x91   : > { %553 = vmatpush.msra.mxu0 %v1726_v36  ;;  %1511 = vrot.lane.b32.xlu1 %v1510_v41, %s1617_s21 }
  0x92   : > { %1516 = vrot.lane.b32.xlu0 %v1515_v52, %s1617_s21  ;;  %1506 = vrot.lane.b32.xlu2 %v1505_v48, %s1617_s21 }
  0x93   : > { %554 = vmatpush.msra.mxu0 %v1736_v49  ;;  %v1387_v54 = vpop.permute.xlu0 %1386 }
  0x94   : > { %v1389_v56 = vunpack.i.h.bf16 %v1387_v54  ;;  %v1388_v57 = vunpack.i.l.bf16 %v1387_v54  ;;  %v1392_v58 = vpop.permute.xlu1 %1391  ;;  %v1814_v54 = vsel %vm263_vm1, %v1413_v43, %v1414_v42 }
  0x95   : > { %555 = vmatpush.msra.mxu0 %v1749_v55  ;;  %v1394_v63 = vunpack.i.h.bf16 %v1392_v58  ;;  %v1393_v1 = vunpack.i.l.bf16 %v1392_v58  ;;  %v1758_v3 = vpop.permute.xlu2 %1441 }
  0x96   : > { %v1756_v62 = vsel %vm202_vm0, %v1388_v57, %v1389_v56  ;;  %v1444_v34 = vunpack.i.h.bf16 %v1758_v3 }
  0x97   : > { %v1535_v4 = vpack.i.bf16 %v1389_v56, %v1756_v62  ;;  %556 = vmatpush.msra.mxu0 %v1743_v53  ;;  %v1771_v9 = vsel %vm263_vm1, %v1393_v1, %v1394_v63  ;;  %v1443_v56 = vunpack.i.l.bf16 %v1758_v3  ;;  %v1428_v3 = vunpack.i.l.bf16 %v1732_v47 }
  0x98   : > { %v1540_v12 = vpack.i.bf16 %v1394_v63, %v1771_v9 }
  0x99   : > { %1531 = vrot.lane.b32.xlu1 %v1530_v59, %s1617_s21  ;;  %557 = vmatpush.msra.mxu0 %v1756_v62 }
  0x9a   : > { %1536 = vrot.lane.b32.xlu0 %v1535_v4, %s1617_s21  ;;  %1521 = vrot.lane.b32.xlu2 %v1520_v5, %s1617_s21  ;;  %v1560_v4 = vpack.i.bf16 %v1414_v42, %v1814_v54  ;;  %v1429_v5 = vunpack.i.h.bf16 %v1732_v47 }
  0x9b   : > { %v1402_v10 = vpop.permute.xlu0 %1401  ;;  %558 = vmatpush.msra.mxu0 %v1766_v7 }
  0x9c   : > { %v1407_v13 = vpop.permute.xlu1 %1406  ;;  %v1404_v16 = vunpack.i.h.bf16 %v1402_v10  ;;  %v1403_v19 = vunpack.i.l.bf16 %v1402_v10  ;;  %v1844_v47 = vsel %vm263_vm1, %v1428_v3, %v1429_v5 }
  0x9d   : > { %559 = vmatpush.msra.mxu0 %v1656_v0  ;;  %v1777_v22 = vpop.permute.xlu2 %1456  ;;  %v1409_v30 = vunpack.i.h.bf16 %v1407_v13  ;;  %v1408_v32 = vunpack.i.l.bf16 %v1407_v13  ;;  %v522_v13 = vld [vmem:[%s2461_s1] sm:$0xff] }
  0x9e   : > { %v1783_v24 = vsel %vm263_vm1, %v1403_v19, %v1404_v16  ;;  %v1458_v19 = vunpack.i.l.bf16 %v1777_v22 }
  0x9f   : > { %560 = vmatpush.msra.mxu0 %v1670_v8  ;;  %v1550_v28 = vpack.i.bf16 %v1404_v16, %v1783_v24  ;;  %v1799_v38 = vsel %vm263_vm1, %v1408_v32, %v1409_v30  ;;  %v1459_v16 = vunpack.i.h.bf16 %v1777_v22  ;;  %v1575_v32 = vpack.i.bf16 %v1429_v5, %v1844_v47 }
  0xa0   : > { %v1555_v44 = vpack.i.bf16 %v1409_v30, %v1799_v38 }
  0xa1   : > { %1541 = vrot.lane.b32.xlu1 %v1540_v12, %s1617_s21  ;;  %561 = vmatpush.msra.mxu0 %v1660_v2  ;;  %v1830_v12 = vsel %vm312_vm2, %v1443_v56, %v1444_v34 }
  0xa2   : > { %1546 = vrot.lane.b32.xlu0 %v1545_v15, %s1617_s21  ;;  %1526 = vrot.lane.b32.xlu2 %v1685_v17, %s1617_s21 }
  0xa3   : > { %v1417_v25 = vpop.permute.xlu0 %1416  ;;  %562 = vmatpush.msra.mxu0 %v1675_v11 }
  0xa4   : > { %v1419_v26 = vunpack.i.h.bf16 %v1417_v25  ;;  %v1418_v27 = vunpack.i.l.bf16 %v1417_v25  ;;  %v1422_v35 = vpop.permute.xlu1 %1421 }
  0xa5   : > { %563 = vmatpush.msra.mxu0 %v1666_v6  ;;  %v1795_v37 = vpop.permute.xlu2 %1461  ;;  %v1424_v48 = vunpack.i.h.bf16 %v1422_v35  ;;  %v1423_v50 = vunpack.i.l.bf16 %v1422_v35 }
  0xa6   : > { %v1790_v29 = vsel %vm263_vm1, %v1418_v27, %v1419_v26  ;;  %v1463_v27 = vunpack.i.l.bf16 %v1795_v37 }
  0xa7   : > { %v1565_v33 = vpack.i.bf16 %v1419_v26, %v1790_v29  ;;  %564 = vmatpush.msra.mxu0 %v1680_v14  ;;  %v1819_v57 = vsel %vm263_vm1, %v1423_v50, %v1424_v48  ;;  %v1464_v26 = vunpack.i.h.bf16 %v1795_v37  ;;  %v526_v37 = vld [vmem:[%s2461_s1 + $0x20] sm:$0xff] }
  0xa8   : > { %v1570_v58 = vpack.i.bf16 %v1424_v48, %v1819_v57  ;;  %v530_v50 = vld [vmem:[%s2461_s1 + $0x40] sm:$0xff] }
  0xa9   : > { %1551 = vrot.lane.b32.xlu1 %v1550_v28, %s1617_s21  ;;  %565 = vmatpush.msra.mxu0 %v1688_v18  ;;  %v1866_v43 = vsel %vm312_vm2, %v1463_v27, %v1464_v26 }
  0xaa   : > { %1566 = vrot.lane.b32.xlu0 %v1565_v33, %s1617_s21  ;;  %1571 = vrot.lane.b32.xlu2 %v1570_v58, %s1617_s21 }
  0xab   : > { %v1432_v39 = vpop.permute.xlu0 %1431  ;;  %566 = vmatpush.msra.mxu0 %v1696_v21 }
  0xac   : > { %v1434_v40 = vunpack.i.h.bf16 %v1432_v39  ;;  %v1433_v41 = vunpack.i.l.bf16 %v1432_v39  ;;  %v1447_v52 = vpop.permute.xlu1 %1446  ;;  %567 = vmatmul.f32.vlgmr.msra.gmra.mxu0 %v522_v13 }
  0xad   : > { %v1467_v17 = vpop.permute.xlu2 %1466  ;;  %v1449_v63 = vunpack.i.h.bf16 %v1447_v52  ;;  %v1448_v1 = vunpack.i.l.bf16 %v1447_v52 }
  0xae   : > { %v1807_v45 = vsel %vm263_vm1, %v1433_v41, %v1434_v40  ;;  %v1469_v35 = vunpack.i.h.bf16 %v1467_v17  ;;  %v1468_v39 = vunpack.i.l.bf16 %v1467_v17 }
  0xaf   : > { %v1580_v51 = vpack.i.bf16 %v1434_v40, %v1807_v45  ;;  %v1838_v15 = vsel %vm312_vm2, %v1448_v1, %v1449_v63  ;;  %v1858_v40 = vsel %vm312_vm2, %v1458_v19, %v1459_v16 }
  0xb1   : > { %1556 = vrot.lane.b32.xlu1 %v1555_v44, %s1617_s21  ;;  %v1872_v44 = vsel %vm312_vm2, %v1468_v39, %v1469_v35 }
  0xb2   : > { %1581 = vrot.lane.b32.xlu0 %v1580_v51, %s1617_s21  ;;  %1591 = vrot.lane.b32.xlu2 %v1700_v23, %s1617_s21  ;;  %v534_v23 = vld [vmem:[%s2461_s1 + $0x60] sm:$0xff] }
  0xb3   : > { %v1437_v59 = vpop.permute.xlu0 %1436 }
  0xb4   : > { %v1439_v60 = vunpack.i.h.bf16 %v1437_v59  ;;  %v1438_v61 = vunpack.i.l.bf16 %v1437_v59  ;;  %570 = vmatmul.f32.gmra.mxu0 %v526_v37  ;;  %v1931_v56 = vpop.permute.xlu1 %1491 }
  0xb5   : > { %v1477_v33 = vpop.permute.xlu2 %1476 }
  0xb6   : > { %v1827_v10 = vsel %vm312_vm2, %v1438_v61, %v1439_v60  ;;  %v1479_v41 = vunpack.i.h.bf16 %v1477_v33  ;;  %v1478_v42 = vunpack.i.l.bf16 %v1477_v33 }
  0xb7   : > { %580 = vmatpush.msra.mxu1 %v1827_v10  ;;  %745 = vmatpush.msrb.mxu0 %v1827_v10 }
  0xb8   : > { %v1877_v48 = vsel %vm312_vm2, %v1478_v42, %v1479_v41 }
  0xb9   : > { %1561 = vrot.lane.b32.xlu1 %v1560_v4, %s1617_s21  ;;  %581 = vmatpush.msra.mxu1 %v1830_v12 }
  0xba   : > { %746 = vmatpush.msrb.mxu0 %v1830_v12 }
  0xbb   : > { %v1452_v25 = vpop.permute.xlu0 %1451  ;;  %582 = vmatpush.msra.mxu1 %v1838_v15 }
  0xbc   : > { %v1454_v28 = vunpack.i.h.bf16 %v1452_v25  ;;  %v1453_v30 = vunpack.i.l.bf16 %v1452_v25  ;;  %747 = vmatpush.msrb.mxu0 %v1838_v15 }
  0xbd   : > { %573 = vmatmul.f32.gmra.mxu0 %v530_v50  ;;  %v1925_v52 = vpop.permute.xlu2 %1486 }
  0xbe   : > { %v1855_v22 = vsel %vm312_vm2, %v1453_v30, %v1454_v28 }
  0xbf   : > { %583 = vmatpush.msra.mxu1 %v1855_v22  ;;  %748 = vmatpush.msrb.mxu0 %v1855_v22 }
  0xc1   : > { %584 = vmatpush.msra.mxu1 %v1858_v40  ;;  %1576 = vrot.lane.b32.xlu1 %v1575_v32, %s1617_s21 }
  0xc2   : > { %749 = vmatpush.msrb.mxu0 %v1858_v40 }
  0xc3   : > { %585 = vmatpush.msra.mxu1 %v1866_v43  ;;  %v1919_v51 = vpop.permute.xlu0 %1471 }
  0xc4   : > { %750 = vmatpush.msrb.mxu0 %v1866_v43  ;;  %v1474_v42 = vunpack.i.h.bf16 %v1919_v51 }
  0xc5   : > { %586 = vmatpush.msra.mxu1 %v1872_v44  ;;  %576 = vmatmul.f32.gmra.mxu0 %v534_v23 }
  0xc6   : > { %751 = vmatpush.msrb.mxu0 %v1872_v44 }
  0xc7   : > { %587 = vmatpush.msra.mxu1 %v1877_v48 }
  0xc8   : > { %752 = vmatpush.msrb.mxu0 %v1877_v48 }
  0xc9   : > { %588 = vmatpush.msra.mxu1 %v1771_v9  ;;  %1586 = vrot.lane.b32.xlu1 %v1693_v20, %s1617_s21  ;;  %v1279_v20 = vld [vmem:[%s2461_s1 + $0x88] sm:$0xff] }
  0xca   : > { %753 = vmatpush.msrb.mxu0 %v1771_v9 }
  0xcb   : > { %589 = vmatpush.msra.mxu1 %v1783_v24  ;;  %v1928_v34 = vpop.permute.xlu0 %1481 }
  0xcc   : > { %754 = vmatpush.msrb.mxu0 %v1783_v24  ;;  %v1484_v50 = vunpack.i.h.bf16 %v1928_v34 }
  0xcd   : > { %590 = vmatpush.msra.mxu1 %v1799_v38 }
  0xce   : > { %755 = vmatpush.msrb.mxu0 %v1799_v38 }
  0xcf   : > { %591 = vmatpush.msra.mxu1 %v1814_v54 }
  0xd0   : > { %756 = vmatpush.msrb.mxu0 %v1814_v54 }
  0xd1   : > { %592 = vmatpush.msra.mxu1 %v1790_v29 }
  0xd2   : > { %757 = vmatpush.msrb.mxu0 %v1790_v29 }
  0xd3   : > { %593 = vmatpush.msra.mxu1 %v1819_v57  ;;  %v1938_v59 = vpop.permute.xlu0 %1496 }
  0xd4   : > { %758 = vmatpush.msrb.mxu0 %v1819_v57 }
  0xd5   : > { %594 = vmatpush.msra.mxu1 %v1844_v47 }
  0xd6   : > { %759 = vmatpush.msrb.mxu0 %v1844_v47 }
  0xd7   : > { %595 = vmatpush.msra.mxu1 %v1807_v45 }
  0xd8   : > { %760 = vmatpush.msrb.mxu0 %v1807_v45 }
  0xd9   : > { %761 = vmatmul.f32.vlgmr.msrb.gmra.mxu0 %v1279_v20 }
  0xda   : > { %914 = vmatpush.msra.mxu0 %v1827_v10 }
  0xdc   : > { %915 = vmatpush.msra.mxu0 %v1830_v12 }
  0xde   : > { %916 = vmatpush.msra.mxu0 %v1838_v15 }
  0xe0   : > { %917 = vmatpush.msra.mxu0 %v1855_v22 }
  0xe2   : > { %918 = vmatpush.msra.mxu0 %v1858_v40 }
  0xe4   : > { %919 = vmatpush.msra.mxu0 %v1866_v43 }
  0xe6   : > { %920 = vmatpush.msra.mxu0 %v1872_v44 }
  0xe8   : > { %921 = vmatpush.msra.mxu0 %v1877_v48 }
  0xea   : > { %922 = vmatpush.msra.mxu0 %v1771_v9 }
  0xec   : > { %923 = vmatpush.msra.mxu0 %v1783_v24  ;;  %v1507_v58 = vpop.permute.xlu2 %1506 }
  0xed   : > { %v1509_v60 = vunpack.i.h.bf16 %v1507_v58  ;;  %v1508_v61 = vunpack.i.l.bf16 %v1507_v58 }
  0xee   : > { %924 = vmatpush.msra.mxu0 %v1799_v38 }
  0xef   : > { %v1949_v5 = vsel %vm449_vm3, %v1508_v61, %v1509_v60  ;;  %v1499_v60 = vunpack.i.h.bf16 %v1938_v59 }
  0xf0   : > { %925 = vmatpush.msra.mxu0 %v1814_v54 }
  0xf2   : > { %926 = vmatpush.msra.mxu0 %v1790_v29 }
  0xf4   : > { %927 = vmatpush.msra.mxu0 %v1819_v57  ;;  %v1522_v3 = vpop.permute.xlu2 %1521 }
  0xf5   : > { %v1524_v25 = vunpack.i.h.bf16 %v1522_v3  ;;  %v1523_v26 = vunpack.i.l.bf16 %v1522_v3 }
  0xf6   : > { %928 = vmatpush.msra.mxu0 %v1844_v47 }
  0xf7   : > { %v1969_v30 = vsel %vm449_vm3, %v1523_v26, %v1524_v25 }
  0xf8   : > { %929 = vmatpush.msra.mxu0 %v1807_v45 }
  0xfa   : > { %1083 = vmatpush.msrb.mxu0 %v1827_v10 }
  0xfb   : > { %v1502_v17 = vpop.permute.xlu1 %1501 }
  0xfc   : > { %1084 = vmatpush.msrb.mxu0 %v1830_v12  ;;  %v1504_v63 = vunpack.i.h.bf16 %v1502_v17  ;;  %v1503_v1 = vunpack.i.l.bf16 %v1502_v17 }
  0xfe   : > { %1085 = vmatpush.msrb.mxu0 %v1838_v15  ;;  %v1943_v4 = vsel %vm449_vm3, %v1503_v1, %v1504_v63  ;;  %v1498_v1 = vunpack.i.l.bf16 %v1938_v59  ;;  %v523_v59 = vld [vmem:[%s2461_s1 + $0x8] sm:$0xff] }
  0xff   : > { %609 = vmatpush.msra.mxu2 %v1943_v4  ;;  %774 = vmatpush.msrb.mxu1 %v1943_v4 }
 0x100   : > { %1086 = vmatpush.msrb.mxu0 %v1855_v22  ;;  %596 = vmatmul.f32.vlgmr.msra.gmra.mxu1 %v523_v59 }
 0x101   : > { %610 = vmatpush.msra.mxu2 %v1949_v5  ;;  %775 = vmatpush.msrb.mxu1 %v1949_v5 }
 0x102   : > { %1087 = vmatpush.msrb.mxu0 %v1858_v40 }
 0x103   : > { %v1512_v10 = vpop.permute.xlu1 %1511 }
 0x104   : > { %1088 = vmatpush.msrb.mxu0 %v1866_v43  ;;  %v1514_v12 = vunpack.i.h.bf16 %v1512_v10  ;;  %v1513_v13 = vunpack.i.l.bf16 %v1512_v10  ;;  %v1517_v15 = vpop.permute.xlu0 %1516  ;;  %v1473_v43 = vunpack.i.l.bf16 %v1919_v51  ;;  %v1494_v51 = vunpack.i.h.bf16 %v1931_v56 }
 0x105   : > { %v1519_v16 = vunpack.i.h.bf16 %v1517_v15  ;;  %v1518_v19 = vunpack.i.l.bf16 %v1517_v15  ;;  %v2036_v15 = vsel %vm449_vm3, %v1498_v1, %v1499_v60  ;;  %v525_v1 = vld [vmem:[%s2461_s1 + $0x18] sm:$0xff] }
 0x106   : > { %1089 = vmatpush.msrb.mxu0 %v1872_v44  ;;  %v1957_v27 = vsel %vm449_vm3, %v1513_v13, %v1514_v12  ;;  %v2005_v20 = vsel %vm449_vm3, %v1473_v43, %v1474_v42 }
 0x107   : > { %611 = vmatpush.msra.mxu2 %v1957_v27  ;;  %776 = vmatpush.msrb.mxu1 %v1957_v27  ;;  %v1962_v28 = vsel %vm449_vm3, %v1518_v19, %v1519_v16 }
 0x108   : > { %1090 = vmatpush.msrb.mxu0 %v1877_v48 }
 0x109   : > { %612 = vmatpush.msra.mxu2 %v1962_v28  ;;  %777 = vmatpush.msrb.mxu1 %v1962_v28 }
 0x10a   : > { %1091 = vmatpush.msrb.mxu0 %v1771_v9 }
 0x10b   : > { %v1532_v32 = vpop.permute.xlu1 %1531  ;;  %613 = vmatpush.msra.mxu2 %v1969_v30  ;;  %778 = vmatpush.msrb.mxu1 %v1969_v30 }
 0x10c   : > { %1092 = vmatpush.msrb.mxu0 %v1783_v24  ;;  %v1534_v33 = vunpack.i.h.bf16 %v1532_v32  ;;  %v1533_v35 = vunpack.i.l.bf16 %v1532_v32  ;;  %v1537_v39 = vpop.permute.xlu0 %1536 }
 0x10d   : > { %v1539_v9 = vunpack.i.h.bf16 %v1537_v39  ;;  %v1538_v22 = vunpack.i.l.bf16 %v1537_v39 }
 0x10e   : > { %1093 = vmatpush.msrb.mxu0 %v1799_v38  ;;  %v1976_v40 = vsel %vm449_vm3, %v1533_v35, %v1534_v33 }
 0x10f   : > { %614 = vmatpush.msra.mxu2 %v1976_v40  ;;  %779 = vmatpush.msrb.mxu1 %v1976_v40  ;;  %v1981_v24 = vsel %vm449_vm3, %v1538_v22, %v1539_v9  ;;  %v527_v22 = vld [vmem:[%s2461_s1 + $0x28] sm:$0xff] }
 0x110   : > { %1094 = vmatpush.msrb.mxu0 %v1814_v54  ;;  %599 = vmatmul.f32.gmra.mxu1 %v527_v22  ;;  %v499_v22 = vld [vmem:[%s2462_s2 + $0x8] sm:$0xff] }
 0x111   : > { %615 = vmatpush.msra.mxu2 %v1981_v24  ;;  %780 = vmatpush.msrb.mxu1 %v1981_v24 }
 0x112   : > { %1095 = vmatpush.msrb.mxu0 %v1790_v29 }
 0x113   : > { %v1542_v38 = vpop.permute.xlu1 %1541 }
 0x114   : > { %1096 = vmatpush.msrb.mxu0 %v1819_v57  ;;  %v1544_v54 = vunpack.i.h.bf16 %v1542_v38  ;;  %v1543_v37 = vunpack.i.l.bf16 %v1542_v38  ;;  %v1547_v41 = vpop.permute.xlu0 %1546  ;;  %v1483_v57 = vunpack.i.l.bf16 %v1928_v34  ;;  %v1493_v34 = vunpack.i.l.bf16 %v1931_v56 }
 0x115   : > { %v1549_v44 = vunpack.i.h.bf16 %v1547_v41  ;;  %v1548_v48 = vunpack.i.l.bf16 %v1547_v41 }
 0x116   : > { %1097 = vmatpush.msrb.mxu0 %v1844_v47  ;;  %v1992_v29 = vsel %vm449_vm3, %v1543_v37, %v1544_v54  ;;  %v1489_v47 = vunpack.i.h.bf16 %v1925_v52  ;;  %v2012_v17 = vsel %vm449_vm3, %v1483_v57, %v1484_v50  ;;  %v2027_v13 = vsel %vm449_vm3, %v1493_v34, %v1494_v51 }
 0x117   : > { %v1997_v23 = vsel %vm449_vm3, %v1548_v48, %v1549_v44  ;;  %646 = vmatpush.msra.mxu3 %v1992_v29 }
 0x118   : > { %1098 = vmatpush.msrb.mxu0 %v1807_v45  ;;  %616 = vmatpush.msra.mxu2 %v1997_v23  ;;  %v1488_v45 = vunpack.i.l.bf16 %v1925_v52  ;;  %v1527_v52 = vpop.permute.xlu2 %1526 }
 0x119   : > { %781 = vmatpush.msrb.mxu1 %v1997_v23  ;;  %v1529_v10 = vunpack.i.h.bf16 %v1527_v52  ;;  %v1528_v56 = vunpack.i.l.bf16 %v1527_v52  ;;  %v1618_v52 = vmov 0  }
 0x11a   : > { %617 = vmatpush.msra.mxu2 %v2005_v20  ;;  %v2019_v3 = vsel %vm449_vm3, %v1488_v45, %v1489_v47  ;;  %v531_v45 = vld [vmem:[%s2461_s1 + $0x48] sm:$0xff]  ;;  %1595 = vset.pattern.permute.xlu0 %v1618_v52 }
 0x11b   : > { %782 = vmatpush.msrb.mxu1 %v2005_v20  ;;  %v1552_v58 = vpop.permute.xlu1 %1551  ;;  %v2039_v16 = vsel %vm449_vm3, %v1528_v56, %v1529_v10  ;;  %v498_v10 = vld [vmem:[%s2462_s2] sm:$0xff]  ;;  %1596 = vset.pattern.permute.xlu1 %v1618_v52 }
 0x11c   : > { %v1554_v61 = vunpack.i.h.bf16 %v1552_v58  ;;  %v1553_v63 = vunpack.i.l.bf16 %v1552_v58  ;;  %618 = vmatpush.msra.mxu2 %v2012_v17  ;;  %v1567_v32 = vpop.permute.xlu0 %1566  ;;  %602 = vmatmul.f32.gmra.mxu1 %v531_v45  ;;  %v1282_v45 = vld [vmem:[%s2461_s1 + $0xa0] sm:$0xff] }
 0x11d   : > { %783 = vmatpush.msrb.mxu1 %v2012_v17  ;;  %v1569_v39 = vunpack.i.h.bf16 %v1567_v32  ;;  %v1568_v9 = vunpack.i.l.bf16 %v1567_v32  ;;  %1597 = vset.pattern.permute.xlu2 %v1618_v52 }
 0x11e   : > { %619 = vmatpush.msra.mxu2 %v2019_v3  ;;  %v2024_v12 = vsel %vm449_vm3, %v1553_v63, %v1554_v61  ;;  %504 = vperm.xlu0 %1595, %v498_v10  }
 0x11f   : > { %784 = vmatpush.msrb.mxu1 %v2019_v3  ;;  %647 = vmatpush.msra.mxu3 %v2024_v12  ;;  %v2056_v44 = vsel %vm449_vm3, %v1568_v9, %v1569_v39  ;;  %v524_v9 = vld [vmem:[%s2461_s1 + $0x10] sm:$0xff] }
 0x120   : > { %620 = vmatpush.msra.mxu2 %v2027_v13  ;;  %v1572_v35 = vpop.permute.xlu2 %1571  ;;  %509 = vperm.xlu1 %1596, %v499_v22   ;;  %v1326_v22 = vld [vmem:[%s2461_s1 + $0x1c0] sm:$0xff] }
 0x121   : > { %785 = vmatpush.msrb.mxu1 %v2027_v13  ;;  %v1574_v41 = vunpack.i.h.bf16 %v1572_v35  ;;  %v1573_v42 = vunpack.i.l.bf16 %v1572_v35 }
 0x122   : > { %621 = vmatpush.msra.mxu2 %v2036_v15 }
 0x123   : > { %786 = vmatpush.msrb.mxu1 %v2036_v15  ;;  %v1557_v19 = vpop.permute.xlu1 %1556  ;;  %v2060_v50 = vsel %vm449_vm3, %v1573_v42, %v1574_v41  ;;  %v533_v41 = vld [vmem:[%s2461_s1 + $0x58] sm:$0xff] }
 0x124   : > { %v1559_v25 = vunpack.i.h.bf16 %v1557_v19  ;;  %v1558_v26 = vunpack.i.l.bf16 %v1557_v19  ;;  %622 = vmatpush.msra.mxu2 %v2039_v16  ;;  %v1582_v48 = vpop.permute.xlu0 %1581  ;;  %v535_v19 = vld [vmem:[%s2461_s1 + $0x68] sm:$0xff]  ;;  %v501_v42 = vld [vmem:[%s2462_s2 + $0x18] sm:$0xff] }
 0x125   : > { %787 = vmatpush.msrb.mxu1 %v2039_v16  ;;  %v1584_v57 = vunpack.i.h.bf16 %v1582_v48  ;;  %v1583_v47 = vunpack.i.l.bf16 %v1582_v48  ;;  %v1281_v48 = vld [vmem:[%s2461_s1 + $0x98] sm:$0xff] }
 0x126   : > { %v2046_v33 = vsel %vm449_vm3, %v1558_v26, %v1559_v25  ;;  %605 = vmatmul.f32.gmra.mxu1 %v535_v19  ;;  %v1321_v19 = vld [vmem:[%s2461_s1 + $0x198] sm:$0xff] }
 0x127   : > { %648 = vmatpush.msra.mxu3 %v2046_v33  ;;  %v2071_v61 = vsel %vm449_vm3, %v1583_v47, %v1584_v57  ;;  %v1288_v57 = vld [vmem:[%s2461_s1 + $0xd0] sm:$0xff] }
 0x128   : > { %v1592_v63 = vpop.permute.xlu2 %1591  ;;  %519 = vperm.xlu1 %1596, %v501_v42   ;;  %v500_v47 = vld [vmem:[%s2462_s2 + $0x10] sm:$0xff] }
 0x129   : > { %v1594_v56 = vunpack.i.h.bf16 %v1592_v63  ;;  %v1593_v59 = vunpack.i.l.bf16 %v1592_v63  ;;  %514 = vperm.xlu2 %1597, %v500_v47   ;;  %v1320_v63 = vld [vmem:[%s2461_s1 + $0x190] sm:$0xff]  ;;  %v568_v52 = vpop.f32.mrf.mxu0 }
 0x12b   : > { %v1562_v38 = vpop.permute.xlu1 %1561  ;;  %v2092_v39 = vsel %vm449_vm3, %v1593_v59, %v1594_v56  ;;  %v1331_v59 = vld [vmem:[%s2461_s1 + $0x1e8] sm:$0xff] }
 0x12c   : > { %v1564_v54 = vunpack.i.h.bf16 %v1562_v38  ;;  %v1563_v37 = vunpack.i.l.bf16 %v1562_v38  ;;  %v529_v38 = vld [vmem:[%s2461_s1 + $0x38] sm:$0xff] }
 0x12e   : > { %v2053_v43 = vsel %vm449_vm3, %v1563_v37, %v1564_v54  ;;  %v1280_v54 = vld [vmem:[%s2461_s1 + $0x90] sm:$0xff] }
 0x12f   : > { %649 = vmatpush.msra.mxu3 %v2053_v43  ;;  %v528_v37 = vld [vmem:[%s2461_s1 + $0x30] sm:$0xff] }
 0x131   : > { %650 = vmatpush.msra.mxu3 %v2056_v44 }
 0x133   : > { %v1577_v51 = vpop.permute.xlu1 %1576  ;;  %651 = vmatpush.msra.mxu3 %v2060_v50 }
 0x134   : > { %v1579_v34 = vunpack.i.h.bf16 %v1577_v51  ;;  %v1578_v58 = vunpack.i.l.bf16 %v1577_v51  ;;  %v1605_v51 = vld [vmem:[%s1653_s17] sm:$0xff] }
 0x136   : > { %v2068_v60 = vsel %vm449_vm3, %v1578_v58, %v1579_v34  ;;  %v1293_v34 = vld [vmem:[%s2461_s1 + $0xf8] sm:$0xff]  ;;  %v1310_v58 = vld [vmem:[%s2461_s1 + $0x160] sm:$0xff] }
 0x137   : > { %652 = vmatpush.msra.mxu3 %v2068_v60 }
 0x139   : > { %653 = vmatpush.msra.mxu3 %v2071_v61 }
 0x13a   : > { %1274 = vmatmul.msk.f32.vlgmr.msra.gmra.mxu3 %vm538_vm4, %v525_v1  ;;  %v1318_v1 = vld [vmem:[%s2461_s1 + $0x180] sm:$0xff] }
 0x13b   : > { %716 = vmatpush.msrb.mxu3 %v1718_v31  ;;  %v1587_v25 = vpop.permute.xlu1 %1586 }
 0x13c   : > { %v1589_v26 = vunpack.i.h.bf16 %v1587_v25  ;;  %v1588_v32 = vunpack.i.l.bf16 %v1587_v25  ;;  %v1324_v25 = vld [vmem:[%s2461_s1 + $0x1b0] sm:$0xff] }
 0x13d   : > { %717 = vmatpush.msrb.mxu3 %v1730_v46 }
 0x13e   : > { %v2089_v35 = vsel %vm449_vm3, %v1588_v32, %v1589_v26  ;;  %v1322_v26 = vld [vmem:[%s2461_s1 + $0x1a0] sm:$0xff]  ;;  %v1325_v32 = vld [vmem:[%s2461_s1 + $0x1b8] sm:$0xff] }
 0x13f   : > { %718 = vmatpush.msrb.mxu3 %v1726_v36  ;;  %623 = vmatpush.msra.mxu2 %v2089_v35 }
 0x140   : > { %788 = vmatpush.msrb.mxu1 %v2089_v35 }
 0x141   : > { %719 = vmatpush.msrb.mxu3 %v1736_v49  ;;  %624 = vmatpush.msra.mxu2 %v2092_v39 }
 0x142   : > { %789 = vmatpush.msrb.mxu1 %v2092_v39  ;;  %625 = vmatmul.f32.vlgmr.msra.gmra.mxu2 %v524_v9  ;;  %v571_v9 = vpop.f32.mrf.mxu0 }
 0x143   : > { %720 = vmatpush.msrb.mxu3 %v1749_v55  ;;  %811 = vmatpush.msrb.mxu2 %v1992_v29 }
 0x144   : > { %943 = vmatpush.msra.mxu1 %v1943_v4  ;;  %1275 = vmatmul.msk.f32.gmra.mxu3 %vm538_vm4, %v529_v38 }
 0x145   : > { %721 = vmatpush.msrb.mxu3 %v1743_v53  ;;  %812 = vmatpush.msrb.mxu2 %v2024_v12 }
 0x146   : > { %944 = vmatpush.msra.mxu1 %v1949_v5 }
 0x147   : > { %790 = vmatmul.f32.vlgmr.msrb.gmra.mxu1 %v1280_v54  ;;  %722 = vmatpush.msrb.mxu3 %v1756_v62  ;;  %v1329_v54 = vld [vmem:[%s2461_s1 + $0x1d8] sm:$0xff] }
 0x148   : > { %813 = vmatpush.msrb.mxu2 %v2046_v33  ;;  %945 = vmatpush.msra.mxu1 %v1957_v27 }
 0x149   : > { %723 = vmatpush.msrb.mxu3 %v1766_v7 }
 0x14a   : > { %814 = vmatpush.msrb.mxu2 %v2053_v43  ;;  %946 = vmatpush.msra.mxu1 %v1962_v28 }
 0x14b   : > { %628 = vmatmul.f32.gmra.mxu2 %v528_v37  ;;  %724 = vmatpush.msrb.mxu3 %v1656_v0  ;;  %v1283_v0 = vld [vmem:[%s2461_s1 + $0xa8] sm:$0xff]  ;;  %v1332_v37 = vld [vmem:[%s2461_s1 + $0x1f0] sm:$0xff] }
 0x14c   : > { %815 = vmatpush.msrb.mxu2 %v2056_v44  ;;  %947 = vmatpush.msra.mxu1 %v1969_v30 }
 0x14d   : > { %725 = vmatpush.msrb.mxu3 %v1670_v8  ;;  %v532_v8 = vld [vmem:[%s2461_s1 + $0x50] sm:$0xff]  ;;  %764 = vmatmul.f32.gmra.mxu0 %v1283_v0 }
 0x14e   : > { %816 = vmatpush.msrb.mxu2 %v2060_v50  ;;  %948 = vmatpush.msra.mxu1 %v1976_v40 }
 0x14f   : > { %1276 = vmatmul.msk.f32.gmra.mxu3 %vm538_vm4, %v533_v41  ;;  %v574_v41 = vpop.f32.mrf.mxu0 }
 0x150   : > { %726 = vmatpush.msrb.mxu3 %v1660_v2  ;;  %817 = vmatpush.msrb.mxu2 %v2068_v60  ;;  %v1284_v2 = vld [vmem:[%s2461_s1 + $0xb0] sm:$0xff] }
 0x151   : > { %949 = vmatpush.msra.mxu1 %v1981_v24 }
 0x152   : > { %727 = vmatpush.msrb.mxu3 %v1675_v11  ;;  %818 = vmatpush.msrb.mxu2 %v2071_v61  ;;  %v537_v11 = vld [vmem:[%s2461_s1 + $0x78] sm:$0xff] }
 0x153   : > { %950 = vmatpush.msra.mxu1 %v1997_v23  ;;  %631 = vmatmul.f32.gmra.mxu2 %v532_v8  ;;  %v1330_v8 = vld [vmem:[%s2461_s1 + $0x1e0] sm:$0xff] }
 0x154   : > { %980 = vmatpush.msra.mxu2 %v1992_v29  ;;  %728 = vmatpush.msrb.mxu3 %v1666_v6  ;;  %v1287_v6 = vld [vmem:[%s2461_s1 + $0xc8] sm:$0xff] }
 0x155   : > { %951 = vmatpush.msra.mxu1 %v2005_v20  ;;  %767 = vmatmul.f32.gmra.mxu0 %v1287_v6 }
 0x156   : > { %981 = vmatpush.msra.mxu2 %v2024_v12  ;;  %729 = vmatpush.msrb.mxu3 %v1680_v14  ;;  %v536_v14 = vld [vmem:[%s2461_s1 + $0x70] sm:$0xff] }
 0x157   : > { %793 = vmatmul.f32.gmra.mxu1 %v1284_v2  ;;  %1277 = vmatmul.msk.f32.gmra.mxu3 %vm538_vm4, %v537_v11  ;;  %v1333_v11 = vld [vmem:[%s2461_s1 + $0x1f8] sm:$0xff]  ;;  %v577_v42 = vpop.f32.mrf.mxu0 }
 0x158   : > { %952 = vmatpush.msra.mxu1 %v2012_v17  ;;  %982 = vmatpush.msra.mxu2 %v2046_v33 }
 0x159   : > { %730 = vmatpush.msrb.mxu3 %v1688_v18  ;;  %v1278_v18 = vld [vmem:[%s2461_s1 + $0x80] sm:$0xff] }
 0x15a   : > { %953 = vmatpush.msra.mxu1 %v2019_v3  ;;  %983 = vmatpush.msra.mxu2 %v2053_v43 }
 0x15b   : > { %731 = vmatpush.msrb.mxu3 %v1696_v21  ;;  %634 = vmatmul.f32.gmra.mxu2 %v536_v14  ;;  %v1291_v21 = vld [vmem:[%s2461_s1 + $0xe8] sm:$0xff] }
 0x15c   : > { %954 = vmatpush.msra.mxu1 %v2027_v13  ;;  %984 = vmatpush.msra.mxu2 %v2056_v44 }
 0x15d   : > { %885 = vmatpush.msra.mxu3 %v1718_v31  ;;  %770 = vmatmul.f32.gmra.mxu0 %v1291_v21 }
 0x15e   : > { %955 = vmatpush.msra.mxu1 %v2036_v15  ;;  %985 = vmatpush.msra.mxu2 %v2060_v50 }
 0x15f   : > { %886 = vmatpush.msra.mxu3 %v1730_v46  ;;  %796 = vmatmul.f32.gmra.mxu1 %v1288_v57 }
 0x160   : > { %956 = vmatpush.msra.mxu1 %v2039_v16  ;;  %986 = vmatpush.msra.mxu2 %v2068_v60 }
 0x161   : > { %887 = vmatpush.msra.mxu3 %v1726_v36 }
 0x162   : > { %732 = vmatmul.f32.vlgmr.msrb.gmra.mxu3 %v1278_v18  ;;  %957 = vmatpush.msra.mxu1 %v2089_v35 }
 0x163   : > { %888 = vmatpush.msra.mxu3 %v1736_v49  ;;  %987 = vmatpush.msra.mxu2 %v2071_v61 }
 0x164   : > { %958 = vmatpush.msra.mxu1 %v2092_v39  ;;  %1294 = vmatmul.msk.f32.vlgmr.msrb.gmra.mxu2 %vm538_vm4, %v1281_v48 }
 0x165   : > { %889 = vmatpush.msra.mxu3 %v1749_v55  ;;  %1149 = vmatpush.msrb.mxu2 %v1992_v29  ;;  %v2227_v29 = vld [vmem:[%s1653_s17 + $0x70] sm:$0xff] }
 0x166   : > { %1112 = vmatpush.msrb.mxu1 %v1943_v4  ;;  %v1299_v4 = vld [vmem:[%s2461_s1 + $0x108] sm:$0xff] }
 0x167   : > { %890 = vmatpush.msra.mxu3 %v1743_v53  ;;  %1150 = vmatpush.msrb.mxu2 %v2024_v12  ;;  %v2243_v12 = vld [vmem:[%s1653_s17 + $0x50] sm:$0xff] }
 0x168   : > { %1113 = vmatpush.msrb.mxu1 %v1949_v5  ;;  %v1285_v5 = vld [vmem:[%s2461_s1 + $0xb8] sm:$0xff]  ;;  %930 = vmatmul.f32.vlgmr.msra.gmra.mxu0 %v1299_v4 }
 0x169   : > { %891 = vmatpush.msra.mxu3 %v1756_v62  ;;  %1151 = vmatpush.msrb.mxu2 %v2046_v33  ;;  %v2252_v33 = vld [vmem:[%s1653_s17 + $0x40] sm:$0xff] }
 0x16a   : > { %1114 = vmatpush.msrb.mxu1 %v1957_v27  ;;  %735 = vmatmul.f32.gmra.mxu3 %v1282_v45  ;;  %v2234_v27 = vld [vmem:[%s1653_s17 + $0x60] sm:$0xff]  ;;  %v762_v45 = vpop.f32.mrf.mxu0 }
 0x16b   : > { %892 = vmatpush.msra.mxu3 %v1766_v7  ;;  %1152 = vmatpush.msrb.mxu2 %v2053_v43  ;;  %v1292_v43 = vld [vmem:[%s2461_s1 + $0xf0] sm:$0xff] }
 0x16c   : > { %1115 = vmatpush.msrb.mxu1 %v1962_v28  ;;  %1295 = vmatmul.msk.f32.gmra.mxu2 %vm538_vm4, %v1285_v5  ;;  %v1286_v28 = vld [vmem:[%s2461_s1 + $0xc0] sm:$0xff] }
 0x16d   : > { %893 = vmatpush.msra.mxu3 %v2227_v29  ;;  %1153 = vmatpush.msrb.mxu2 %v2056_v44  ;;  %v1603_v44 = vld [vmem:[%s1653_s17 + $0x20] sm:$0xff] }
 0x16e   : > { %1116 = vmatpush.msrb.mxu1 %v1969_v30  ;;  %v1303_v30 = vld [vmem:[%s2461_s1 + $0x128] sm:$0xff] }
 0x16f   : > { %894 = vmatpush.msra.mxu3 %v2234_v27  ;;  %1154 = vmatpush.msrb.mxu2 %v2060_v50  ;;  %v1604_v50 = vld [vmem:[%s1653_s17 + $0x10] sm:$0xff] }
 0x170   : > { %1117 = vmatpush.msrb.mxu1 %v1976_v40  ;;  %v1289_v40 = vld [vmem:[%s2461_s1 + $0xd8] sm:$0xff]  ;;  %933 = vmatmul.f32.gmra.mxu0 %v1303_v30 }
 0x171   : > { %895 = vmatpush.msra.mxu3 %v2243_v12  ;;  %1155 = vmatpush.msrb.mxu2 %v2068_v60  ;;  %v1327_v60 = vld [vmem:[%s2461_s1 + $0x1c8] sm:$0xff] }
 0x172   : > { %1118 = vmatpush.msrb.mxu1 %v1981_v24  ;;  %738 = vmatmul.f32.gmra.mxu3 %v1286_v28  ;;  %v1602_v24 = vld [vmem:[%s1653_s17 + $0x30] sm:$0xff] }
 0x173   : > { %896 = vmatpush.msra.mxu3 %v2252_v33  ;;  %1156 = vmatpush.msrb.mxu2 %v2071_v61  ;;  %v1313_v61 = vld [vmem:[%s2461_s1 + $0x178] sm:$0xff] }
 0x174   : > { %1119 = vmatpush.msrb.mxu1 %v1997_v23  ;;  %1296 = vmatmul.msk.f32.gmra.mxu2 %vm538_vm4, %v1289_v40  ;;  %v1290_v23 = vld [vmem:[%s2461_s1 + $0xe0] sm:$0xff] }
 0x175   : > { %897 = vmatpush.msra.mxu3 %v1602_v24  ;;  %799 = vmatmul.f32.gmra.mxu1 %v1292_v43 }
 0x176   : > { %1120 = vmatpush.msrb.mxu1 %v2005_v20  ;;  %v1307_v20 = vld [vmem:[%s2461_s1 + $0x148] sm:$0xff] }
 0x177   : > { %898 = vmatpush.msra.mxu3 %v1603_v44 }
 0x178   : > { %1121 = vmatpush.msrb.mxu1 %v2012_v17  ;;  %v1300_v17 = vld [vmem:[%s2461_s1 + $0x110] sm:$0xff]  ;;  %936 = vmatmul.f32.gmra.mxu0 %v1307_v20 }
 0x179   : > { %899 = vmatpush.msra.mxu3 %v1604_v50 }
 0x17a   : > { %1122 = vmatpush.msrb.mxu1 %v2019_v3  ;;  %741 = vmatmul.f32.gmra.mxu3 %v1290_v23  ;;  %v1298_v3 = vld [vmem:[%s2461_s1 + $0x100] sm:$0xff] }
 0x17b   : > { %900 = vmatpush.msra.mxu3 %v1605_v51 }
 0x17c   : > { %1123 = vmatpush.msrb.mxu1 %v2027_v13  ;;  %1297 = vmatmul.msk.f32.gmra.mxu2 %vm538_vm4, %v1293_v34  ;;  %v1304_v13 = vld [vmem:[%s2461_s1 + $0x130] sm:$0xff] }
 0x17d   : > { %1054 = vmatpush.msrb.mxu3 %v1718_v31  ;;  %959 = vmatmul.f32.vlgmr.msra.gmra.mxu1 %v1300_v17  ;;  %v1311_v31 = vld [vmem:[%s2461_s1 + $0x168] sm:$0xff]  ;;  %v597_v10 = vpop.f32.mrf.mxu1 }
 0x17e   : > { %1124 = vmatpush.msrb.mxu1 %v2036_v15  ;;  %v1309_v15 = vld [vmem:[%s2461_s1 + $0x158] sm:$0xff]  ;;  %v598_v56 = vadd.f32 %v597_v10, %v568_v52 }
 0x17f   : > { %1055 = vmatpush.msrb.mxu3 %v1730_v46  ;;  %v1301_v46 = vld [vmem:[%s2461_s1 + $0x118] sm:$0xff] }
 0x180   : > { %1125 = vmatpush.msrb.mxu1 %v2039_v16  ;;  %939 = vmatmul.f32.gmra.mxu0 %v1311_v31  ;;  %v1312_v16 = vld [vmem:[%s2461_s1 + $0x170] sm:$0xff] }
 0x181   : > { %1056 = vmatpush.msrb.mxu3 %v1726_v36  ;;  %v1302_v36 = vld [vmem:[%s2461_s1 + $0x120] sm:$0xff] }
 0x182   : > { %1126 = vmatpush.msrb.mxu1 %v2089_v35  ;;  %901 = vmatmul.f32.vlgmr.msra.gmra.mxu3 %v1298_v3  ;;  %v1328_v35 = vld [vmem:[%s2461_s1 + $0x1d0] sm:$0xff] }
 0x183   : > { %1057 = vmatpush.msrb.mxu3 %v1736_v49  ;;  %v1319_v49 = vld [vmem:[%s2461_s1 + $0x188] sm:$0xff] }
 0x184   : > { %1127 = vmatpush.msrb.mxu1 %v2092_v39  ;;  %1314 = vmatmul.msk.f32.vlgmr.msra.gmra.mxu2 %vm538_vm4, %v1301_v46 }
 0x185   : > { %1058 = vmatpush.msrb.mxu3 %v1749_v55  ;;  %962 = vmatmul.f32.gmra.mxu1 %v1304_v13  ;;  %v1305_v55 = vld [vmem:[%s2461_s1 + $0x138] sm:$0xff] }
 0x187   : > { %1059 = vmatpush.msrb.mxu3 %v1743_v53  ;;  %v1308_v53 = vld [vmem:[%s2461_s1 + $0x150] sm:$0xff] }
 0x188   : > { %1099 = vmatmul.f32.vlgmr.msrb.gmra.mxu0 %v1319_v49 }
 0x189   : > { %1060 = vmatpush.msrb.mxu3 %v1756_v62  ;;  %v1306_v62 = vld [vmem:[%s2461_s1 + $0x140] sm:$0xff] }
 0x18a   : > { %904 = vmatmul.f32.gmra.mxu3 %v1302_v36 }
 0x18b   : > { %1061 = vmatpush.msrb.mxu3 %v1766_v7  ;;  %v1323_v7 = vld [vmem:[%s2461_s1 + $0x1a8] sm:$0xff] }
 0x18c   : > { %1315 = vmatmul.msk.f32.gmra.mxu2 %vm538_vm4, %v1305_v55 }
 0x18d   : > { %1062 = vmatpush.msrb.mxu3 %v2227_v29  ;;  %965 = vmatmul.f32.gmra.mxu1 %v1308_v53  ;;  %v600_v39 = vpop.f32.mrf.mxu1 }
 0x18e   : > { %v601_v38 = vadd.f32 %v600_v39, %v571_v9 }
 0x18f   : > { %1063 = vmatpush.msrb.mxu3 %v2234_v27 }
 0x190   : > { %1102 = vmatmul.f32.gmra.mxu0 %v1323_v7 }
 0x191   : > { %1064 = vmatpush.msrb.mxu3 %v2243_v12 }
 0x192   : > { %907 = vmatmul.f32.gmra.mxu3 %v1306_v62 }
 0x193   : > { %1065 = vmatpush.msrb.mxu3 %v2252_v33 }
 0x194   : > { %1316 = vmatmul.msk.f32.gmra.mxu2 %vm538_vm4, %v1309_v15 }
 0x195   : > { %1066 = vmatpush.msrb.mxu3 %v1602_v24  ;;  %968 = vmatmul.f32.gmra.mxu1 %v1312_v16 }
 0x197   : > { %1067 = vmatpush.msrb.mxu3 %v1603_v44 }
 0x198   : > { %1105 = vmatmul.f32.gmra.mxu0 %v1327_v60 }
 0x199   : > { %1068 = vmatpush.msrb.mxu3 %v1604_v50  ;;  %v603_v0 = vpop.f32.mrf.mxu1 }
 0x19a   : > { %910 = vmatmul.f32.gmra.mxu3 %v1310_v58  ;;  %v604_v2 = vadd.f32 %v603_v0, %v574_v41 }
 0x19b   : > { %1069 = vmatpush.msrb.mxu3 %v1605_v51 }
 0x19c   : > { %1317 = vmatmul.msk.f32.gmra.mxu2 %vm538_vm4, %v1313_v61 }
 0x19d   : > { %1128 = vmatmul.f32.vlgmr.msrb.gmra.mxu1 %v1320_v63 }
 0x1a0   : > { %1108 = vmatmul.f32.gmra.mxu0 %v1331_v59 }
 0x1a2   : > { %1070 = vmatmul.f32.vlgmr.msrb.gmra.mxu3 %v1318_v1 }
 0x1a3   : > { %v606_v6 = vpop.f32.mrf.mxu1 }
 0x1a4   : > { %1334 = vmatmul.msk.f32.vlgmr.msrb.gmra.mxu2 %vm538_vm4, %v1321_v19  ;;  %v607_v14 = vadd.f32 %v606_v6, %v577_v42  ;;  %v2417_v6 = vpop.permute.xlu1 %509 }
 0x1a5   : > { %1131 = vmatmul.f32.gmra.mxu1 %v1324_v25 }
 0x1aa   : > { %1073 = vmatmul.f32.gmra.mxu3 %v1322_v26 }
 0x1ac   : > { %1335 = vmatmul.msk.f32.gmra.mxu2 %vm538_vm4, %v1325_v32 }
 0x1ad   : > { %1134 = vmatmul.f32.gmra.mxu1 %v1328_v35  ;;  %v505_v35 = vpop.permute.xlu0 %504 }
 0x1b2   : > { %1076 = vmatmul.f32.gmra.mxu3 %v1326_v22 }
 0x1b4   : > { %1336 = vmatmul.msk.f32.gmra.mxu2 %vm538_vm4, %v1329_v54 }
 0x1b5   : > { %1137 = vmatmul.f32.gmra.mxu1 %v1332_v37 }
 0x1ba   : > { %1079 = vmatmul.f32.gmra.mxu3 %v1330_v8 }
 0x1bc   : > { %1337 = vmatmul.msk.f32.gmra.mxu2 %vm538_vm4, %v1333_v11 }
 0x1bd   : > { %v655_v18 = vpop.f32.mrf.mxu3 }
 0x1c4   : > { %v791_v28 = vpop.f32.mrf.mxu1 }
 0x1c5   : > { %v626_v21 = vpop.f32.mrf.mxu2 }
 0x1c6   : > { %v627_v48 = vadd.f32 %v626_v21, %v598_v56 }
 0x1c7   : > { %v658_v47 = vpop.f32.mrf.mxu3 }
 0x1c8   : > { %v656_v57 = vadd.f32 %v655_v18, %v627_v48 }
 0x1ca   : > { %v765_v12 = vpop.f32.mrf.mxu0  ;;  %v667_v0 = vadd.f32 %v656_v57, %v505_v35 }
 0x1cc   : > { %v675_v18 = vmul.f32 0.25, %v667_v0  ;;  %vm671_vm6 = vcmp.gt.f32.partialorder %v667_v0, 0.0 }
 0x1ce   : > { %v629_v4 = vpop.f32.mrf.mxu2 }
 0x1cf   : > { %v630_v5 = vadd.f32 %v629_v4, %v601_v38 }
 0x1d1   : > { %v2393_v29 = vadd.f32 %v658_v47, %v630_v5 }
 0x1d2   : > { %v661_v27 = vpop.f32.mrf.mxu3  ;;  %v768_v23 = vpop.f32.mrf.mxu0 }
 0x1d4   : > { %v794_v24 = vpop.f32.mrf.mxu1 }
 0x1d6   : > { %v632_v30 = vpop.f32.mrf.mxu2 }
 0x1d7   : > { %v633_v33 = vadd.f32 %v632_v30, %v604_v2 }
 0x1d9   : > { %v2395_v40 = vadd.f32 %v661_v27, %v633_v33  ;;  %v679_v27 = vmul.f32 0.05, %v667_v0 }
 0x1da   : > { %v664_v43 = vpop.f32.mrf.mxu3  ;;  %v2399_v3 = vpop.f32.mrf.mxu0 }
 0x1dc   : > { %v797_v17 = vpop.f32.mrf.mxu1 }
 0x1de   : > { %v635_v44 = vpop.f32.mrf.mxu2 }
 0x1df   : > { %v636_v50 = vadd.f32 %v635_v44, %v607_v14 }
 0x1e1   : > { %v2397_v20 = vadd.f32 %v664_v43, %v636_v50  ;;  %v2421_v43 = vpop.permute.xlu2 %514 }
 0x1e5   : > { %v733_v51 = vpop.f32.mrf.mxu3  ;;  %v931_v49 = vpop.f32.mrf.mxu0 }
 0x1e6   : > { %v763_v56 = vadd.f32 %v762_v45, %v733_v51 }
 0x1e7   : > { %v820_v34 = vpop.f32.mrf.mxu2 }
 0x1e8   : > { %v792_v26 = vadd.f32 %v791_v28, %v763_v56  ;;  %v668_v28 = vadd.f32 %v2393_v29, %v2417_v6  ;;  %v683_v29 = vsel %vm671_vm6, %v675_v18, %v679_v27 }
 0x1ea   : > { %v821_v9 = vadd.f32 %v820_v34, %v792_v26  ;;  %vm672_vm8 = vcmp.gt.f32.partialorder %v668_v28, 0.0 }
 0x1ec   : > { %v832_v2 = vadd.f32 %v821_v9, %v505_v35 }
 0x1ed   : > { %v736_v31 = vpop.f32.mrf.mxu3  ;;  %v934_v7 = vpop.f32.mrf.mxu0 }
 0x1ee   : > { %v766_v22 = vadd.f32 %v765_v12, %v736_v31  ;;  %v840_v48 = vmul.f32 0.25, %v832_v2  ;;  %v844_v47 = vmul.f32 0.05, %v832_v2  ;;  %vm836_vm5 = vcmp.gt.f32.partialorder %v832_v2, 0.0 }
 0x1ef   : > { %v823_v46 = vpop.f32.mrf.mxu2 }
 0x1f0   : > { %v795_v11 = vadd.f32 %v794_v24, %v766_v22  ;;  %v848_v51 = vsel %vm836_vm5, %v840_v48, %v844_v47 }
 0x1f2   : > { %v2401_v13 = vpop.f32.mrf.mxu1  ;;  %v824_v45 = vadd.f32 %v823_v46, %v795_v11 }
 0x1f4   : > { %v833_v34 = vadd.f32 %v824_v45, %v2417_v6 }
 0x1f5   : > { %v739_v36 = vpop.f32.mrf.mxu3  ;;  %v937_v61 = vpop.f32.mrf.mxu0 }
 0x1f6   : > { %v769_v4 = vadd.f32 %v768_v23, %v739_v36  ;;  %vm837_vm10 = vcmp.gt.f32.partialorder %v833_v34, 0.0 }
 0x1f7   : > { %v2403_v55 = vpop.f32.mrf.mxu2 }
 0x1f8   : > { %v798_v23 = vadd.f32 %v797_v17, %v769_v4  ;;  %v841_v17 = vmul.f32 0.25, %v833_v34 }
 0x1fa   : > { %v960_v53 = vpop.f32.mrf.mxu1  ;;  %v827_v56 = vadd.f32 %v2403_v55, %v798_v23 }
 0x1fd   : > { %v2405_v62 = vpop.f32.mrf.mxu3  ;;  %v2409_v10 = vpop.f32.mrf.mxu0 }
 0x1ff   : > { %v2407_v15 = vpop.f32.mrf.mxu2 }
 0x202   : > { %v963_v16 = vpop.f32.mrf.mxu1 }
 0x205   : > { %v902_v58 = vpop.f32.mrf.mxu3  ;;  %v1100_v54 = vpop.f32.mrf.mxu0 }
 0x206   : > { %v932_v25 = vadd.f32 %v931_v49, %v902_v58  ;;  %v676_v49 = vmul.f32 0.25, %v668_v28  ;;  %v2427_v58 = vadd.f32 %v2395_v40, %v2421_v43 }
 0x207   : > { %v989_v60 = vpop.f32.mrf.mxu2 }
 0x208   : > { %v961_v39 = vadd.f32 %v960_v53, %v932_v25  ;;  %v680_v53 = vmul.f32 0.05, %v668_v28  ;;  %vm673_vm14 = vcmp.gt.f32.partialorder %v2427_v58, 0.0 }
 0x20a   : > { %v966_v63 = vpop.f32.mrf.mxu1  ;;  %v990_v8 = vadd.f32 %v989_v60, %v961_v39  ;;  %v852_v60 = vadd.f32 %v848_v51, %v683_v29 }
 0x20c   : > { %v1001_v21 = vadd.f32 %v990_v8, %v505_v35 }
 0x20d   : > { %v905_v52 = vpop.f32.mrf.mxu3  ;;  %v1103_v33 = vpop.f32.mrf.mxu0 }
 0x20e   : > { %v935_v37 = vadd.f32 %v934_v7, %v905_v52  ;;  %v1009_v24 = vmul.f32 0.25, %v1001_v21  ;;  %v1013_v44 = vmul.f32 0.05, %v1001_v21  ;;  %vm1005_vm7 = vcmp.gt.f32.partialorder %v1001_v21, 0.0 }
 0x20f   : > { %v992_v1 = vpop.f32.mrf.mxu2 }
 0x210   : > { %v964_v14 = vadd.f32 %v963_v16, %v935_v37 }
 0x212   : > { %v2411_v19 = vpop.f32.mrf.mxu1  ;;  %v993_v12 = vadd.f32 %v992_v1, %v964_v14  ;;  %v845_v1 = vmul.f32 0.05, %v833_v34  ;;  %v677_v14 = vmul.f32 0.25, %v2427_v58 }
 0x214   : > { %v1002_v7 = vadd.f32 %v993_v12, %v2417_v6  ;;  %v681_v12 = vmul.f32 0.05, %v2427_v58 }
 0x215   : > { %v908_v59 = vpop.f32.mrf.mxu3  ;;  %v1106_v8 = vpop.f32.mrf.mxu0 }
 0x216   : > { %v938_v30 = vadd.f32 %v937_v61, %v908_v59  ;;  %v1017_v61 = vsel %vm1005_vm7, %v1009_v24, %v1013_v44  ;;  %v772_v59 = vadd.f32 %v2399_v3, %v2405_v62  ;;  %v1010_v40 = vmul.f32 0.25, %v1002_v7  ;;  %v520_v24 = vpop.permute.xlu1 %519 }
 0x217   : > { %v2413_v32 = vpop.f32.mrf.mxu2  ;;  %v1021_v9 = vadd.f32 %v1017_v61, %v852_v60  ;;  %v834_v62 = vadd.f32 %v827_v56, %v2421_v43  ;;  %vm1006_vm11 = vcmp.gt.f32.partialorder %v1002_v7, 0.0 }
 0x218   : > { %v967_v16 = vadd.f32 %v966_v63, %v938_v30  ;;  %v801_v37 = vadd.f32 %v2401_v13, %v772_v59 }
 0x219   : > { %v842_v47 = vmul.f32 0.25, %v834_v62  ;;  %v846_v45 = vmul.f32 0.05, %v834_v62  ;;  %vm838_vm13 = vcmp.gt.f32.partialorder %v834_v62, 0.0 }
 0x21a   : > { %v1129_v41 = vpop.f32.mrf.mxu1  ;;  %v996_v22 = vadd.f32 %v2413_v32, %v967_v16  ;;  %v849_v32 = vsel %vm837_vm10, %v841_v17, %v845_v1  ;;  %v830_v4 = vadd.f32 %v2407_v15, %v801_v37 }
 0x21b   : > { %v850_v23 = vsel %vm838_vm13, %v842_v47, %v846_v45 }
 0x21c   : > { %v835_v15 = vadd.f32 %v830_v4, %v520_v24 }
 0x21d   : > { %v911_v38 = vpop.f32.mrf.mxu3  ;;  %v1109_v29 = vpop.f32.mrf.mxu0 }
 0x21e   : > { %v843_v16 = vmul.f32 0.25, %v835_v15  ;;  %v847_v60 = vmul.f32 0.05, %v835_v15  ;;  %vm839_vm1 = vcmp.gt.f32.partialorder %v835_v15, 0.0 }
 0x21f   : > { %v2415_v42 = vpop.f32.mrf.mxu2 }
 0x222   : > { %v1132_v46 = vpop.f32.mrf.mxu1 }
 0x225   : > { %v1071_v5 = vpop.f32.mrf.mxu3 }
 0x226   : > { %v1101_v57 = vadd.f32 %v1100_v54, %v1071_v5  ;;  %v1014_v54 = vmul.f32 0.05, %v1002_v7 }
 0x227   : > { %v1158_v31 = vpop.f32.mrf.mxu2 }
 0x228   : > { %v1130_v50 = vadd.f32 %v1129_v41, %v1101_v57  ;;  %v1018_v18 = vsel %vm1006_vm11, %v1010_v40, %v1014_v54  ;;  %v851_v40 = vsel %vm839_vm1, %v843_v16, %v847_v60 }
 0x22a   : > { %v1159_v36 = vadd.f32 %v1158_v31, %v1130_v50  ;;  %v1135_v11 = vpop.f32.mrf.mxu1 }
 0x22c   : > { %v1170_v52 = vadd.f32 %v1159_v36, %v505_v35  ;;  %v941_v35 = vadd.f32 %v2409_v10, %v911_v38  ;;  %v684_v10 = vsel %vm672_vm8, %v676_v49, %v680_v53  ;;  %v1003_v38 = vadd.f32 %v996_v22, %v2421_v43 }
 0x22d   : > { %v1074_v25 = vpop.f32.mrf.mxu3  ;;  %v853_v13 = vadd.f32 %v849_v32, %v684_v10  ;;  %v685_v36 = vsel %vm673_vm14, %v677_v14, %v681_v12 }
 0x22e   : > { %vm1174_vm9 = vcmp.gt.f32.partialorder %v1170_v52, 0.0  ;;  %v1178_v26 = vmul.f32 0.25, %v1170_v52  ;;  %v1182_v39 = vmul.f32 0.05, %v1170_v52  ;;  %v1104_v63 = vadd.f32 %v1103_v33, %v1074_v25 }
 0x22f   : > { %v1161_v0 = vpop.f32.mrf.mxu2  ;;  %v970_v21 = vadd.f32 %v2411_v19, %v941_v35  ;;  %v1022_v30 = vadd.f32 %v1018_v18, %v853_v13  ;;  %v1011_v33 = vmul.f32 0.25, %v1003_v38  ;;  %v1015_v19 = vmul.f32 0.05, %v1003_v38 }
 0x230   : > { %v1186_v3 = vsel %vm1174_vm9, %v1178_v26, %v1182_v39  ;;  %v1133_v55 = vadd.f32 %v1132_v46, %v1104_v63  ;;  %vm1007_vm15 = vcmp.gt.f32.partialorder %v1003_v38, 0.0  ;;  %v670_v46 = vadd.f32 %v2397_v20, %v520_v24 }
 0x231   : > { %v1190_v41 = vadd.f32 %v1186_v3, %v1021_v9  ;;  %v1019_v49 = vsel %vm1007_vm15, %v1011_v33, %v1015_v19 }
 0x232   : > { %v1162_v2 = vadd.f32 %v1161_v0, %v1133_v55  ;;  %v1138_v58 = vpop.f32.mrf.mxu1  ;;  %v678_v56 = vmul.f32 0.25, %v670_v46  ;;  %v682_v59 = vmul.f32 0.05, %v670_v46  ;;  %vm674_vm2 = vcmp.gt.f32.partialorder %v670_v46, 0.0 }
 0x233   : > { %1194 = vst [vmem:[%s2438_s11] sm:$0xff] %v1190_v41 }
 0x234   : > { %v1171_v48 = vadd.f32 %v1162_v2, %v2417_v6  ;;  %v999_v6 = vadd.f32 %v2415_v42, %v970_v21  ;;  %v854_v42 = vadd.f32 %v850_v23, %v685_v36  ;;  %v686_v54 = vsel %vm674_vm2, %v678_v56, %v682_v59 }
 0x235   : > { %v1077_v5 = vpop.f32.mrf.mxu3  ;;  %v855_v55 = vadd.f32 %v851_v40, %v686_v54 }
 0x236   : > { %vm1175_vm12 = vcmp.gt.f32.partialorder %v1171_v48, 0.0  ;;  %v1179_v27 = vmul.f32 0.25, %v1171_v48  ;;  %v1183_v28 = vmul.f32 0.05, %v1171_v48  ;;  %v1107_v57 = vadd.f32 %v1106_v8, %v1077_v5 }
 0x237   : > { %v1164_v34 = vpop.f32.mrf.mxu2  ;;  %v1004_v53 = vadd.f32 %v999_v6, %v520_v24  ;;  %v1023_v20 = vadd.f32 %v1019_v49, %v854_v42 }
 0x238   : > { %v1187_v44 = vsel %vm1175_vm12, %v1179_v27, %v1183_v28  ;;  %v1136_v50 = vadd.f32 %v1135_v11, %v1107_v57 }
 0x239   : > { %v1191_v51 = vadd.f32 %v1187_v44, %v1022_v30  ;;  %v1012_v25 = vmul.f32 0.25, %v1004_v53  ;;  %v1016_v26 = vmul.f32 0.05, %v1004_v53  ;;  %vm1008_vm3 = vcmp.gt.f32.partialorder %v1004_v53, 0.0 }
 0x23a   : > { %v1165_v31 = vadd.f32 %v1164_v34, %v1136_v50 }
 0x23b   : > { %1195 = vst [vmem:[%s2438_s11 + $0x8] sm:$0xff] %v1191_v51  ;;  %v1020_v35 = vsel %vm1008_vm3, %v1012_v25, %v1016_v26 }
 0x23c   : > { %v1172_v7 = vadd.f32 %v1165_v31, %v2421_v43  ;;  %v1024_v41 = vadd.f32 %v1020_v35, %v855_v55 }
 0x23d   : > { %v1080_v61 = vpop.f32.mrf.mxu3 }
 0x23e   : > { %vm1176_vm0 = vcmp.gt.f32.partialorder %v1172_v7, 0.0  ;;  %v1180_v52 = vmul.f32 0.25, %v1172_v7  ;;  %v1184_v17 = vmul.f32 0.05, %v1172_v7  ;;  %v1110_v1 = vadd.f32 %v1109_v29, %v1080_v61 }
 0x23f   : > { %v1167_v9 = vpop.f32.mrf.mxu2 }
 0x240   : > { %v1188_v39 = vsel %vm1176_vm0, %v1180_v52, %v1184_v17  ;;  %v1139_v63 = vadd.f32 %v1138_v58, %v1110_v1 }
 0x241   : > { %v1192_v43 = vadd.f32 %v1188_v39, %v1023_v20 }
 0x242   : > { %v1168_v22 = vadd.f32 %v1167_v9, %v1139_v63 }
 0x243   : > { %1196 = vst [vmem:[%s2438_s11 + $0x10] sm:$0xff] %v1192_v43 }
 0x244   : > { %v1173_v3 = vadd.f32 %v1168_v22, %v520_v24 }
 0x246   : > { %vm1177_vm4 = vcmp.gt.f32.partialorder %v1173_v3, 0.0  ;;  %v1181_v62 = vmul.f32 0.25, %v1173_v3  ;;  %v1185_v37 = vmul.f32 0.05, %v1173_v3 }
 0x248   : > { %v1189_v0 = vsel %vm1177_vm4, %v1181_v62, %v1185_v37 }
 0x249   : > { %v1193_v8 = vadd.f32 %v1189_v0, %v1024_v41 }
 0x24b   : > { %1197 = vst [vmem:[%s2438_s11 + $0x18] sm:$0xff] %v1193_v8 }
 0x24c PF: > { %s13_s12 = sadd.s32 1, %s1612_s12  }
 0x24d   : > { %p10_p4 = scmp.ge.s32.totalorder %s13_s12, 4  }
 0x24f   :  { %12 = sbr.rel (!%p10_p4) target bundleno = 1 (0x1), region = 68 }

// kernel: generator_8192_forward.7
= control target key start
LH: loop header
LB: loop body
LE: loop exit
PB: predicated region body
PF: predicated region fallthrough
CT: control target
= control target key end

     0   :  { %9 = vsyncpa [#allocation3], 0  ;;  %s3823_s0 = inlined_call_operand.vmem [shape: f32[8,2,512], index: 0, kind: input, shape index: {}]   ;;  %s3824_s1 = inlined_call_operand.hbm [shape: s8[8,512,8192], index: 1, kind: input, shape index: {}]   ;;  %s3825_s2 = inlined_call_operand.vmem [shape: f32[1,8192], index: 2, kind: input, shape index: {}]   ;;  %s3826_s3 = inlined_call_operand.vmem [shape: f32[1,8192], index: 3, kind: input, shape index: {}]   ;;  %s3827_s4 = inlined_call_operand.hbm [shape: f32[2,8192], index: 4, kind: output, shape index: {}]  }
   0x1   :  { %11 = vsyncpa [#allocation3 + $0x1], 0 }
   0x2   :  { %12 = vsyncpa [#allocation4], 0 }
   0x3   :  { %14 = vsyncpa [#allocation4 + $0x1], 0  ;;  %s2657_s15 = smov 0   ;;  %s2659_s16 = smov 0  }
   0x4   :  { %s2661_s17 = smov 0   ;;  %s2663_s18 = smov 0  }
   0x5 LB: > { %s2678_s19 = sadd.s32 4294967295, %s2591_s18   ;;  %s2306_s20 = sadd.s32 4294967294, %s2591_s18   ;;  %s2591_s18 = sphi %s2663_s18, %s3848_s18   ;;  %s2587_s17 = sphi %s2661_s17, %s3847_s17   ;;  %s2583_s16 = sphi %s2659_s16, %s3846_s16   ;;  %s2579_s15 = sphi %s2657_s15, %s3845_s15  }
   0x6   : > { %s2682_s21 = sadd.s32 1, %s2591_s18   ;;  %s48_s22 = sadd.s32 1, %s2587_s17 }
   0x7   : > { %s45_s23 = ssub.s32 %s2591_s18, %s2682_s21  ;;  %p55_p0 = scmp.ne.s32.totalorder %s2587_s17, %s2583_s16 }
   0x8   : > { %p46_p1 = scmp.eq.s32.totalorder %s45_s23, 0  ;;  %p56_p2 = scmp.eq.s32.totalorder %s2591_s18, 0 }
   0x9   : > { %p61_p3 = scmp.ne.s32.totalorder %s2583_s16, %s2579_s15  ;;  %p62_p4 = scmp.eq.s32.totalorder %s2678_s19, 0 }
   0xa   : > { %s2694_s24 = scalar_select %p46_p1, %s2587_s17, %s48_s22  }
   0xb   : > { %p2696_p5 = por %p56_p2, %p55_p0  ;;  %p2700_p6 = por %p62_p4, %p61_p3 }
   0xc   : > { %p137_p7 = scmp.eq.s32.totalorder %s2678_s19, 7  ;;  %p143_p8 = scmp.eq.s32.totalorder %s2306_s20, 7 }
   0xd   : > { %p2342_p9 = scmp.lt.s32.totalorder %s2591_s18, 8  ;;  %s166_s29 = sand.u32 1, %s2587_s17  }
   0xe   : > { %p2706_p10 = por %p137_p7, %p55_p0  ;;  %p2710_p11 = por %p143_p8, %p61_p3 }
   0xf   : > { %s2326_s30 = sshll.u32 %s2591_s18, 6  ;;  %s2309_s5 = sshll.u32 %s166_s29, 13 }
  0x10   : > { %s175_s8 = scalar_lea.hbm %s3824_s1, %s2326_s30  ;;  %s170_s10 = scalar_lea.vmem [#allocation2], %s2309_s5 }
  0x11   : > { %s176_s9 = sshll.u32 %s175_s8, 4  ;;  %s178_s11 = sshll.u32 %s170_s10, 4  ;;  %s177_s9 = int_to_ptr.hbm [resolvable:$true] %s176_s9  ;;  %s179_s11 = int_to_ptr.vmem [resolvable:$true] %s178_s11 }
  0x12   : > { %p2721_p12 = pnand %p2342_p9, %p2696_p5  ;;  %p2312_p13 = scmp.ge.s32.totalorder %s2591_s18, 1 }
  0x13   : > { %s167_s13 = scalar_lea.sflag [#allocation3], %s166_s29  ;;  %s2459_s14 = sshra.s32 %s177_s9, 4  ;;  %s2460_s14 = int_to_ptr.hbm [resolvable:$true] %s2459_s14 }
  0x14   : > { %s2461_s20 = scalar_lea.hbm %s2460_s14, 8192  ;;  %p2463_p1 = pneg %p2721_p12 }
  0x15   : > { %p2462_p0 = scmp.ne.s32.totalorder %s2460_s14, %s2461_s20  ;;  %s2466_s30 = scalar_lea.hbm %s3824_s1, 65536 }
  0x16   : > { %p2467_p4 = scmp.lt.s32.totalorder %s2460_s14, %s3824_s1  ;;  %p2468_p5 = scmp.lt.s32.totalorder %s2466_s30, %s2461_s20 }
  0x17   : > { %p2464_p2 = pnand %p2463_p1, %p2462_p0 }
  0x18   : > { %p2469_p7 = por %p2468_p5, %p2467_p4 }
  0x19   : > { %p2465_p3 = pneg %p2464_p2 }
  0x1b   : > { %p2470_p8 = pnand %p2469_p7, %p2465_p3 }
  0x1d   : > { %2473 = shalt.err (!%p2470_p8)
}
  0x1e   : > { %s2629_s29 = smov 8192   ;;  %s2630_s6 = smov 1024  }
  0x1f   : > { %s2631_s7 = smov 64   ;;  %p202_p9 = scmp.lt.s32.totalorder %s2591_s18, 9 }
  0x20   : > { %2337 = dma.hbm_to_vmem [thread:$0]  (!%p2721_p12), %s177_s9, 131072, %s179_s11, %s167_s13, %s2629_s29, %s2630_s6, %s2631_s7  }
  0x21   : > { %p203_p0 = pnand %p2312_p13, %p202_p9 }
  0x22   : > { %s2740_s8 = sand.u32 (!%p203_p0), 1, %s2583_s16  }
  0x23   : > { %206 = sbr.rel (%p203_p0) target bundleno = 472 (0x1d8), region = 36  ;;  %s2313_s10 = sshll.u32 (!%p203_p0), %s2740_s8, 13 }
  0x24   : > { %s209_s14 = scalar_lea.sflag (!%p203_p0), [#allocation3], %s2740_s8  ;;  %s2744_s20 = scalar_lea.vmem (!%p203_p0), [#allocation2], %s2313_s10 }
  0x28   : > { %2570 = dma.done.wait (%p2700_p6), %s209_s14, 131072  }
  0x29   : > { %2572 = vsyncadd (%p2700_p6), %s209_s14, 4294836224  ;;  %s2314_s9 = sshll.u32 %s2740_s8, 4  ;;  %s2315_s11 = sshll.u32 %s2678_s19, 3  ;;  %v2764_v0 = vmov 0.0   ;;  %v2766_v1 = vmov 0.0   ;;  %v2768_v2 = vmov 0.0  }
  0x2a   : > { %p248_p12 = scmp.lt.s32.totalorder %s2315_s11, 63  ;;  %s2762_s5 = scalar_lea.vmem [#allocation5], %s2314_s9  ;;  %v2770_v3 = vmov 0.0   ;;  %v2772_v4 = vmov 0.0   ;;  %v2774_v5 = vmov 0.0   ;;  %v2776_v6 = vmov 0.0  }
  0x2b   : > { %v2778_v7 = vmov 0.0   ;;  %s2780_s26 = smov 0  }
  0x2c   : > { %s3850_s11 = smov (!%p248_p12, %s2315_s11), 63 }
  0x2d   : > { %s250_s22 = scalar_lea.vmem %s3825_s2, %s3850_s11  ;;  %s255_s25 = scalar_lea.vmem %s3826_s3, %s3850_s11 }
  0x2e LB: >> { %s2327_s29 = sshll.u32 %s2627_s26, 10  ;;  %s2328_s7 = sshll.u32 %s2627_s26, 3  ;;  %s2627_s26 = sphi %s2780_s26, %s263_s26   ;;  %v2623_v7 = vphi %v2778_v7, %v3844_v7   ;;  %v2619_v6 = vphi %v2776_v6, %v3843_v6   ;;  %v2615_v5 = vphi %v2774_v5, %v3842_v5   ;;  %v2611_v4 = vphi %v2772_v4, %v3841_v4   ;;  %v2607_v3 = vphi %v2770_v3, %v3840_v3   ;;  %v2603_v2 = vphi %v2768_v2, %v3839_v2   ;;  %v2599_v1 = vphi %v2766_v1, %v3838_v1   ;;  %v2595_v0 = vphi %v2764_v0, %v3837_v0  }
  0x2f   : >> { %s2811_s6 = scalar_lea.vmem %s2744_s20, %s2327_s29 [#allocation2]  ;;  %s1429_s9 = scalar_lea.vmem %s3823_s0, %s2328_s7 }
  0x30   : >> { %v363_v8 = vld [vmem:[%s2811_s6 + $0x2c0] sm:$0xff]  ;;  %s263_s26 = sadd.s32 1, %s2627_s26  }
  0x31   : >> { %v395_v9 = vld [vmem:[%s2811_s6 + $0x3c0] sm:$0xff]  ;;  %v779_v11 = vunpack.c.3.s8 %v363_v8  ;;  %v771_v12 = vunpack.c.2.s8 %v363_v8  ;;  %v763_v17 = vunpack.c.1.s8 %v363_v8  ;;  %v755_v30 = vunpack.c.0.s8 %v363_v8  ;;  %p260_p6 = scmp.ge.s32.totalorder %s263_s26, 8  }
  0x32   : >> { %v299_v10 = vld [vmem:[%s2811_s6 + $0xc0] sm:$0xff]  ;;  %v907_v13 = vunpack.c.3.s8 %v395_v9  ;;  %v899_v18 = vunpack.c.2.s8 %v395_v9  ;;  %v891_v31 = vunpack.c.1.s8 %v395_v9  ;;  %v883_v35 = vunpack.c.0.s8 %v395_v9  ;;  %s2329_s20 = sshll.u32 (%p260_p6), %s2678_s19, 4  ;;  %s2182_s19 = sshll.u32 (%p260_p6), %s2762_s5, 4  ;;  %s2183_s19 = int_to_ptr.vmem [resolvable:$true] %s2182_s19 }
  0x33   : >> { %v523_v14 = vunpack.c.3.s8 %v299_v10  ;;  %v331_v15 = vld [vmem:[%s2811_s6 + $0x1c0] sm:$0xff]  ;;  %v515_v19 = vunpack.c.2.s8 %v299_v10  ;;  %v1291_v20 = vcvt.s32.f32 %v779_v11  ;;  %v1283_v21 = vcvt.s32.f32 %v771_v12  ;;  %s2169_s29 = scalar_lea.sflag (%p260_p6), [#allocation4], %s2740_s8 }
  0x34   : >> { %v651_v16 = vunpack.c.3.s8 %v331_v15  ;;  %v1419_v22 = vcvt.s32.f32 %v907_v13  ;;  %v2818_v24 = vld [vmem:[%s2811_s6 + $0x280] sm:$0xff]  ;;  %v1275_v26 = vcvt.s32.f32 %v763_v17  ;;  %v1411_v27 = vcvt.s32.f32 %v899_v18 }
  0x35   : >> { %v1035_v23 = vcvt.s32.f32 %v523_v14  ;;  %v1027_v28 = vcvt.s32.f32 %v515_v19  ;;  %1481 = vmatpush.msra.mxu2 %v1291_v20  ;;  %v643_v29 = vunpack.c.2.s8 %v331_v15  ;;  %v507_v32 = vunpack.c.1.s8 %v299_v10  ;;  %v2822_v37 = vld [vmem:[%s2811_s6 + $0x380] sm:$0xff] }
  0x36   : >> { %v1163_v25 = vcvt.s32.f32 %v651_v16  ;;  %1501 = vmatpush.msra.mxu3 %v1419_v22  ;;  %v635_v33 = vunpack.c.1.s8 %v331_v15  ;;  %v747_v34 = vunpack.c.3.s8 %v2818_v24  ;;  %v499_v36 = vunpack.c.0.s8 %v299_v10  ;;  %v2825_v38 = vld [vmem:[%s2811_s6 + $0x80] sm:$0xff] }
  0x37   : >> { %1441 = vmatpush.msra.mxu0 %v1035_v23  ;;  %1482 = vmatpush.msra.mxu2 %v1283_v21  ;;  %v1155_v39 = vcvt.s32.f32 %v643_v29  ;;  %v1267_v40 = vcvt.s32.f32 %v755_v30  ;;  %v1403_v41 = vcvt.s32.f32 %v891_v31  ;;  %v1019_v42 = vcvt.s32.f32 %v507_v32  ;;  %v2828_v43 = vld [vmem:[%s2811_s6 + $0x180] sm:$0xff] }
  0x38   : >> { %1461 = vmatpush.msra.mxu1 %v1163_v25  ;;  %1502 = vmatpush.msra.mxu3 %v1411_v27  ;;  %v1147_v44 = vcvt.s32.f32 %v635_v33  ;;  %v1259_v45 = vcvt.s32.f32 %v747_v34  ;;  %v1395_v46 = vcvt.s32.f32 %v883_v35  ;;  %v1011_v47 = vcvt.s32.f32 %v499_v36  ;;  %v2838_v60 = vld [vmem:[%s2811_s6 + $0x240] sm:$0xff] }
  0x39   : >> { %1442 = vmatpush.msra.mxu0 %v1027_v28  ;;  %1483 = vmatpush.msra.mxu2 %v1275_v26  ;;  %v627_v48 = vunpack.c.0.s8 %v331_v15  ;;  %v739_v49 = vunpack.c.2.s8 %v2818_v24  ;;  %v875_v50 = vunpack.c.3.s8 %v2822_v37  ;;  %v491_v51 = vunpack.c.3.s8 %v2825_v38  ;;  %v2849_v17 = vld [vmem:[%s2811_s6 + $0x340] sm:$0xff] }
  0x3a   : >> { %1462 = vmatpush.msra.mxu1 %v1155_v39  ;;  %1503 = vmatpush.msra.mxu3 %v1403_v41  ;;  %v619_v52 = vunpack.c.3.s8 %v2828_v43  ;;  %v731_v53 = vunpack.c.1.s8 %v2818_v24  ;;  %v867_v54 = vunpack.c.2.s8 %v2822_v37  ;;  %v483_v55 = vunpack.c.2.s8 %v2825_v38  ;;  %v2852_v18 = vld [vmem:[%s2811_s6 + $0x40] sm:$0xff] }
  0x3b   : >> { %1443 = vmatpush.msra.mxu0 %v1019_v42  ;;  %1484 = vmatpush.msra.mxu2 %v1267_v40  ;;  %v1139_v56 = vcvt.s32.f32 %v627_v48  ;;  %v1251_v57 = vcvt.s32.f32 %v739_v49  ;;  %v1387_v58 = vcvt.s32.f32 %v875_v50  ;;  %v1003_v59 = vcvt.s32.f32 %v491_v51  ;;  %v2855_v23 = vld [vmem:[%s2811_s6 + $0x140] sm:$0xff] }
  0x3c   : >> { %1463 = vmatpush.msra.mxu1 %v1147_v44  ;;  %1504 = vmatpush.msra.mxu3 %v1395_v46  ;;  %v1131_v61 = vcvt.s32.f32 %v619_v52  ;;  %v1243_v62 = vcvt.s32.f32 %v731_v53  ;;  %v1379_v63 = vcvt.s32.f32 %v867_v54  ;;  %v995_v8 = vcvt.s32.f32 %v483_v55  ;;  %v2866_v40 = vld [vmem:[%s2811_s6 + $0x200] sm:$0xff] }
  0x3d   : >> { %1444 = vmatpush.msra.mxu0 %v1011_v47  ;;  %1485 = vmatpush.msra.mxu2 %v1259_v45  ;;  %v611_v9 = vunpack.c.2.s8 %v2828_v43  ;;  %v723_v10 = vunpack.c.0.s8 %v2818_v24  ;;  %v859_v11 = vunpack.c.1.s8 %v2822_v37  ;;  %v475_v12 = vunpack.c.1.s8 %v2825_v38  ;;  %v2878_v53 = vld [vmem:[%s2811_s6 + $0x300] sm:$0xff] }
  0x3e   : >> { %1464 = vmatpush.msra.mxu1 %v1139_v56  ;;  %1505 = vmatpush.msra.mxu3 %v1387_v58  ;;  %v603_v13 = vunpack.c.1.s8 %v2828_v43  ;;  %v715_v14 = vunpack.c.3.s8 %v2838_v60  ;;  %v851_v15 = vunpack.c.0.s8 %v2822_v37  ;;  %v467_v16 = vunpack.c.0.s8 %v2825_v38  ;;  %v2881_v54 = vld [vmem:[%s2811_s6] sm:$0xff] }
  0x3f   : >> { %1445 = vmatpush.msra.mxu0 %v1003_v59  ;;  %1486 = vmatpush.msra.mxu2 %v1251_v57  ;;  %v1123_v19 = vcvt.s32.f32 %v611_v9  ;;  %v1235_v20 = vcvt.s32.f32 %v723_v10  ;;  %v1371_v21 = vcvt.s32.f32 %v859_v11  ;;  %v987_v22 = vcvt.s32.f32 %v475_v12  ;;  %v2884_v59 = vld [vmem:[%s2811_s6 + $0x100] sm:$0xff] }
  0x40   : >> { %1465 = vmatpush.msra.mxu1 %v1131_v61  ;;  %1506 = vmatpush.msra.mxu3 %v1379_v63  ;;  %v1115_v24 = vcvt.s32.f32 %v603_v13  ;;  %v1227_v25 = vcvt.s32.f32 %v715_v14  ;;  %v1363_v26 = vcvt.s32.f32 %v851_v15  ;;  %v979_v27 = vcvt.s32.f32 %v467_v16  ;;  %v2898_v16 = vld [vmem:[%s2811_s6 + $0x2c8] sm:$0xff] }
  0x41   : >> { %1446 = vmatpush.msra.mxu0 %v995_v8  ;;  %1487 = vmatpush.msra.mxu2 %v1243_v62  ;;  %v595_v28 = vunpack.c.0.s8 %v2828_v43  ;;  %v707_v29 = vunpack.c.2.s8 %v2838_v60  ;;  %v843_v30 = vunpack.c.3.s8 %v2849_v17  ;;  %v459_v31 = vunpack.c.3.s8 %v2852_v18 }
  0x42   : >> { %1466 = vmatpush.msra.mxu1 %v1123_v19  ;;  %1507 = vmatpush.msra.mxu3 %v1371_v21  ;;  %v587_v32 = vunpack.c.3.s8 %v2855_v23  ;;  %v699_v33 = vunpack.c.1.s8 %v2838_v60  ;;  %v835_v34 = vunpack.c.2.s8 %v2849_v17  ;;  %v451_v35 = vunpack.c.2.s8 %v2852_v18 }
  0x43   : >> { %1447 = vmatpush.msra.mxu0 %v987_v22  ;;  %1488 = vmatpush.msra.mxu2 %v1235_v20  ;;  %v1107_v36 = vcvt.s32.f32 %v595_v28  ;;  %v1219_v37 = vcvt.s32.f32 %v707_v29  ;;  %v1355_v38 = vcvt.s32.f32 %v843_v30  ;;  %v971_v39 = vcvt.s32.f32 %v459_v31 }
  0x44   : >> { %1467 = vmatpush.msra.mxu1 %v1115_v24  ;;  %1508 = vmatpush.msra.mxu3 %v1363_v26  ;;  %v1099_v41 = vcvt.s32.f32 %v587_v32  ;;  %v1211_v42 = vcvt.s32.f32 %v699_v33  ;;  %v1347_v43 = vcvt.s32.f32 %v835_v34  ;;  %v963_v44 = vcvt.s32.f32 %v451_v35  ;;  %v2909_v34 = vld [vmem:[%s2811_s6 + $0x3c8] sm:$0xff] }
  0x45   : >> { %1448 = vmatpush.msra.mxu0 %v979_v27  ;;  %1489 = vmatpush.msra.mxu2 %v1227_v25  ;;  %v579_v45 = vunpack.c.2.s8 %v2855_v23  ;;  %v691_v46 = vunpack.c.0.s8 %v2838_v60  ;;  %v827_v47 = vunpack.c.1.s8 %v2849_v17  ;;  %v443_v48 = vunpack.c.1.s8 %v2852_v18  ;;  %v2912_v35 = vld [vmem:[%s2811_s6 + $0xc8] sm:$0xff] }
  0x46   : >> { %1468 = vmatpush.msra.mxu1 %v1107_v36  ;;  %1509 = vmatpush.msra.mxu3 %v1355_v38  ;;  %v571_v49 = vunpack.c.1.s8 %v2855_v23  ;;  %v683_v50 = vunpack.c.3.s8 %v2866_v40  ;;  %v819_v51 = vunpack.c.0.s8 %v2849_v17  ;;  %v435_v52 = vunpack.c.0.s8 %v2852_v18  ;;  %v1430_v17 = vld [vmem:[%s1429_s9] sm:$0xff]  ;;  %s2509_s9 = scalar_lea.hbm (%p260_p6), %s3827_s4, 128 }
  0x47   : >> { %1449 = vmatpush.msra.mxu0 %v971_v39  ;;  %1490 = vmatpush.msra.mxu2 %v1219_v37  ;;  %v1091_v55 = vcvt.s32.f32 %v579_v45  ;;  %v1203_v56 = vcvt.s32.f32 %v691_v46  ;;  %v1339_v57 = vcvt.s32.f32 %v827_v47  ;;  %v955_v58 = vcvt.s32.f32 %v443_v48  ;;  %1432 = vst [vmem:[#allocation1] ss:$4 sm:$0xff] %v1430_v17 }
  0x48   : >> { %1469 = vmatpush.msra.mxu1 %v1099_v41  ;;  %1510 = vmatpush.msra.mxu3 %v1347_v43  ;;  %v1083_v60 = vcvt.s32.f32 %v571_v49  ;;  %v1195_v61 = vcvt.s32.f32 %v683_v50  ;;  %v1331_v62 = vcvt.s32.f32 %v819_v51  ;;  %v947_v63 = vcvt.s32.f32 %v435_v52 }
  0x49   : >> { %1450 = vmatpush.msra.mxu0 %v963_v44  ;;  %1491 = vmatpush.msra.mxu2 %v1211_v42  ;;  %v563_v8 = vunpack.c.0.s8 %v2855_v23  ;;  %v675_v9 = vunpack.c.2.s8 %v2866_v40  ;;  %v811_v10 = vunpack.c.3.s8 %v2878_v53  ;;  %v427_v11 = vunpack.c.3.s8 %v2881_v54 }
  0x4a   : >> { %1470 = vmatpush.msra.mxu1 %v1091_v55  ;;  %1511 = vmatpush.msra.mxu3 %v1339_v57  ;;  %v555_v12 = vunpack.c.3.s8 %v2884_v59  ;;  %v667_v13 = vunpack.c.1.s8 %v2866_v40  ;;  %v803_v14 = vunpack.c.2.s8 %v2878_v53  ;;  %v419_v15 = vunpack.c.2.s8 %v2881_v54  ;;  %v2926_v57 = vld [vmem:[%s2811_s6 + $0x288] sm:$0xff] }
  0x4b   : >> { %1451 = vmatpush.msra.mxu0 %v955_v58  ;;  %1492 = vmatpush.msra.mxu2 %v1203_v56  ;;  %v1075_v18 = vcvt.s32.f32 %v563_v8  ;;  %v1187_v19 = vcvt.s32.f32 %v675_v9  ;;  %v1323_v20 = vcvt.s32.f32 %v811_v10  ;;  %v939_v21 = vcvt.s32.f32 %v427_v11 }
  0x4c   : >> { %1471 = vmatpush.msra.mxu1 %v1083_v60  ;;  %1512 = vmatpush.msra.mxu3 %v1331_v62  ;;  %v1067_v22 = vcvt.s32.f32 %v555_v12  ;;  %v1179_v23 = vcvt.s32.f32 %v667_v13  ;;  %v1315_v24 = vcvt.s32.f32 %v803_v14  ;;  %v931_v25 = vcvt.s32.f32 %v419_v15  ;;  %v2937_v14 = vld [vmem:[%s2811_s6 + $0x388] sm:$0xff] }
  0x4d   : >> { %1452 = vmatpush.msra.mxu0 %v947_v63  ;;  %1493 = vmatpush.msra.mxu2 %v1195_v61  ;;  %v547_v26 = vunpack.c.2.s8 %v2884_v59  ;;  %v659_v27 = vunpack.c.0.s8 %v2866_v40  ;;  %v795_v28 = vunpack.c.1.s8 %v2878_v53  ;;  %v780_v29 = vunpack.c.3.s8 %v2898_v16  ;;  %v2915_v40 = vld [vmem:[%s2811_s6 + $0x1c8] sm:$0xff] }
  0x4e   : >> { %1472 = vmatpush.msra.mxu1 %v1075_v18  ;;  %1513 = vmatpush.msra.mxu3 %v1323_v20  ;;  %v411_v30 = vunpack.c.1.s8 %v2881_v54  ;;  %v539_v31 = vunpack.c.1.s8 %v2884_v59  ;;  %v787_v32 = vunpack.c.0.s8 %v2878_v53  ;;  %v772_v33 = vunpack.c.2.s8 %v2898_v16  ;;  %v2940_v15 = vld [vmem:[%s2811_s6 + $0x88] sm:$0xff] }
  0x4f   : >> { %1453 = vmatpush.msra.mxu0 %v939_v21  ;;  %1494 = vmatpush.msra.mxu2 %v1187_v19  ;;  %v1059_v36 = vcvt.s32.f32 %v547_v26  ;;  %v1171_v37 = vcvt.s32.f32 %v659_v27  ;;  %v1307_v38 = vcvt.s32.f32 %v795_v28  ;;  %v1292_v39 = vcvt.s32.f32 %v780_v29  ;;  %v2943_v20 = vld [vmem:[%s2811_s6 + $0x188] sm:$0xff] }
  0x50   : >> { %1473 = vmatpush.msra.mxu1 %v1067_v22  ;;  %1514 = vmatpush.msra.mxu3 %v1315_v24  ;;  %v923_v41 = vcvt.s32.f32 %v411_v30  ;;  %v1051_v42 = vcvt.s32.f32 %v539_v31  ;;  %v1299_v43 = vcvt.s32.f32 %v787_v32  ;;  %v1284_v44 = vcvt.s32.f32 %v772_v33 }
  0x51   : >> { %1454 = vmatpush.msra.mxu0 %v931_v25  ;;  %1495 = vmatpush.msra.mxu2 %v1179_v23  ;;  %v908_v45 = vunpack.c.3.s8 %v2909_v34  ;;  %v403_v46 = vunpack.c.0.s8 %v2881_v54  ;;  %v531_v47 = vunpack.c.0.s8 %v2884_v59  ;;  %v524_v48 = vunpack.c.3.s8 %v2912_v35 }
  0x52   : >> { %1474 = vmatpush.msra.mxu1 %v1059_v36  ;;  %1515 = vmatpush.msra.mxu3 %v1307_v38  ;;  %v652_v49 = vunpack.c.3.s8 %v2915_v40  ;;  %v764_v50 = vunpack.c.1.s8 %v2898_v16  ;;  %v900_v51 = vunpack.c.2.s8 %v2909_v34  ;;  %v516_v52 = vunpack.c.2.s8 %v2912_v35 }
  0x53   : >> { %1455 = vmatpush.msra.mxu0 %v923_v41  ;;  %1496 = vmatpush.msra.mxu2 %v1171_v37  ;;  %v1420_v53 = vcvt.s32.f32 %v908_v45  ;;  %v915_v55 = vcvt.s32.f32 %v403_v46  ;;  %v1043_v56 = vcvt.s32.f32 %v531_v47  ;;  %v1036_v54 = vcvt.s32.f32 %v524_v48  ;;  %v2954_v37 = vld [vmem:[%s2811_s6 + $0x248] sm:$0xff] }
  0x54   : >> { %1475 = vmatpush.msra.mxu1 %v1051_v42  ;;  %1516 = vmatpush.msra.mxu3 %v1299_v43  ;;  %v1164_v58 = vcvt.s32.f32 %v652_v49  ;;  %v1276_v59 = vcvt.s32.f32 %v764_v50  ;;  %v1412_v60 = vcvt.s32.f32 %v900_v51  ;;  %v1028_v61 = vcvt.s32.f32 %v516_v52  ;;  %v2965_v50 = vld [vmem:[%s2811_s6 + $0x348] sm:$0xff] }
  0x55   : >> { %1561 = vmatpush.msrb.mxu2 %v1292_v39  ;;  %1456 = vmatpush.msra.mxu0 %v915_v55  ;;  %v644_v62 = vunpack.c.2.s8 %v2915_v40  ;;  %v756_v63 = vunpack.c.0.s8 %v2898_v16  ;;  %v892_v8 = vunpack.c.1.s8 %v2909_v34  ;;  %v508_v9 = vunpack.c.1.s8 %v2912_v35  ;;  %v2968_v51 = vld [vmem:[%s2811_s6 + $0x48] sm:$0xff] }
  0x56   : >> { %1581 = vmatpush.msrb.mxu3 %v1420_v53  ;;  %1476 = vmatpush.msra.mxu1 %v1043_v56  ;;  %v636_v10 = vunpack.c.1.s8 %v2915_v40  ;;  %v748_v11 = vunpack.c.3.s8 %v2926_v57  ;;  %v884_v12 = vunpack.c.0.s8 %v2909_v34  ;;  %v500_v13 = vunpack.c.0.s8 %v2912_v35 }
  0x57   : >> { %1562 = vmatpush.msrb.mxu2 %v1284_v44  ;;  %1521 = vmatpush.msrb.mxu0 %v1036_v54  ;;  %v1156_v16 = vcvt.s32.f32 %v644_v62  ;;  %v1268_v17 = vcvt.s32.f32 %v756_v63  ;;  %v1404_v18 = vcvt.s32.f32 %v892_v8  ;;  %v1020_v19 = vcvt.s32.f32 %v508_v9  ;;  %v2971_v54 = vld [vmem:[%s2811_s6 + $0x148] sm:$0xff] }
  0x58   : >> { %1541 = vmatpush.msrb.mxu1 %v1164_v58  ;;  %1582 = vmatpush.msrb.mxu3 %v1412_v60  ;;  %v1148_v21 = vcvt.s32.f32 %v636_v10  ;;  %v1260_v22 = vcvt.s32.f32 %v748_v11  ;;  %v1396_v23 = vcvt.s32.f32 %v884_v12  ;;  %v1012_v24 = vcvt.s32.f32 %v500_v13 }
  0x59   : >> { %1563 = vmatpush.msrb.mxu2 %v1276_v59  ;;  %1522 = vmatpush.msrb.mxu0 %v1028_v61  ;;  %v628_v25 = vunpack.c.0.s8 %v2915_v40  ;;  %v740_v26 = vunpack.c.2.s8 %v2926_v57  ;;  %v876_v27 = vunpack.c.3.s8 %v2937_v14  ;;  %v492_v28 = vunpack.c.3.s8 %v2940_v15 }
  0x5a   : >> { %1542 = vmatpush.msrb.mxu1 %v1156_v16  ;;  %1583 = vmatpush.msrb.mxu3 %v1404_v18  ;;  %v620_v29 = vunpack.c.3.s8 %v2943_v20  ;;  %v732_v30 = vunpack.c.1.s8 %v2926_v57  ;;  %v868_v31 = vunpack.c.2.s8 %v2937_v14  ;;  %v484_v32 = vunpack.c.2.s8 %v2940_v15 }
  0x5b   : >> { %1564 = vmatpush.msrb.mxu2 %v1268_v17  ;;  %1523 = vmatpush.msrb.mxu0 %v1020_v19  ;;  %v1140_v33 = vcvt.s32.f32 %v628_v25  ;;  %v1252_v34 = vcvt.s32.f32 %v740_v26  ;;  %v1388_v35 = vcvt.s32.f32 %v876_v27  ;;  %v1004_v36 = vcvt.s32.f32 %v492_v28  ;;  %v2982_v17 = vld [vmem:[%s2811_s6 + $0x208] sm:$0xff] }
  0x5c   : >> { %1543 = vmatpush.msrb.mxu1 %v1148_v21  ;;  %1584 = vmatpush.msrb.mxu3 %v1396_v23  ;;  %v1132_v38 = vcvt.s32.f32 %v620_v29  ;;  %v1244_v39 = vcvt.s32.f32 %v732_v30  ;;  %v1380_v40 = vcvt.s32.f32 %v868_v31  ;;  %v996_v41 = vcvt.s32.f32 %v484_v32  ;;  %v2993_v30 = vld [vmem:[%s2811_s6 + $0x308] sm:$0xff] }
  0x5d   : >> { %1565 = vmatpush.msrb.mxu2 %v1260_v22  ;;  %1524 = vmatpush.msrb.mxu0 %v1012_v24  ;;  %v612_v42 = vunpack.c.2.s8 %v2943_v20  ;;  %v724_v43 = vunpack.c.0.s8 %v2926_v57  ;;  %v860_v44 = vunpack.c.1.s8 %v2937_v14  ;;  %v476_v45 = vunpack.c.1.s8 %v2940_v15  ;;  %v2996_v31 = vld [vmem:[%s2811_s6 + $0x8] sm:$0xff] }
  0x5e   : >> { %1544 = vmatpush.msrb.mxu1 %v1140_v33  ;;  %1585 = vmatpush.msrb.mxu3 %v1388_v35  ;;  %v604_v46 = vunpack.c.1.s8 %v2943_v20  ;;  %v716_v47 = vunpack.c.3.s8 %v2954_v37  ;;  %v852_v48 = vunpack.c.0.s8 %v2937_v14  ;;  %v468_v49 = vunpack.c.0.s8 %v2940_v15 }
  0x5f   : >> { %1566 = vmatpush.msrb.mxu2 %v1252_v34  ;;  %1525 = vmatpush.msrb.mxu0 %v1004_v36  ;;  %v1124_v52 = vcvt.s32.f32 %v612_v42  ;;  %v1236_v53 = vcvt.s32.f32 %v724_v43  ;;  %v1372_v55 = vcvt.s32.f32 %v860_v44  ;;  %v988_v56 = vcvt.s32.f32 %v476_v45  ;;  %v2999_v36 = vld [vmem:[%s2811_s6 + $0x108] sm:$0xff] }
  0x60   : >> { %1545 = vmatpush.msrb.mxu1 %v1132_v38  ;;  %1586 = vmatpush.msrb.mxu3 %v1380_v40  ;;  %v1116_v57 = vcvt.s32.f32 %v604_v46  ;;  %v1228_v58 = vcvt.s32.f32 %v716_v47  ;;  %v1364_v59 = vcvt.s32.f32 %v852_v48  ;;  %v980_v60 = vcvt.s32.f32 %v468_v49  ;;  %v3010_v49 = vld [vmem:[%s2811_s6 + $0x2d0] sm:$0xff] }
  0x61   : >> { %1567 = vmatpush.msrb.mxu2 %v1244_v39  ;;  %1526 = vmatpush.msrb.mxu0 %v996_v41  ;;  %v596_v61 = vunpack.c.0.s8 %v2943_v20  ;;  %v708_v62 = vunpack.c.2.s8 %v2954_v37  ;;  %v844_v63 = vunpack.c.3.s8 %v2965_v50  ;;  %v460_v8 = vunpack.c.3.s8 %v2968_v51 }
  0x62   : >> { %1546 = vmatpush.msrb.mxu1 %v1124_v52  ;;  %1587 = vmatpush.msrb.mxu3 %v1372_v55  ;;  %v588_v9 = vunpack.c.3.s8 %v2971_v54  ;;  %v700_v10 = vunpack.c.1.s8 %v2954_v37  ;;  %v836_v11 = vunpack.c.2.s8 %v2965_v50  ;;  %v452_v12 = vunpack.c.2.s8 %v2968_v51 }
  0x63   : >> { %1568 = vmatpush.msrb.mxu2 %v1236_v53  ;;  %1527 = vmatpush.msrb.mxu0 %v988_v56  ;;  %v1108_v13 = vcvt.s32.f32 %v596_v61  ;;  %v1220_v14 = vcvt.s32.f32 %v708_v62  ;;  %v1356_v15 = vcvt.s32.f32 %v844_v63  ;;  %v972_v16 = vcvt.s32.f32 %v460_v8 }
  0x64   : >> { %1547 = vmatpush.msrb.mxu1 %v1116_v57  ;;  %1588 = vmatpush.msrb.mxu3 %v1364_v59  ;;  %v1100_v18 = vcvt.s32.f32 %v588_v9  ;;  %v1212_v19 = vcvt.s32.f32 %v700_v10  ;;  %v1348_v20 = vcvt.s32.f32 %v836_v11  ;;  %v964_v21 = vcvt.s32.f32 %v452_v12  ;;  %v3021_v10 = vld [vmem:[%s2811_s6 + $0x3d0] sm:$0xff] }
  0x65   : >> { %1569 = vmatpush.msrb.mxu2 %v1228_v58  ;;  %1528 = vmatpush.msrb.mxu0 %v980_v60  ;;  %v580_v22 = vunpack.c.2.s8 %v2971_v54  ;;  %v692_v23 = vunpack.c.0.s8 %v2954_v37  ;;  %v828_v24 = vunpack.c.1.s8 %v2965_v50  ;;  %v444_v25 = vunpack.c.1.s8 %v2968_v51  ;;  %v3024_v11 = vld [vmem:[%s2811_s6 + $0xd0] sm:$0xff] }
  0x66   : >> { %1548 = vmatpush.msrb.mxu1 %v1108_v13  ;;  %1589 = vmatpush.msrb.mxu3 %v1356_v15  ;;  %v572_v26 = vunpack.c.1.s8 %v2971_v54  ;;  %v684_v27 = vunpack.c.3.s8 %v2982_v17  ;;  %v820_v28 = vunpack.c.0.s8 %v2965_v50  ;;  %v436_v29 = vunpack.c.0.s8 %v2968_v51  ;;  %v3027_v15 = vld [vmem:[%s2811_s6 + $0x1d0] sm:$0xff] }
  0x67   : >> { %1570 = vmatpush.msrb.mxu2 %v1220_v14  ;;  %1529 = vmatpush.msrb.mxu0 %v972_v16  ;;  %v1092_v32 = vcvt.s32.f32 %v580_v22  ;;  %v1204_v33 = vcvt.s32.f32 %v692_v23  ;;  %v1340_v34 = vcvt.s32.f32 %v828_v24  ;;  %v956_v35 = vcvt.s32.f32 %v444_v25  ;;  %v3029_v16 = vld.sshfl [vmem:[#allocation1 + $0x10] sm:$0xff pattern:$0x73625140] }
  0x68   : >> { %1549 = vmatpush.msrb.mxu1 %v1100_v18  ;;  %1590 = vmatpush.msrb.mxu3 %v1348_v20  ;;  %v1084_v37 = vcvt.s32.f32 %v572_v26  ;;  %v1196_v38 = vcvt.s32.f32 %v684_v27  ;;  %v1332_v39 = vcvt.s32.f32 %v820_v28  ;;  %v948_v40 = vcvt.s32.f32 %v436_v29  ;;  %v3039_v29 = vld.sshfl [vmem:[#allocation1 + $0x18] sm:$0xff pattern:$0x73625140] }
  0x69   : >> { %1571 = vmatpush.msrb.mxu2 %v1212_v19  ;;  %1530 = vmatpush.msrb.mxu0 %v964_v21  ;;  %v564_v41 = vunpack.c.0.s8 %v2971_v54  ;;  %v676_v42 = vunpack.c.2.s8 %v2982_v17  ;;  %v812_v43 = vunpack.c.3.s8 %v2993_v30  ;;  %v428_v44 = vunpack.c.3.s8 %v2996_v31 }
  0x6a   : >> { %1550 = vmatpush.msrb.mxu1 %v1092_v32  ;;  %1591 = vmatpush.msrb.mxu3 %v1340_v34  ;;  %v556_v45 = vunpack.c.3.s8 %v2999_v36  ;;  %v668_v46 = vunpack.c.1.s8 %v2982_v17  ;;  %v804_v47 = vunpack.c.2.s8 %v2993_v30  ;;  %v420_v48 = vunpack.c.2.s8 %v2996_v31  ;;  %v3043_v34 = vld [vmem:[%s2811_s6 + $0x290] sm:$0xff] }
  0x6b   : >> { %1572 = vmatpush.msrb.mxu2 %v1204_v33  ;;  %1531 = vmatpush.msrb.mxu0 %v956_v35  ;;  %v1076_v50 = vcvt.s32.f32 %v564_v41  ;;  %v1188_v51 = vcvt.s32.f32 %v676_v42  ;;  %v1324_v52 = vcvt.s32.f32 %v812_v43  ;;  %v940_v53 = vcvt.s32.f32 %v428_v44 }
  0x6c   : >> { %1551 = vmatpush.msrb.mxu1 %v1084_v37  ;;  %1592 = vmatpush.msrb.mxu3 %v1332_v39  ;;  %v1068_v55 = vcvt.s32.f32 %v556_v45  ;;  %v1180_v56 = vcvt.s32.f32 %v668_v46  ;;  %v1316_v54 = vcvt.s32.f32 %v804_v47  ;;  %v932_v57 = vcvt.s32.f32 %v420_v48  ;;  %v3047_v39 = vld.sshfl [vmem:[#allocation1 + $0x8] sm:$0xff pattern:$0x73625140]  ;;  %v3058_v48 = vld [vmem:[%s2811_s6 + $0x390] sm:$0xff] }
  0x6d   : >> { %1573 = vmatpush.msrb.mxu2 %v1196_v38  ;;  %1532 = vmatpush.msrb.mxu0 %v948_v40  ;;  %v548_v58 = vunpack.c.2.s8 %v2999_v36  ;;  %v660_v59 = vunpack.c.0.s8 %v2982_v17  ;;  %v796_v60 = vunpack.c.1.s8 %v2993_v30  ;;  %v781_v61 = vunpack.c.3.s8 %v3010_v49  ;;  %v3045_v38 = vld.sshfl [vmem:[#allocation1] sm:$0xff pattern:$0x73625140] }
  0x6e   : >> { %1552 = vmatpush.msrb.mxu1 %v1076_v50  ;;  %1593 = vmatpush.msrb.mxu3 %v1324_v52  ;;  %v412_v62 = vunpack.c.1.s8 %v2996_v31  ;;  %v540_v63 = vunpack.c.1.s8 %v2999_v36  ;;  %v788_v8 = vunpack.c.0.s8 %v2993_v30  ;;  %v773_v9 = vunpack.c.2.s8 %v3010_v49  ;;  %v3061_v50 = vld [vmem:[%s2811_s6 + $0x90] sm:$0xff] }
  0x6f   : >> { %1574 = vmatpush.msrb.mxu2 %v1188_v51  ;;  %1533 = vmatpush.msrb.mxu0 %v940_v53  ;;  %v1060_v12 = vcvt.s32.f32 %v548_v58  ;;  %v1172_v13 = vcvt.s32.f32 %v660_v59  ;;  %v1308_v14 = vcvt.s32.f32 %v796_v60  ;;  %v1293_v17 = vcvt.s32.f32 %v781_v61 }
  0x70   : >> { %1553 = vmatpush.msrb.mxu1 %v1068_v55  ;;  %1594 = vmatpush.msrb.mxu3 %v1316_v54  ;;  %v924_v18 = vcvt.s32.f32 %v412_v62  ;;  %v1052_v19 = vcvt.s32.f32 %v540_v63  ;;  %v1300_v20 = vcvt.s32.f32 %v788_v8  ;;  %v909_v21 = vunpack.c.3.s8 %v3021_v10  ;;  %v3065_v55 = vld [vmem:[%s2811_s6 + $0x190] sm:$0xff] }
  0x71   : >> { %1575 = vmatpush.msrb.mxu2 %v1180_v56  ;;  %1534 = vmatpush.msrb.mxu0 %v932_v57  ;;  %v404_v22 = vunpack.c.0.s8 %v2996_v31  ;;  %v532_v23 = vunpack.c.0.s8 %v2999_v36  ;;  %v525_v24 = vunpack.c.3.s8 %v3024_v11  ;;  %v1285_v25 = vcvt.s32.f32 %v773_v9 }
  0x72   : >> { %1554 = vmatpush.msrb.mxu1 %v1060_v12  ;;  %1595 = vmatpush.msrb.mxu3 %v1308_v14  ;;  %v653_v26 = vunpack.c.3.s8 %v3027_v15  ;;  %v765_v27 = vunpack.c.1.s8 %v3010_v49  ;;  %v901_v28 = vunpack.c.2.s8 %v3021_v10  ;;  %v1421_v30 = vcvt.s32.f32 %v909_v21 }
  0x73   : >> { %1576 = vmatpush.msrb.mxu2 %v1172_v13  ;;  %1535 = vmatpush.msrb.mxu0 %v924_v18  ;;  %v916_v31 = vcvt.s32.f32 %v404_v22  ;;  %v1044_v32 = vcvt.s32.f32 %v532_v23  ;;  %v517_v33 = vunpack.c.2.s8 %v3024_v11  ;;  %v1037_v35 = vcvt.s32.f32 %v525_v24 }
  0x74   : >> { %1497 = vmatmul.f32.vlgmr.msra.gmra.mxu2 %v3029_v16  ;;  %1555 = vmatpush.msrb.mxu1 %v1052_v19  ;;  %v1165_v36 = vcvt.s32.f32 %v653_v26  ;;  %v1277_v37 = vcvt.s32.f32 %v765_v27  ;;  %v645_v40 = vunpack.c.2.s8 %v3027_v15  ;;  %v757_v41 = vunpack.c.0.s8 %v3010_v49 }
  0x75   : >> { %1641 = vmatpush.msra.mxu2 %v1293_v17  ;;  %1596 = vmatpush.msrb.mxu3 %v1300_v20  ;;  %v893_v42 = vunpack.c.1.s8 %v3021_v10  ;;  %v509_v43 = vunpack.c.1.s8 %v3024_v11  ;;  %v1413_v44 = vcvt.s32.f32 %v901_v28  ;;  %v637_v45 = vunpack.c.1.s8 %v3027_v15 }
  0x76   : >> { %1536 = vmatpush.msrb.mxu0 %v916_v31  ;;  %1517 = vmatmul.f32.vlgmr.msra.gmra.mxu3 %v3039_v29  ;;  %v749_v46 = vunpack.c.3.s8 %v3043_v34  ;;  %v885_v47 = vunpack.c.0.s8 %v3021_v10  ;;  %v1029_v49 = vcvt.s32.f32 %v517_v33  ;;  %v1157_v51 = vcvt.s32.f32 %v645_v40  ;;  %v3091_v31 = vld [vmem:[%s2811_s6 + $0x50] sm:$0xff] }
  0x77   : >> { %1642 = vmatpush.msra.mxu2 %v1285_v25  ;;  %1661 = vmatpush.msra.mxu3 %v1421_v30  ;;  %v1269_v52 = vcvt.s32.f32 %v757_v41  ;;  %v501_v53 = vunpack.c.0.s8 %v3024_v11  ;;  %v1405_v56 = vcvt.s32.f32 %v893_v42  ;;  %v1021_v54 = vcvt.s32.f32 %v509_v43  ;;  %v3088_v30 = vld [vmem:[%s2811_s6 + $0x350] sm:$0xff] }
  0x78   : >> { %1556 = vmatpush.msrb.mxu1 %v1044_v32  ;;  %1457 = vmatmul.f32.vlgmr.msra.gmra.mxu0 %v3045_v38  ;;  %v1149_v57 = vcvt.s32.f32 %v637_v45  ;;  %v1261_v58 = vcvt.s32.f32 %v749_v46  ;;  %v629_v59 = vunpack.c.0.s8 %v3027_v15  ;;  %v741_v60 = vunpack.c.2.s8 %v3043_v34  ;;  %v3078_v15 = vld [vmem:[%s2811_s6 + $0x250] sm:$0xff] }
  0x79   : >> { %1477 = vmatmul.f32.vlgmr.msra.gmra.mxu1 %v3047_v39  ;;  %1601 = vmatpush.msra.mxu0 %v1037_v35  ;;  %v877_v61 = vunpack.c.3.s8 %v3058_v48  ;;  %v493_v62 = vunpack.c.3.s8 %v3061_v50  ;;  %v1397_v63 = vcvt.s32.f32 %v885_v47  ;;  %v621_v8 = vunpack.c.3.s8 %v3065_v55 }
  0x7a   : >> { %1621 = vmatpush.msra.mxu1 %v1165_v36  ;;  %1643 = vmatpush.msra.mxu2 %v1277_v37  ;;  %v733_v9 = vunpack.c.1.s8 %v3043_v34  ;;  %v869_v10 = vunpack.c.2.s8 %v3058_v48  ;;  %v1013_v11 = vcvt.s32.f32 %v501_v53  ;;  %v1141_v12 = vcvt.s32.f32 %v629_v59  ;;  %v3095_v36 = vld [vmem:[%s2811_s6 + $0x150] sm:$0xff] }
  0x7b   : >> { %1662 = vmatpush.msra.mxu3 %v1413_v44  ;;  %1602 = vmatpush.msra.mxu0 %v1029_v49  ;;  %v1253_v13 = vcvt.s32.f32 %v741_v60  ;;  %v485_v14 = vunpack.c.2.s8 %v3061_v50  ;;  %v1389_v17 = vcvt.s32.f32 %v877_v61  ;;  %v1005_v18 = vcvt.s32.f32 %v493_v62 }
  0x7c   : >> { %1622 = vmatpush.msra.mxu1 %v1157_v51  ;;  %1644 = vmatpush.msra.mxu2 %v1269_v52  ;;  %v1133_v19 = vcvt.s32.f32 %v621_v8  ;;  %v1245_v20 = vcvt.s32.f32 %v733_v9  ;;  %v613_v21 = vunpack.c.2.s8 %v3065_v55  ;;  %v725_v22 = vunpack.c.0.s8 %v3043_v34 }
  0x7d   : >> { %1663 = vmatpush.msra.mxu3 %v1405_v56  ;;  %1603 = vmatpush.msra.mxu0 %v1021_v54  ;;  %v861_v23 = vunpack.c.1.s8 %v3058_v48  ;;  %v477_v24 = vunpack.c.1.s8 %v3061_v50  ;;  %v1381_v25 = vcvt.s32.f32 %v869_v10  ;;  %v605_v26 = vunpack.c.1.s8 %v3065_v55  ;;  %v3106_v56 = vld [vmem:[%s2811_s6 + $0x210] sm:$0xff] }
  0x7e   : >> { %1623 = vmatpush.msra.mxu1 %v1149_v57  ;;  %1645 = vmatpush.msra.mxu2 %v1261_v58  ;;  %v717_v27 = vunpack.c.3.s8 %v3078_v15  ;;  %v853_v28 = vunpack.c.0.s8 %v3058_v48  ;;  %v997_v32 = vcvt.s32.f32 %v485_v14  ;;  %v1125_v33 = vcvt.s32.f32 %v613_v21 }
  0x7f   : >> { %1664 = vmatpush.msra.mxu3 %v1397_v63  ;;  %1604 = vmatpush.msra.mxu0 %v1013_v11  ;;  %v1237_v34 = vcvt.s32.f32 %v725_v22  ;;  %v469_v35 = vunpack.c.0.s8 %v3061_v50  ;;  %v1373_v37 = vcvt.s32.f32 %v861_v23  ;;  %v989_v40 = vcvt.s32.f32 %v477_v24 }
  0x80   : >> { %1624 = vmatpush.msra.mxu1 %v1141_v12  ;;  %1646 = vmatpush.msra.mxu2 %v1253_v13  ;;  %v1117_v41 = vcvt.s32.f32 %v605_v26  ;;  %v1229_v42 = vcvt.s32.f32 %v717_v27  ;;  %v597_v43 = vunpack.c.0.s8 %v3065_v55  ;;  %v709_v44 = vunpack.c.2.s8 %v3078_v15  ;;  %v3116_v12 = vld [vmem:[%s2811_s6 + $0x310] sm:$0xff] }
  0x81   : >> { %1665 = vmatpush.msra.mxu3 %v1389_v17  ;;  %1605 = vmatpush.msra.mxu0 %v1005_v18  ;;  %v845_v45 = vunpack.c.3.s8 %v3088_v30  ;;  %v461_v46 = vunpack.c.3.s8 %v3091_v31  ;;  %v1365_v47 = vcvt.s32.f32 %v853_v28  ;;  %v589_v48 = vunpack.c.3.s8 %v3095_v36  ;;  %v3119_v13 = vld [vmem:[%s2811_s6 + $0x10] sm:$0xff] }
  0x82   : >> { %1625 = vmatpush.msra.mxu1 %v1133_v19  ;;  %1647 = vmatpush.msra.mxu2 %v1245_v20  ;;  %v701_v50 = vunpack.c.1.s8 %v3078_v15  ;;  %v837_v49 = vunpack.c.2.s8 %v3088_v30  ;;  %v981_v51 = vcvt.s32.f32 %v469_v35  ;;  %v1109_v52 = vcvt.s32.f32 %v597_v43  ;;  %v3123_v19 = vld [vmem:[%s2811_s6 + $0x110] sm:$0xff] }
  0x83   : >> { %1666 = vmatpush.msra.mxu3 %v1381_v25  ;;  %1606 = vmatpush.msra.mxu0 %v997_v32  ;;  %v1221_v53 = vcvt.s32.f32 %v709_v44  ;;  %v453_v55 = vunpack.c.2.s8 %v3091_v31  ;;  %v1357_v54 = vcvt.s32.f32 %v845_v45  ;;  %v973_v57 = vcvt.s32.f32 %v461_v46 }
  0x84   : >> { %1626 = vmatpush.msra.mxu1 %v1125_v33  ;;  %1648 = vmatpush.msra.mxu2 %v1237_v34  ;;  %v1101_v58 = vcvt.s32.f32 %v589_v48  ;;  %v1213_v59 = vcvt.s32.f32 %v701_v50  ;;  %v581_v60 = vunpack.c.2.s8 %v3095_v36  ;;  %v693_v61 = vunpack.c.0.s8 %v3078_v15 }
  0x85   : >> { %1667 = vmatpush.msra.mxu3 %v1373_v37  ;;  %1607 = vmatpush.msra.mxu0 %v989_v40  ;;  %v829_v62 = vunpack.c.1.s8 %v3088_v30  ;;  %v445_v63 = vunpack.c.1.s8 %v3091_v31  ;;  %v1349_v8 = vcvt.s32.f32 %v837_v49  ;;  %v573_v9 = vunpack.c.1.s8 %v3095_v36 }
  0x86   : >> { %1627 = vmatpush.msra.mxu1 %v1117_v41  ;;  %1649 = vmatpush.msra.mxu2 %v1229_v42  ;;  %v685_v10 = vunpack.c.3.s8 %v3106_v56  ;;  %v821_v11 = vunpack.c.0.s8 %v3088_v30  ;;  %v965_v14 = vcvt.s32.f32 %v453_v55  ;;  %v1093_v15 = vcvt.s32.f32 %v581_v60 }
  0x87   : >> { %1668 = vmatpush.msra.mxu3 %v1365_v47  ;;  %1608 = vmatpush.msra.mxu0 %v981_v51  ;;  %v1205_v17 = vcvt.s32.f32 %v693_v61  ;;  %v437_v18 = vunpack.c.0.s8 %v3091_v31  ;;  %v1341_v20 = vcvt.s32.f32 %v829_v62  ;;  %v957_v21 = vcvt.s32.f32 %v445_v63  ;;  %v3143_v51 = vld [vmem:[%s2811_s6 + $0x3d8] sm:$0xff] }
  0x88   : >> { %1628 = vmatpush.msra.mxu1 %v1109_v52  ;;  %1650 = vmatpush.msra.mxu2 %v1221_v53  ;;  %v1085_v22 = vcvt.s32.f32 %v573_v9  ;;  %v1197_v23 = vcvt.s32.f32 %v685_v10  ;;  %v565_v24 = vunpack.c.0.s8 %v3095_v36  ;;  %v677_v25 = vunpack.c.2.s8 %v3106_v56  ;;  %v3134_v36 = vld [vmem:[%s2811_s6 + $0x2d8] sm:$0xff] }
  0x89   : >> { %1669 = vmatpush.msra.mxu3 %v1357_v54  ;;  %1609 = vmatpush.msra.mxu0 %v973_v57  ;;  %v813_v26 = vunpack.c.3.s8 %v3116_v12  ;;  %v429_v27 = vunpack.c.3.s8 %v3119_v13  ;;  %v1333_v28 = vcvt.s32.f32 %v821_v11  ;;  %v557_v30 = vunpack.c.3.s8 %v3123_v19 }
  0x8a   : >> { %1629 = vmatpush.msra.mxu1 %v1101_v58  ;;  %1651 = vmatpush.msra.mxu2 %v1213_v59  ;;  %v669_v31 = vunpack.c.1.s8 %v3106_v56  ;;  %v805_v32 = vunpack.c.2.s8 %v3116_v12  ;;  %v949_v33 = vcvt.s32.f32 %v437_v18  ;;  %v1077_v34 = vcvt.s32.f32 %v565_v24  ;;  %v3148_v58 = vld [vmem:[%s2811_s6 + $0xd8] sm:$0xff] }
  0x8b   : >> { %1670 = vmatpush.msra.mxu3 %v1349_v8  ;;  %1610 = vmatpush.msra.mxu0 %v965_v14  ;;  %v421_v35 = vunpack.c.2.s8 %v3119_v13  ;;  %v1189_v37 = vcvt.s32.f32 %v677_v25  ;;  %v1325_v40 = vcvt.s32.f32 %v813_v26  ;;  %v941_v41 = vcvt.s32.f32 %v429_v27  ;;  %v3151_v59 = vld [vmem:[%s2811_s6 + $0x1d8] sm:$0xff] }
  0x8c   : >> { %1630 = vmatpush.msra.mxu1 %v1093_v15  ;;  %1652 = vmatpush.msra.mxu2 %v1205_v17  ;;  %v1069_v42 = vcvt.s32.f32 %v557_v30  ;;  %v1181_v43 = vcvt.s32.f32 %v669_v31  ;;  %v549_v44 = vunpack.c.2.s8 %v3123_v19  ;;  %v661_v45 = vunpack.c.0.s8 %v3106_v56  ;;  %v3171_v30 = vld [vmem:[%s2811_s6 + $0x398] sm:$0xff] }
  0x8d   : >> { %1671 = vmatpush.msra.mxu3 %v1341_v20  ;;  %1611 = vmatpush.msra.mxu0 %v957_v21  ;;  %v797_v46 = vunpack.c.1.s8 %v3116_v12  ;;  %v1317_v47 = vcvt.s32.f32 %v805_v32  ;;  %v782_v48 = vunpack.c.3.s8 %v3134_v36  ;;  %v413_v50 = vunpack.c.1.s8 %v3119_v13 }
  0x8e   : >> { %1631 = vmatpush.msra.mxu1 %v1085_v22  ;;  %1653 = vmatpush.msra.mxu2 %v1197_v23  ;;  %v541_v49 = vunpack.c.1.s8 %v3123_v19  ;;  %v933_v52 = vcvt.s32.f32 %v421_v35  ;;  %v1061_v53 = vcvt.s32.f32 %v549_v44  ;;  %v789_v55 = vunpack.c.0.s8 %v3116_v12  ;;  %v3164_v22 = vld [vmem:[%s2811_s6 + $0x298] sm:$0xff] }
  0x8f   : >> { %1672 = vmatpush.msra.mxu3 %v1333_v28  ;;  %1612 = vmatpush.msra.mxu0 %v949_v33  ;;  %v1173_v56 = vcvt.s32.f32 %v661_v45  ;;  %v1309_v54 = vcvt.s32.f32 %v797_v46  ;;  %v774_v57 = vunpack.c.2.s8 %v3134_v36  ;;  %v925_v60 = vcvt.s32.f32 %v413_v50  ;;  %v3177_v35 = vld [vmem:[%s2811_s6 + $0x98] sm:$0xff] }
  0x90   : >> { %1632 = vmatpush.msra.mxu1 %v1077_v34  ;;  %1654 = vmatpush.msra.mxu2 %v1189_v37  ;;  %v910_v61 = vunpack.c.3.s8 %v3143_v51  ;;  %v405_v62 = vunpack.c.0.s8 %v3119_v13  ;;  %v533_v63 = vunpack.c.0.s8 %v3123_v19  ;;  %v1294_v8 = vcvt.s32.f32 %v782_v48 }
  0x91   : >> { %1673 = vmatpush.msra.mxu3 %v1325_v40  ;;  %1613 = vmatpush.msra.mxu0 %v941_v41  ;;  %v1053_v9 = vcvt.s32.f32 %v541_v49  ;;  %v1301_v10 = vcvt.s32.f32 %v789_v55  ;;  %v526_v12 = vunpack.c.3.s8 %v3148_v58  ;;  %v654_v14 = vunpack.c.3.s8 %v3151_v59 }
  0x92   : >> { %1633 = vmatpush.msra.mxu1 %v1069_v42  ;;  %1655 = vmatpush.msra.mxu2 %v1181_v43  ;;  %v917_v11 = vcvt.s32.f32 %v405_v62  ;;  %v1286_v15 = vcvt.s32.f32 %v774_v57  ;;  %v766_v13 = vunpack.c.1.s8 %v3134_v36  ;;  %v902_v17 = vunpack.c.2.s8 %v3143_v51 }
  0x93   : >> { %1674 = vmatpush.msra.mxu3 %v1317_v47  ;;  %1614 = vmatpush.msra.mxu0 %v933_v52  ;;  %v1422_v18 = vcvt.s32.f32 %v910_v61  ;;  %v1045_v19 = vcvt.s32.f32 %v533_v63  ;;  %v518_v20 = vunpack.c.2.s8 %v3148_v58  ;;  %v646_v21 = vunpack.c.2.s8 %v3151_v59 }
  0x94   : >> { %1634 = vmatpush.msra.mxu1 %v1061_v53  ;;  %1656 = vmatpush.msra.mxu2 %v1173_v56  ;;  %v758_v23 = vunpack.c.0.s8 %v3134_v36  ;;  %v894_v24 = vunpack.c.1.s8 %v3143_v51  ;;  %v1038_v25 = vcvt.s32.f32 %v526_v12  ;;  %v1166_v26 = vcvt.s32.f32 %v654_v14  ;;  %v3180_v36 = vld [vmem:[%s2811_s6 + $0x198] sm:$0xff] }
  0x95   : >> { %1675 = vmatpush.msra.mxu3 %v1309_v54  ;;  %1577 = vmatmul.f32.vlgmr.msrb.gmra.mxu2 %v3029_v16  ;;  %v510_v27 = vunpack.c.1.s8 %v3148_v58  ;;  %v638_v28 = vunpack.c.1.s8 %v3151_v59  ;;  %v1278_v31 = vcvt.s32.f32 %v766_v13  ;;  %v1414_v32 = vcvt.s32.f32 %v902_v17  ;;  %v3202_v12 = vld [vmem:[%s2811_s6 + $0x358] sm:$0xff] }
  0x96   : >> { %1615 = vmatpush.msra.mxu0 %v925_v60  ;;  %1721 = vmatpush.msrb.mxu2 %v1294_v8  ;;  %v750_v33 = vunpack.c.3.s8 %v3164_v22  ;;  %v886_v34 = vunpack.c.0.s8 %v3143_v51  ;;  %v1030_v37 = vcvt.s32.f32 %v518_v20  ;;  %v1158_v40 = vcvt.s32.f32 %v646_v21 }
  0x97   : >> { %1635 = vmatpush.msra.mxu1 %v1053_v9  ;;  %1676 = vmatpush.msra.mxu3 %v1301_v10  ;;  %v502_v41 = vunpack.c.0.s8 %v3148_v58  ;;  %v630_v42 = vunpack.c.0.s8 %v3151_v59  ;;  %v1270_v43 = vcvt.s32.f32 %v758_v23  ;;  %v1406_v44 = vcvt.s32.f32 %v894_v24  ;;  %v3195_v59 = vld [vmem:[%s2811_s6 + $0x258] sm:$0xff] }
  0x98   : >> { %1616 = vmatpush.msra.mxu0 %v917_v11  ;;  %1597 = vmatmul.f32.vlgmr.msrb.gmra.mxu3 %v3039_v29  ;;  %v742_v45 = vunpack.c.2.s8 %v3164_v22  ;;  %v878_v46 = vunpack.c.3.s8 %v3171_v30  ;;  %v1022_v47 = vcvt.s32.f32 %v510_v27  ;;  %v1150_v48 = vcvt.s32.f32 %v638_v28 }
  0x99   : >> { %1722 = vmatpush.msrb.mxu2 %v1286_v15  ;;  %1741 = vmatpush.msrb.mxu3 %v1422_v18  ;;  %v494_v50 = vunpack.c.3.s8 %v3177_v35  ;;  %v622_v49 = vunpack.c.3.s8 %v3180_v36  ;;  %v1262_v51 = vcvt.s32.f32 %v750_v33  ;;  %v1398_v52 = vcvt.s32.f32 %v886_v34  ;;  %v3207_v18 = vld [vmem:[%s2811_s6 + $0x58] sm:$0xff] }
  0x9a   : >> { %1636 = vmatpush.msra.mxu1 %v1045_v19  ;;  %1537 = vmatmul.f32.vlgmr.msrb.gmra.mxu0 %v3045_v38  ;;  %v734_v53 = vunpack.c.1.s8 %v3164_v22  ;;  %v870_v55 = vunpack.c.2.s8 %v3171_v30  ;;  %v1014_v56 = vcvt.s32.f32 %v502_v41  ;;  %v1142_v54 = vcvt.s32.f32 %v630_v42  ;;  %v3210_v19 = vld [vmem:[%s2811_s6 + $0x158] sm:$0xff] }
  0x9b   : >> { %1557 = vmatmul.f32.vlgmr.msrb.gmra.mxu1 %v3047_v39  ;;  %1681 = vmatpush.msrb.mxu0 %v1038_v25  ;;  %v486_v57 = vunpack.c.2.s8 %v3177_v35  ;;  %v614_v58 = vunpack.c.2.s8 %v3180_v36  ;;  %v1254_v60 = vcvt.s32.f32 %v742_v45  ;;  %v1390_v61 = vcvt.s32.f32 %v878_v46 }
  0x9c   : >> { %1701 = vmatpush.msrb.mxu1 %v1166_v26  ;;  %1723 = vmatpush.msrb.mxu2 %v1278_v31  ;;  %v726_v62 = vunpack.c.0.s8 %v3164_v22  ;;  %v862_v63 = vunpack.c.1.s8 %v3171_v30  ;;  %v1006_v8 = vcvt.s32.f32 %v494_v50  ;;  %v1134_v9 = vcvt.s32.f32 %v622_v49 }
  0x9d   : >> { %1742 = vmatpush.msrb.mxu3 %v1414_v32  ;;  %1682 = vmatpush.msrb.mxu0 %v1030_v37  ;;  %v478_v10 = vunpack.c.1.s8 %v3177_v35  ;;  %v606_v11 = vunpack.c.1.s8 %v3180_v36  ;;  %v1246_v14 = vcvt.s32.f32 %v734_v53  ;;  %v1382_v15 = vcvt.s32.f32 %v870_v55 }
  0x9e   : >> { %1702 = vmatpush.msrb.mxu1 %v1158_v40  ;;  %1724 = vmatpush.msrb.mxu2 %v1270_v43  ;;  %v718_v13 = vunpack.c.3.s8 %v3195_v59  ;;  %v854_v17 = vunpack.c.0.s8 %v3171_v30  ;;  %v998_v20 = vcvt.s32.f32 %v486_v57  ;;  %v1126_v21 = vcvt.s32.f32 %v614_v58  ;;  %v3223_v43 = vld [vmem:[%s2811_s6 + $0x218] sm:$0xff] }
  0x9f   : >> { %1743 = vmatpush.msrb.mxu3 %v1406_v44  ;;  %1683 = vmatpush.msrb.mxu0 %v1022_v47  ;;  %v470_v22 = vunpack.c.0.s8 %v3177_v35  ;;  %v598_v23 = vunpack.c.0.s8 %v3180_v36  ;;  %v1238_v24 = vcvt.s32.f32 %v726_v62  ;;  %v1374_v25 = vcvt.s32.f32 %v862_v63  ;;  %v3235_v57 = vld [vmem:[%s2811_s6 + $0x18] sm:$0xff] }
  0xa0   : >> { %1703 = vmatpush.msrb.mxu1 %v1150_v48  ;;  %1725 = vmatpush.msrb.mxu2 %v1262_v51  ;;  %v710_v26 = vunpack.c.2.s8 %v3195_v59  ;;  %v846_v27 = vunpack.c.3.s8 %v3202_v12  ;;  %v990_v28 = vcvt.s32.f32 %v478_v10  ;;  %v1118_v30 = vcvt.s32.f32 %v606_v11  ;;  %v3238_v58 = vld [vmem:[%s2811_s6 + $0x118] sm:$0xff] }
  0xa1   : >> { %1744 = vmatpush.msrb.mxu3 %v1398_v52  ;;  %1684 = vmatpush.msrb.mxu0 %v1014_v56  ;;  %v462_v31 = vunpack.c.3.s8 %v3207_v18  ;;  %v590_v32 = vunpack.c.3.s8 %v3210_v19  ;;  %v1230_v33 = vcvt.s32.f32 %v718_v13  ;;  %v1366_v34 = vcvt.s32.f32 %v854_v17  ;;  %v3230_v52 = vld [vmem:[%s2811_s6 + $0x318] sm:$0xff] }
  0xa2   : >> { %1704 = vmatpush.msrb.mxu1 %v1142_v54  ;;  %1726 = vmatpush.msrb.mxu2 %v1254_v60  ;;  %v702_v35 = vunpack.c.1.s8 %v3195_v59  ;;  %v838_v36 = vunpack.c.2.s8 %v3202_v12  ;;  %v982_v37 = vcvt.s32.f32 %v470_v22  ;;  %v1110_v40 = vcvt.s32.f32 %v598_v23 }
  0xa3   : >> { %1745 = vmatpush.msrb.mxu3 %v1390_v61  ;;  %1685 = vmatpush.msrb.mxu0 %v1006_v8  ;;  %v454_v41 = vunpack.c.2.s8 %v3207_v18  ;;  %v582_v42 = vunpack.c.2.s8 %v3210_v19  ;;  %v1222_v44 = vcvt.s32.f32 %v710_v26  ;;  %v1358_v45 = vcvt.s32.f32 %v846_v27 }
  0xa4   : >> { %1705 = vmatpush.msrb.mxu1 %v1134_v9  ;;  %1727 = vmatpush.msrb.mxu2 %v1246_v14  ;;  %v694_v46 = vunpack.c.0.s8 %v3195_v59  ;;  %v830_v47 = vunpack.c.1.s8 %v3202_v12  ;;  %v974_v48 = vcvt.s32.f32 %v462_v31  ;;  %v1102_v50 = vcvt.s32.f32 %v590_v32 }
  0xa5   : >> { %1746 = vmatpush.msrb.mxu3 %v1382_v15  ;;  %1686 = vmatpush.msrb.mxu0 %v998_v20  ;;  %v446_v49 = vunpack.c.1.s8 %v3207_v18  ;;  %v574_v51 = vunpack.c.1.s8 %v3210_v19  ;;  %v1214_v53 = vcvt.s32.f32 %v702_v35  ;;  %v1350_v55 = vcvt.s32.f32 %v838_v36 }
  0xa6   : >> { %1706 = vmatpush.msrb.mxu1 %v1126_v21  ;;  %1728 = vmatpush.msrb.mxu2 %v1238_v24  ;;  %v686_v56 = vunpack.c.3.s8 %v3223_v43  ;;  %v822_v54 = vunpack.c.0.s8 %v3202_v12  ;;  %v966_v59 = vcvt.s32.f32 %v454_v41  ;;  %v1094_v60 = vcvt.s32.f32 %v582_v42  ;;  %v3251_v24 = vld [vmem:[%s2811_s6 + $0x2e0] sm:$0xff] }
  0xa7   : >> { %1747 = vmatpush.msrb.mxu3 %v1374_v25  ;;  %1687 = vmatpush.msrb.mxu0 %v990_v28  ;;  %v438_v61 = vunpack.c.0.s8 %v3207_v18  ;;  %v566_v62 = vunpack.c.0.s8 %v3210_v19  ;;  %v1206_v63 = vcvt.s32.f32 %v694_v46  ;;  %v1342_v8 = vcvt.s32.f32 %v830_v47  ;;  %v3265_v47 = vld [vmem:[%s2811_s6 + $0xe0] sm:$0xff] }
  0xa8   : >> { %1707 = vmatpush.msrb.mxu1 %v1118_v30  ;;  %1729 = vmatpush.msrb.mxu2 %v1230_v33  ;;  %v678_v9 = vunpack.c.2.s8 %v3223_v43  ;;  %v814_v10 = vunpack.c.3.s8 %v3230_v52  ;;  %v958_v11 = vcvt.s32.f32 %v446_v49  ;;  %v1086_v12 = vcvt.s32.f32 %v574_v51 }
  0xa9   : >> { %1748 = vmatpush.msrb.mxu3 %v1366_v34  ;;  %1688 = vmatpush.msrb.mxu0 %v982_v37  ;;  %v430_v14 = vunpack.c.3.s8 %v3235_v57  ;;  %v558_v15 = vunpack.c.3.s8 %v3238_v58  ;;  %v1198_v13 = vcvt.s32.f32 %v686_v56  ;;  %v1334_v17 = vcvt.s32.f32 %v822_v54  ;;  %v3259_v37 = vld [vmem:[%s2811_s6 + $0x3e0] sm:$0xff] }
  0xaa   : >> { %1708 = vmatpush.msrb.mxu1 %v1110_v40  ;;  %1730 = vmatpush.msrb.mxu2 %v1222_v44  ;;  %v670_v18 = vunpack.c.1.s8 %v3223_v43  ;;  %v806_v19 = vunpack.c.2.s8 %v3230_v52  ;;  %v950_v20 = vcvt.s32.f32 %v438_v61  ;;  %v1078_v21 = vcvt.s32.f32 %v566_v62 }
  0xab   : >> { %1749 = vmatpush.msrb.mxu3 %v1358_v45  ;;  %1689 = vmatpush.msrb.mxu0 %v974_v48  ;;  %v422_v22 = vunpack.c.2.s8 %v3235_v57  ;;  %v550_v23 = vunpack.c.2.s8 %v3238_v58  ;;  %v1190_v25 = vcvt.s32.f32 %v678_v9  ;;  %v1326_v26 = vcvt.s32.f32 %v814_v10  ;;  %v3268_v48 = vld [vmem:[%s2811_s6 + $0x1e0] sm:$0xff] }
  0xac   : >> { %1709 = vmatpush.msrb.mxu1 %v1102_v50  ;;  %1731 = vmatpush.msrb.mxu2 %v1214_v53  ;;  %v662_v27 = vunpack.c.0.s8 %v3223_v43  ;;  %v798_v28 = vunpack.c.1.s8 %v3230_v52  ;;  %v942_v30 = vcvt.s32.f32 %v430_v14  ;;  %v1070_v31 = vcvt.s32.f32 %v558_v15  ;;  %v3280_v9 = vld [vmem:[%s2811_s6 + $0x2a0] sm:$0xff] }
  0xad   : >> { %1750 = vmatpush.msrb.mxu3 %v1350_v55  ;;  %1690 = vmatpush.msrb.mxu0 %v966_v59  ;;  %v414_v32 = vunpack.c.1.s8 %v3235_v57  ;;  %v1182_v33 = vcvt.s32.f32 %v670_v18  ;;  %v1318_v34 = vcvt.s32.f32 %v806_v19  ;;  %v783_v35 = vunpack.c.3.s8 %v3251_v24 }
  0xae   : >> { %1710 = vmatpush.msrb.mxu1 %v1094_v60  ;;  %1732 = vmatpush.msrb.mxu2 %v1206_v63  ;;  %v542_v36 = vunpack.c.1.s8 %v3238_v58  ;;  %v934_v40 = vcvt.s32.f32 %v422_v22  ;;  %v1062_v41 = vcvt.s32.f32 %v550_v23  ;;  %v790_v42 = vunpack.c.0.s8 %v3230_v52  ;;  %v3296_v22 = vld [vmem:[%s2811_s6 + $0x1a0] sm:$0xff] }
  0xaf   : >> { %1751 = vmatpush.msrb.mxu3 %v1342_v8  ;;  %1691 = vmatpush.msrb.mxu0 %v958_v11  ;;  %v406_v43 = vunpack.c.0.s8 %v3235_v57  ;;  %v1174_v44 = vcvt.s32.f32 %v662_v27  ;;  %v1310_v45 = vcvt.s32.f32 %v798_v28  ;;  %v775_v46 = vunpack.c.2.s8 %v3251_v24 }
  0xb0   : >> { %1711 = vmatpush.msrb.mxu1 %v1086_v12  ;;  %1733 = vmatpush.msrb.mxu2 %v1198_v13  ;;  %v926_v50 = vcvt.s32.f32 %v414_v32  ;;  %v911_v49 = vunpack.c.3.s8 %v3259_v37  ;;  %v534_v51 = vunpack.c.0.s8 %v3238_v58  ;;  %v1295_v52 = vcvt.s32.f32 %v783_v35  ;;  %v3287_v13 = vld [vmem:[%s2811_s6 + $0x3a0] sm:$0xff] }
  0xb1   : >> { %1752 = vmatpush.msrb.mxu3 %v1334_v17  ;;  %1692 = vmatpush.msrb.mxu0 %v950_v20  ;;  %v1054_v53 = vcvt.s32.f32 %v542_v36  ;;  %v1302_v55 = vcvt.s32.f32 %v790_v42  ;;  %v918_v56 = vcvt.s32.f32 %v406_v43  ;;  %v527_v54 = vunpack.c.3.s8 %v3265_v47  ;;  %v3311_v43 = vld [vmem:[%s2811_s6 + $0x260] sm:$0xff] }
  0xb2   : >> { %1712 = vmatpush.msrb.mxu1 %v1078_v21  ;;  %1734 = vmatpush.msrb.mxu2 %v1190_v25  ;;  %v655_v57 = vunpack.c.3.s8 %v3268_v48  ;;  %v1287_v59 = vcvt.s32.f32 %v775_v46  ;;  %v767_v60 = vunpack.c.1.s8 %v3251_v24  ;;  %v903_v58 = vunpack.c.2.s8 %v3259_v37  ;;  %v3293_v21 = vld [vmem:[%s2811_s6 + $0xa0] sm:$0xff] }
  0xb3   : >> { %1753 = vmatpush.msrb.mxu3 %v1326_v26  ;;  %1693 = vmatpush.msrb.mxu0 %v942_v30  ;;  %v1423_v61 = vcvt.s32.f32 %v911_v49  ;;  %v1046_v62 = vcvt.s32.f32 %v534_v51  ;;  %v519_v63 = vunpack.c.2.s8 %v3265_v47  ;;  %v647_v8 = vunpack.c.2.s8 %v3268_v48 }
  0xb4   : >> { %1713 = vmatpush.msrb.mxu1 %v1070_v31  ;;  %1735 = vmatpush.msrb.mxu2 %v1182_v33  ;;  %v759_v10 = vunpack.c.0.s8 %v3251_v24  ;;  %v895_v11 = vunpack.c.1.s8 %v3259_v37  ;;  %v1167_v12 = vcvt.s32.f32 %v655_v57  ;;  %v511_v14 = vunpack.c.1.s8 %v3265_v47  ;;  %v3323_v57 = vld [vmem:[%s2811_s6 + $0x60] sm:$0xff] }
  0xb5   : >> { %1754 = vmatpush.msrb.mxu3 %v1318_v34  ;;  %1694 = vmatpush.msrb.mxu0 %v934_v40  ;;  %v639_v15 = vunpack.c.1.s8 %v3268_v48  ;;  %v1279_v17 = vcvt.s32.f32 %v767_v60  ;;  %v1415_v18 = vcvt.s32.f32 %v903_v58  ;;  %v751_v19 = vunpack.c.3.s8 %v3280_v9 }
  0xb6   : >> { %1714 = vmatpush.msrb.mxu1 %v1062_v41  ;;  %1736 = vmatpush.msrb.mxu2 %v1174_v44  ;;  %v887_v20 = vunpack.c.0.s8 %v3259_v37  ;;  %v1031_v23 = vcvt.s32.f32 %v519_v63  ;;  %v1159_v24 = vcvt.s32.f32 %v647_v8  ;;  %v503_v25 = vunpack.c.0.s8 %v3265_v47 }
  0xb7   : >> { %1755 = vmatpush.msrb.mxu3 %v1310_v45  ;;  %1657 = vmatmul.f32.vlgmr.msra.gmra.mxu2 %v3029_v16  ;;  %v1039_v16 = vcvt.s32.f32 %v527_v54  ;;  %v631_v26 = vunpack.c.0.s8 %v3268_v48  ;;  %v1407_v27 = vcvt.s32.f32 %v895_v11  ;;  %v743_v28 = vunpack.c.2.s8 %v3280_v9 }
  0xb8   : >> { %1695 = vmatpush.msrb.mxu0 %v926_v50  ;;  %1801 = vmatpush.msra.mxu2 %v1295_v52  ;;  %v879_v30 = vunpack.c.3.s8 %v3287_v13  ;;  %v1023_v31 = vcvt.s32.f32 %v511_v14  ;;  %v1151_v32 = vcvt.s32.f32 %v639_v15  ;;  %v495_v33 = vunpack.c.3.s8 %v3293_v21  ;;  %v3318_v52 = vld [vmem:[%s2811_s6 + $0x360] sm:$0xff] }
  0xb9   : >> { %1715 = vmatpush.msrb.mxu1 %v1054_v53  ;;  %1756 = vmatpush.msrb.mxu3 %v1302_v55  ;;  %v623_v34 = vunpack.c.3.s8 %v3296_v22  ;;  %v1399_v35 = vcvt.s32.f32 %v887_v20  ;;  %v871_v36 = vunpack.c.2.s8 %v3287_v13  ;;  %v1015_v37 = vcvt.s32.f32 %v503_v25 }
  0xba   : >> { %1696 = vmatpush.msrb.mxu0 %v918_v56  ;;  %1677 = vmatmul.f32.vlgmr.msra.gmra.mxu3 %v3039_v29  ;;  %v1271_v29 = vcvt.s32.f32 %v759_v10  ;;  %v1143_v40 = vcvt.s32.f32 %v631_v26  ;;  %v487_v41 = vunpack.c.2.s8 %v3293_v21  ;;  %v615_v42 = vunpack.c.2.s8 %v3296_v22 }
  0xbb   : >> { %1802 = vmatpush.msra.mxu2 %v1287_v59  ;;  %1821 = vmatpush.msra.mxu3 %v1423_v61  ;;  %v1255_v44 = vcvt.s32.f32 %v743_v28  ;;  %v1391_v45 = vcvt.s32.f32 %v879_v30  ;;  %v727_v46 = vunpack.c.0.s8 %v3280_v9  ;;  %v863_v47 = vunpack.c.1.s8 %v3287_v13  ;;  %v3326_v59 = vld [vmem:[%s2811_s6 + $0x160] sm:$0xff] }
  0xbc   : >> { %1716 = vmatpush.msrb.mxu1 %v1046_v62  ;;  %1617 = vmatmul.f32.vlgmr.msra.gmra.mxu0 %v3045_v38  ;;  %v1263_v38 = vcvt.s32.f32 %v751_v19  ;;  %v1007_v48 = vcvt.s32.f32 %v495_v33  ;;  %v1135_v50 = vcvt.s32.f32 %v623_v34  ;;  %v479_v49 = vunpack.c.1.s8 %v3293_v21 }
  0xbd   : >> { %1637 = vmatmul.f32.vlgmr.msra.gmra.mxu1 %v3047_v39  ;;  %1761 = vmatpush.msra.mxu0 %v1039_v16  ;;  %v735_v39 = vunpack.c.1.s8 %v3280_v9  ;;  %v607_v51 = vunpack.c.1.s8 %v3296_v22  ;;  %v1383_v55 = vcvt.s32.f32 %v871_v36  ;;  %v719_v56 = vunpack.c.3.s8 %v3311_v43  ;;  %v3354_v36 = vld [vmem:[%s2811_s6 + $0x120] sm:$0xff] }
  0xbe   : >> { %1781 = vmatpush.msra.mxu1 %v1167_v12  ;;  %1803 = vmatpush.msra.mxu2 %v1279_v17  ;;  %v855_v54 = vunpack.c.0.s8 %v3287_v13  ;;  %v999_v60 = vcvt.s32.f32 %v487_v41  ;;  %v1127_v58 = vcvt.s32.f32 %v615_v42  ;;  %v471_v61 = vunpack.c.0.s8 %v3293_v21 }
  0xbf   : >> { %1822 = vmatpush.msra.mxu3 %v1415_v18  ;;  %1762 = vmatpush.msra.mxu0 %v1031_v23  ;;  %v1247_v53 = vcvt.s32.f32 %v735_v39  ;;  %v599_v62 = vunpack.c.0.s8 %v3296_v22  ;;  %v1239_v63 = vcvt.s32.f32 %v727_v46  ;;  %v1375_v8 = vcvt.s32.f32 %v863_v47  ;;  %v3339_v23 = vld [vmem:[%s2811_s6 + $0x220] sm:$0xff] }
  0xc0   : >> { %1782 = vmatpush.msra.mxu1 %v1159_v24  ;;  %1804 = vmatpush.msra.mxu2 %v1271_v29  ;;  %v711_v9 = vunpack.c.2.s8 %v3311_v43  ;;  %v847_v10 = vunpack.c.3.s8 %v3318_v52  ;;  %v991_v11 = vcvt.s32.f32 %v479_v49  ;;  %v1119_v16 = vcvt.s32.f32 %v607_v51  ;;  %v3351_v39 = vld [vmem:[%s2811_s6 + $0x20] sm:$0xff] }
  0xc1   : >> { %1823 = vmatpush.msra.mxu3 %v1407_v27  ;;  %1763 = vmatpush.msra.mxu0 %v1023_v31  ;;  %v463_v12 = vunpack.c.3.s8 %v3323_v57  ;;  %v591_v14 = vunpack.c.3.s8 %v3326_v59  ;;  %v1231_v15 = vcvt.s32.f32 %v719_v56  ;;  %v1367_v13 = vcvt.s32.f32 %v855_v54 }
  0xc2   : >> { %1783 = vmatpush.msra.mxu1 %v1151_v32  ;;  %1805 = vmatpush.msra.mxu2 %v1263_v38  ;;  %v703_v17 = vunpack.c.1.s8 %v3311_v43  ;;  %v839_v18 = vunpack.c.2.s8 %v3318_v52  ;;  %v983_v19 = vcvt.s32.f32 %v471_v61  ;;  %v1111_v20 = vcvt.s32.f32 %v599_v62  ;;  %v3346_v32 = vld [vmem:[%s2811_s6 + $0x320] sm:$0xff] }
  0xc3   : >> { %1824 = vmatpush.msra.mxu3 %v1399_v35  ;;  %1764 = vmatpush.msra.mxu0 %v1015_v37  ;;  %v455_v21 = vunpack.c.2.s8 %v3323_v57  ;;  %v583_v22 = vunpack.c.2.s8 %v3326_v59  ;;  %v1223_v24 = vcvt.s32.f32 %v711_v9  ;;  %v1359_v25 = vcvt.s32.f32 %v847_v10 }
  0xc4   : >> { %1784 = vmatpush.msra.mxu1 %v1143_v40  ;;  %1806 = vmatpush.msra.mxu2 %v1255_v44  ;;  %v695_v26 = vunpack.c.0.s8 %v3311_v43  ;;  %v831_v29 = vunpack.c.1.s8 %v3318_v52  ;;  %v975_v27 = vcvt.s32.f32 %v463_v12  ;;  %v1103_v28 = vcvt.s32.f32 %v591_v14 }
  0xc5   : >> { %1825 = vmatpush.msra.mxu3 %v1391_v45  ;;  %1765 = vmatpush.msra.mxu0 %v1007_v48  ;;  %v447_v30 = vunpack.c.1.s8 %v3323_v57  ;;  %v575_v31 = vunpack.c.1.s8 %v3326_v59  ;;  %v1215_v33 = vcvt.s32.f32 %v703_v17  ;;  %v1351_v34 = vcvt.s32.f32 %v839_v18 }
  0xc6   : >> { %1785 = vmatpush.msra.mxu1 %v1135_v50  ;;  %1807 = vmatpush.msra.mxu2 %v1247_v53  ;;  %v687_v38 = vunpack.c.3.s8 %v3339_v23  ;;  %v823_v35 = vunpack.c.0.s8 %v3318_v52  ;;  %v967_v37 = vcvt.s32.f32 %v455_v21  ;;  %v1095_v40 = vcvt.s32.f32 %v583_v22 }
  0xc7   : >> { %1826 = vmatpush.msra.mxu3 %v1383_v55  ;;  %1766 = vmatpush.msra.mxu0 %v999_v60  ;;  %v439_v41 = vunpack.c.0.s8 %v3323_v57  ;;  %v567_v42 = vunpack.c.0.s8 %v3326_v59  ;;  %v1207_v43 = vcvt.s32.f32 %v695_v26  ;;  %v1343_v44 = vcvt.s32.f32 %v831_v29  ;;  %v3367_v60 = vld [vmem:[%s2811_s6 + $0x2e8] sm:$0xff] }
  0xc8   : >> { %1786 = vmatpush.msra.mxu1 %v1127_v58  ;;  %1808 = vmatpush.msra.mxu2 %v1239_v63  ;;  %v679_v45 = vunpack.c.2.s8 %v3339_v23  ;;  %v815_v46 = vunpack.c.3.s8 %v3346_v32  ;;  %v959_v47 = vcvt.s32.f32 %v447_v30  ;;  %v1087_v48 = vcvt.s32.f32 %v575_v31 }
  0xc9   : >> { %1827 = vmatpush.msra.mxu3 %v1375_v8  ;;  %1767 = vmatpush.msra.mxu0 %v991_v11  ;;  %v431_v50 = vunpack.c.3.s8 %v3351_v39  ;;  %v559_v49 = vunpack.c.3.s8 %v3354_v36  ;;  %v1199_v51 = vcvt.s32.f32 %v687_v38  ;;  %v1335_v52 = vcvt.s32.f32 %v823_v35 }
  0xca   : >> { %1787 = vmatpush.msra.mxu1 %v1119_v16  ;;  %1809 = vmatpush.msra.mxu2 %v1231_v15  ;;  %v671_v53 = vunpack.c.1.s8 %v3339_v23  ;;  %v807_v55 = vunpack.c.2.s8 %v3346_v32  ;;  %v951_v56 = vcvt.s32.f32 %v439_v41  ;;  %v1079_v54 = vcvt.s32.f32 %v567_v42  ;;  %v3375_v15 = vld [vmem:[%s2811_s6 + $0x3e8] sm:$0xff] }
  0xcb   : >> { %1828 = vmatpush.msra.mxu3 %v1367_v13  ;;  %1768 = vmatpush.msra.mxu0 %v983_v19  ;;  %v423_v57 = vunpack.c.2.s8 %v3351_v39  ;;  %v551_v59 = vunpack.c.2.s8 %v3354_v36  ;;  %v1191_v58 = vcvt.s32.f32 %v679_v45  ;;  %v1327_v61 = vcvt.s32.f32 %v815_v46 }
  0xcc   : >> { %1788 = vmatpush.msra.mxu1 %v1111_v20  ;;  %1810 = vmatpush.msra.mxu2 %v1223_v24  ;;  %v663_v62 = vunpack.c.0.s8 %v3339_v23  ;;  %v799_v63 = vunpack.c.1.s8 %v3346_v32  ;;  %v943_v8 = vcvt.s32.f32 %v431_v50  ;;  %v1071_v9 = vcvt.s32.f32 %v559_v49  ;;  %v3381_v23 = vld [vmem:[%s2811_s6 + $0xe8] sm:$0xff] }
  0xcd   : >> { %1829 = vmatpush.msra.mxu3 %v1359_v25  ;;  %1769 = vmatpush.msra.mxu0 %v975_v27  ;;  %v415_v10 = vunpack.c.1.s8 %v3351_v39  ;;  %v1183_v11 = vcvt.s32.f32 %v671_v53  ;;  %v1319_v16 = vcvt.s32.f32 %v807_v55  ;;  %v784_v12 = vunpack.c.3.s8 %v3367_v60  ;;  %v3384_v24 = vld [vmem:[%s2811_s6 + $0x1e8] sm:$0xff] }
  0xce   : >> { %1789 = vmatpush.msra.mxu1 %v1103_v28  ;;  %1811 = vmatpush.msra.mxu2 %v1215_v33  ;;  %v543_v14 = vunpack.c.1.s8 %v3354_v36  ;;  %v935_v13 = vcvt.s32.f32 %v423_v57  ;;  %v1063_v17 = vcvt.s32.f32 %v551_v59  ;;  %v791_v18 = vunpack.c.0.s8 %v3346_v32  ;;  %v3406_v49 = vld [vmem:[%s2811_s6 + $0x3a8] sm:$0xff] }
  0xcf   : >> { %1830 = vmatpush.msra.mxu3 %v1351_v34  ;;  %1770 = vmatpush.msra.mxu0 %v967_v37  ;;  %v407_v19 = vunpack.c.0.s8 %v3351_v39  ;;  %v1175_v20 = vcvt.s32.f32 %v663_v62  ;;  %v1311_v21 = vcvt.s32.f32 %v799_v63  ;;  %v776_v22 = vunpack.c.2.s8 %v3367_v60  ;;  %v3393_v39 = vld [vmem:[%s2811_s6 + $0x2a8] sm:$0xff]  ;;  %v3421_v62 = vld.sshfl [vmem:[#allocation1] sm:$0xff pattern:$0x73625140] }
  0xd0   : >> { %1790 = vmatpush.msra.mxu1 %v1095_v40  ;;  %1812 = vmatpush.msra.mxu2 %v1207_v43  ;;  %v927_v25 = vcvt.s32.f32 %v415_v10  ;;  %v912_v26 = vunpack.c.3.s8 %v3375_v15  ;;  %v535_v29 = vunpack.c.0.s8 %v3354_v36  ;;  %v1296_v27 = vcvt.s32.f32 %v784_v12  ;;  %v3395_v36 = vld.sshfl [vmem:[#allocation1 + $0x10] sm:$0xff pattern:$0x73625140]  ;;  %v3417_v57 = vld [vmem:[%s2811_s6 + $0x1a8] sm:$0xff] }
  0xd1   : >> { %1831 = vmatpush.msra.mxu3 %v1343_v44  ;;  %1771 = vmatpush.msra.mxu0 %v959_v47  ;;  %v1055_v28 = vcvt.s32.f32 %v543_v14  ;;  %v1303_v30 = vcvt.s32.f32 %v791_v18  ;;  %v919_v31 = vcvt.s32.f32 %v407_v19  ;;  %v528_v32 = vunpack.c.3.s8 %v3381_v23  ;;  %v3424_v63 = vld.sshfl [vmem:[#allocation1 + $0x8] sm:$0xff pattern:$0x73625140] }
  0xd2   : >> { %1791 = vmatpush.msra.mxu1 %v1087_v48  ;;  %1813 = vmatpush.msra.mxu2 %v1199_v51  ;;  %v656_v33 = vunpack.c.3.s8 %v3384_v24  ;;  %v1288_v34 = vcvt.s32.f32 %v776_v22  ;;  %v768_v38 = vunpack.c.1.s8 %v3367_v60  ;;  %v904_v35 = vunpack.c.2.s8 %v3375_v15  ;;  %v3408_v51 = vld.sshfl [vmem:[#allocation1 + $0x18] sm:$0xff pattern:$0x73625140] }
  0xd3   : >> { %1832 = vmatpush.msra.mxu3 %v1335_v52  ;;  %1772 = vmatpush.msra.mxu0 %v951_v56  ;;  %v1424_v37 = vcvt.s32.f32 %v912_v26  ;;  %v1047_v40 = vcvt.s32.f32 %v535_v29  ;;  %v520_v41 = vunpack.c.2.s8 %v3381_v23  ;;  %v648_v42 = vunpack.c.2.s8 %v3384_v24 }
  0xd4   : >> { %1792 = vmatpush.msra.mxu1 %v1079_v54  ;;  %1814 = vmatpush.msra.mxu2 %v1191_v58  ;;  %v760_v43 = vunpack.c.0.s8 %v3367_v60  ;;  %v896_v44 = vunpack.c.1.s8 %v3375_v15  ;;  %v512_v45 = vunpack.c.1.s8 %v3381_v23  ;;  %v1040_v46 = vcvt.s32.f32 %v528_v32  ;;  %v3414_v54 = vld [vmem:[%s2811_s6 + $0xa8] sm:$0xff] }
  0xd5   : >> { %1833 = vmatpush.msra.mxu3 %v1327_v61  ;;  %1773 = vmatpush.msra.mxu0 %v943_v8  ;;  %v1168_v47 = vcvt.s32.f32 %v656_v33  ;;  %v640_v48 = vunpack.c.1.s8 %v3384_v24  ;;  %v752_v50 = vunpack.c.3.s8 %v3393_v39  ;;  %v1280_v52 = vcvt.s32.f32 %v768_v38  ;;  %v3443_v33 = vld [vmem:[%s2811_s6 + $0x368] sm:$0xff] }
  0xd6   : >> { %1793 = vmatpush.msra.mxu1 %v1071_v9  ;;  %1815 = vmatpush.msra.mxu2 %v1183_v11  ;;  %v1416_v53 = vcvt.s32.f32 %v904_v35  ;;  %v888_v55 = vunpack.c.0.s8 %v3375_v15  ;;  %v504_v56 = vunpack.c.0.s8 %v3381_v23  ;;  %v1032_v59 = vcvt.s32.f32 %v520_v41 }
  0xd7   : >> { %1834 = vmatpush.msra.mxu3 %v1319_v16  ;;  %1774 = vmatpush.msra.mxu0 %v935_v13  ;;  %v1160_v60 = vcvt.s32.f32 %v648_v42  ;;  %v632_v58 = vunpack.c.0.s8 %v3384_v24  ;;  %v744_v61 = vunpack.c.2.s8 %v3393_v39  ;;  %v1272_v8 = vcvt.s32.f32 %v760_v43 }
  0xd8   : >> { %1794 = vmatpush.msra.mxu1 %v1063_v17  ;;  %1816 = vmatpush.msra.mxu2 %v1175_v20  ;;  %v1408_v9 = vcvt.s32.f32 %v896_v44  ;;  %v1024_v10 = vcvt.s32.f32 %v512_v45  ;;  %v880_v11 = vunpack.c.3.s8 %v3406_v49  ;;  %v1152_v16 = vcvt.s32.f32 %v640_v48  ;;  %v3433_v20 = vld [vmem:[%s2811_s6 + $0x268] sm:$0xff] }
  0xd9   : >> { %1835 = vmatpush.msra.mxu3 %v1311_v21  ;;  %1737 = vmatmul.f32.vlgmr.msrb.gmra.mxu2 %v3395_v36  ;;  %v1264_v12 = vcvt.s32.f32 %v752_v50  ;;  %v496_v14 = vunpack.c.3.s8 %v3414_v54  ;;  %v624_v15 = vunpack.c.3.s8 %v3417_v57  ;;  %v1400_v13 = vcvt.s32.f32 %v888_v55 }
  0xda   : >> { %1775 = vmatpush.msra.mxu0 %v927_v25  ;;  %1881 = vmatpush.msrb.mxu2 %v1296_v27  ;;  %v1016_v17 = vcvt.s32.f32 %v504_v56  ;;  %v736_v18 = vunpack.c.1.s8 %v3393_v39  ;;  %v872_v19 = vunpack.c.2.s8 %v3406_v49  ;;  %v1144_v21 = vcvt.s32.f32 %v632_v58 }
  0xdb   : >> { %1795 = vmatpush.msra.mxu1 %v1055_v28  ;;  %1836 = vmatpush.msra.mxu3 %v1303_v30  ;;  %v1256_v22 = vcvt.s32.f32 %v744_v61  ;;  %v488_v23 = vunpack.c.2.s8 %v3414_v54  ;;  %v616_v24 = vunpack.c.2.s8 %v3417_v57  ;;  %v1392_v25 = vcvt.s32.f32 %v880_v11 }
  0xdc   : >> { %1776 = vmatpush.msra.mxu0 %v919_v31  ;;  %1757 = vmatmul.f32.vlgmr.msrb.gmra.mxu3 %v3408_v51  ;;  %v728_v26 = vunpack.c.0.s8 %v3393_v39  ;;  %v864_v29 = vunpack.c.1.s8 %v3406_v49  ;;  %v480_v27 = vunpack.c.1.s8 %v3414_v54  ;;  %v1008_v28 = vcvt.s32.f32 %v496_v14 }
  0xdd   : >> { %1882 = vmatpush.msrb.mxu2 %v1288_v34  ;;  %1901 = vmatpush.msrb.mxu3 %v1424_v37  ;;  %v1136_v30 = vcvt.s32.f32 %v624_v15  ;;  %v608_v31 = vunpack.c.1.s8 %v3417_v57  ;;  %v720_v32 = vunpack.c.3.s8 %v3433_v20  ;;  %v1248_v34 = vcvt.s32.f32 %v736_v18  ;;  %v3448_v37 = vld [vmem:[%s2811_s6 + $0x68] sm:$0xff] }
  0xde   : >> { %1796 = vmatpush.msra.mxu1 %v1047_v40  ;;  %1697 = vmatmul.f32.vlgmr.msrb.gmra.mxu0 %v3421_v62  ;;  %v1384_v38 = vcvt.s32.f32 %v872_v19  ;;  %v856_v35 = vunpack.c.0.s8 %v3406_v49  ;;  %v472_v39 = vunpack.c.0.s8 %v3414_v54  ;;  %v3451_v40 = vld [vmem:[%s2811_s6 + $0x168] sm:$0xff]  ;;  %v1000_v41 = vcvt.s32.f32 %v488_v23 }
  0xdf   : >> { %1717 = vmatmul.f32.vlgmr.msrb.gmra.mxu1 %v3424_v63  ;;  %1841 = vmatpush.msrb.mxu0 %v1040_v46  ;;  %v1128_v42 = vcvt.s32.f32 %v616_v24  ;;  %v600_v43 = vunpack.c.0.s8 %v3417_v57  ;;  %v712_v44 = vunpack.c.2.s8 %v3433_v20  ;;  %v1240_v45 = vcvt.s32.f32 %v728_v26  ;;  %v3479_v23 = vld [vmem:[%s2811_s6 + $0x128] sm:$0xff] }
  0xe0   : >> { %1861 = vmatpush.msrb.mxu1 %v1168_v47  ;;  %1883 = vmatpush.msrb.mxu2 %v1280_v52  ;;  %v1376_v46 = vcvt.s32.f32 %v864_v29  ;;  %v992_v47 = vcvt.s32.f32 %v480_v27  ;;  %v848_v48 = vunpack.c.3.s8 %v3443_v33  ;;  %v1120_v50 = vcvt.s32.f32 %v608_v31 }
  0xe1   : >> { %1902 = vmatpush.msrb.mxu3 %v1416_v53  ;;  %1842 = vmatpush.msrb.mxu0 %v1032_v59  ;;  %v1232_v49 = vcvt.s32.f32 %v720_v32  ;;  %v464_v52 = vunpack.c.3.s8 %v3448_v37  ;;  %v592_v53 = vunpack.c.3.s8 %v3451_v40  ;;  %v1368_v55 = vcvt.s32.f32 %v856_v35  ;;  %v3461_v59 = vld [vmem:[%s2811_s6 + $0x228] sm:$0xff]  ;;  %v3487_v35 = vld [vmem:[%s2811_s6 + $0x2f0] sm:$0xff] }
  0xe2   : >> { %1862 = vmatpush.msrb.mxu1 %v1160_v60  ;;  %1884 = vmatpush.msrb.mxu2 %v1272_v8  ;;  %v984_v56 = vcvt.s32.f32 %v472_v39  ;;  %v704_v54 = vunpack.c.1.s8 %v3433_v20  ;;  %v840_v57 = vunpack.c.2.s8 %v3443_v33  ;;  %v1112_v60 = vcvt.s32.f32 %v600_v43 }
  0xe3   : >> { %1903 = vmatpush.msrb.mxu3 %v1408_v9  ;;  %1843 = vmatpush.msrb.mxu0 %v1024_v10  ;;  %v1224_v58 = vcvt.s32.f32 %v712_v44  ;;  %v456_v61 = vunpack.c.2.s8 %v3448_v37  ;;  %v584_v8 = vunpack.c.2.s8 %v3451_v40  ;;  %v1360_v9 = vcvt.s32.f32 %v848_v48 }
  0xe4   : >> { %1863 = vmatpush.msrb.mxu1 %v1152_v16  ;;  %1885 = vmatpush.msrb.mxu2 %v1264_v12  ;;  %v696_v10 = vunpack.c.0.s8 %v3433_v20  ;;  %v832_v11 = vunpack.c.1.s8 %v3443_v33  ;;  %v448_v16 = vunpack.c.1.s8 %v3448_v37  ;;  %v976_v12 = vcvt.s32.f32 %v464_v52 }
  0xe5   : >> { %1904 = vmatpush.msrb.mxu3 %v1400_v13  ;;  %1844 = vmatpush.msrb.mxu0 %v1016_v17  ;;  %v1104_v14 = vcvt.s32.f32 %v592_v53  ;;  %v576_v15 = vunpack.c.1.s8 %v3451_v40  ;;  %v688_v13 = vunpack.c.3.s8 %v3461_v59  ;;  %v3471_v17 = vld [vmem:[%s2811_s6 + $0x328] sm:$0xff]  ;;  %v1216_v18 = vcvt.s32.f32 %v704_v54 }
  0xe6   : >> { %1864 = vmatpush.msrb.mxu1 %v1144_v21  ;;  %1886 = vmatpush.msrb.mxu2 %v1256_v22  ;;  %v1352_v19 = vcvt.s32.f32 %v840_v57  ;;  %v824_v20 = vunpack.c.0.s8 %v3443_v33  ;;  %v440_v21 = vunpack.c.0.s8 %v3448_v37  ;;  %v3476_v22 = vld [vmem:[%s2811_s6 + $0x28] sm:$0xff]  ;;  %v968_v24 = vcvt.s32.f32 %v456_v61 }
  0xe7   : >> { %1905 = vmatpush.msrb.mxu3 %v1392_v25  ;;  %1845 = vmatpush.msrb.mxu0 %v1008_v28  ;;  %v1096_v25 = vcvt.s32.f32 %v584_v8  ;;  %v568_v26 = vunpack.c.0.s8 %v3451_v40  ;;  %v680_v29 = vunpack.c.2.s8 %v3461_v59  ;;  %v1208_v27 = vcvt.s32.f32 %v696_v10 }
  0xe8   : >> { %1865 = vmatpush.msrb.mxu1 %v1136_v30  ;;  %1887 = vmatpush.msrb.mxu2 %v1248_v34  ;;  %v1344_v28 = vcvt.s32.f32 %v832_v11  ;;  %v960_v30 = vcvt.s32.f32 %v448_v16  ;;  %v816_v31 = vunpack.c.3.s8 %v3471_v17  ;;  %v1088_v32 = vcvt.s32.f32 %v576_v15  ;;  %v3508_v15 = vld [vmem:[%s2811_s6 + $0x1f0] sm:$0xff] }
  0xe9   : >> { %1906 = vmatpush.msrb.mxu3 %v1384_v38  ;;  %1846 = vmatpush.msrb.mxu0 %v1000_v41  ;;  %v1200_v33 = vcvt.s32.f32 %v688_v13  ;;  %v432_v34 = vunpack.c.3.s8 %v3476_v22  ;;  %v560_v38 = vunpack.c.3.s8 %v3479_v23  ;;  %v1336_v39 = vcvt.s32.f32 %v824_v20 }
  0xea   : >> { %1866 = vmatpush.msrb.mxu1 %v1128_v42  ;;  %1888 = vmatpush.msrb.mxu2 %v1240_v45  ;;  %v952_v37 = vcvt.s32.f32 %v440_v21  ;;  %v672_v40 = vunpack.c.1.s8 %v3461_v59  ;;  %v808_v41 = vunpack.c.2.s8 %v3471_v17  ;;  %v1080_v42 = vcvt.s32.f32 %v568_v26 }
  0xeb   : >> { %1907 = vmatpush.msrb.mxu3 %v1376_v46  ;;  %1847 = vmatpush.msrb.mxu0 %v992_v47  ;;  %v1192_v43 = vcvt.s32.f32 %v680_v29  ;;  %v424_v44 = vunpack.c.2.s8 %v3476_v22  ;;  %v552_v45 = vunpack.c.2.s8 %v3479_v23  ;;  %v1328_v46 = vcvt.s32.f32 %v816_v31 }
  0xec   : >> { %1867 = vmatpush.msrb.mxu1 %v1120_v50  ;;  %1889 = vmatpush.msrb.mxu2 %v1232_v49  ;;  %v664_v47 = vunpack.c.0.s8 %v3461_v59  ;;  %v800_v48 = vunpack.c.1.s8 %v3471_v17  ;;  %v785_v50 = vunpack.c.3.s8 %v3487_v35  ;;  %v944_v49 = vcvt.s32.f32 %v432_v34 }
  0xed   : >> { %1908 = vmatpush.msrb.mxu3 %v1368_v55  ;;  %1848 = vmatpush.msrb.mxu0 %v984_v56  ;;  %v1072_v52 = vcvt.s32.f32 %v560_v38  ;;  %v416_v53 = vunpack.c.1.s8 %v3476_v22  ;;  %v544_v55 = vunpack.c.1.s8 %v3479_v23  ;;  %v1184_v56 = vcvt.s32.f32 %v672_v40 }
  0xee   : >> { %1868 = vmatpush.msrb.mxu1 %v1112_v60  ;;  %1890 = vmatpush.msrb.mxu2 %v1224_v58  ;;  %v1320_v54 = vcvt.s32.f32 %v808_v41  ;;  %v792_v57 = vunpack.c.0.s8 %v3471_v17  ;;  %v777_v59 = vunpack.c.2.s8 %v3487_v35  ;;  %v3501_v60 = vld [vmem:[%s2811_s6 + $0x3f0] sm:$0xff]  ;;  %v936_v58 = vcvt.s32.f32 %v424_v44 }
  0xef   : >> { %1909 = vmatpush.msrb.mxu3 %v1360_v9  ;;  %1849 = vmatpush.msrb.mxu0 %v976_v12  ;;  %v1064_v61 = vcvt.s32.f32 %v552_v45  ;;  %v408_v8 = vunpack.c.0.s8 %v3476_v22  ;;  %v3505_v9 = vld [vmem:[%s2811_s6 + $0xf0] sm:$0xff]  ;;  %v1176_v16 = vcvt.s32.f32 %v664_v47  ;;  %v1312_v12 = vcvt.s32.f32 %v800_v48 }
  0xf0   : >> { %1869 = vmatpush.msrb.mxu1 %v1104_v14  ;;  %1891 = vmatpush.msrb.mxu2 %v1216_v18  ;;  %v1297_v14 = vcvt.s32.f32 %v785_v50  ;;  %v928_v18 = vcvt.s32.f32 %v416_v53  ;;  %v913_v20 = vunpack.c.3.s8 %v3501_v60  ;;  %v536_v21 = vunpack.c.0.s8 %v3479_v23 }
  0xf1   : >> { %1910 = vmatpush.msrb.mxu3 %v1352_v19  ;;  %1850 = vmatpush.msrb.mxu0 %v968_v24  ;;  %v1056_v19 = vcvt.s32.f32 %v544_v55  ;;  %v1304_v22 = vcvt.s32.f32 %v792_v57  ;;  %v1289_v24 = vcvt.s32.f32 %v777_v59  ;;  %v920_v29 = vcvt.s32.f32 %v408_v8 }
  0xf2   : >> { %1870 = vmatpush.msrb.mxu1 %v1096_v25  ;;  %1892 = vmatpush.msrb.mxu2 %v1208_v27  ;;  %v529_v25 = vunpack.c.3.s8 %v3505_v9  ;;  %v657_v27 = vunpack.c.3.s8 %v3508_v15  ;;  %v905_v23 = vunpack.c.2.s8 %v3501_v60  ;;  %v521_v31 = vunpack.c.2.s8 %v3505_v9 }
  0xf3   : >> { %1911 = vmatpush.msrb.mxu3 %v1344_v28  ;;  %1851 = vmatpush.msrb.mxu0 %v960_v30  ;;  %v769_v28 = vunpack.c.1.s8 %v3487_v35  ;;  %v1425_v34 = vcvt.s32.f32 %v913_v20  ;;  %v1048_v38 = vcvt.s32.f32 %v536_v21  ;;  %v897_v40 = vunpack.c.1.s8 %v3501_v60 }
  0xf4   : >> { %1871 = vmatpush.msrb.mxu1 %v1088_v32  ;;  %1893 = vmatpush.msrb.mxu2 %v1200_v33  ;;  %v3518_v32 = vld [vmem:[%s2811_s6 + $0x2b0] sm:$0xff]  ;;  %v513_v41 = vunpack.c.1.s8 %v3505_v9  ;;  %v1169_v44 = vcvt.s32.f32 %v657_v27  ;;  %v641_v45 = vunpack.c.1.s8 %v3508_v15  ;;  %v1417_v48 = vcvt.s32.f32 %v905_v23 }
  0xf5   : >> { %1912 = vmatpush.msrb.mxu3 %v1336_v39  ;;  %1852 = vmatpush.msrb.mxu0 %v952_v37  ;;  %v1458_v10 = vpop.f32.mrf.mxu0  ;;  %v649_v39 = vunpack.c.2.s8 %v3508_v15  ;;  %v761_v37 = vunpack.c.0.s8 %v3487_v35  ;;  %v3531_v35 = vld [vmem:[%s2811_s6 + $0x3b0] sm:$0xff]  ;;  %v1281_v47 = vcvt.s32.f32 %v769_v28  ;;  %v889_v50 = vunpack.c.0.s8 %v3501_v60 }
  0xf6   : >> { %1872 = vmatpush.msrb.mxu1 %v1080_v42  ;;  %v1478_v11 = vpop.f32.mrf.mxu1  ;;  %1894 = vmatpush.msrb.mxu2 %v1192_v43  ;;  %v1041_v43 = vcvt.s32.f32 %v529_v25  ;;  %v1033_v53 = vcvt.s32.f32 %v521_v31  ;;  %v1409_v57 = vcvt.s32.f32 %v897_v40  ;;  %v1025_v59 = vcvt.s32.f32 %v513_v41  ;;  %v3562_v28 = vld [vmem:[%s2811_s6 + $0x370] sm:$0xff] }
  0xf7   : >> { %1913 = vmatpush.msrb.mxu3 %v1328_v46  ;;  %v1479_v13 = vadd.f32 %v1478_v11, %v1458_v10  ;;  %v1498_v17 = vpop.f32.mrf.mxu2  ;;  %1853 = vmatpush.msrb.mxu0 %v944_v49  ;;  %v753_v46 = vunpack.c.3.s8 %v3518_v32  ;;  %v505_v49 = vunpack.c.0.s8 %v3505_v9  ;;  %v1161_v55 = vcvt.s32.f32 %v649_v39 }
  0xf8   : >> { %1873 = vmatpush.msrb.mxu1 %v1072_v52  ;;  %1895 = vmatpush.msrb.mxu2 %v1184_v56  ;;  %v3540_v52 = vld [vmem:[%s2811_s6 + $0x1b0] sm:$0xff]  ;;  %v1273_v56 = vcvt.s32.f32 %v761_v37  ;;  %v745_v60 = vunpack.c.2.s8 %v3518_v32  ;;  %v1401_v11 = vcvt.s32.f32 %v889_v50  ;;  %v857_v31 = vunpack.c.0.s8 %v3531_v35 }
  0xf9   : >> { %1914 = vmatpush.msrb.mxu3 %v1320_v54  ;;  %v1499_v26 = vadd.f32 %v1498_v17, %v1479_v13  ;;  %1854 = vmatpush.msrb.mxu0 %v936_v58  ;;  %v1518_v30 = vpop.f32.mrf.mxu3  ;;  %v633_v54 = vunpack.c.0.s8 %v3508_v15  ;;  %v881_v58 = vunpack.c.3.s8 %v3531_v35  ;;  %v1265_v8 = vcvt.s32.f32 %v753_v46  ;;  %v3552_v15 = vld [vmem:[%s2811_s6 + $0x270] sm:$0xff] }
  0xfa   : >> { %1874 = vmatpush.msrb.mxu1 %v1064_v61  ;;  %1896 = vmatpush.msrb.mxu2 %v1176_v16  ;;  %v1153_v61 = vcvt.s32.f32 %v641_v45  ;;  %v625_v10 = vunpack.c.3.s8 %v3540_v52  ;;  %v1017_v16 = vcvt.s32.f32 %v505_v49  ;;  %v1257_v20 = vcvt.s32.f32 %v745_v60 }
  0xfb   : >> { %1915 = vmatpush.msrb.mxu3 %v1312_v12  ;;  %v1519_v33 = vadd.f32 %v1518_v30, %v1499_v26  ;;  %1817 = vmatmul.f32.vlgmr.msra.gmra.mxu2 %v3395_v36  ;;  %v737_v12 = vunpack.c.1.s8 %v3518_v32  ;;  %v1145_v13 = vcvt.s32.f32 %v633_v54  ;;  %v1393_v21 = vcvt.s32.f32 %v881_v58 }
  0xfc   : >> { %1855 = vmatpush.msrb.mxu0 %v928_v18  ;;  %1961 = vmatpush.msra.mxu2 %v1297_v14  ;;  %v873_v14 = vunpack.c.2.s8 %v3531_v35  ;;  %v617_v18 = vunpack.c.2.s8 %v3540_v52  ;;  %v1137_v26 = vcvt.s32.f32 %v625_v10  ;;  %v721_v27 = vunpack.c.3.s8 %v3552_v15 }
  0xfd   : >> { %1875 = vmatpush.msrb.mxu1 %v1056_v19  ;;  %v3526_v7 = vadd.f32 %v2623_v7, %v1519_v33   ;;  %1916 = vmatpush.msrb.mxu3 %v1304_v22  ;;  %v729_v19 = vunpack.c.0.s8 %v3518_v32  ;;  %v865_v22 = vunpack.c.1.s8 %v3531_v35  ;;  %v1249_v30 = vcvt.s32.f32 %v737_v12  ;;  %v3567_v33 = vld [vmem:[%s2811_s6 + $0x70] sm:$0xff] }
  0xfe   : >> { %1856 = vmatpush.msrb.mxu0 %v920_v29  ;;  %1837 = vmatmul.f32.vlgmr.msra.gmra.mxu3 %v3408_v51  ;;  %v609_v29 = vunpack.c.1.s8 %v3540_v52  ;;  %v1385_v23 = vcvt.s32.f32 %v873_v14  ;;  %v1129_v39 = vcvt.s32.f32 %v617_v18  ;;  %v601_v40 = vunpack.c.0.s8 %v3540_v52  ;;  %v3598_v18 = vld [vmem:[%s2811_s6 + $0x130] sm:$0xff] }
  0xff   : >> { %v3833_v42 = vmov %v3526_v7  ;;  %1962 = vmatpush.msra.mxu2 %v1289_v24  ;;  %v3537_v7 = vld [vmem:[%s2811_s6 + $0xb0] sm:$0xff]  ;;  %1981 = vmatpush.msra.mxu3 %v1425_v34  ;;  %v1241_v37 = vcvt.s32.f32 %v729_v19  ;;  %v1377_v41 = vcvt.s32.f32 %v865_v22  ;;  %v849_v45 = vunpack.c.3.s8 %v3562_v28 }
 0x100   : >> { %1876 = vmatpush.msrb.mxu1 %v1048_v38  ;;  %1777 = vmatmul.f32.vlgmr.msra.gmra.mxu0 %v3421_v62  ;;  %v497_v9 = vunpack.c.3.s8 %v3537_v7  ;;  %v489_v17 = vunpack.c.2.s8 %v3537_v7  ;;  %v481_v24 = vunpack.c.1.s8 %v3537_v7  ;;  %v473_v32 = vunpack.c.0.s8 %v3537_v7  ;;  %v3570_v34 = vld [vmem:[%s2811_s6 + $0x170] sm:$0xff] }
 0x101   : >> { %1797 = vmatmul.f32.vlgmr.msra.gmra.mxu1 %v3424_v63  ;;  %1921 = vmatpush.msra.mxu0 %v1041_v43  ;;  %v1121_v46 = vcvt.s32.f32 %v609_v29  ;;  %v1233_v35 = vcvt.s32.f32 %v721_v27  ;;  %v1369_v50 = vcvt.s32.f32 %v857_v31  ;;  %v705_v7 = vunpack.c.1.s8 %v3552_v15  ;;  %v3606_v31 = vld [vmem:[%s2811_s6 + $0x2f8] sm:$0xff] }
 0x102   : >> { %1941 = vmatpush.msra.mxu1 %v1169_v44  ;;  %1963 = vmatpush.msra.mxu2 %v1281_v47  ;;  %v1009_v25 = vcvt.s32.f32 %v497_v9  ;;  %v1001_v38 = vcvt.s32.f32 %v489_v17  ;;  %v993_v43 = vcvt.s32.f32 %v481_v24  ;;  %v713_v44 = vunpack.c.2.s8 %v3552_v15  ;;  %v3595_v17 = vld [vmem:[%s2811_s6 + $0x30] sm:$0xff] }
 0x103   : >> { %1982 = vmatpush.msra.mxu3 %v1417_v48  ;;  %1922 = vmatpush.msra.mxu0 %v1033_v53  ;;  %v465_v47 = vunpack.c.3.s8 %v3567_v33  ;;  %v593_v48 = vunpack.c.3.s8 %v3570_v34  ;;  %v985_v49 = vcvt.s32.f32 %v473_v32  ;;  %v841_v52 = vunpack.c.2.s8 %v3562_v28  ;;  %v3580_v53 = vld [vmem:[%s2811_s6 + $0x230] sm:$0xff] }
 0x104   : >> { %1942 = vmatpush.msra.mxu1 %v1161_v55  ;;  %1964 = vmatpush.msra.mxu2 %v1273_v56  ;;  %v1113_v55 = vcvt.s32.f32 %v601_v40  ;;  %v457_v56 = vunpack.c.2.s8 %v3567_v33  ;;  %v585_v54 = vunpack.c.2.s8 %v3570_v34  ;;  %v1361_v60 = vcvt.s32.f32 %v849_v45 }
 0x105   : >> { %1983 = vmatpush.msra.mxu3 %v1409_v57  ;;  %1923 = vmatpush.msra.mxu0 %v1025_v59  ;;  %v697_v57 = vunpack.c.0.s8 %v3552_v15  ;;  %v1225_v59 = vcvt.s32.f32 %v713_v44  ;;  %v833_v58 = vunpack.c.1.s8 %v3562_v28  ;;  %v1105_v9 = vcvt.s32.f32 %v593_v48 }
 0x106   : >> { %1943 = vmatpush.msra.mxu1 %v1153_v61  ;;  %1965 = vmatpush.msra.mxu2 %v1265_v8  ;;  %v449_v61 = vunpack.c.1.s8 %v3567_v33  ;;  %v977_v8 = vcvt.s32.f32 %v465_v47  ;;  %v577_v10 = vunpack.c.1.s8 %v3570_v34  ;;  %v1217_v12 = vcvt.s32.f32 %v705_v7 }
 0x107   : >> { %1984 = vmatpush.msra.mxu3 %v1401_v11  ;;  %1924 = vmatpush.msra.mxu0 %v1017_v16  ;;  %v689_v11 = vunpack.c.3.s8 %v3580_v53  ;;  %v3590_v16 = vld [vmem:[%s2811_s6 + $0x330] sm:$0xff]  ;;  %v1353_v14 = vcvt.s32.f32 %v841_v52  ;;  %v825_v15 = vunpack.c.0.s8 %v3562_v28  ;;  %v969_v19 = vcvt.s32.f32 %v457_v56 }
 0x108   : >> { %1944 = vmatpush.msra.mxu1 %v1145_v13  ;;  %1966 = vmatpush.msra.mxu2 %v1257_v20  ;;  %v441_v13 = vunpack.c.0.s8 %v3567_v33  ;;  %v1097_v20 = vcvt.s32.f32 %v585_v54  ;;  %v569_v22 = vunpack.c.0.s8 %v3570_v34  ;;  %v1345_v24 = vcvt.s32.f32 %v833_v58 }
 0x109   : >> { %1985 = vmatpush.msra.mxu3 %v1393_v21  ;;  %1925 = vmatpush.msra.mxu0 %v1009_v25  ;;  %v1209_v21 = vcvt.s32.f32 %v697_v57  ;;  %v961_v25 = vcvt.s32.f32 %v449_v61  ;;  %v817_v29 = vunpack.c.3.s8 %v3590_v16  ;;  %v1089_v27 = vcvt.s32.f32 %v577_v10  ;;  %v3627_v10 = vld [vmem:[%s2811_s6 + $0x1f8] sm:$0xff] }
 0x10a   : >> { %1945 = vmatpush.msra.mxu1 %v1137_v26  ;;  %1967 = vmatpush.msra.mxu2 %v1249_v30  ;;  %v681_v26 = vunpack.c.2.s8 %v3580_v53  ;;  %v1201_v28 = vcvt.s32.f32 %v689_v11  ;;  %v433_v30 = vunpack.c.3.s8 %v3595_v17  ;;  %v1337_v32 = vcvt.s32.f32 %v825_v15 }
 0x10b   : >> { %1986 = vmatpush.msra.mxu3 %v1385_v23  ;;  %1926 = vmatpush.msra.mxu0 %v1001_v38  ;;  %v561_v23 = vunpack.c.3.s8 %v3598_v18  ;;  %v953_v33 = vcvt.s32.f32 %v441_v13  ;;  %v673_v34 = vunpack.c.1.s8 %v3580_v53  ;;  %v809_v38 = vunpack.c.2.s8 %v3590_v16 }
 0x10c   : >> { %1946 = vmatpush.msra.mxu1 %v1129_v39  ;;  %1968 = vmatpush.msra.mxu2 %v1241_v37  ;;  %v1081_v39 = vcvt.s32.f32 %v569_v22  ;;  %v425_v37 = vunpack.c.2.s8 %v3595_v17  ;;  %v553_v40 = vunpack.c.2.s8 %v3598_v18  ;;  %v1329_v44 = vcvt.s32.f32 %v817_v29 }
 0x10d   : >> { %1987 = vmatpush.msra.mxu3 %v1377_v41  ;;  %1927 = vmatpush.msra.mxu0 %v993_v43  ;;  %v665_v41 = vunpack.c.0.s8 %v3580_v53  ;;  %v1193_v43 = vcvt.s32.f32 %v681_v26  ;;  %v801_v45 = vunpack.c.1.s8 %v3590_v16  ;;  %v1073_v47 = vcvt.s32.f32 %v561_v23  ;;  %v3619_v53 = vld [vmem:[%s2811_s6 + $0x3f8] sm:$0xff] }
 0x10e   : >> { %1947 = vmatpush.msra.mxu1 %v1121_v46  ;;  %1969 = vmatpush.msra.mxu2 %v1233_v35  ;;  %v786_v46 = vunpack.c.3.s8 %v3606_v31  ;;  %v945_v35 = vcvt.s32.f32 %v433_v30  ;;  %v417_v48 = vunpack.c.1.s8 %v3595_v17  ;;  %v545_v7 = vunpack.c.1.s8 %v3598_v18 }
 0x10f   : >> { %1988 = vmatpush.msra.mxu3 %v1369_v50  ;;  %1928 = vmatpush.msra.mxu0 %v985_v49  ;;  %v1185_v50 = vcvt.s32.f32 %v673_v34  ;;  %v1321_v49 = vcvt.s32.f32 %v809_v38  ;;  %v793_v52 = vunpack.c.0.s8 %v3590_v16  ;;  %v1065_v56 = vcvt.s32.f32 %v553_v40 }
 0x110   : >> { %1948 = vmatpush.msra.mxu1 %v1113_v55  ;;  %1970 = vmatpush.msra.mxu2 %v1225_v59  ;;  %v937_v55 = vcvt.s32.f32 %v425_v37  ;;  %v1177_v54 = vcvt.s32.f32 %v665_v41  ;;  %v409_v57 = vunpack.c.0.s8 %v3595_v17  ;;  %v3623_v59 = vld [vmem:[%s2811_s6 + $0xf8] sm:$0xff]  ;;  %v1313_v61 = vcvt.s32.f32 %v801_v45 }
 0x111   : >> { %1989 = vmatpush.msra.mxu3 %v1361_v60  ;;  %1929 = vmatpush.msra.mxu0 %v977_v8  ;;  %v1298_v8 = vcvt.s32.f32 %v786_v46  ;;  %v537_v15 = vunpack.c.0.s8 %v3598_v18  ;;  %v1057_v13 = vcvt.s32.f32 %v545_v7  ;;  %v1305_v17 = vcvt.s32.f32 %v793_v52  ;;  %v3649_v41 = vld [vmem:[%s2811_s6 + $0x3b8] sm:$0xff] }
 0x112   : >> { %1949 = vmatpush.msra.mxu1 %v1105_v9  ;;  %1971 = vmatpush.msra.mxu2 %v1217_v12  ;;  %v778_v9 = vunpack.c.2.s8 %v3606_v31  ;;  %v929_v12 = vcvt.s32.f32 %v417_v48  ;;  %v658_v22 = vunpack.c.3.s8 %v3627_v10  ;;  %v906_v18 = vunpack.c.2.s8 %v3619_v53 }
 0x113   : >> { %1990 = vmatpush.msra.mxu3 %v1353_v14  ;;  %1930 = vmatpush.msra.mxu0 %v969_v19  ;;  %v914_v14 = vunpack.c.3.s8 %v3619_v53  ;;  %v530_v19 = vunpack.c.3.s8 %v3623_v59  ;;  %v522_v29 = vunpack.c.2.s8 %v3623_v59  ;;  %v1049_v30 = vcvt.s32.f32 %v537_v15 }
 0x114   : >> { %1950 = vmatpush.msra.mxu1 %v1097_v20  ;;  %1972 = vmatpush.msra.mxu2 %v1209_v21  ;;  %v921_v21 = vcvt.s32.f32 %v409_v57  ;;  %v1290_v26 = vcvt.s32.f32 %v778_v9  ;;  %v650_v23 = vunpack.c.2.s8 %v3627_v10  ;;  %v898_v34 = vunpack.c.1.s8 %v3619_v53 }
 0x115   : >> { %1991 = vmatpush.msra.mxu3 %v1345_v24  ;;  %1931 = vmatpush.msra.mxu0 %v961_v25  ;;  %v770_v24 = vunpack.c.1.s8 %v3606_v31  ;;  %v514_v38 = vunpack.c.1.s8 %v3623_v59  ;;  %v1170_v37 = vcvt.s32.f32 %v658_v22  ;;  %v890_v46 = vunpack.c.0.s8 %v3619_v53 }
 0x116   : >> { %1951 = vmatpush.msra.mxu1 %v1089_v27  ;;  %1973 = vmatpush.msra.mxu2 %v1201_v28  ;;  %v1426_v28 = vcvt.s32.f32 %v914_v14  ;;  %v882_v53 = vunpack.c.3.s8 %v3649_v41  ;;  %vm2155_vm0 = vcmask (%p260_p6), 1041408   ;;  %vm2157_vm1 = vcmask (%p260_p6), 1045508  }
 0x117   : >> { %1992 = vmatpush.msra.mxu3 %v1337_v32  ;;  %1932 = vmatpush.msra.mxu0 %v953_v33  ;;  %v1538_v60 = vpop.f32.mrf.mxu0  ;;  %v762_v32 = vunpack.c.0.s8 %v3606_v31  ;;  %v3640_v33 = vld [vmem:[%s2811_s6 + $0x2b8] sm:$0xff]  ;;  %v1282_v40 = vcvt.s32.f32 %v770_v24  ;;  %v642_v31 = vunpack.c.1.s8 %v3627_v10  ;;  %v1026_v7 = vcvt.s32.f32 %v514_v38 }
 0x118   : >> { %1952 = vmatpush.msra.mxu1 %v1081_v39  ;;  %v1558_v58 = vpop.f32.mrf.mxu1  ;;  %1974 = vmatpush.msra.mxu2 %v1193_v43  ;;  %v1578_v16 = vpop.f32.mrf.mxu2  ;;  %v1042_v39 = vcvt.s32.f32 %v530_v19  ;;  %v1418_v43 = vcvt.s32.f32 %v906_v18  ;;  %v754_v45 = vunpack.c.3.s8 %v3640_v33  ;;  %v746_v52 = vunpack.c.2.s8 %v3640_v33  ;;  %v3688_v18 = vld [vmem:[%s2811_s6 + $0x178] sm:$0xff] }
 0x119   : >> { %1993 = vmatpush.msra.mxu3 %v1329_v44  ;;  %v1559_v11 = vadd.f32 %v1558_v58, %v1538_v60  ;;  %1933 = vmatpush.msra.mxu0 %v945_v35  ;;  %v1034_v44 = vcvt.s32.f32 %v522_v29  ;;  %v3655_v35 = vld [vmem:[%s2811_s6 + $0xb8] sm:$0xff]  ;;  %v1274_v48 = vcvt.s32.f32 %v762_v32  ;;  %v738_v57 = vunpack.c.1.s8 %v3640_v33 }
 0x11a   : >> { %1953 = vmatpush.msra.mxu1 %v1073_v47  ;;  %1975 = vmatpush.msra.mxu2 %v1185_v50  ;;  %v1162_v47 = vcvt.s32.f32 %v650_v23  ;;  %v506_v50 = vunpack.c.0.s8 %v3623_v59  ;;  %v874_v59 = vunpack.c.2.s8 %v3649_v41  ;;  %v490_v60 = vunpack.c.2.s8 %v3655_v35 }
 0x11b   : >> { %1994 = vmatpush.msra.mxu3 %v1321_v49  ;;  %v1579_v20 = vadd.f32 %v1578_v16, %v1559_v11  ;;  %1934 = vmatpush.msra.mxu0 %v937_v55  ;;  %v1598_v25 = vpop.f32.mrf.mxu3  ;;  %v634_v49 = vunpack.c.0.s8 %v3627_v10  ;;  %v1154_v55 = vcvt.s32.f32 %v642_v31  ;;  %v730_v9 = vunpack.c.0.s8 %v3640_v33  ;;  %v3674_v10 = vld [vmem:[%s2811_s6 + $0x278] sm:$0xff] }
 0x11c   : >> { %1954 = vmatpush.msra.mxu1 %v1065_v56  ;;  %1976 = vmatpush.msra.mxu2 %v1177_v54  ;;  %v498_v56 = vunpack.c.3.s8 %v3655_v35  ;;  %v1018_v58 = vcvt.s32.f32 %v506_v50  ;;  %v1258_v11 = vcvt.s32.f32 %v746_v52  ;;  %v1394_v16 = vcvt.s32.f32 %v882_v53 }
 0x11d   : >> { %1995 = vmatpush.msra.mxu3 %v1313_v61  ;;  %v1599_v27 = vadd.f32 %v1598_v25, %v1579_v20  ;;  %1897 = vmatmul.f32.vlgmr.msrb.gmra.mxu2 %v3395_v36  ;;  %v1146_v61 = vcvt.s32.f32 %v634_v49  ;;  %v482_v14 = vunpack.c.1.s8 %v3655_v35  ;;  %v3680_v20 = vld [vmem:[%s2811_s6 + $0x378] sm:$0xff]  ;;  %v1002_v22 = vcvt.s32.f32 %v490_v60 }
 0x11e   : >> { %1935 = vmatpush.msra.mxu0 %v929_v12  ;;  %2041 = vmatpush.msrb.mxu2 %v1298_v8  ;;  %v866_v12 = vunpack.c.1.s8 %v3649_v41  ;;  %v1010_v15 = vcvt.s32.f32 %v498_v56  ;;  %v722_v24 = vunpack.c.3.s8 %v3674_v10  ;;  %v858_v25 = vunpack.c.0.s8 %v3649_v41 }
 0x11f   : >> { %1955 = vmatpush.msra.mxu1 %v1057_v13  ;;  %v3645_v6 = vadd.f32 %v2619_v6, %v1599_v27   ;;  %1996 = vmatpush.msra.mxu3 %v1305_v17  ;;  %v1250_v17 = vcvt.s32.f32 %v738_v57  ;;  %v1242_v27 = vcvt.s32.f32 %v730_v9  ;;  %v994_v32 = vcvt.s32.f32 %v482_v14 }
 0x120   : >> { %1936 = vmatpush.msra.mxu0 %v921_v21  ;;  %1917 = vmatmul.f32.vlgmr.msrb.gmra.mxu3 %v3408_v51  ;;  %v1410_v51 = vcvt.s32.f32 %v898_v34  ;;  %v1386_v21 = vcvt.s32.f32 %v874_v59  ;;  %v1378_v23 = vcvt.s32.f32 %v866_v12  ;;  %v714_v33 = vunpack.c.2.s8 %v3674_v10 }
 0x121   : >> { %v3834_v36 = vmov %v3645_v6  ;;  %2042 = vmatpush.msrb.mxu2 %v1290_v26  ;;  %v3658_v6 = vld [vmem:[%s2811_s6 + $0x1b8] sm:$0xff]  ;;  %2061 = vmatpush.msrb.mxu3 %v1426_v28  ;;  %v474_v28 = vunpack.c.0.s8 %v3655_v35  ;;  %v850_v34 = vunpack.c.3.s8 %v3680_v20  ;;  %v1234_v31 = vcvt.s32.f32 %v722_v24 }
 0x122   : >> { %1956 = vmatpush.msra.mxu1 %v1049_v30  ;;  %1857 = vmatmul.f32.vlgmr.msrb.gmra.mxu0 %v3421_v62  ;;  %v626_v54 = vunpack.c.3.s8 %v3658_v6  ;;  %v1266_v62 = vcvt.s32.f32 %v754_v45  ;;  %v618_v8 = vunpack.c.2.s8 %v3658_v6  ;;  %v610_v19 = vunpack.c.1.s8 %v3658_v6  ;;  %v3685_v26 = vld [vmem:[%s2811_s6 + $0x78] sm:$0xff] }
 0x123   : >> { %1877 = vmatmul.f32.vlgmr.msrb.gmra.mxu1 %v3424_v63  ;;  %2001 = vmatpush.msrb.mxu0 %v1042_v39  ;;  %v1402_v63 = vcvt.s32.f32 %v890_v46  ;;  %v602_v30 = vunpack.c.0.s8 %v3658_v6  ;;  %v466_v39 = vunpack.c.3.s8 %v3685_v26  ;;  %v1370_v41 = vcvt.s32.f32 %v858_v25  ;;  %v3701_v6 = vld [vmem:[%s2811_s6 + $0x238] sm:$0xff]  ;;  %v2455_v25 = vld.sshfl [vmem:[#allocation1 + $0x10] sm:$0xff pattern:$0x73625140] }
 0x124   : >> { %2021 = vmatpush.msrb.mxu1 %v1170_v37  ;;  %2043 = vmatpush.msrb.mxu2 %v1282_v40  ;;  %v1138_v13 = vcvt.s32.f32 %v626_v54  ;;  %v1130_v29 = vcvt.s32.f32 %v618_v8  ;;  %v1122_v38 = vcvt.s32.f32 %v610_v19  ;;  %v594_v37 = vunpack.c.3.s8 %v3688_v18 }
 0x125   : >> { %2062 = vmatpush.msrb.mxu3 %v1418_v43  ;;  %2002 = vmatpush.msrb.mxu0 %v1034_v44  ;;  %v706_v40 = vunpack.c.1.s8 %v3674_v10  ;;  %v842_v43 = vunpack.c.2.s8 %v3680_v20  ;;  %v986_v44 = vcvt.s32.f32 %v474_v28  ;;  %v1114_v45 = vcvt.s32.f32 %v602_v30 }
 0x126   : >> { %2022 = vmatpush.msrb.mxu1 %v1162_v47  ;;  %2044 = vmatpush.msrb.mxu2 %v1274_v48  ;;  %v458_v46 = vunpack.c.2.s8 %v3685_v26  ;;  %v586_v35 = vunpack.c.2.s8 %v3688_v18  ;;  %v1226_v47 = vcvt.s32.f32 %v714_v33  ;;  %v1362_v48 = vcvt.s32.f32 %v850_v34 }
 0x127   : >> { %2063 = vmatpush.msrb.mxu3 %v1410_v51  ;;  %2003 = vmatpush.msrb.mxu0 %v1026_v7  ;;  %v698_v50 = vunpack.c.0.s8 %v3674_v10  ;;  %v834_v49 = vunpack.c.1.s8 %v3680_v20  ;;  %v978_v51 = vcvt.s32.f32 %v466_v39  ;;  %v1106_v7 = vcvt.s32.f32 %v594_v37  ;;  %v3718_v10 = vld [vmem:[%s2811_s6 + $0x138] sm:$0xff] }
 0x128   : >> { %2023 = vmatpush.msrb.mxu1 %v1154_v55  ;;  %2045 = vmatpush.msrb.mxu2 %v1266_v62  ;;  %v1218_v52 = vcvt.s32.f32 %v706_v40  ;;  %v450_v53 = vunpack.c.1.s8 %v3685_v26  ;;  %v1354_v55 = vcvt.s32.f32 %v842_v43  ;;  %v578_v56 = vunpack.c.1.s8 %v3688_v18  ;;  %v3710_v62 = vld [vmem:[%s2811_s6 + $0x338] sm:$0xff] }
 0x129   : >> { %2064 = vmatpush.msrb.mxu3 %v1402_v63  ;;  %2004 = vmatpush.msrb.mxu0 %v1018_v58  ;;  %v690_v54 = vunpack.c.3.s8 %v3701_v6  ;;  %v826_v57 = vunpack.c.0.s8 %v3680_v20  ;;  %v970_v63 = vcvt.s32.f32 %v458_v46  ;;  %v1098_v59 = vcvt.s32.f32 %v586_v35  ;;  %v3714_v58 = vld [vmem:[%s2811_s6 + $0x38] sm:$0xff] }
 0x12a   : >> { %2024 = vmatpush.msrb.mxu1 %v1146_v61  ;;  %2046 = vmatpush.msrb.mxu2 %v1258_v11  ;;  %v442_v60 = vunpack.c.0.s8 %v3685_v26  ;;  %v1210_v61 = vcvt.s32.f32 %v698_v50  ;;  %v1346_v8 = vcvt.s32.f32 %v834_v49  ;;  %v570_v9 = vunpack.c.0.s8 %v3688_v18  ;;  %v2456_v40 = vld.sshfl [vmem:[#allocation1 + $0x18] sm:$0xff pattern:$0x73625140] }
 0x12b   : >> { %2065 = vmatpush.msrb.mxu3 %v1394_v16  ;;  %2005 = vmatpush.msrb.mxu0 %v1010_v15  ;;  %v962_v11 = vcvt.s32.f32 %v450_v53  ;;  %v682_v16 = vunpack.c.2.s8 %v3701_v6  ;;  %v818_v12 = vunpack.c.3.s8 %v3710_v62  ;;  %v1090_v14 = vcvt.s32.f32 %v578_v56 }
 0x12c   : >> { %2025 = vmatpush.msrb.mxu1 %v1138_v13  ;;  %2047 = vmatpush.msrb.mxu2 %v1250_v17  ;;  %v1202_v15 = vcvt.s32.f32 %v690_v54  ;;  %v1338_v13 = vcvt.s32.f32 %v826_v57  ;;  %v434_v17 = vunpack.c.3.s8 %v3714_v58  ;;  %v954_v19 = vcvt.s32.f32 %v442_v60 }
 0x12d   : >> { %2066 = vmatpush.msrb.mxu3 %v1386_v21  ;;  %2006 = vmatpush.msrb.mxu0 %v1002_v22  ;;  %v562_v20 = vunpack.c.3.s8 %v3718_v10  ;;  %v674_v21 = vunpack.c.1.s8 %v3701_v6  ;;  %v810_v22 = vunpack.c.2.s8 %v3710_v62  ;;  %v1082_v24 = vcvt.s32.f32 %v570_v9 }
 0x12e   : >> { %2026 = vmatpush.msrb.mxu1 %v1130_v29  ;;  %2048 = vmatpush.msrb.mxu2 %v1242_v27  ;;  %v1194_v26 = vcvt.s32.f32 %v682_v16  ;;  %v1330_v18 = vcvt.s32.f32 %v818_v12  ;;  %v426_v29 = vunpack.c.2.s8 %v3714_v58  ;;  %v554_v27 = vunpack.c.2.s8 %v3718_v10 }
 0x12f   : >> { %2067 = vmatpush.msrb.mxu3 %v1378_v23  ;;  %2007 = vmatpush.msrb.mxu0 %v994_v32  ;;  %v946_v28 = vcvt.s32.f32 %v434_v17  ;;  %v666_v30 = vunpack.c.0.s8 %v3701_v6  ;;  %v802_v23 = vunpack.c.1.s8 %v3710_v62  ;;  %v1074_v32 = vcvt.s32.f32 %v562_v20  ;;  %v2457_v6 = vld.sshfl [vmem:[#allocation1] sm:$0xff pattern:$0x73625140] }
 0x130   : >> { %2027 = vmatpush.msrb.mxu1 %v1122_v38  ;;  %2049 = vmatpush.msrb.mxu2 %v1234_v31  ;;  %v1186_v33 = vcvt.s32.f32 %v674_v21  ;;  %v1322_v34 = vcvt.s32.f32 %v810_v22  ;;  %v418_v38 = vunpack.c.1.s8 %v3714_v58  ;;  %v546_v31 = vunpack.c.1.s8 %v3718_v10 }
 0x131   : >> { %2068 = vmatpush.msrb.mxu3 %v1370_v41  ;;  %2008 = vmatpush.msrb.mxu0 %v986_v44  ;;  %v794_v41 = vunpack.c.0.s8 %v3710_v62  ;;  %v1066_v46 = vcvt.s32.f32 %v554_v27  ;;  %v410_v35 = vunpack.c.0.s8 %v3714_v58  ;;  %v1314_v50 = vcvt.s32.f32 %v802_v23 }
 0x132   : >> { %2028 = vmatpush.msrb.mxu1 %v1114_v45  ;;  %2050 = vmatpush.msrb.mxu2 %v1226_v47  ;;  %v938_v45 = vcvt.s32.f32 %v426_v29  ;;  %v2458_v47 = vld.sshfl [vmem:[#allocation1 + $0x8] sm:$0xff pattern:$0x73625140]  ;;  %v538_v49 = vunpack.c.0.s8 %v3718_v10  ;;  %v1058_v53 = vcvt.s32.f32 %v546_v31  ;;  %vm2159_vm2 = vcmask (%p260_p6), 1043456  }
 0x133   : >> { %2069 = vmatpush.msrb.mxu3 %v1362_v48  ;;  %2009 = vmatpush.msrb.mxu0 %v978_v51  ;;  %v1178_v48 = vcvt.s32.f32 %v666_v30  ;;  %v922_v54 = vcvt.s32.f32 %v410_v35 }
 0x134   : >> { %2029 = vmatpush.msrb.mxu1 %v1106_v7  ;;  %2051 = vmatpush.msrb.mxu2 %v1218_v52  ;;  %v930_v7 = vcvt.s32.f32 %v418_v38  ;;  %v1050_v57 = vcvt.s32.f32 %v538_v49 }
 0x135   : >> { %2070 = vmatpush.msrb.mxu3 %v1354_v55  ;;  %2010 = vmatpush.msrb.mxu0 %v970_v63  ;;  %v1306_v55 = vcvt.s32.f32 %v794_v41 }
 0x136   : >> { %2030 = vmatpush.msrb.mxu1 %v1098_v59  ;;  %2052 = vmatpush.msrb.mxu2 %v1210_v61 }
 0x137   : >> { %2071 = vmatpush.msrb.mxu3 %v1346_v8  ;;  %1977 = vmatmul.f32.vlgmr.msra.gmra.mxu2 %v2455_v25 }
 0x138   : >> { %2011 = vmatpush.msrb.mxu0 %v962_v11  ;;  %2031 = vmatpush.msrb.mxu1 %v1090_v14 }
 0x139   : >> { %2053 = vmatpush.msrb.mxu2 %v1202_v15  ;;  %2072 = vmatpush.msrb.mxu3 %v1338_v13  ;;  %v1618_v39 = vpop.f32.mrf.mxu0 }
 0x13a   : >> { %2012 = vmatpush.msrb.mxu0 %v954_v19  ;;  %v1638_v37 = vpop.f32.mrf.mxu1  ;;  %1997 = vmatmul.f32.vlgmr.msra.gmra.mxu3 %v2456_v40  ;;  %v1658_v44 = vpop.f32.mrf.mxu2 }
 0x13b   : >> { %2032 = vmatpush.msrb.mxu1 %v1082_v24  ;;  %v1639_v43 = vadd.f32 %v1638_v37, %v1618_v39  ;;  %2054 = vmatpush.msrb.mxu2 %v1194_v26 }
 0x13c   : >> { %2073 = vmatpush.msrb.mxu3 %v1330_v18  ;;  %1937 = vmatmul.f32.vlgmr.msra.gmra.mxu0 %v2457_v6 }
 0x13d   : >> { %1957 = vmatmul.f32.vlgmr.msra.gmra.mxu1 %v2458_v47  ;;  %v1659_v51 = vadd.f32 %v1658_v44, %v1639_v43  ;;  %2013 = vmatpush.msrb.mxu0 %v946_v28  ;;  %v1678_v52 = vpop.f32.mrf.mxu3  ;;  %v2089_v43 = vld [vmem:[%s250_s22] sm:$0xff] (%p260_p6) }
 0x13e   : >> { %2033 = vmatpush.msrb.mxu1 %v1074_v32  ;;  %2055 = vmatpush.msrb.mxu2 %v1186_v33  ;;  %v2115_v44 = vld [vmem:[%s255_s25] sm:$0xff] (%p260_p6)  ;;  %v2093_v35 = vperm.slane (%p260_p6), %v2089_v43, 2  ;;  %s2180_s25 = scalar_lea.hbm (%p260_p6), %s3827_s4, %s2329_s20 }
 0x13f   : >> { %2074 = vmatpush.msrb.mxu3 %v1322_v34  ;;  %v1679_v56 = vadd.f32 %v1678_v52, %v1659_v51  ;;  %2014 = vmatpush.msrb.mxu0 %v938_v45  ;;  %v2091_v45 = vperm.slane (%p260_p6), %v2089_v43, 0  ;;  %v2096_v52 = vperm.slane (%p260_p6), %v2089_v43, 5  ;;  %s2184_s26 = sshll.u32 (%p260_p6), %s2180_s25, 4  ;;  %s2185_s26 = int_to_ptr.hbm [resolvable:$true] %s2184_s26 }
 0x140   : >> { %2034 = vmatpush.msrb.mxu1 %v1066_v46  ;;  %2056 = vmatpush.msrb.mxu2 %v1178_v48  ;;  %v2092_v46 = vperm.slane (%p260_p6), %v2089_v43, 1  ;;  %v2117_v48 = vperm.slane (%p260_p6), %v2115_v44, 0  ;;  %s2503_s6 = sshra.s32 (%p260_p6), %s2185_s26, 4  ;;  %s2504_s6 = int_to_ptr.hbm [resolvable:$true] %s2503_s6 }
 0x141   : >> { %2075 = vmatpush.msrb.mxu3 %v1314_v50  ;;  %v3736_v5 = vadd.f32 %v2615_v5, %v1679_v56   ;;  %2057 = vmatmul.f32.vlgmr.msrb.gmra.mxu2 %v2455_v25  ;;  %s2505_s7 = scalar_lea.hbm (%p260_p6), %s2504_s6, 16  ;;  %p2510_p3 = scmp.lt.s32.totalorder (%p260_p6), %s2504_s6, %s3827_s4 }
 0x142   : >> { %2015 = vmatpush.msrb.mxu0 %v930_v7  ;;  %2035 = vmatpush.msrb.mxu1 %v1058_v53  ;;  %v3844_v7 = vmov %v3833_v42  ;;  %v2108_v50 = vmul.f32 (%p260_p6), %v2092_v46, %v3834_v36  ;;  %v2097_v53 = vperm.slane (%p260_p6), %v2089_v43, 6  ;;  %p2506_p13 = scmp.ne.s32.totalorder (%p260_p6), %s2504_s6, %s2505_s7  ;;  %p2511_p4 = scmp.lt.s32.totalorder (%p260_p6), %s2509_s9, %s2505_s7 }
 0x143   : >> { %v3835_v62 = vmov %v3736_v5  ;;  %2076 = vmatpush.msrb.mxu3 %v1306_v55  ;;  %v2095_v7 = vperm.slane (%p260_p6), %v2089_v43, 4  ;;  %v2098_v55 = vperm.slane (%p260_p6), %v2089_v43, 7 }
 0x144   : >> { %2077 = vmatmul.f32.vlgmr.msrb.gmra.mxu3 %v2456_v40  ;;  %2016 = vmatpush.msrb.mxu0 %v922_v54  ;;  %v2109_v49 = vmul.f32 (%p260_p6), %v2093_v35, %v3835_v62  ;;  %p2507_p1 = pnand (%p260_p6), %p2506_p13, %p2706_p10  ;;  %p2512_p5 = por (%p260_p6), %p2511_p4, %p2510_p3 }
 0x145   : >> { %2036 = vmatpush.msrb.mxu1 %v1050_v57  ;;  %2017 = vmatmul.f32.vlgmr.msrb.gmra.mxu0 %v2457_v6  ;;  %v3843_v6 = vmov %v3834_v36 }
 0x146   : >> { %2037 = vmatmul.f32.vlgmr.msrb.gmra.mxu1 %v2458_v47  ;;  %v2094_v47 = vperm.slane (%p260_p6), %v2089_v43, 3  ;;  %v2107_v6 = vmul.f32 (%p260_p6), %v2091_v45, %v3833_v42  ;;  %p2508_p2 = pneg (%p260_p6), %p2507_p1 }
 0x148   : > { %v2133_v56 = vadd.f32 (%p260_p6), %v2117_v48, %v2107_v6  ;;  %p2513_p7 = pnand (%p260_p6), %p2512_p5, %p2508_p2 }
 0x15b   : >> { %v1698_v63 = vpop.f32.mrf.mxu0 }
 0x15c   : >> { %v1718_v59 = vpop.f32.mrf.mxu1  ;;  %v1738_v58 = vpop.f32.mrf.mxu2 }
 0x15d   : >> { %v1719_v60 = vadd.f32 %v1718_v59, %v1698_v63 }
 0x15f   : >> { %v1739_v61 = vadd.f32 %v1738_v58, %v1719_v60  ;;  %v1758_v8 = vpop.f32.mrf.mxu3 }
 0x161   : >> { %v1759_v9 = vadd.f32 %v1758_v8, %v1739_v61  ;;  %v2121_v8 = vperm.slane (%p260_p6), %v2115_v44, 4 }
 0x163   : >> { %v2084_v10 = vadd.f32 %v2611_v4, %v1759_v9   ;;  %v2122_v9 = vperm.slane (%p260_p6), %v2115_v44, 5 }
 0x165   : > { %v2110_v51 = vmul.f32 (%p260_p6), %v2094_v47, %v2084_v10 }
 0x17d   : >> { %v1778_v11 = vpop.f32.mrf.mxu0 }
 0x17e   : >> { %v1798_v5 = vpop.f32.mrf.mxu1  ;;  %v1818_v12 = vpop.f32.mrf.mxu2 }
 0x17f   : >> { %v1799_v16 = vadd.f32 %v1798_v5, %v1778_v11  ;;  %v3842_v5 = vmov %v3835_v62  ;;  %v2124_v11 = vperm.slane (%p260_p6), %v2115_v44, 7 }
 0x181   : >> { %v1819_v14 = vadd.f32 %v1818_v12, %v1799_v16  ;;  %v1838_v15 = vpop.f32.mrf.mxu3 }
 0x183   : >> { %v1839_v13 = vadd.f32 %v1838_v15, %v1819_v14 }
 0x185   : >> { %v3740_v3 = vadd.f32 %v2607_v3, %v1839_v13  }
 0x187   : >> { %v3836_v17 = vmov %v3740_v3 }
 0x188   : > { %v2111_v59 = vmul.f32 (%p260_p6), %v2095_v7, %v3836_v17 }
 0x18a   : > { %v2137_v12 = vadd.f32 (%p260_p6), %v2121_v8, %v2111_v59 }
 0x19f   : >> { %v1858_v19 = vpop.f32.mrf.mxu0 }
 0x1a0   : >> { %v1878_v20 = vpop.f32.mrf.mxu1  ;;  %v1898_v22 = vpop.f32.mrf.mxu2 }
 0x1a1   : >> { %v1879_v21 = vadd.f32 %v1878_v20, %v1858_v19 }
 0x1a3   : >> { %v1899_v24 = vadd.f32 %v1898_v22, %v1879_v21  ;;  %v1918_v25 = vpop.f32.mrf.mxu3 }
 0x1a5   : >> { %v1919_v26 = vadd.f32 %v1918_v25, %v1899_v24 }
 0x1a7   : >> { %v2086_v18 = vadd.f32 %v2603_v2, %v1919_v26  }
 0x1a9   : >> { %v3839_v2 = vmov %v2086_v18  ;;  %v2112_v60 = vmul.f32 (%p260_p6), %v2096_v52, %v2086_v18 }
 0x1aa   : > { %v2120_v2 = vperm.slane (%p260_p6), %v2115_v44, 3 }
 0x1ab   : > { %v2138_v15 = vadd.f32 (%p260_p6), %v2122_v9, %v2112_v60 }
 0x1ac   : > { %v2136_v63 = vadd.f32 (%p260_p6), %v2120_v2, %v2110_v51 }
 0x1ad   : > { %v2152_v19 = vrot.slane (%p260_p6), %v2138_v15, 6 }
 0x1ae   : > { %v2151_v62 = vrot.slane (%p260_p6), %v2136_v63, 2 }
 0x1af   : > { %v2161_v22 = vsel (%p260_p6), %vm2155_vm0, %v2137_v12, %v2152_v19 }
 0x1b9   : >> { %v1938_v4 = vpop.f32.mrf.mxu0 }
 0x1ba   : >> { %v1958_v29 = vpop.f32.mrf.mxu1  ;;  %v1978_v28 = vpop.f32.mrf.mxu2 }
 0x1bb   : >> { %v1959_v27 = vadd.f32 %v1958_v29, %v1938_v4  ;;  %v3841_v4 = vmov %v2084_v10  ;;  %v2123_v10 = vperm.slane (%p260_p6), %v2115_v44, 6 }
 0x1bd   : >> { %v1979_v30 = vadd.f32 %v1978_v28, %v1959_v27  ;;  %v1998_v23 = vpop.f32.mrf.mxu3 }
 0x1bf   : >> { %v1999_v32 = vadd.f32 %v1998_v23, %v1979_v30 }
 0x1c1   : >> { %v2087_v33 = vadd.f32 %v2599_v1, %v1999_v32  }
 0x1c2   : >> { %v2018_v34 = vpop.f32.mrf.mxu0 }
 0x1c3   : >> { %v2038_v3 = vpop.f32.mrf.mxu1  ;;  %v3838_v1 = vmov %v2087_v33  ;;  %v2113_v58 = vmul.f32 (%p260_p6), %v2097_v53, %v2087_v33 }
 0x1c4   : >> { %v2039_v38 = vadd.f32 %v2038_v3, %v2018_v34  ;;  %v2058_v39 = vpop.f32.mrf.mxu2  ;;  %v3840_v3 = vmov %v3836_v17  ;;  %v2119_v1 = vperm.slane (%p260_p6), %v2115_v44, 2 }
 0x1c5   : > { %v2139_v13 = vadd.f32 (%p260_p6), %v2123_v10, %v2113_v58 }
 0x1c6   : >> { %v2059_v37 = vadd.f32 %v2058_v39, %v2039_v38  ;;  %v2135_v57 = vadd.f32 (%p260_p6), %v2119_v1, %v2109_v49 }
 0x1c7   : >> { %v2078_v40 = vpop.f32.mrf.mxu3  ;;  %v2153_v20 = vrot.slane (%p260_p6), %v2139_v13, 4 }
 0x1c8   : >> { %v2079_v31 = vadd.f32 %v2078_v40, %v2059_v37  ;;  %262 = sbr.rel (!%p260_p6) target bundleno = 46 (0x2e), region = 96  ;;  %v2150_v36 = vrot.slane (%p260_p6), %v2135_v57, 4 }
 0x1ca   : >> { %v2088_v41 = vadd.f32 %v2595_v0, %v2079_v31   ;;  %v2158_v16 = vsel (%p260_p6), %vm2157_vm1, %v2150_v36, %v2151_v62 }
 0x1cc   : >> { %v3837_v0 = vmov %v2088_v41  ;;  %v2114_v61 = vmul.f32 (%p260_p6), %v2098_v55, %v2088_v41 }
 0x1cd   : > { %v2118_v0 = vperm.slane %v2115_v44, 1 }
 0x1ce   : > { %v2140_v17 = vadd.f32 %v2124_v11, %v2114_v61 }
 0x1cf   : > { %v2134_v54 = vadd.f32 %v2118_v0, %v2108_v50 }
 0x1d0   : > { %v2154_v21 = vrot.slane %v2140_v17, 2 }
 0x1d1   : > { %v2149_v42 = vrot.slane %v2134_v54, 6 }
 0x1d2   : > { %v2162_v24 = vsel %vm2157_vm1, %v2153_v20, %v2154_v21 }
 0x1d3   : > { %v2156_v5 = vsel %vm2155_vm0, %v2133_v56, %v2149_v42  ;;  %v2163_v25 = vsel %vm2159_vm2, %v2161_v22, %v2162_v24 }
 0x1d4   : > { %v2160_v14 = vsel %vm2159_vm2, %v2156_v5, %v2158_v16  ;;  %2167 = vst [vmem:[%s2762_s5 + $0x8] sm:$0xff] %v2163_v25 }
 0x1d5   : > { %2166 = vst [vmem:[%s2762_s5] sm:$0xff] %v2160_v14 }
 0x1d6   : > { %2516 = shalt.err (!%p2513_p7)
}
 0x1d7   : > { %2332 = dma.vmem_to_hbm [thread:$0]  (%p2706_p10), %s2183_s19, 256, %s2185_s26, %s2169_s29  }
 0x1d8 PF: > { %p2343_p8 = scmp.ge.s32.totalorder %s2591_s18, 2  ;;  %s2196_s8 = sand.u32 1, %s2579_s15  }
 0x1d9   : > { %s2197_s5 = scalar_lea.sflag [#allocation4], %s2196_s8 }
 0x1da   : > { %p2339_p9 = pnand %p2343_p8, %p2710_p11 }
 0x1dc   : > { %p2340_p0 = pneg %p2339_p9 }
 0x1de   : > { %2574 = dma.done.wait (%p2340_p0), %s2197_s5, 256  }
 0x1df   : > { %2576 = vsyncadd (%p2340_p0), %s2197_s5, 4294967040  ;;  %p17_p12 = scmp.ge.s32.totalorder %s2682_s21, 10   ;;  %s3845_s15 = smov %s2583_s16 }
 0x1e0   : > { %s3846_s16 = smov %s2587_s17  ;;  %s3847_s17 = smov %s2694_s24 }
 0x1e1   : > { %s3848_s18 = smov %s2682_s21  ;;  %19 = sbr.rel (!%p17_p12) target bundleno = 5 (0x5), region = 107 }
 0x1e6   :  { %2203 = vsyncpa [#allocation3], 1 }
 0x1e7   :  { %2205 = vsyncpa [#allocation3 + $0x1], 1 }
 0x1e8   :  { %2206 = vsyncpa [#allocation4], 1 }
 0x1e9   :  { %2208 = vsyncpa [#allocation4 + $0x1], 1 }

</bundles_post_ra>
